<compile_context>
chip_gen: v7x
topology: tpu7x:2x2x1
jax: 0.10.0
libtpu: 0.0.40
codegen_flags: <defaults>
</compile_context>

<pallas_src>
import numpy as np
import jax
import jax.numpy as jnp
from jax.experimental import pallas as pl
from jax.experimental.pallas import tpu as pltpu

NEG_SLOPE = 0.33


def _leaky(v):
    return jnp.where(v >= 0, v, NEG_SLOPE * v)


def _round_up(n, m):
    return ((n + m - 1) // m) * m


def _bias_layout(C2, C3, HID, NCLS):
    """Lane-aligned offsets of [b2 | b3 | b4 | b5] inside the packed bias slab."""
    off_b2 = 0
    off_b3 = off_b2 + _round_up(C2, 128)
    off_b4 = off_b3 + _round_up(C3, 128)
    off_b5 = off_b4 + _round_up(HID, 128)
    total = off_b5 + _round_up(NCLS, 128)
    return off_b2, off_b3, off_b4, off_b5, total


# ----------------------------- fused forward kernel -----------------------------
# Flattened edge index: f = j * C1 + o   (j = column index, o = E2E output channel)
#   si[b,j,o] = sum_i x[b,i,j]*W1[o,0,i,j]        ("row"   path of E2E, replicated over i)
#   sj[i,b,o] = sum_j x[b,i,j]*W1[o,0,i,j]        ("colum" path of E2E, replicated over j)
#   h1[i,b,f] = leaky(si[b,j(f),o(f)] + sj[i,b,o(f)])
#   h2[i,b,p] = leaky(sum_f h1[i,b,f]*W2_k[i,f,p] + b2[p])           (E2N)
#   g[b,q]    = leaky(sum_{i,p} h2[i,b,p]*W3_flat[i*C2+p,q] + b3[q]) (N2G + row sum)
#   concept   = leaky(g @ W4^T + b4); z = leaky(concept @ W5^T + b5); logp = log_softmax(z)
def fused_kernel(x_t_ref, w1_ref, w2_ref, w3_ref, w4_ref, w5_ref, bias_ref,
                 logp_ref, concept_ref, h1_ref, h2f_ref):
    d, TB, _ = x_t_ref.shape
    C1 = w1_ref.shape[2]
    C2 = w2_ref.shape[2]
    C3 = w3_ref.shape[1]
    HID = w4_ref.shape[1]
    NCLS = w5_ref.shape[1]
    off_b2, off_b3, off_b4, off_b5, _ = _bias_layout(C2, C3, HID, NCLS)

    # ---- E2E ("element-wise" edge-to-edge) on the VPU (K=d, M=B is far below MXU fill) ----
    # prod[i,b,j,o] = x[b,0,i,j] * W1[o,0,i,j]
    prod = x_t_ref[...][:, :, :, None] * w1_ref[...][:, None, :, :]      # (d, TB, d, C1) f32
    sj = jnp.sum(prod, axis=2)                                           # (d, TB, C1)  sum over j
    si = jnp.sum(prod, axis=0)                                           # (TB, d, C1)  sum over i

    # h1[i,b, j*C1+o] = leaky(si[b,j,o] + sj[i,b,o]) -> lane-dense bf16 scratch (no reshape)
    for j in range(d):
        h1_j = _leaky(si[:, j, :][None, :, :] + sj)                      # (d, TB, C1)
        h1_ref[:, :, j * C1:(j + 1) * C1] = h1_j.astype(h1_ref.dtype)

    # ---- E2N: per-row-i contraction over f = (j, o), K = d*C1, bf16 x bf16 -> f32 ----
    h2 = jnp.einsum('ibf,ifp->ibp', h1_ref[...], w2_ref[...],
                    preferred_element_type=jnp.float32)                  # (d, TB, C2)
    h2 = _leaky(h2 + bias_ref[:, off_b2:off_b2 + C2])

    # relayout (d, TB, C2) -> (TB, d*C2) so N2G's row sum folds into one K=d*C2 dot
    for i in range(d):
        h2f_ref[:, i * C2:(i + 1) * C2] = h2[i].astype(h2f_ref.dtype)

    # ---- N2G (1x(d) conv + sum over rows folded into a single dot) ----
    g = _leaky(jnp.dot(h2f_ref[...], w3_ref[...],
                       preferred_element_type=jnp.float32)
               + bias_ref[:, off_b3:off_b3 + C3])                        # (TB, C3)

    # ---- dense1 / dense2 / log_softmax (kept f32 for output accuracy; <10% of bytes) ----
    concept = _leaky(jnp.dot(g, w4_ref[...],
                             preferred_element_type=jnp.float32)
                     + bias_ref[:, off_b4:off_b4 + HID])                 # (TB, HID)
    z = _leaky(jnp.dot(concept, w5_ref[...],
                       preferred_element_type=jnp.float32)
               + bias_ref[:, off_b5:off_b5 + NCLS])                      # (TB, NCLS)
    m = jnp.max(z, axis=1, keepdims=True)
    lse = jnp.log(jnp.sum(jnp.exp(z - m), axis=1, keepdims=True)) + m
    logp_ref[...] = z - lse
    concept_ref[...] = concept


# ----------------------------- one-time parameter packing -----------------------------
def pack_params(params):
    W1, W2, b2, W3, b3, W4, b4, W5, b5 = params
    C1, d = W1.shape[0], W1.shape[2]
    C2, C3, HID, NCLS = W2.shape[0], W3.shape[0], W4.shape[0], W5.shape[0]
    F = d * C1

    W1_ijo = jnp.transpose(W1[:, 0], (1, 2, 0)).astype(jnp.float32)              # (d_i, d_j, C1)
    # W2_k[i, j*C1+o, p] = W2[p, o, i, j]      (big slab -> bf16)
    W2_k = jnp.transpose(W2, (2, 3, 1, 0)).reshape(d, F, C2).astype(jnp.bfloat16)
    # W3_flat[i*C2+p, q] = W3[q, p, i, 0]      (big slab -> bf16)
    W3_flat = jnp.transpose(W3[:, :, :, 0], (2, 1, 0)).reshape(d * C2, C3).astype(jnp.bfloat16)
    W4_T = W4.T.astype(jnp.float32)                                              # (C3, HID)
    W5_T = W5.T.astype(jnp.float32)                                              # (HID, NCLS)

    off_b2, off_b3, off_b4, off_b5, total = _bias_layout(C2, C3, HID, NCLS)
    bias = jnp.zeros((1, total), jnp.float32)
    bias = bias.at[0, off_b2:off_b2 + C2].set(b2.astype(jnp.float32))
    bias = bias.at[0, off_b3:off_b3 + C3].set(b3.astype(jnp.float32))
    bias = bias.at[0, off_b4:off_b4 + HID].set(b4.astype(jnp.float32))
    bias = bias.at[0, off_b5:off_b5 + NCLS].set(b5.astype(jnp.float32))
    return (W1_ijo, W2_k, W3_flat, W4_T, W5_T, bias)


# ----------------------------- forward -----------------------------
def brainnet_forward(x, packed, batch_block=128):
    W1_ijo, W2_k, W3_flat, W4_T, W5_T, bias = packed
    B = x.shape[0]
    d, _, C1 = W1_ijo.shape
    F = d * C1
    C2 = W2_k.shape[2]
    C3 = W3_flat.shape[1]
    HID = W4_T.shape[1]
    NCLS = W5_T.shape[1]
    LB = bias.shape[1]

    TB = B if B <= batch_block else batch_block
    grid = (pl.cdiv(B, TB),)

    # tiny per-call rearrangement of x only (a couple of KiB); weights are pre-packed
    x_t = jnp.transpose(x[:, 0].astype(jnp.float32), (1, 0, 2))          # (d, B, d)

    logp, concept = pl.pallas_call(
        fused_kernel,
        grid=grid,
        in_specs=(
            pl.BlockSpec((d, TB, d), lambda b: (0, b, 0)),               # x tiles over batch
            pl.BlockSpec((d, d, C1), lambda b: (0, 0, 0)),               # weights: resident
            pl.BlockSpec((d, F, C2), lambda b: (0, 0, 0)),
            pl.BlockSpec((d * C2, C3), lambda b: (0, 0)),
            pl.BlockSpec((C3, HID), lambda b: (0, 0)),
            pl.BlockSpec((HID, NCLS), lambda b: (0, 0)),
            pl.BlockSpec((1, LB), lambda b: (0, 0)),
        ),
        out_specs=(
            pl.BlockSpec((TB, NCLS), lambda b: (b, 0)),
            pl.BlockSpec((TB, HID), lambda b: (b, 0)),
        ),
        out_shape=(jax.ShapeDtypeStruct((B, NCLS), jnp.float32),
                   jax.ShapeDtypeStruct((B, HID), jnp.float32)),
        scratch_shapes=[pltpu.VMEM((d, TB, F), jnp.bfloat16),            # flattened h1
                        pltpu.VMEM((TB, d * C2), jnp.bfloat16)],         # flattened h2
        compiler_params=pltpu.CompilerParams(
            dimension_semantics=("parallel",)),
    )(x_t, W1_ijo, W2_k, W3_flat, W4_T, W5_T, bias)
    return logp, concept


# ----------------------------- float64 numpy reference (PyTorch semantics) -----------------------------
def reference_np(x, params):
    W1, W2, b2, W3, b3, W4, b4, W5, b5 = [np.asarray(p, np.float64) for p in params]
    x = np.asarray(x, np.float64)

    def leaky(v):
        return np.where(v >= 0, v, NEG_SLOPE * v)

    xb, w1 = x[:, 0], W1[:, 0]
    prod = xb[:, None, :, :] * w1[None, :, :, :]                               # (B, C1, d, d)
    h1 = leaky(prod.sum(axis=3)[:, :, :, None] + prod.sum(axis=2)[:, :, None, :])
    h2 = leaky(np.einsum('boij,poij->bpi', h1, W2) + b2[None, :, None])
    h3 = leaky(np.einsum('bpi,qpi->bq', h2, W3[:, :, :, 0]) + b3[None, :])
    concept = leaky(h3 @ W4.T + b4[None, :])
    z = leaky(concept @ W5.T + b5[None, :])
    z = z - z.max(axis=1, keepdims=True)
    logp = z - np.log(np.exp(z).sum(axis=1, keepdims=True))
    return logp, concept


if __name__ == "__main__":
    B, d = 2, 16
    C1, C2, C3, HID, NCLS = 32, 64, 128, 256, 2

    key = jax.random.PRNGKey(0)
    ks = jax.random.split(key, 10)
    x = jax.random.normal(ks[0], (B, 1, d, d), jnp.float32)

    # deterministic synthetic parameters (module __init__ shapes); biases nonzero to
    # exercise the bias-add paths (the module's E2N bias is learnable, zero-initialized).
    W1 = 0.1 * jax.random.normal(ks[1], (C1, 1, d, d), jnp.float32)    # e2econv1.weight
    W2 = 0.1 * jax.random.normal(ks[2], (C2, C1, d, d), jnp.float32)   # E2N.weight
    b2 = 0.1 * jax.random.normal(ks[3], (C2,), jnp.float32)            # E2N.bias
    W3 = 0.1 * jax.random.normal(ks[4], (C3, C2, d, 1), jnp.float32)   # N2G.weight
    b3 = 0.1 * jax.random.normal(ks[5], (C3,), jnp.float32)            # N2G.bias
    W4 = 0.1 * jax.random.normal(ks[6], (HID, C3), jnp.float32)        # dense1.weight
    b4 = 0.1 * jax.random.normal(ks[7], (HID,), jnp.float32)           # dense1.bias
    W5 = 0.1 * jax.random.normal(ks[8], (NCLS, HID), jnp.float32)      # dense2.weight
    b5 = 0.1 * jax.random.normal(ks[9], (NCLS,), jnp.float32)          # dense2.bias
    params = (W1, W2, b2, W3, b3, W4, b4, W5, b5)

    packed = pack_params(params)                     # one-time weight packing
    fwd = jax.jit(brainnet_forward)
    logp, concept = fwd(x, packed)
    jax.block_until_ready((logp, concept))

    logp_ref, concept_ref = reference_np(x, params)
    # bf16 storage of the two big weight slabs (W2, W3) sets an ~1% error floor on the
    # deep activations; tolerances below still catch any structural/indexing bug.
    np.testing.assert_allclose(np.asarray(logp), logp_ref, rtol=2e-2, atol=5e-2)
    np.testing.assert_allclose(np.asarray(concept), concept_ref, rtol=2e-2, atol=5e-2)
    assert logp.shape == (B, NCLS) and concept.shape == (B, HID)

    print("KERNEL_OK")
</pallas_src>

<mosaic_0001>
module attributes {stable_mosaic.version = 11 : i64} {
  func.func @fused_kernel(%arg0: i32, %arg1: memref<16x2x16xf32, #tpu.memory_space<vmem>>, %arg2: memref<16x16x32xf32, #tpu.memory_space<vmem>>, %arg3: memref<16x512x64xbf16, #tpu.memory_space<vmem>>, %arg4: memref<1024x128xbf16, #tpu.memory_space<vmem>>, %arg5: memref<128x256xf32, #tpu.memory_space<vmem>>, %arg6: memref<256x2xf32, #tpu.memory_space<vmem>>, %arg7: memref<1x640xf32, #tpu.memory_space<vmem>>, %arg8: memref<2x2xf32, #tpu.memory_space<vmem>>, %arg9: memref<2x256xf32, #tpu.memory_space<vmem>>, %arg10: memref<16x2x512xbf16, #tpu.memory_space<vmem>>, %arg11: memref<2x1024xbf16, #tpu.memory_space<vmem>>) attributes {dimension_semantics = [#tpu.dimension_semantics<parallel>], iteration_bounds = array<i64: 1>, scalar_prefetch = 0 : i64, scratch_operands = 2 : i64, tpu.core_type = #tpu.core_type<tc>, window_params = [{transform_indices = @transform_0, window_bounds = array<i64: 16, 2, 16>}, {pipeline_mode = #tpu.pipeline_mode<synchronous>, transform_indices = @transform_1, window_bounds = array<i64: 16, 16, 32>}, {pipeline_mode = #tpu.pipeline_mode<synchronous>, transform_indices = @transform_2, window_bounds = array<i64: 16, 512, 64>}, {pipeline_mode = #tpu.pipeline_mode<synchronous>, transform_indices = @transform_3, window_bounds = array<i64: 1024, 128>}, {pipeline_mode = #tpu.pipeline_mode<synchronous>, transform_indices = @transform_4, window_bounds = array<i64: 128, 256>}, {pipeline_mode = #tpu.pipeline_mode<synchronous>, transform_indices = @transform_5, window_bounds = array<i64: 256, 2>}, {pipeline_mode = #tpu.pipeline_mode<synchronous>, transform_indices = @transform_6, window_bounds = array<i64: 1, 640>}, {transform_indices = @transform_7, window_bounds = array<i64: 2, 2>}, {transform_indices = @transform_8, window_bounds = array<i64: 2, 256>}]} {
    %c0 = arith.constant 0 : index
    %c0_0 = arith.constant 0 : index
    %c0_1 = arith.constant 0 : index
    %0 = vector.load %arg1[%c0, %c0_0, %c0_1] : memref<16x2x16xf32, #tpu.memory_space<vmem>>, vector<16x2x16xf32>
    %1 = vector.shape_cast %0 : vector<16x2x16xf32> to vector<16x2x16x1xf32>
    %c0_2 = arith.constant 0 : index
    %c0_3 = arith.constant 0 : index
    %c0_4 = arith.constant 0 : index
    %2 = vector.load %arg2[%c0_2, %c0_3, %c0_4] : memref<16x16x32xf32, #tpu.memory_space<vmem>>, vector<16x16x32xf32>
    %3 = vector.shape_cast %2 : vector<16x16x32xf32> to vector<16x1x16x32xf32>
    %4 = vector.broadcast %1 : vector<16x2x16x1xf32> to vector<16x2x16x32xf32>
    %5 = vector.broadcast %3 : vector<16x1x16x32xf32> to vector<16x2x16x32xf32>
    %6 = arith.mulf %4, %5 : vector<16x2x16x32xf32>
    %cst = arith.constant dense<0.000000e+00> : vector<16x2x32xf32>
    %7 = vector.multi_reduction <add>, %6, %cst [2] : vector<16x2x16x32xf32> to vector<16x2x32xf32>
    %cst_5 = arith.constant dense<0.000000e+00> : vector<2x16x32xf32>
    %8 = vector.multi_reduction <add>, %6, %cst_5 [0] : vector<16x2x16x32xf32> to vector<2x16x32xf32>
    %9 = vector.extract_strided_slice %8 {offsets = [0, 0, 0], sizes = [2, 1, 32], strides = [1, 1, 1]} : vector<2x16x32xf32> to vector<2x1x32xf32>
    %10 = vector.shape_cast %9 : vector<2x1x32xf32> to vector<2x32xf32>
    %11 = vector.shape_cast %10 : vector<2x32xf32> to vector<1x2x32xf32>
    %12 = vector.broadcast %11 : vector<1x2x32xf32> to vector<16x2x32xf32>
    %13 = arith.addf %12, %7 : vector<16x2x32xf32>
    %cst_6 = arith.constant 0.000000e+00 : f32
    %14 = vector.broadcast %cst_6 : f32 to vector<16x2x32xf32>
    %15 = arith.cmpf oge, %13, %14 : vector<16x2x32xf32>
    %cst_7 = arith.constant 3.300000e-01 : f32
    %16 = vector.broadcast %cst_7 : f32 to vector<16x2x32xf32>
    %17 = arith.mulf %16, %13 : vector<16x2x32xf32>
    %18 = arith.select %15, %13, %17 : vector<16x2x32xi1>, vector<16x2x32xf32>
    %19 = arith.truncf %18 : vector<16x2x32xf32> to vector<16x2x32xbf16>
    %c0_8 = arith.constant 0 : index
    %c0_9 = arith.constant 0 : index
    %c0_10 = arith.constant 0 : index
    %20 = vector.load %arg10[%c0_8, %c0_9, %c0_10] : memref<16x2x512xbf16, #tpu.memory_space<vmem>>, vector<16x2x32xbf16>
    tpu.vector_store %arg10[%c0_8, %c0_9, %c0_10], %19 {strides = array<i32>} : memref<16x2x512xbf16, #tpu.memory_space<vmem>>, vector<16x2x32xbf16>,
    %21 = vector.extract_strided_slice %8 {offsets = [0, 1, 0], sizes = [2, 1, 32], strides = [1, 1, 1]} : vector<2x16x32xf32> to vector<2x1x32xf32>
    %22 = vector.shape_cast %21 : vector<2x1x32xf32> to vector<2x32xf32>
    %23 = vector.shape_cast %22 : vector<2x32xf32> to vector<1x2x32xf32>
    %24 = vector.broadcast %23 : vector<1x2x32xf32> to vector<16x2x32xf32>
    %25 = arith.addf %24, %7 : vector<16x2x32xf32>
    %cst_11 = arith.constant 0.000000e+00 : f32
    %26 = vector.broadcast %cst_11 : f32 to vector<16x2x32xf32>
    %27 = arith.cmpf oge, %25, %26 : vector<16x2x32xf32>
    %cst_12 = arith.constant 3.300000e-01 : f32
    %28 = vector.broadcast %cst_12 : f32 to vector<16x2x32xf32>
    %29 = arith.mulf %28, %25 : vector<16x2x32xf32>
    %30 = arith.select %27, %25, %29 : vector<16x2x32xi1>, vector<16x2x32xf32>
    %31 = arith.truncf %30 : vector<16x2x32xf32> to vector<16x2x32xbf16>
    %c0_13 = arith.constant 0 : index
    %c0_14 = arith.constant 0 : index
    %c32 = arith.constant 32 : index
    %32 = vector.load %arg10[%c0_13, %c0_14, %c32] : memref<16x2x512xbf16, #tpu.memory_space<vmem>>, vector<16x2x32xbf16>
    tpu.vector_store %arg10[%c0_13, %c0_14, %c32], %31 {strides = array<i32>} : memref<16x2x512xbf16, #tpu.memory_space<vmem>>, vector<16x2x32xbf16>,
    %33 = vector.extract_strided_slice %8 {offsets = [0, 2, 0], sizes = [2, 1, 32], strides = [1, 1, 1]} : vector<2x16x32xf32> to vector<2x1x32xf32>
    %34 = vector.shape_cast %33 : vector<2x1x32xf32> to vector<2x32xf32>
    %35 = vector.shape_cast %34 : vector<2x32xf32> to vector<1x2x32xf32>
    %36 = vector.broadcast %35 : vector<1x2x32xf32> to vector<16x2x32xf32>
    %37 = arith.addf %36, %7 : vector<16x2x32xf32>
    %cst_15 = arith.constant 0.000000e+00 : f32
    %38 = vector.broadcast %cst_15 : f32 to vector<16x2x32xf32>
    %39 = arith.cmpf oge, %37, %38 : vector<16x2x32xf32>
    %cst_16 = arith.constant 3.300000e-01 : f32
    %40 = vector.broadcast %cst_16 : f32 to vector<16x2x32xf32>
    %41 = arith.mulf %40, %37 : vector<16x2x32xf32>
    %42 = arith.select %39, %37, %41 : vector<16x2x32xi1>, vector<16x2x32xf32>
    %43 = arith.truncf %42 : vector<16x2x32xf32> to vector<16x2x32xbf16>
    %c0_17 = arith.constant 0 : index
    %c0_18 = arith.constant 0 : index
    %c64 = arith.constant 64 : index
    %44 = vector.load %arg10[%c0_17, %c0_18, %c64] : memref<16x2x512xbf16, #tpu.memory_space<vmem>>, vector<16x2x32xbf16>
    tpu.vector_store %arg10[%c0_17, %c0_18, %c64], %43 {strides = array<i32>} : memref<16x2x512xbf16, #tpu.memory_space<vmem>>, vector<16x2x32xbf16>,
    %45 = vector.extract_strided_slice %8 {offsets = [0, 3, 0], sizes = [2, 1, 32], strides = [1, 1, 1]} : vector<2x16x32xf32> to vector<2x1x32xf32>
    %46 = vector.shape_cast %45 : vector<2x1x32xf32> to vector<2x32xf32>
    %47 = vector.shape_cast %46 : vector<2x32xf32> to vector<1x2x32xf32>
    %48 = vector.broadcast %47 : vector<1x2x32xf32> to vector<16x2x32xf32>
    %49 = arith.addf %48, %7 : vector<16x2x32xf32>
    %cst_19 = arith.constant 0.000000e+00 : f32
    %50 = vector.broadcast %cst_19 : f32 to vector<16x2x32xf32>
    %51 = arith.cmpf oge, %49, %50 : vector<16x2x32xf32>
    %cst_20 = arith.constant 3.300000e-01 : f32
    %52 = vector.broadcast %cst_20 : f32 to vector<16x2x32xf32>
    %53 = arith.mulf %52, %49 : vector<16x2x32xf32>
    %54 = arith.select %51, %49, %53 : vector<16x2x32xi1>, vector<16x2x32xf32>
    %55 = arith.truncf %54 : vector<16x2x32xf32> to vector<16x2x32xbf16>
    %c0_21 = arith.constant 0 : index
    %c0_22 = arith.constant 0 : index
    %c96 = arith.constant 96 : index
    %56 = vector.load %arg10[%c0_21, %c0_22, %c96] : memref<16x2x512xbf16, #tpu.memory_space<vmem>>, vector<16x2x32xbf16>
    tpu.vector_store %arg10[%c0_21, %c0_22, %c96], %55 {strides = array<i32>} : memref<16x2x512xbf16, #tpu.memory_space<vmem>>, vector<16x2x32xbf16>,
    %57 = vector.extract_strided_slice %8 {offsets = [0, 4, 0], sizes = [2, 1, 32], strides = [1, 1, 1]} : vector<2x16x32xf32> to vector<2x1x32xf32>
    %58 = vector.shape_cast %57 : vector<2x1x32xf32> to vector<2x32xf32>
    %59 = vector.shape_cast %58 : vector<2x32xf32> to vector<1x2x32xf32>
    %60 = vector.broadcast %59 : vector<1x2x32xf32> to vector<16x2x32xf32>
    %61 = arith.addf %60, %7 : vector<16x2x32xf32>
    %cst_23 = arith.constant 0.000000e+00 : f32
    %62 = vector.broadcast %cst_23 : f32 to vector<16x2x32xf32>
    %63 = arith.cmpf oge, %61, %62 : vector<16x2x32xf32>
    %cst_24 = arith.constant 3.300000e-01 : f32
    %64 = vector.broadcast %cst_24 : f32 to vector<16x2x32xf32>
    %65 = arith.mulf %64, %61 : vector<16x2x32xf32>
    %66 = arith.select %63, %61, %65 : vector<16x2x32xi1>, vector<16x2x32xf32>
    %67 = arith.truncf %66 : vector<16x2x32xf32> to vector<16x2x32xbf16>
    %c0_25 = arith.constant 0 : index
    %c0_26 = arith.constant 0 : index
    %c128 = arith.constant 128 : index
    %68 = vector.load %arg10[%c0_25, %c0_26, %c128] : memref<16x2x512xbf16, #tpu.memory_space<vmem>>, vector<16x2x32xbf16>
    tpu.vector_store %arg10[%c0_25, %c0_26, %c128], %67 {strides = array<i32>} : memref<16x2x512xbf16, #tpu.memory_space<vmem>>, vector<16x2x32xbf16>,
    %69 = vector.extract_strided_slice %8 {offsets = [0, 5, 0], sizes = [2, 1, 32], strides = [1, 1, 1]} : vector<2x16x32xf32> to vector<2x1x32xf32>
    %70 = vector.shape_cast %69 : vector<2x1x32xf32> to vector<2x32xf32>
    %71 = vector.shape_cast %70 : vector<2x32xf32> to vector<1x2x32xf32>
    %72 = vector.broadcast %71 : vector<1x2x32xf32> to vector<16x2x32xf32>
    %73 = arith.addf %72, %7 : vector<16x2x32xf32>
    %cst_27 = arith.constant 0.000000e+00 : f32
    %74 = vector.broadcast %cst_27 : f32 to vector<16x2x32xf32>
    %75 = arith.cmpf oge, %73, %74 : vector<16x2x32xf32>
    %cst_28 = arith.constant 3.300000e-01 : f32
    %76 = vector.broadcast %cst_28 : f32 to vector<16x2x32xf32>
    %77 = arith.mulf %76, %73 : vector<16x2x32xf32>
    %78 = arith.select %75, %73, %77 : vector<16x2x32xi1>, vector<16x2x32xf32>
    %79 = arith.truncf %78 : vector<16x2x32xf32> to vector<16x2x32xbf16>
    %c0_29 = arith.constant 0 : index
    %c0_30 = arith.constant 0 : index
    %c160 = arith.constant 160 : index
    %80 = vector.load %arg10[%c0_29, %c0_30, %c160] : memref<16x2x512xbf16, #tpu.memory_space<vmem>>, vector<16x2x32xbf16>
    tpu.vector_store %arg10[%c0_29, %c0_30, %c160], %79 {strides = array<i32>} : memref<16x2x512xbf16, #tpu.memory_space<vmem>>, vector<16x2x32xbf16>,
    %81 = vector.extract_strided_slice %8 {offsets = [0, 6, 0], sizes = [2, 1, 32], strides = [1, 1, 1]} : vector<2x16x32xf32> to vector<2x1x32xf32>
    %82 = vector.shape_cast %81 : vector<2x1x32xf32> to vector<2x32xf32>
    %83 = vector.shape_cast %82 : vector<2x32xf32> to vector<1x2x32xf32>
    %84 = vector.broadcast %83 : vector<1x2x32xf32> to vector<16x2x32xf32>
    %85 = arith.addf %84, %7 : vector<16x2x32xf32>
    %cst_31 = arith.constant 0.000000e+00 : f32
    %86 = vector.broadcast %cst_31 : f32 to vector<16x2x32xf32>
    %87 = arith.cmpf oge, %85, %86 : vector<16x2x32xf32>
    %cst_32 = arith.constant 3.300000e-01 : f32
    %88 = vector.broadcast %cst_32 : f32 to vector<16x2x32xf32>
    %89 = arith.mulf %88, %85 : vector<16x2x32xf32>
    %90 = arith.select %87, %85, %89 : vector<16x2x32xi1>, vector<16x2x32xf32>
    %91 = arith.truncf %90 : vector<16x2x32xf32> to vector<16x2x32xbf16>
    %c0_33 = arith.constant 0 : index
    %c0_34 = arith.constant 0 : index
    %c192 = arith.constant 192 : index
    %92 = vector.load %arg10[%c0_33, %c0_34, %c192] : memref<16x2x512xbf16, #tpu.memory_space<vmem>>, vector<16x2x32xbf16>
    tpu.vector_store %arg10[%c0_33, %c0_34, %c192], %91 {strides = array<i32>} : memref<16x2x512xbf16, #tpu.memory_space<vmem>>, vector<16x2x32xbf16>,
    %93 = vector.extract_strided_slice %8 {offsets = [0, 7, 0], sizes = [2, 1, 32], strides = [1, 1, 1]} : vector<2x16x32xf32> to vector<2x1x32xf32>
    %94 = vector.shape_cast %93 : vector<2x1x32xf32> to vector<2x32xf32>
    %95 = vector.shape_cast %94 : vector<2x32xf32> to vector<1x2x32xf32>
    %96 = vector.broadcast %95 : vector<1x2x32xf32> to vector<16x2x32xf32>
    %97 = arith.addf %96, %7 : vector<16x2x32xf32>
    %cst_35 = arith.constant 0.000000e+00 : f32
    %98 = vector.broadcast %cst_35 : f32 to vector<16x2x32xf32>
    %99 = arith.cmpf oge, %97, %98 : vector<16x2x32xf32>
    %cst_36 = arith.constant 3.300000e-01 : f32
    %100 = vector.broadcast %cst_36 : f32 to vector<16x2x32xf32>
    %101 = arith.mulf %100, %97 : vector<16x2x32xf32>
    %102 = arith.select %99, %97, %101 : vector<16x2x32xi1>, vector<16x2x32xf32>
    %103 = arith.truncf %102 : vector<16x2x32xf32> to vector<16x2x32xbf16>
    %c0_37 = arith.constant 0 : index
    %c0_38 = arith.constant 0 : index
    %c224 = arith.constant 224 : index
    %104 = vector.load %arg10[%c0_37, %c0_38, %c224] : memref<16x2x512xbf16, #tpu.memory_space<vmem>>, vector<16x2x32xbf16>
    tpu.vector_store %arg10[%c0_37, %c0_38, %c224], %103 {strides = array<i32>} : memref<16x2x512xbf16, #tpu.memory_space<vmem>>, vector<16x2x32xbf16>,
    %105 = vector.extract_strided_slice %8 {offsets = [0, 8, 0], sizes = [2, 1, 32], strides = [1, 1, 1]} : vector<2x16x32xf32> to vector<2x1x32xf32>
    %106 = vector.shape_cast %105 : vector<2x1x32xf32> to vector<2x32xf32>
    %107 = vector.shape_cast %106 : vector<2x32xf32> to vector<1x2x32xf32>
    %108 = vector.broadcast %107 : vector<1x2x32xf32> to vector<16x2x32xf32>
    %109 = arith.addf %108, %7 : vector<16x2x32xf32>
    %cst_39 = arith.constant 0.000000e+00 : f32
    %110 = vector.broadcast %cst_39 : f32 to vector<16x2x32xf32>
    %111 = arith.cmpf oge, %109, %110 : vector<16x2x32xf32>
    %cst_40 = arith.constant 3.300000e-01 : f32
    %112 = vector.broadcast %cst_40 : f32 to vector<16x2x32xf32>
    %113 = arith.mulf %112, %109 : vector<16x2x32xf32>
    %114 = arith.select %111, %109, %113 : vector<16x2x32xi1>, vector<16x2x32xf32>
    %115 = arith.truncf %114 : vector<16x2x32xf32> to vector<16x2x32xbf16>
    %c0_41 = arith.constant 0 : index
    %c0_42 = arith.constant 0 : index
    %c256 = arith.constant 256 : index
    %116 = vector.load %arg10[%c0_41, %c0_42, %c256] : memref<16x2x512xbf16, #tpu.memory_space<vmem>>, vector<16x2x32xbf16>
    tpu.vector_store %arg10[%c0_41, %c0_42, %c256], %115 {strides = array<i32>} : memref<16x2x512xbf16, #tpu.memory_space<vmem>>, vector<16x2x32xbf16>,
    %117 = vector.extract_strided_slice %8 {offsets = [0, 9, 0], sizes = [2, 1, 32], strides = [1, 1, 1]} : vector<2x16x32xf32> to vector<2x1x32xf32>
    %118 = vector.shape_cast %117 : vector<2x1x32xf32> to vector<2x32xf32>
    %119 = vector.shape_cast %118 : vector<2x32xf32> to vector<1x2x32xf32>
    %120 = vector.broadcast %119 : vector<1x2x32xf32> to vector<16x2x32xf32>
    %121 = arith.addf %120, %7 : vector<16x2x32xf32>
    %cst_43 = arith.constant 0.000000e+00 : f32
    %122 = vector.broadcast %cst_43 : f32 to vector<16x2x32xf32>
    %123 = arith.cmpf oge, %121, %122 : vector<16x2x32xf32>
    %cst_44 = arith.constant 3.300000e-01 : f32
    %124 = vector.broadcast %cst_44 : f32 to vector<16x2x32xf32>
    %125 = arith.mulf %124, %121 : vector<16x2x32xf32>
    %126 = arith.select %123, %121, %125 : vector<16x2x32xi1>, vector<16x2x32xf32>
    %127 = arith.truncf %126 : vector<16x2x32xf32> to vector<16x2x32xbf16>
    %c0_45 = arith.constant 0 : index
    %c0_46 = arith.constant 0 : index
    %c288 = arith.constant 288 : index
    %128 = vector.load %arg10[%c0_45, %c0_46, %c288] : memref<16x2x512xbf16, #tpu.memory_space<vmem>>, vector<16x2x32xbf16>
    tpu.vector_store %arg10[%c0_45, %c0_46, %c288], %127 {strides = array<i32>} : memref<16x2x512xbf16, #tpu.memory_space<vmem>>, vector<16x2x32xbf16>,
    %129 = vector.extract_strided_slice %8 {offsets = [0, 10, 0], sizes = [2, 1, 32], strides = [1, 1, 1]} : vector<2x16x32xf32> to vector<2x1x32xf32>
    %130 = vector.shape_cast %129 : vector<2x1x32xf32> to vector<2x32xf32>
    %131 = vector.shape_cast %130 : vector<2x32xf32> to vector<1x2x32xf32>
    %132 = vector.broadcast %131 : vector<1x2x32xf32> to vector<16x2x32xf32>
    %133 = arith.addf %132, %7 : vector<16x2x32xf32>
    %cst_47 = arith.constant 0.000000e+00 : f32
    %134 = vector.broadcast %cst_47 : f32 to vector<16x2x32xf32>
    %135 = arith.cmpf oge, %133, %134 : vector<16x2x32xf32>
    %cst_48 = arith.constant 3.300000e-01 : f32
    %136 = vector.broadcast %cst_48 : f32 to vector<16x2x32xf32>
    %137 = arith.mulf %136, %133 : vector<16x2x32xf32>
    %138 = arith.select %135, %133, %137 : vector<16x2x32xi1>, vector<16x2x32xf32>
    %139 = arith.truncf %138 : vector<16x2x32xf32> to vector<16x2x32xbf16>
    %c0_49 = arith.constant 0 : index
    %c0_50 = arith.constant 0 : index
    %c320 = arith.constant 320 : index
    %140 = vector.load %arg10[%c0_49, %c0_50, %c320] : memref<16x2x512xbf16, #tpu.memory_space<vmem>>, vector<16x2x32xbf16>
    tpu.vector_store %arg10[%c0_49, %c0_50, %c320], %139 {strides = array<i32>} : memref<16x2x512xbf16, #tpu.memory_space<vmem>>, vector<16x2x32xbf16>,
    %141 = vector.extract_strided_slice %8 {offsets = [0, 11, 0], sizes = [2, 1, 32], strides = [1, 1, 1]} : vector<2x16x32xf32> to vector<2x1x32xf32>
    %142 = vector.shape_cast %141 : vector<2x1x32xf32> to vector<2x32xf32>
    %143 = vector.shape_cast %142 : vector<2x32xf32> to vector<1x2x32xf32>
    %144 = vector.broadcast %143 : vector<1x2x32xf32> to vector<16x2x32xf32>
    %145 = arith.addf %144, %7 : vector<16x2x32xf32>
    %cst_51 = arith.constant 0.000000e+00 : f32
    %146 = vector.broadcast %cst_51 : f32 to vector<16x2x32xf32>
    %147 = arith.cmpf oge, %145, %146 : vector<16x2x32xf32>
    %cst_52 = arith.constant 3.300000e-01 : f32
    %148 = vector.broadcast %cst_52 : f32 to vector<16x2x32xf32>
    %149 = arith.mulf %148, %145 : vector<16x2x32xf32>
    %150 = arith.select %147, %145, %149 : vector<16x2x32xi1>, vector<16x2x32xf32>
    %151 = arith.truncf %150 : vector<16x2x32xf32> to vector<16x2x32xbf16>
    %c0_53 = arith.constant 0 : index
    %c0_54 = arith.constant 0 : index
    %c352 = arith.constant 352 : index
    %152 = vector.load %arg10[%c0_53, %c0_54, %c352] : memref<16x2x512xbf16, #tpu.memory_space<vmem>>, vector<16x2x32xbf16>
    tpu.vector_store %arg10[%c0_53, %c0_54, %c352], %151 {strides = array<i32>} : memref<16x2x512xbf16, #tpu.memory_space<vmem>>, vector<16x2x32xbf16>,
    %153 = vector.extract_strided_slice %8 {offsets = [0, 12, 0], sizes = [2, 1, 32], strides = [1, 1, 1]} : vector<2x16x32xf32> to vector<2x1x32xf32>
    %154 = vector.shape_cast %153 : vector<2x1x32xf32> to vector<2x32xf32>
    %155 = vector.shape_cast %154 : vector<2x32xf32> to vector<1x2x32xf32>
    %156 = vector.broadcast %155 : vector<1x2x32xf32> to vector<16x2x32xf32>
    %157 = arith.addf %156, %7 : vector<16x2x32xf32>
    %cst_55 = arith.constant 0.000000e+00 : f32
    %158 = vector.broadcast %cst_55 : f32 to vector<16x2x32xf32>
    %159 = arith.cmpf oge, %157, %158 : vector<16x2x32xf32>
    %cst_56 = arith.constant 3.300000e-01 : f32
    %160 = vector.broadcast %cst_56 : f32 to vector<16x2x32xf32>
    %161 = arith.mulf %160, %157 : vector<16x2x32xf32>
    %162 = arith.select %159, %157, %161 : vector<16x2x32xi1>, vector<16x2x32xf32>
    %163 = arith.truncf %162 : vector<16x2x32xf32> to vector<16x2x32xbf16>
    %c0_57 = arith.constant 0 : index
    %c0_58 = arith.constant 0 : index
    %c384 = arith.constant 384 : index
    %164 = vector.load %arg10[%c0_57, %c0_58, %c384] : memref<16x2x512xbf16, #tpu.memory_space<vmem>>, vector<16x2x32xbf16>
    tpu.vector_store %arg10[%c0_57, %c0_58, %c384], %163 {strides = array<i32>} : memref<16x2x512xbf16, #tpu.memory_space<vmem>>, vector<16x2x32xbf16>,
    %165 = vector.extract_strided_slice %8 {offsets = [0, 13, 0], sizes = [2, 1, 32], strides = [1, 1, 1]} : vector<2x16x32xf32> to vector<2x1x32xf32>
    %166 = vector.shape_cast %165 : vector<2x1x32xf32> to vector<2x32xf32>
    %167 = vector.shape_cast %166 : vector<2x32xf32> to vector<1x2x32xf32>
    %168 = vector.broadcast %167 : vector<1x2x32xf32> to vector<16x2x32xf32>
    %169 = arith.addf %168, %7 : vector<16x2x32xf32>
    %cst_59 = arith.constant 0.000000e+00 : f32
    %170 = vector.broadcast %cst_59 : f32 to vector<16x2x32xf32>
    %171 = arith.cmpf oge, %169, %170 : vector<16x2x32xf32>
    %cst_60 = arith.constant 3.300000e-01 : f32
    %172 = vector.broadcast %cst_60 : f32 to vector<16x2x32xf32>
    %173 = arith.mulf %172, %169 : vector<16x2x32xf32>
    %174 = arith.select %171, %169, %173 : vector<16x2x32xi1>, vector<16x2x32xf32>
    %175 = arith.truncf %174 : vector<16x2x32xf32> to vector<16x2x32xbf16>
    %c0_61 = arith.constant 0 : index
    %c0_62 = arith.constant 0 : index
    %c416 = arith.constant 416 : index
    %176 = vector.load %arg10[%c0_61, %c0_62, %c416] : memref<16x2x512xbf16, #tpu.memory_space<vmem>>, vector<16x2x32xbf16>
    tpu.vector_store %arg10[%c0_61, %c0_62, %c416], %175 {strides = array<i32>} : memref<16x2x512xbf16, #tpu.memory_space<vmem>>, vector<16x2x32xbf16>,
    %177 = vector.extract_strided_slice %8 {offsets = [0, 14, 0], sizes = [2, 1, 32], strides = [1, 1, 1]} : vector<2x16x32xf32> to vector<2x1x32xf32>
    %178 = vector.shape_cast %177 : vector<2x1x32xf32> to vector<2x32xf32>
    %179 = vector.shape_cast %178 : vector<2x32xf32> to vector<1x2x32xf32>
    %180 = vector.broadcast %179 : vector<1x2x32xf32> to vector<16x2x32xf32>
    %181 = arith.addf %180, %7 : vector<16x2x32xf32>
    %cst_63 = arith.constant 0.000000e+00 : f32
    %182 = vector.broadcast %cst_63 : f32 to vector<16x2x32xf32>
    %183 = arith.cmpf oge, %181, %182 : vector<16x2x32xf32>
    %cst_64 = arith.constant 3.300000e-01 : f32
    %184 = vector.broadcast %cst_64 : f32 to vector<16x2x32xf32>
    %185 = arith.mulf %184, %181 : vector<16x2x32xf32>
    %186 = arith.select %183, %181, %185 : vector<16x2x32xi1>, vector<16x2x32xf32>
    %187 = arith.truncf %186 : vector<16x2x32xf32> to vector<16x2x32xbf16>
    %c0_65 = arith.constant 0 : index
    %c0_66 = arith.constant 0 : index
    %c448 = arith.constant 448 : index
    %188 = vector.load %arg10[%c0_65, %c0_66, %c448] : memref<16x2x512xbf16, #tpu.memory_space<vmem>>, vector<16x2x32xbf16>
    tpu.vector_store %arg10[%c0_65, %c0_66, %c448], %187 {strides = array<i32>} : memref<16x2x512xbf16, #tpu.memory_space<vmem>>, vector<16x2x32xbf16>,
    %189 = vector.extract_strided_slice %8 {offsets = [0, 15, 0], sizes = [2, 1, 32], strides = [1, 1, 1]} : vector<2x16x32xf32> to vector<2x1x32xf32>
    %190 = vector.shape_cast %189 : vector<2x1x32xf32> to vector<2x32xf32>
    %191 = vector.shape_cast %190 : vector<2x32xf32> to vector<1x2x32xf32>
    %192 = vector.broadcast %191 : vector<1x2x32xf32> to vector<16x2x32xf32>
    %193 = arith.addf %192, %7 : vector<16x2x32xf32>
    %cst_67 = arith.constant 0.000000e+00 : f32
    %194 = vector.broadcast %cst_67 : f32 to vector<16x2x32xf32>
    %195 = arith.cmpf oge, %193, %194 : vector<16x2x32xf32>
    %cst_68 = arith.constant 3.300000e-01 : f32
    %196 = vector.broadcast %cst_68 : f32 to vector<16x2x32xf32>
    %197 = arith.mulf %196, %193 : vector<16x2x32xf32>
    %198 = arith.select %195, %193, %197 : vector<16x2x32xi1>, vector<16x2x32xf32>
    %199 = arith.truncf %198 : vector<16x2x32xf32> to vector<16x2x32xbf16>
    %c0_69 = arith.constant 0 : index
    %c0_70 = arith.constant 0 : index
    %c480 = arith.constant 480 : index
    %200 = vector.load %arg10[%c0_69, %c0_70, %c480] : memref<16x2x512xbf16, #tpu.memory_space<vmem>>, vector<16x2x32xbf16>
    tpu.vector_store %arg10[%c0_69, %c0_70, %c480], %199 {strides = array<i32>} : memref<16x2x512xbf16, #tpu.memory_space<vmem>>, vector<16x2x32xbf16>,
    %c0_71 = arith.constant 0 : index
    %c0_72 = arith.constant 0 : index
    %c0_73 = arith.constant 0 : index
    %201 = vector.load %arg10[%c0_71, %c0_72, %c0_73] : memref<16x2x512xbf16, #tpu.memory_space<vmem>>, vector<16x2x512xbf16>
    %c0_74 = arith.constant 0 : index
    %c0_75 = arith.constant 0 : index
    %c0_76 = arith.constant 0 : index
    %202 = vector.load %arg3[%c0_74, %c0_75, %c0_76] : memref<16x512x64xbf16, #tpu.memory_space<vmem>>, vector<16x512x64xbf16>
    "tpu.trace_start"() <{level = 10 : i32, message = "ibf,ifp->ibp"}> : () -> ()
    %cst_77 = arith.constant dense<0.000000e+00> : vector<16x2x64xf32>
    %203 = tpu.matmul %201, %202, %cst_77 {dimension_numbers = #tpu.dot_dimension_numbers<[2], [1], [1], [2], [0, 0, 0, 1, 1, 2], [0], [0]>} : vector<16x2x512xbf16>, vector<16x512x64xbf16>, vector<16x2x64xf32> -> vector<16x2x64xf32>
    "tpu.trace_stop"() : () -> ()
    %c0_78 = arith.constant 0 : index
    %c0_79 = arith.constant 0 : index
    %204 = vector.load %arg7[%c0_78, %c0_79] : memref<1x640xf32, #tpu.memory_space<vmem>>, vector<1x64xf32>
    %205 = vector.shape_cast %204 : vector<1x64xf32> to vector<1x1x64xf32>
    %206 = vector.broadcast %205 : vector<1x1x64xf32> to vector<16x2x64xf32>
    %207 = arith.addf %203, %206 : vector<16x2x64xf32>
    %cst_80 = arith.constant 0.000000e+00 : f32
    %208 = vector.broadcast %cst_80 : f32 to vector<16x2x64xf32>
    %209 = arith.cmpf oge, %207, %208 : vector<16x2x64xf32>
    %cst_81 = arith.constant 3.300000e-01 : f32
    %210 = vector.broadcast %cst_81 : f32 to vector<16x2x64xf32>
    %211 = arith.mulf %210, %207 : vector<16x2x64xf32>
    %212 = arith.select %209, %207, %211 : vector<16x2x64xi1>, vector<16x2x64xf32>
    %213 = vector.extract_strided_slice %212 {offsets = [0, 0, 0], sizes = [1, 2, 64], strides = [1, 1, 1]} : vector<16x2x64xf32> to vector<1x2x64xf32>
    %214 = vector.shape_cast %213 : vector<1x2x64xf32> to vector<2x64xf32>
    %215 = arith.truncf %214 : vector<2x64xf32> to vector<2x64xbf16>
    %c0_82 = arith.constant 0 : index
    %c0_83 = arith.constant 0 : index
    %216 = vector.load %arg11[%c0_82, %c0_83] : memref<2x1024xbf16, #tpu.memory_space<vmem>>, vector<2x64xbf16>
    tpu.vector_store %arg11[%c0_82, %c0_83], %215 {strides = array<i32>} : memref<2x1024xbf16, #tpu.memory_space<vmem>>, vector<2x64xbf16>,
    %217 = vector.extract_strided_slice %212 {offsets = [1, 0, 0], sizes = [1, 2, 64], strides = [1, 1, 1]} : vector<16x2x64xf32> to vector<1x2x64xf32>
    %218 = vector.shape_cast %217 : vector<1x2x64xf32> to vector<2x64xf32>
    %219 = arith.truncf %218 : vector<2x64xf32> to vector<2x64xbf16>
    %c0_84 = arith.constant 0 : index
    %c64_85 = arith.constant 64 : index
    %220 = vector.load %arg11[%c0_84, %c64_85] : memref<2x1024xbf16, #tpu.memory_space<vmem>>, vector<2x64xbf16>
    tpu.vector_store %arg11[%c0_84, %c64_85], %219 {strides = array<i32>} : memref<2x1024xbf16, #tpu.memory_space<vmem>>, vector<2x64xbf16>,
    %221 = vector.extract_strided_slice %212 {offsets = [2, 0, 0], sizes = [1, 2, 64], strides = [1, 1, 1]} : vector<16x2x64xf32> to vector<1x2x64xf32>
    %222 = vector.shape_cast %221 : vector<1x2x64xf32> to vector<2x64xf32>
    %223 = arith.truncf %222 : vector<2x64xf32> to vector<2x64xbf16>
    %c0_86 = arith.constant 0 : index
    %c128_87 = arith.constant 128 : index
    %224 = vector.load %arg11[%c0_86, %c128_87] : memref<2x1024xbf16, #tpu.memory_space<vmem>>, vector<2x64xbf16>
    tpu.vector_store %arg11[%c0_86, %c128_87], %223 {strides = array<i32>} : memref<2x1024xbf16, #tpu.memory_space<vmem>>, vector<2x64xbf16>,
    %225 = vector.extract_strided_slice %212 {offsets = [3, 0, 0], sizes = [1, 2, 64], strides = [1, 1, 1]} : vector<16x2x64xf32> to vector<1x2x64xf32>
    %226 = vector.shape_cast %225 : vector<1x2x64xf32> to vector<2x64xf32>
    %227 = arith.truncf %226 : vector<2x64xf32> to vector<2x64xbf16>
    %c0_88 = arith.constant 0 : index
    %c192_89 = arith.constant 192 : index
    %228 = vector.load %arg11[%c0_88, %c192_89] : memref<2x1024xbf16, #tpu.memory_space<vmem>>, vector<2x64xbf16>
    tpu.vector_store %arg11[%c0_88, %c192_89], %227 {strides = array<i32>} : memref<2x1024xbf16, #tpu.memory_space<vmem>>, vector<2x64xbf16>,
    %229 = vector.extract_strided_slice %212 {offsets = [4, 0, 0], sizes = [1, 2, 64], strides = [1, 1, 1]} : vector<16x2x64xf32> to vector<1x2x64xf32>
    %230 = vector.shape_cast %229 : vector<1x2x64xf32> to vector<2x64xf32>
    %231 = arith.truncf %230 : vector<2x64xf32> to vector<2x64xbf16>
    %c0_90 = arith.constant 0 : index
    %c256_91 = arith.constant 256 : index
    %232 = vector.load %arg11[%c0_90, %c256_91] : memref<2x1024xbf16, #tpu.memory_space<vmem>>, vector<2x64xbf16>
    tpu.vector_store %arg11[%c0_90, %c256_91], %231 {strides = array<i32>} : memref<2x1024xbf16, #tpu.memory_space<vmem>>, vector<2x64xbf16>,
    %233 = vector.extract_strided_slice %212 {offsets = [5, 0, 0], sizes = [1, 2, 64], strides = [1, 1, 1]} : vector<16x2x64xf32> to vector<1x2x64xf32>
    %234 = vector.shape_cast %233 : vector<1x2x64xf32> to vector<2x64xf32>
    %235 = arith.truncf %234 : vector<2x64xf32> to vector<2x64xbf16>
    %c0_92 = arith.constant 0 : index
    %c320_93 = arith.constant 320 : index
    %236 = vector.load %arg11[%c0_92, %c320_93] : memref<2x1024xbf16, #tpu.memory_space<vmem>>, vector<2x64xbf16>
    tpu.vector_store %arg11[%c0_92, %c320_93], %235 {strides = array<i32>} : memref<2x1024xbf16, #tpu.memory_space<vmem>>, vector<2x64xbf16>,
    %237 = vector.extract_strided_slice %212 {offsets = [6, 0, 0], sizes = [1, 2, 64], strides = [1, 1, 1]} : vector<16x2x64xf32> to vector<1x2x64xf32>
    %238 = vector.shape_cast %237 : vector<1x2x64xf32> to vector<2x64xf32>
    %239 = arith.truncf %238 : vector<2x64xf32> to vector<2x64xbf16>
    %c0_94 = arith.constant 0 : index
    %c384_95 = arith.constant 384 : index
    %240 = vector.load %arg11[%c0_94, %c384_95] : memref<2x1024xbf16, #tpu.memory_space<vmem>>, vector<2x64xbf16>
    tpu.vector_store %arg11[%c0_94, %c384_95], %239 {strides = array<i32>} : memref<2x1024xbf16, #tpu.memory_space<vmem>>, vector<2x64xbf16>,
    %241 = vector.extract_strided_slice %212 {offsets = [7, 0, 0], sizes = [1, 2, 64], strides = [1, 1, 1]} : vector<16x2x64xf32> to vector<1x2x64xf32>
    %242 = vector.shape_cast %241 : vector<1x2x64xf32> to vector<2x64xf32>
    %243 = arith.truncf %242 : vector<2x64xf32> to vector<2x64xbf16>
    %c0_96 = arith.constant 0 : index
    %c448_97 = arith.constant 448 : index
    %244 = vector.load %arg11[%c0_96, %c448_97] : memref<2x1024xbf16, #tpu.memory_space<vmem>>, vector<2x64xbf16>
    tpu.vector_store %arg11[%c0_96, %c448_97], %243 {strides = array<i32>} : memref<2x1024xbf16, #tpu.memory_space<vmem>>, vector<2x64xbf16>,
    %245 = vector.extract_strided_slice %212 {offsets = [8, 0, 0], sizes = [1, 2, 64], strides = [1, 1, 1]} : vector<16x2x64xf32> to vector<1x2x64xf32>
    %246 = vector.shape_cast %245 : vector<1x2x64xf32> to vector<2x64xf32>
    %247 = arith.truncf %246 : vector<2x64xf32> to vector<2x64xbf16>
    %c0_98 = arith.constant 0 : index
    %c512 = arith.constant 512 : index
    %248 = vector.load %arg11[%c0_98, %c512] : memref<2x1024xbf16, #tpu.memory_space<vmem>>, vector<2x64xbf16>
    tpu.vector_store %arg11[%c0_98, %c512], %247 {strides = array<i32>} : memref<2x1024xbf16, #tpu.memory_space<vmem>>, vector<2x64xbf16>,
    %249 = vector.extract_strided_slice %212 {offsets = [9, 0, 0], sizes = [1, 2, 64], strides = [1, 1, 1]} : vector<16x2x64xf32> to vector<1x2x64xf32>
    %250 = vector.shape_cast %249 : vector<1x2x64xf32> to vector<2x64xf32>
    %251 = arith.truncf %250 : vector<2x64xf32> to vector<2x64xbf16>
    %c0_99 = arith.constant 0 : index
    %c576 = arith.constant 576 : index
    %252 = vector.load %arg11[%c0_99, %c576] : memref<2x1024xbf16, #tpu.memory_space<vmem>>, vector<2x64xbf16>
    tpu.vector_store %arg11[%c0_99, %c576], %251 {strides = array<i32>} : memref<2x1024xbf16, #tpu.memory_space<vmem>>, vector<2x64xbf16>,
    %253 = vector.extract_strided_slice %212 {offsets = [10, 0, 0], sizes = [1, 2, 64], strides = [1, 1, 1]} : vector<16x2x64xf32> to vector<1x2x64xf32>
    %254 = vector.shape_cast %253 : vector<1x2x64xf32> to vector<2x64xf32>
    %255 = arith.truncf %254 : vector<2x64xf32> to vector<2x64xbf16>
    %c0_100 = arith.constant 0 : index
    %c640 = arith.constant 640 : index
    %256 = vector.load %arg11[%c0_100, %c640] : memref<2x1024xbf16, #tpu.memory_space<vmem>>, vector<2x64xbf16>
    tpu.vector_store %arg11[%c0_100, %c640], %255 {strides = array<i32>} : memref<2x1024xbf16, #tpu.memory_space<vmem>>, vector<2x64xbf16>,
    %257 = vector.extract_strided_slice %212 {offsets = [11, 0, 0], sizes = [1, 2, 64], strides = [1, 1, 1]} : vector<16x2x64xf32> to vector<1x2x64xf32>
    %258 = vector.shape_cast %257 : vector<1x2x64xf32> to vector<2x64xf32>
    %259 = arith.truncf %258 : vector<2x64xf32> to vector<2x64xbf16>
    %c0_101 = arith.constant 0 : index
    %c704 = arith.constant 704 : index
    %260 = vector.load %arg11[%c0_101, %c704] : memref<2x1024xbf16, #tpu.memory_space<vmem>>, vector<2x64xbf16>
    tpu.vector_store %arg11[%c0_101, %c704], %259 {strides = array<i32>} : memref<2x1024xbf16, #tpu.memory_space<vmem>>, vector<2x64xbf16>,
    %261 = vector.extract_strided_slice %212 {offsets = [12, 0, 0], sizes = [1, 2, 64], strides = [1, 1, 1]} : vector<16x2x64xf32> to vector<1x2x64xf32>
    %262 = vector.shape_cast %261 : vector<1x2x64xf32> to vector<2x64xf32>
    %263 = arith.truncf %262 : vector<2x64xf32> to vector<2x64xbf16>
    %c0_102 = arith.constant 0 : index
    %c768 = arith.constant 768 : index
    %264 = vector.load %arg11[%c0_102, %c768] : memref<2x1024xbf16, #tpu.memory_space<vmem>>, vector<2x64xbf16>
    tpu.vector_store %arg11[%c0_102, %c768], %263 {strides = array<i32>} : memref<2x1024xbf16, #tpu.memory_space<vmem>>, vector<2x64xbf16>,
    %265 = vector.extract_strided_slice %212 {offsets = [13, 0, 0], sizes = [1, 2, 64], strides = [1, 1, 1]} : vector<16x2x64xf32> to vector<1x2x64xf32>
    %266 = vector.shape_cast %265 : vector<1x2x64xf32> to vector<2x64xf32>
    %267 = arith.truncf %266 : vector<2x64xf32> to vector<2x64xbf16>
    %c0_103 = arith.constant 0 : index
    %c832 = arith.constant 832 : index
    %268 = vector.load %arg11[%c0_103, %c832] : memref<2x1024xbf16, #tpu.memory_space<vmem>>, vector<2x64xbf16>
    tpu.vector_store %arg11[%c0_103, %c832], %267 {strides = array<i32>} : memref<2x1024xbf16, #tpu.memory_space<vmem>>, vector<2x64xbf16>,
    %269 = vector.extract_strided_slice %212 {offsets = [14, 0, 0], sizes = [1, 2, 64], strides = [1, 1, 1]} : vector<16x2x64xf32> to vector<1x2x64xf32>
    %270 = vector.shape_cast %269 : vector<1x2x64xf32> to vector<2x64xf32>
    %271 = arith.truncf %270 : vector<2x64xf32> to vector<2x64xbf16>
    %c0_104 = arith.constant 0 : index
    %c896 = arith.constant 896 : index
    %272 = vector.load %arg11[%c0_104, %c896] : memref<2x1024xbf16, #tpu.memory_space<vmem>>, vector<2x64xbf16>
    tpu.vector_store %arg11[%c0_104, %c896], %271 {strides = array<i32>} : memref<2x1024xbf16, #tpu.memory_space<vmem>>, vector<2x64xbf16>,
    %273 = vector.extract_strided_slice %212 {offsets = [15, 0, 0], sizes = [1, 2, 64], strides = [1, 1, 1]} : vector<16x2x64xf32> to vector<1x2x64xf32>
    %274 = vector.shape_cast %273 : vector<1x2x64xf32> to vector<2x64xf32>
    %275 = arith.truncf %274 : vector<2x64xf32> to vector<2x64xbf16>
    %c0_105 = arith.constant 0 : index
    %c960 = arith.constant 960 : index
    %276 = vector.load %arg11[%c0_105, %c960] : memref<2x1024xbf16, #tpu.memory_space<vmem>>, vector<2x64xbf16>
    tpu.vector_store %arg11[%c0_105, %c960], %275 {strides = array<i32>} : memref<2x1024xbf16, #tpu.memory_space<vmem>>, vector<2x64xbf16>,
    %c0_106 = arith.constant 0 : index
    %c0_107 = arith.constant 0 : index
    %277 = vector.load %arg11[%c0_106, %c0_107] : memref<2x1024xbf16, #tpu.memory_space<vmem>>, vector<2x1024xbf16>
    %c0_108 = arith.constant 0 : index
    %c0_109 = arith.constant 0 : index
    %278 = vector.load %arg4[%c0_108, %c0_109] : memref<1024x128xbf16, #tpu.memory_space<vmem>>, vector<1024x128xbf16>
    %cst_110 = arith.constant dense<0.000000e+00> : vector<2x128xf32>
    %279 = tpu.matmul %277, %278, %cst_110 {dimension_numbers = #tpu.dot_dimension_numbers<[1], [0], [0], [1], [0, 0, 1, 1], [], []>} : vector<2x1024xbf16>, vector<1024x128xbf16>, vector<2x128xf32> -> vector<2x128xf32>
    %c0_111 = arith.constant 0 : index
    %c128_112 = arith.constant 128 : index
    %280 = vector.load %arg7[%c0_111, %c128_112] : memref<1x640xf32, #tpu.memory_space<vmem>>, vector<1x128xf32>
    %281 = vector.broadcast %280 : vector<1x128xf32> to vector<2x128xf32>
    %282 = arith.addf %279, %281 : vector<2x128xf32>
    %cst_113 = arith.constant 0.000000e+00 : f32
    %283 = vector.broadcast %cst_113 : f32 to vector<2x128xf32>
    %284 = arith.cmpf oge, %282, %283 : vector<2x128xf32>
    %cst_114 = arith.constant 3.300000e-01 : f32
    %285 = vector.broadcast %cst_114 : f32 to vector<2x128xf32>
    %286 = arith.mulf %285, %282 : vector<2x128xf32>
    %287 = arith.select %284, %282, %286 : vector<2x128xi1>, vector<2x128xf32>
    %c0_115 = arith.constant 0 : index
    %c0_116 = arith.constant 0 : index
    %288 = vector.load %arg5[%c0_115, %c0_116] : memref<128x256xf32, #tpu.memory_space<vmem>>, vector<128x256xf32>
    %cst_117 = arith.constant dense<0.000000e+00> : vector<2x256xf32>
    %289 = tpu.matmul %287, %288, %cst_117 {dimension_numbers = #tpu.dot_dimension_numbers<[1], [0], [0], [1], [0, 0, 1, 1], [], []>} : vector<2x128xf32>, vector<128x256xf32>, vector<2x256xf32> -> vector<2x256xf32>
    %c0_118 = arith.constant 0 : index
    %c256_119 = arith.constant 256 : index
    %290 = vector.load %arg7[%c0_118, %c256_119] : memref<1x640xf32, #tpu.memory_space<vmem>>, vector<1x256xf32>
    %291 = vector.broadcast %290 : vector<1x256xf32> to vector<2x256xf32>
    %292 = arith.addf %289, %291 : vector<2x256xf32>
    %cst_120 = arith.constant 0.000000e+00 : f32
    %293 = vector.broadcast %cst_120 : f32 to vector<2x256xf32>
    %294 = arith.cmpf oge, %292, %293 : vector<2x256xf32>
    %cst_121 = arith.constant 3.300000e-01 : f32
    %295 = vector.broadcast %cst_121 : f32 to vector<2x256xf32>
    %296 = arith.mulf %295, %292 : vector<2x256xf32>
    %297 = arith.select %294, %292, %296 : vector<2x256xi1>, vector<2x256xf32>
    %c0_122 = arith.constant 0 : index
    %c0_123 = arith.constant 0 : index
    %298 = vector.load %arg6[%c0_122, %c0_123] : memref<256x2xf32, #tpu.memory_space<vmem>>, vector<256x2xf32>
    %cst_124 = arith.constant dense<0.000000e+00> : vector<2x2xf32>
    %299 = tpu.matmul %297, %298, %cst_124 {dimension_numbers = #tpu.dot_dimension_numbers<[1], [0], [0], [1], [0, 0, 1, 1], [], []>} : vector<2x256xf32>, vector<256x2xf32>, vector<2x2xf32> -> vector<2x2xf32>
    %c0_125 = arith.constant 0 : index
    %c512_126 = arith.constant 512 : index
    %300 = vector.load %arg7[%c0_125, %c512_126] : memref<1x640xf32, #tpu.memory_space<vmem>>, vector<1x2xf32>
    %301 = vector.broadcast %300 : vector<1x2xf32> to vector<2x2xf32>
    %302 = arith.addf %299, %301 : vector<2x2xf32>
    %cst_127 = arith.constant 0.000000e+00 : f32
    %303 = vector.broadcast %cst_127 : f32 to vector<2x2xf32>
    %304 = arith.cmpf oge, %302, %303 : vector<2x2xf32>
    %cst_128 = arith.constant 3.300000e-01 : f32
    %305 = vector.broadcast %cst_128 : f32 to vector<2x2xf32>
    %306 = arith.mulf %305, %302 : vector<2x2xf32>
    %307 = arith.select %304, %302, %306 : vector<2x2xi1>, vector<2x2xf32>
    %cst_129 = arith.constant dense<0xFF800000> : vector<2xf32>
    %308 = vector.multi_reduction <maximumf>, %307, %cst_129 [1] : vector<2x2xf32> to vector<2xf32>
    %309 = vector.shape_cast %308 : vector<2xf32> to vector<2x1xf32>
    %310 = vector.broadcast %309 : vector<2x1xf32> to vector<2x2xf32>
    %311 = arith.subf %307, %310 : vector<2x2xf32>
    %312 = math.exp %311 : vector<2x2xf32>
    %cst_130 = arith.constant dense<0.000000e+00> : vector<2xf32>
    %313 = vector.multi_reduction <add>, %312, %cst_130 [1] : vector<2x2xf32> to vector<2xf32>
    %314 = vector.shape_cast %313 : vector<2xf32> to vector<2x1xf32>
    %315 = math.log %314 : vector<2x1xf32>
    %316 = arith.addf %315, %309 : vector<2x1xf32>
    %317 = vector.broadcast %316 : vector<2x1xf32> to vector<2x2xf32>
    %318 = arith.subf %307, %317 : vector<2x2xf32>
    %c0_131 = arith.constant 0 : index
    %c0_132 = arith.constant 0 : index
    %319 = vector.load %arg8[%c0_131, %c0_132] : memref<2x2xf32, #tpu.memory_space<vmem>>, vector<2x2xf32>
    tpu.vector_store %arg8[%c0_131, %c0_132], %318 {strides = array<i32>} : memref<2x2xf32, #tpu.memory_space<vmem>>, vector<2x2xf32>,
    %c0_133 = arith.constant 0 : index
    %c0_134 = arith.constant 0 : index
    %320 = vector.load %arg9[%c0_133, %c0_134] : memref<2x256xf32, #tpu.memory_space<vmem>>, vector<2x256xf32>
    tpu.vector_store %arg9[%c0_133, %c0_134], %297 {strides = array<i32>} : memref<2x256xf32, #tpu.memory_space<vmem>>, vector<2x256xf32>,
    return
  }
  func.func @transform_0(%arg0: i32) -> (i32, i32, i32) {
    %c0_i32 = arith.constant 0 : i32
    %c0_i32_0 = arith.constant 0 : i32
    %c0_i32_1 = arith.constant 0 : i32
    return %c0_i32, %arg0, %c0_i32_0 : i32, i32, i32
  }
  func.func @transform_1(%arg0: i32) -> (i32, i32, i32) {
    %c0_i32 = arith.constant 0 : i32
    %c0_i32_0 = arith.constant 0 : i32
    %c0_i32_1 = arith.constant 0 : i32
    %c0_i32_2 = arith.constant 0 : i32
    return %c0_i32, %c0_i32_0, %c0_i32_1 : i32, i32, i32
  }
  func.func @transform_2(%arg0: i32) -> (i32, i32, i32) {
    %c0_i32 = arith.constant 0 : i32
    %c0_i32_0 = arith.constant 0 : i32
    %c0_i32_1 = arith.constant 0 : i32
    %c0_i32_2 = arith.constant 0 : i32
    return %c0_i32, %c0_i32_0, %c0_i32_1 : i32, i32, i32
  }
  func.func @transform_3(%arg0: i32) -> (i32, i32) {
    %c0_i32 = arith.constant 0 : i32
    %c0_i32_0 = arith.constant 0 : i32
    %c0_i32_1 = arith.constant 0 : i32
    return %c0_i32, %c0_i32_0 : i32, i32
  }
  func.func @transform_4(%arg0: i32) -> (i32, i32) {
    %c0_i32 = arith.constant 0 : i32
    %c0_i32_0 = arith.constant 0 : i32
    %c0_i32_1 = arith.constant 0 : i32
    return %c0_i32, %c0_i32_0 : i32, i32
  }
  func.func @transform_5(%arg0: i32) -> (i32, i32) {
    %c0_i32 = arith.constant 0 : i32
    %c0_i32_0 = arith.constant 0 : i32
    %c0_i32_1 = arith.constant 0 : i32
    return %c0_i32, %c0_i32_0 : i32, i32
  }
  func.func @transform_6(%arg0: i32) -> (i32, i32) {
    %c0_i32 = arith.constant 0 : i32
    %c0_i32_0 = arith.constant 0 : i32
    %c0_i32_1 = arith.constant 0 : i32
    return %c0_i32, %c0_i32_0 : i32, i32
  }
  func.func @transform_7(%arg0: i32) -> (i32, i32) {
    %c0_i32 = arith.constant 0 : i32
    %c0_i32_0 = arith.constant 0 : i32
    return %arg0, %c0_i32 : i32, i32
  }
  func.func @transform_8(%arg0: i32) -> (i32, i32) {
    %c0_i32 = arith.constant 0 : i32
    %c0_i32_0 = arith.constant 0 : i32
    return %arg0, %c0_i32 : i32, i32
  }
}

</mosaic_0001>

<bundles_post_ra>
// kernel: brainnet_forward.1
= control target key start
LH: loop header
LB: loop body
LE: loop exit
PB: predicated region body
PF: predicated region fallthrough
CT: control target
= control target key end

     0   :  { %14 = vsyncpa [#allocation5], 0  ;;  %v47_v0 = vlaneseq  ;;  %vm495_vm0 = vcmask 261120   ;;  %vm1965_vm7 = vcmask 1041409   ;;  %s21104_s10 = smov 64   ;;  %s21105_s11 = smov 96   ;;  %s27940_s0 = inlined_call_operand.vmem [shape: f32[16,2,16], index: 0, kind: input, shape index: {}]   ;;  %s27941_s1 = inlined_call_operand.vmem [shape: f32[16,16,32], index: 1, kind: input, shape index: {}]   ;;  %s27942_s2 = inlined_call_operand.vmem [shape: bf16[16,512,64], index: 2, kind: input, shape index: {}]   ;;  %s27943_s3 = inlined_call_operand.vmem [shape: bf16[1024,128], index: 3, kind: input, shape index: {}]   ;;  %s27944_s4 = inlined_call_operand.vmem [shape: f32[128,256], index: 4, kind: input, shape index: {}]   ;;  %s27945_s5 = inlined_call_operand.vmem [shape: f32[256,2], index: 5, kind: input, shape index: {}]   ;;  %s27946_s6 = inlined_call_operand.vmem [shape: f32[1,640], index: 6, kind: input, shape index: {}]   ;;  %s27947_s7 = inlined_call_operand.hbm [shape: f32[2,2], index: 7, kind: output, shape index: {0}]   ;;  %s27948_s8 = inlined_call_operand.hbm [shape: f32[2,256], index: 8, kind: output, shape index: {1}]  }
   0x1   :  { %v32_v2 = vld [vmem:[%s27940_s0 + $0x2] sm:$0x3]  ;;  %v31_v3 = vld [vmem:[%s27940_s0] sm:$0x3]  ;;  %v33_v9 = vld [vmem:[%s27940_s0 + $0x4] sm:$0x3] }
   0x2   :  { %v21154_v1 = vshrl.u32 %v47_v0, 7  ;;  %v34_v12 = vld [vmem:[%s27940_s0 + $0x6] sm:$0x3]  ;;  %v35_v15 = vld [vmem:[%s27940_s0 + $0x8] sm:$0x3]  ;;  %v401_v48 = vld [vmem:[%s27941_s1 + $0x10] sm:$0xff] }
   0x3   :  { %v36_v18 = vld [vmem:[%s27940_s0 + $0xa] sm:$0x3]  ;;  %v37_v21 = vld [vmem:[%s27940_s0 + $0xc] sm:$0x3]  ;;  %v38_v24 = vld [vmem:[%s27940_s0 + $0xe] sm:$0x3] }
   0x4   :  { %v21163_v4 = vsub.s32 1, %v21154_v1  ;;  %v21168_v7 = vsub.s32 0, %v21154_v1  ;;  %v39_v27 = vld [vmem:[%s27940_s0 + $0x10] sm:$0x3]  ;;  %v40_v30 = vld [vmem:[%s27940_s0 + $0x12] sm:$0x3] }
   0x5   :  { %v41_v33 = vld [vmem:[%s27940_s0 + $0x14] sm:$0x3]  ;;  %v42_v36 = vld [vmem:[%s27940_s0 + $0x16] sm:$0x3]  ;;  %v43_v39 = vld [vmem:[%s27940_s0 + $0x18] sm:$0x3] }
   0x6   :  { %28104 = vst [vmem:[#allocation10_spill] sm:$0xff] %v21163_v4  ;;  %v83_v5 = vrot.slane %v32_v2, %v21163_v4  ;;  %v61_v6 = vrot.slane %v31_v3, %v21163_v4  ;;  %28105 = vst [vmem:[#allocation11_spill] sm:$0xff] %v21168_v7  ;;  %v50_v8 = vrot.slane %v31_v3, %v21168_v7  ;;  %v44_v42 = vld [vmem:[%s27940_s0 + $0x1a] sm:$0x3]  ;;  %v45_v45 = vld [vmem:[%s27940_s0 + $0x1c] sm:$0x3] }
   0x7   :  { %v72_v10 = vrot.slane %v32_v2, %v21168_v7  ;;  %v105_v11 = vrot.slane %v33_v9, %v21163_v4  ;;  %v94_v13 = vrot.slane %v33_v9, %v21168_v7  ;;  %v127_v14 = vrot.slane %v34_v12, %v21163_v4  ;;  %v399_v49 = vld [vmem:[%s27941_s1] sm:$0xff]  ;;  %v46_v50 = vld [vmem:[%s27940_s0 + $0x1e] sm:$0x3]  ;;  %v400_v55 = vld [vmem:[%s27941_s1 + $0x8] sm:$0xff] }
   0x8   :  { %85 = vbcast.lane.b32.xlu1 %v83_v5, 256  ;;  %63 = vbcast.lane.b32.xlu0 %v61_v6, 256  ;;  %v116_v16 = vrot.slane %v34_v12, %v21168_v7  ;;  %v149_v17 = vrot.slane %v35_v15, %v21163_v4  ;;  %v138_v19 = vrot.slane %v35_v15, %v21168_v7  ;;  %v402_v54 = vld [vmem:[%s27941_s1 + $0x18] sm:$0xff] }
   0x9   :  { %v171_v20 = vrot.slane %v36_v18, %v21163_v4  ;;  %v160_v22 = vrot.slane %v36_v18, %v21168_v7  ;;  %v193_v23 = vrot.slane %v37_v21, %v21163_v4  ;;  %v182_v25 = vrot.slane %v37_v21, %v21168_v7 }
   0xa   :  { %v215_v26 = vrot.slane %v38_v24, %v21163_v4  ;;  %v204_v28 = vrot.slane %v38_v24, %v21168_v7  ;;  %v237_v29 = vrot.slane %v39_v27, %v21163_v4  ;;  %v226_v31 = vrot.slane %v39_v27, %v21168_v7  ;;  %v404_v24 = vld [vmem:[%s27941_s1 + $0x28] sm:$0xff] }
   0xb   :  { %v259_v32 = vrot.slane %v40_v30, %v21163_v4  ;;  %v248_v34 = vrot.slane %v40_v30, %v21168_v7  ;;  %v281_v35 = vrot.slane %v41_v33, %v21163_v4  ;;  %v270_v37 = vrot.slane %v41_v33, %v21168_v7 }
   0xc   :  { %89 = vbcast.lane.b32.xlu1 %v83_v5, 264  ;;  %67 = vbcast.lane.b32.xlu0 %v61_v6, 264  ;;  %v303_v38 = vrot.slane %v42_v36, %v21163_v4  ;;  %v292_v40 = vrot.slane %v42_v36, %v21168_v7  ;;  %v325_v41 = vrot.slane %v43_v39, %v21163_v4 }
   0xd   :  { %v314_v43 = vrot.slane %v43_v39, %v21168_v7  ;;  %v347_v44 = vrot.slane %v44_v42, %v21163_v4  ;;  %v336_v46 = vrot.slane %v44_v42, %v21168_v7  ;;  %v369_v47 = vrot.slane %v45_v45, %v21163_v4 }
   0xe   :  { %v358_v51 = vrot.slane %v45_v45, %v21168_v7  ;;  %v391_v58 = vrot.slane %v46_v50, %v21163_v4  ;;  %v380_v2 = vrot.slane %v46_v50, %v21168_v7 }
  0x10   :  { %56 = vbcast.lane.b32.xlu1 %v50_v8, 264  ;;  %52 = vbcast.lane.b32.xlu0 %v50_v8, 256 }
  0x14   :  { %78 = vbcast.lane.b32.xlu1 %v72_v10, 264  ;;  %74 = vbcast.lane.b32.xlu0 %v72_v10, 256 }
  0x18   :  { %111 = vbcast.lane.b32.xlu1 %v105_v11, 264  ;;  %107 = vbcast.lane.b32.xlu0 %v105_v11, 256 }
  0x1c   :  { %100 = vbcast.lane.b32.xlu1 %v94_v13, 264  ;;  %96 = vbcast.lane.b32.xlu0 %v94_v13, 256 }
  0x20   :  { %133 = vbcast.lane.b32.xlu1 %v127_v14, 264  ;;  %129 = vbcast.lane.b32.xlu0 %v127_v14, 256 }
  0x24   :  { %122 = vbcast.lane.b32.xlu1 %v116_v16, 264  ;;  %118 = vbcast.lane.b32.xlu0 %v116_v16, 256 }
  0x28   :  { %155 = vbcast.lane.b32.xlu1 %v149_v17, 264  ;;  %151 = vbcast.lane.b32.xlu0 %v149_v17, 256 }
  0x2c   :  { %144 = vbcast.lane.b32.xlu1 %v138_v19, 264  ;;  %140 = vbcast.lane.b32.xlu0 %v138_v19, 256 }
  0x30   :  { %177 = vbcast.lane.b32.xlu1 %v171_v20, 264  ;;  %173 = vbcast.lane.b32.xlu0 %v171_v20, 256 }
  0x34   :  { %166 = vbcast.lane.b32.xlu1 %v160_v22, 264  ;;  %162 = vbcast.lane.b32.xlu0 %v160_v22, 256 }
  0x38   :  { %199 = vbcast.lane.b32.xlu1 %v193_v23, 264  ;;  %195 = vbcast.lane.b32.xlu0 %v193_v23, 256 }
  0x3c   :  { %188 = vbcast.lane.b32.xlu1 %v182_v25, 264  ;;  %184 = vbcast.lane.b32.xlu0 %v182_v25, 256  ;;  %v403_v25 = vld [vmem:[%s27941_s1 + $0x20] sm:$0xff] }
  0x40   :  { %221 = vbcast.lane.b32.xlu1 %v215_v26, 264  ;;  %217 = vbcast.lane.b32.xlu0 %v215_v26, 256 }
  0x44   :  { %210 = vbcast.lane.b32.xlu1 %v204_v28, 264  ;;  %206 = vbcast.lane.b32.xlu0 %v204_v28, 256 }
  0x48   :  { %243 = vbcast.lane.b32.xlu1 %v237_v29, 264  ;;  %239 = vbcast.lane.b32.xlu0 %v237_v29, 256 }
  0x4c   :  { %232 = vbcast.lane.b32.xlu1 %v226_v31, 264  ;;  %228 = vbcast.lane.b32.xlu0 %v226_v31, 256 }
  0x50   :  { %265 = vbcast.lane.b32.xlu1 %v259_v32, 264  ;;  %261 = vbcast.lane.b32.xlu0 %v259_v32, 256 }
  0x54   :  { %254 = vbcast.lane.b32.xlu1 %v248_v34, 264  ;;  %250 = vbcast.lane.b32.xlu0 %v248_v34, 256 }
  0x58   :  { %287 = vbcast.lane.b32.xlu1 %v281_v35, 264  ;;  %283 = vbcast.lane.b32.xlu0 %v281_v35, 256 }
  0x5c   :  { %276 = vbcast.lane.b32.xlu1 %v270_v37, 264  ;;  %272 = vbcast.lane.b32.xlu0 %v270_v37, 256 }
  0x60   :  { %309 = vbcast.lane.b32.xlu1 %v303_v38, 264  ;;  %305 = vbcast.lane.b32.xlu0 %v303_v38, 256 }
  0x64   :  { %298 = vbcast.lane.b32.xlu1 %v292_v40, 264  ;;  %294 = vbcast.lane.b32.xlu0 %v292_v40, 256 }
  0x68   :  { %331 = vbcast.lane.b32.xlu1 %v325_v41, 264  ;;  %327 = vbcast.lane.b32.xlu0 %v325_v41, 256 }
  0x6c   :  { %320 = vbcast.lane.b32.xlu1 %v314_v43, 264  ;;  %316 = vbcast.lane.b32.xlu0 %v314_v43, 256 }
  0x70   :  { %353 = vbcast.lane.b32.xlu1 %v347_v44, 264  ;;  %349 = vbcast.lane.b32.xlu0 %v347_v44, 256  ;;  %v406_v44 = vld [vmem:[%s27941_s1 + $0x38] sm:$0xff] }
  0x74   :  { %342 = vbcast.lane.b32.xlu1 %v336_v46, 264  ;;  %338 = vbcast.lane.b32.xlu0 %v336_v46, 256 }
  0x78   :  { %375 = vbcast.lane.b32.xlu1 %v369_v47, 264  ;;  %371 = vbcast.lane.b32.xlu0 %v369_v47, 256 }
  0x7a   :  { %v86_v52 = vpop.permute.xlu1 %85  ;;  %v64_v53 = vpop.permute.xlu0 %63 }
  0x7b   :  { %v437_v56 = vmul.f32 %v401_v48, %v86_v52  ;;  %v433_v57 = vmul.f32 %v399_v49, %v64_v53 }
  0x7c   :  { %364 = vbcast.lane.b32.xlu1 %v358_v51, 264  ;;  %360 = vbcast.lane.b32.xlu0 %v358_v51, 256 }
  0x7d   :  { %v21254_v59 = vsel %vm495_vm0, %v437_v56, 0.0  ;;  %v21257_v60 = vsel %vm495_vm0, %v433_v57, 0.0 }
  0x7e   :  { %v90_v61 = vpop.permute.xlu1 %89  ;;  %v68_v62 = vpop.permute.xlu0 %67 }
  0x7f   :  { %v438_v63 = vmul.f32 %v402_v54, %v90_v61  ;;  %v434_v0 = vmul.f32 %v400_v55, %v68_v62 }
  0x80   :  { %397 = vbcast.lane.b32.xlu1 %v391_v58, 264  ;;  %393 = vbcast.lane.b32.xlu0 %v391_v58, 256 }
  0x81   :  { %v21261_v3 = vsel %vm495_vm0, %v438_v63, 0.0  ;;  %v21264_v5 = vsel %vm495_vm0, %v434_v0, 0.0 }
  0x82   :  { %v525_v6 = vadd.f32 %v21261_v3, %v21254_v59  ;;  %v57_v8 = vpop.permute.xlu1 %56  ;;  %v53_v9 = vpop.permute.xlu0 %52  ;;  %v507_v13 = vadd.f32 %v21264_v5, %v21257_v60 }
  0x83   :  { %v432_v10 = vmul.f32 %v400_v55, %v57_v8  ;;  %v431_v11 = vmul.f32 %v399_v49, %v53_v9  ;;  %v405_v49 = vld [vmem:[%s27941_s1 + $0x30] sm:$0xff] }
  0x84   :  { %v526_v12 = vrot.slane %v525_v6, 4  ;;  %386 = vbcast.lane.b32.xlu1 %v380_v2, 264  ;;  %382 = vbcast.lane.b32.xlu0 %v380_v2, 256  ;;  %v508_v22 = vrot.slane %v507_v13, 4 }
  0x85   :  { %v21271_v14 = vsel %vm495_vm0, %v432_v10, 0.0  ;;  %v21274_v15 = vsel %vm495_vm0, %v431_v11, 0.0  ;;  %v21102_v10 = vmov 1935823168  }
  0x86   :  { %v498_v16 = vadd.f32 %v21271_v14, %v21274_v15  ;;  %v79_v17 = vpop.permute.xlu1 %78  ;;  %v75_v18 = vpop.permute.xlu0 %74  ;;  %v527_v21 = vadd.f32 %v526_v12, %v525_v6  ;;  %v509_v34 = vadd.f32 %v508_v22, %v507_v13  ;;  %v408_v12 = vld [vmem:[%s27941_s1 + $0x48] sm:$0xff]  ;;  %v407_v13 = vld [vmem:[%s27941_s1 + $0x40] sm:$0xff]  ;;  %v1485_v4 = vunpack.c.l.s4 %v21102_v10 }
  0x87   :  { %v436_v19 = vmul.f32 %v402_v54, %v79_v17  ;;  %v435_v20 = vmul.f32 %v401_v48, %v75_v18 }
  0x88   :  { %v499_v23 = vrot.slane %v498_v16, 4  ;;  %v528_v33 = vrot.slane %v527_v21, 2  ;;  %v510_v45 = vrot.slane %v509_v34, 2 }
  0x89   :  { %v21285_v26 = vsel %vm495_vm0, %v436_v19, 0.0  ;;  %v21288_v27 = vsel %vm495_vm0, %v435_v20, 0.0 }
  0x8a   :  { %v112_v28 = vpop.permute.xlu1 %111  ;;  %v108_v29 = vpop.permute.xlu0 %107  ;;  %v516_v30 = vadd.f32 %v21285_v26, %v21288_v27  ;;  %v500_v35 = vadd.f32 %v499_v23, %v498_v16  ;;  %v21312_v54 = vadd.f32 %v528_v33, %v527_v21  ;;  %v21316_v58 = vadd.f32 %v510_v45, %v509_v34  ;;  %v409_v45 = vld [vmem:[%s27941_s1 + $0x50] sm:$0xff] }
  0x8b   :  { %v442_v31 = vmul.f32 %v404_v24, %v112_v28  ;;  %v441_v32 = vmul.f32 %v403_v25, %v108_v29 }
  0x8c   :  { %v517_v36 = vrot.slane %v516_v30, 4  ;;  %v501_v46 = vrot.slane %v500_v35, 2 }
  0x8d   :  { %v21293_v37 = vsel %vm495_vm0, %v442_v31, 0.0  ;;  %v21296_v38 = vsel %vm495_vm0, %v441_v32, 0.0 }
  0x8e   :  { %v101_v39 = vpop.permute.xlu1 %100  ;;  %v97_v40 = vpop.permute.xlu0 %96  ;;  %v543_v41 = vadd.f32 %v21293_v37, %v21296_v38  ;;  %v518_v47 = vadd.f32 %v517_v36, %v516_v30  ;;  %v21318_v61 = vadd.f32 %v501_v46, %v500_v35 }
  0x8f   :  { %v440_v42 = vmul.f32 %v404_v24, %v101_v39  ;;  %v439_v43 = vmul.f32 %v403_v25, %v97_v40 }
  0x90   :  { %v544_v50 = vrot.slane %v543_v41, 4  ;;  %v519_v62 = vrot.slane %v518_v47, 2 }
  0x91   :  { %v21304_v48 = vsel %vm495_vm0, %v440_v42, 0.0  ;;  %v21310_v51 = vsel %vm495_vm0, %v439_v43, 0.0 }
  0x92   :  { %v134_v52 = vpop.permute.xlu1 %133  ;;  %v130_v53 = vpop.permute.xlu0 %129  ;;  %v534_v55 = vadd.f32 %v21304_v48, %v21310_v51  ;;  %v545_v0 = vadd.f32 %v544_v50, %v543_v41  ;;  %v21337_v21 = vadd.f32 %v519_v62, %v518_v47 }
  0x93   :  { %v446_v56 = vmul.f32 %v406_v44, %v134_v52  ;;  %v445_v57 = vmul.f32 %v405_v49, %v130_v53 }
  0x94   :  { %v535_v63 = vrot.slane %v534_v55, 4  ;;  %v546_v22 = vrot.slane %v545_v0, 2 }
  0x95   :  { %v21321_v2 = vsel %vm495_vm0, %v446_v56, 0.0  ;;  %v21324_v6 = vsel %vm495_vm0, %v445_v57, 0.0 }
  0x96   :  { %v123_v8 = vpop.permute.xlu1 %122  ;;  %v119_v9 = vpop.permute.xlu0 %118  ;;  %v536_v11 = vadd.f32 %v535_v63, %v534_v55  ;;  %v561_v16 = vadd.f32 %v21321_v2, %v21324_v6  ;;  %v21348_v35 = vadd.f32 %v546_v22, %v545_v0 }
  0x97   :  { %v444_v17 = vmul.f32 %v406_v44, %v123_v8  ;;  %v443_v18 = vmul.f32 %v405_v49, %v119_v9  ;;  %v410_v44 = vld [vmem:[%s27941_s1 + $0x58] sm:$0xff] }
  0x98   :  { %v537_v23 = vrot.slane %v536_v11, 2  ;;  %v562_v34 = vrot.slane %v561_v16, 4 }
  0x99   :  { %v21340_v24 = vsel %vm495_vm0, %v444_v17, 0.0  ;;  %v21343_v25 = vsel %vm495_vm0, %v443_v18, 0.0 }
  0x9a   :  { %v156_v28 = vpop.permute.xlu1 %155  ;;  %v152_v29 = vpop.permute.xlu0 %151  ;;  %v552_v30 = vadd.f32 %v21340_v24, %v21343_v25  ;;  %v21350_v36 = vadd.f32 %v537_v23, %v536_v11  ;;  %v563_v49 = vadd.f32 %v562_v34, %v561_v16 }
  0x9b   :  { %v450_v31 = vmul.f32 %v408_v12, %v156_v28  ;;  %v449_v32 = vmul.f32 %v407_v13, %v152_v29  ;;  %v412_v29 = vld [vmem:[%s27941_s1 + $0x68] sm:$0xff] }
  0x9c   :  { %v553_v50 = vrot.slane %v552_v30, 4  ;;  %v564_v11 = vrot.slane %v563_v49, 2 }
  0x9d   :  { %v21353_v39 = vsel %vm495_vm0, %v450_v31, 0.0  ;;  %v21356_v40 = vsel %vm495_vm0, %v449_v32, 0.0  ;;  %v411_v31 = vld [vmem:[%s27941_s1 + $0x60] sm:$0xff] }
  0x9e   :  { %v145_v41 = vpop.permute.xlu1 %144  ;;  %v141_v42 = vpop.permute.xlu0 %140  ;;  %v579_v43 = vadd.f32 %v21353_v39, %v21356_v40 }
  0x9f   :  { %v448_v46 = vmul.f32 %v408_v12, %v145_v41  ;;  %v447_v47 = vmul.f32 %v407_v13, %v141_v42  ;;  %v554_v12 = vadd.f32 %v553_v50, %v552_v30  ;;  %v21390_v41 = vadd.f32 %v564_v11, %v563_v49 }
  0xa0   :  { %v580_v52 = vrot.slane %v579_v43, 4 }
  0xa1   :  { %v21369_v56 = vsel %vm495_vm0, %v448_v46, 0.0  ;;  %v21372_v57 = vsel %vm495_vm0, %v447_v47, 0.0  ;;  %v555_v42 = vrot.slane %v554_v12, 2 }
  0xa2   :  { %v178_v62 = vpop.permute.xlu1 %177  ;;  %v174_v63 = vpop.permute.xlu0 %173  ;;  %v570_v0 = vadd.f32 %v21369_v56, %v21372_v57  ;;  %v581_v13 = vadd.f32 %v580_v52, %v579_v43 }
  0xa3   :  { %v454_v8 = vmul.f32 %v410_v44, %v178_v62  ;;  %v453_v9 = vmul.f32 %v409_v45, %v174_v63  ;;  %v21401_v49 = vadd.f32 %v555_v42, %v554_v12  ;;  %v414_v12 = vld [vmem:[%s27941_s1 + $0x78] sm:$0xff] }
  0xa4   :  { %v571_v16 = vrot.slane %v570_v0, 4  ;;  %v582_v43 = vrot.slane %v581_v13, 2 }
  0xa5   :  { %v21377_v17 = vsel %vm495_vm0, %v454_v8, 0.0  ;;  %v21380_v18 = vsel %vm495_vm0, %v453_v9, 0.0 }
  0xa6   :  { %v167_v22 = vpop.permute.xlu1 %166  ;;  %v163_v23 = vpop.permute.xlu0 %162  ;;  %v572_v28 = vadd.f32 %v571_v16, %v570_v0  ;;  %v597_v30 = vadd.f32 %v21377_v17, %v21380_v18  ;;  %v21403_v16 = vadd.f32 %v582_v43, %v581_v13 }
  0xa7   :  { %v452_v32 = vmul.f32 %v410_v44, %v167_v22  ;;  %v451_v34 = vmul.f32 %v409_v45, %v163_v23 }
  0xa8   :  { %v573_v46 = vrot.slane %v572_v28, 2  ;;  %v598_v47 = vrot.slane %v597_v30, 4 }
  0xa9   :  { %v21393_v50 = vsel %vm495_vm0, %v452_v32, 0.0  ;;  %v21396_v52 = vsel %vm495_vm0, %v451_v34, 0.0 }
  0xaa   :  { %v200_v62 = vpop.permute.xlu1 %199  ;;  %v196_v63 = vpop.permute.xlu0 %195  ;;  %v588_v0 = vadd.f32 %v21393_v50, %v21396_v52  ;;  %v599_v9 = vadd.f32 %v598_v47, %v597_v30  ;;  %v21405_v22 = vadd.f32 %v573_v46, %v572_v28  ;;  %v413_v47 = vld [vmem:[%s27941_s1 + $0x70] sm:$0xff] }
  0xab   :  { %v458_v8 = vmul.f32 %v412_v29, %v200_v62  ;;  %v457_v44 = vmul.f32 %v411_v31, %v196_v63 }
  0xac   :  { %v589_v11 = vrot.slane %v588_v0, 4  ;;  %v600_v42 = vrot.slane %v599_v9, 2 }
  0xad   :  { %v21408_v23 = vsel %vm495_vm0, %v458_v8, 0.0  ;;  %v21411_v32 = vsel %vm495_vm0, %v457_v44, 0.0 }
  0xae   :  { %28106 = vst [vmem:[#allocation12_spill] sm:$0xff] %v21408_v23  ;;  %28107 = vst [vmem:[#allocation13_spill] sm:$0xff] %v21411_v32  ;;  %v189_v34 = vpop.permute.xlu1 %188  ;;  %v185_v55 = vpop.permute.xlu0 %184  ;;  %v615_v62 = vadd.f32 %v21408_v23, %v21411_v32  ;;  %v590_v43 = vadd.f32 %v589_v11, %v588_v0  ;;  %v21101_v0 = vmov 1966171168   ;;  %v21432_v53 = vadd.f32 %v600_v42, %v599_v9  ;;  %v415_v9 = vld [vmem:[%s27941_s1 + $0x80] sm:$0xff] }
  0xaf   :  { %v456_v30 = vmul.f32 %v412_v29, %v189_v34  ;;  %v455_v13 = vmul.f32 %v411_v31, %v185_v55  ;;  %v1037_v11 = vunpack.c.l.s4 %v21101_v0  ;;  %v1486_v23 = vunpack.c.0.s8 %v1485_v4 }
  0xb0   :  { %v616_v46 = vrot.slane %v615_v62, 4  ;;  %v591_v63 = vrot.slane %v590_v43, 2 }
  0xb1   :  { %v21425_v44 = vsel %vm495_vm0, %v456_v30, 0.0  ;;  %v21428_v45 = vsel %vm495_vm0, %v455_v13, 0.0 }
  0xb2   :  { %28108 = vst [vmem:[#allocation14_spill] sm:$0xff] %v21425_v44  ;;  %28109 = vst [vmem:[#allocation15_spill] sm:$0xff] %v21428_v45  ;;  %v222_v55 = vpop.permute.xlu1 %221  ;;  %v218_v29 = vpop.permute.xlu0 %217  ;;  %v606_v31 = vadd.f32 %v21425_v44, %v21428_v45  ;;  %v617_v33 = vadd.f32 %v616_v46, %v615_v62  ;;  %v21449_v0 = vadd.f32 %v591_v63, %v590_v43 }
  0xb3   :  { %v462_v34 = vmul.f32 %v414_v12, %v222_v55  ;;  %v461_v28 = vmul.f32 %v413_v47, %v218_v29  ;;  %v416_v55 = vld [vmem:[%s27941_s1 + $0x88] sm:$0xff] }
  0xb4   :  { %v607_v8 = vrot.slane %v606_v31, 4  ;;  %v618_v10 = vrot.slane %v617_v33, 2 }
  0xb5   :  { %v21435_v30 = vsel %vm495_vm0, %v462_v34, 0.0  ;;  %v21438_v13 = vsel %vm495_vm0, %v461_v28, 0.0  ;;  %v1038_v28 = vunpack.c.0.s8 %v1037_v11 }
  0xb6   :  { %v211_v20 = vpop.permute.xlu1 %210  ;;  %v207_v19 = vpop.permute.xlu0 %206  ;;  %v608_v7 = vadd.f32 %v607_v8, %v606_v31  ;;  %v633_v62 = vadd.f32 %v21435_v30, %v21438_v13 }
  0xb7   :  { %v460_v42 = vmul.f32 %v414_v12, %v211_v20  ;;  %v459_v46 = vmul.f32 %v413_v47, %v207_v19  ;;  %v21460_v43 = vsub.s32 %v1038_v28, %v21154_v1  ;;  %v814_v28 = vadd.f32 %v21254_v59, %v21257_v60 }
  0xb8   :  { %v609_v8 = vrot.slane %v608_v7, 2  ;;  %v634_v31 = vrot.slane %v633_v62, 4  ;;  %v784_v59 = vadd.f32 %v21288_v27, %v21274_v15  ;;  %v28113_v27 = vrot.slane %v21316_v58, 1 }
  0xb9   :  { %v21452_v34 = vsel %vm495_vm0, %v460_v42, 0.0  ;;  %v21455_v45 = vsel %vm495_vm0, %v459_v46, 0.0  ;;  %v21463_v42 = vadd.f32 %v618_v10, %v617_v33  ;;  %v829_v33 = vadd.f32 %v21261_v3, %v21264_v5  ;;  %v417_v10 = vld [vmem:[%s27941_s1 + $0x90] sm:$0xff] }
  0xba   :  { %28110 = vst [vmem:[#allocation16_spill] sm:$0xff] %v21455_v45  ;;  %v244_v44 = vpop.permute.xlu1 %243  ;;  %v240_v32 = vpop.permute.xlu0 %239  ;;  %v624_v19 = vadd.f32 %v21452_v34, %v21455_v45  ;;  %v635_v63 = vadd.f32 %v634_v31, %v633_v62  ;;  %v21465_v29 = vadd.f32 %v609_v8, %v608_v7  ;;  %v418_v62 = vld [vmem:[%s27941_s1 + $0x98] sm:$0xff]  ;;  %v28112_v3 = vrot.slane %v21312_v54, 1 }
  0xbb   :  { %v466_v20 = vmul.f32 %v416_v55, %v244_v44  ;;  %v465_v12 = vmul.f32 %v415_v9, %v240_v32  ;;  %v21474_v32 = vsub.s32 %v1486_v23, %v21154_v1  ;;  %v799_v1 = vadd.f32 %v21285_v26, %v21271_v14 }
  0xbc   :  { %v625_v11 = vrot.slane %v624_v19, 4  ;;  %v21495_v5 = vadd.f32 %v28112_v3, %v21312_v54  ;;  %v636_v8 = vrot.slane %v635_v63, 2  ;;  %v21508_v54 = vadd.f32 %v28113_v27, %v21316_v58 }
  0xbd   :  { %v21468_v46 = vsel %vm495_vm0, %v466_v20, 0.0  ;;  %v21471_v4 = vsel %vm495_vm0, %v465_v12, 0.0  ;;  %28111 = vst [vmem:[#allocation17_spill] sm:$0xff] %v21474_v32  ;;  %v620_v12 = vrot.slane %v21463_v42, 1 }
  0xbe   :  { %v233_v45 = vpop.permute.xlu1 %232  ;;  %v229_v44 = vpop.permute.xlu0 %228  ;;  %v651_v7 = vadd.f32 %v21468_v46, %v21471_v4  ;;  %v626_v31 = vadd.f32 %v625_v11, %v624_v19  ;;  %v28114_v19 = vrot.slane %v21318_v61, 1  ;;  %v21520_v3 = vadd.f32 %v636_v8, %v635_v63 }
  0xbf   :  { %v464_v60 = vmul.f32 %v416_v55, %v233_v45  ;;  %v463_v23 = vmul.f32 %v415_v9, %v229_v44  ;;  %v830_v45 = vadd.f32 %v829_v33, %v21293_v37  ;;  %v815_v55 = vadd.f32 %v814_v28, %v21296_v38 }
  0xc0   :  { %v652_v20 = vrot.slane %v651_v7, 4  ;;  %v21517_v11 = vadd.f32 %v28114_v19, %v21318_v61  ;;  %v800_v44 = vadd.f32 %v799_v1, %v21304_v48  ;;  %v627_v58 = vrot.slane %v626_v31, 2 }
  0xc1   :  { %v21500_v32 = vsel %vm495_vm0, %v464_v60, 0.0  ;;  %v21503_v14 = vsel %vm495_vm0, %v463_v23, 0.0  ;;  %v28115_v37 = vrot.slane %v21337_v21, 1  ;;  %v785_v28 = vadd.f32 %v784_v59, %v21310_v51  ;;  %v420_v51 = vld [vmem:[%s27941_s1 + $0xa8] sm:$0xff]  ;;  %v419_v59 = vld [vmem:[%s27941_s1 + $0xa0] sm:$0xff] }
  0xc2   :  { %v266_v15 = vpop.permute.xlu1 %265  ;;  %v262_v26 = vpop.permute.xlu0 %261  ;;  %v642_v9 = vadd.f32 %v21500_v32, %v21503_v14  ;;  %v653_v27 = vadd.f32 %v652_v20, %v651_v7  ;;  %v28116_v63 = vrot.slane %v21348_v35, 1  ;;  %v831_v8 = vadd.f32 %v830_v45, %v21321_v2 }
  0xc3   :  { %v470_v60 = vmul.f32 %v418_v62, %v266_v15  ;;  %v469_v23 = vmul.f32 %v417_v10, %v262_v26  ;;  %v21525_v38 = vadd.f32 %v28115_v37, %v21337_v21  ;;  %v816_v21 = vadd.f32 %v815_v55, %v21324_v6 }
  0xc4   :  { %v643_v47 = vrot.slane %v642_v9, 4  ;;  %v21537_v7 = vadd.f32 %v28116_v63, %v21348_v35  ;;  %v801_v15 = vadd.f32 %v800_v44, %v21340_v24  ;;  %v786_v2 = vadd.f32 %v785_v28, %v21343_v25 }
  0xc5   :  { %v21529_v33 = vsel %vm495_vm0, %v470_v60, 0.0  ;;  %v21532_v61 = vsel %vm495_vm0, %v469_v23, 0.0  ;;  %v654_v45 = vrot.slane %v653_v27, 2  ;;  %v832_v25 = vadd.f32 %v831_v8, %v21353_v39 }
  0xc6   :  { %v255_v48 = vpop.permute.xlu1 %254  ;;  %v251_v1 = vpop.permute.xlu0 %250  ;;  %v644_v20 = vadd.f32 %v643_v47, %v642_v9  ;;  %v669_v26 = vadd.f32 %v21529_v33, %v21532_v61  ;;  %v21552_v47 = vadd.f32 %v627_v58, %v626_v31  ;;  %v817_v31 = vadd.f32 %v816_v21, %v21356_v40 }
  0xc7   :  { %v468_v35 = vmul.f32 %v418_v62, %v255_v48  ;;  %v467_v19 = vmul.f32 %v417_v10, %v251_v1  ;;  %v28117_v62 = vrot.slane %v21350_v36, 1  ;;  %v28118_v37 = vrot.slane %v21390_v41, 1 }
  0xc8   :  { %v645_v55 = vrot.slane %v644_v20, 2  ;;  %v670_v9 = vrot.slane %v669_v26, 4  ;;  %v802_v48 = vadd.f32 %v801_v15, %v21369_v56  ;;  %v21577_v8 = vadd.f32 %v654_v45, %v653_v27  ;;  %v421_v45 = vld [vmem:[%s27941_s1 + $0xb0] sm:$0xff] }
  0xc9   :  { %v21555_v60 = vsel %vm495_vm0, %v468_v35, 0.0  ;;  %v21558_v23 = vsel %vm495_vm0, %v467_v19, 0.0  ;;  %v21563_v10 = vadd.f32 %v28117_v62, %v21350_v36  ;;  %v21572_v28 = vadd.f32 %v28118_v37, %v21390_v41 }
  0xca   :  { %v288_v24 = vpop.permute.xlu1 %287  ;;  %v284_v44 = vpop.permute.xlu0 %283  ;;  %v660_v58 = vadd.f32 %v21555_v60, %v21558_v23  ;;  %v787_v35 = vadd.f32 %v786_v2, %v21372_v57  ;;  %v671_v19 = vadd.f32 %v670_v9, %v669_v26  ;;  %v21579_v40 = vadd.f32 %v645_v55, %v644_v20  ;;  %v422_v2 = vld [vmem:[%s27941_s1 + $0xb8] sm:$0xff] }
  0xcb   :  { %v474_v1 = vmul.f32 %v420_v51, %v288_v24  ;;  %v473_v63 = vmul.f32 %v419_v59, %v284_v44  ;;  %v28119_v15 = vrot.slane %v21401_v49, 1  ;;  %v833_v26 = vadd.f32 %v832_v25, %v21377_v17 }
  0xcc   :  { %v661_v39 = vrot.slane %v660_v58, 4  ;;  %v818_v27 = vadd.f32 %v817_v31, %v21380_v18  ;;  %v28120_v55 = vrot.slane %v21403_v16, 1  ;;  %v803_v17 = vadd.f32 %v802_v48, %v21393_v50 }
  0xcd   :  { %v21582_v21 = vsel %vm495_vm0, %v474_v1, 0.0  ;;  %v21585_v41 = vsel %vm495_vm0, %v473_v63, 0.0  ;;  %v21590_v57 = vadd.f32 %v28119_v15, %v21401_v49  ;;  %v788_v24 = vadd.f32 %v787_v35, %v21396_v52  ;;  %v28122_v52 = vld [vmem:[#allocation12_spill] sm:$0xff] }
  0xce   :  { %v277_v62 = vpop.permute.xlu1 %276  ;;  %v273_v56 = vpop.permute.xlu0 %272  ;;  %v687_v20 = vadd.f32 %v21582_v21, %v21585_v41  ;;  %v21605_v49 = vadd.f32 %v28120_v55, %v21403_v16  ;;  %v672_v44 = vrot.slane %v671_v19, 2  ;;  %v662_v25 = vadd.f32 %v661_v39, %v660_v58  ;;  %v28123_v58 = vld [vmem:[#allocation13_spill] sm:$0xff] }
  0xcf   :  { %v472_v9 = vmul.f32 %v420_v51, %v277_v62  ;;  %v471_v18 = vmul.f32 %v419_v59, %v273_v56  ;;  %v28121_v50 = vrot.slane %v21405_v22, 1  ;;  %v834_v59 = vadd.f32 %v833_v26, %v28122_v52  ;;  %v28125_v56 = vld [vmem:[#allocation14_spill] sm:$0xff]  ;;  %v28127_v52 = vld [vmem:[#allocation15_spill] sm:$0xff] }
  0xd0   :  { %v688_v31 = vrot.slane %v687_v20, 4  ;;  %v819_v48 = vadd.f32 %v818_v27, %v28123_v58  ;;  %v28124_v39 = vrot.slane %v21432_v53, 1  ;;  %v21632_v37 = vadd.f32 %v672_v44, %v671_v19 }
  0xd1   :  { %v21612_v63 = vsel %vm495_vm0, %v472_v9, 0.0  ;;  %v21615_v15 = vsel %vm495_vm0, %v471_v18, 0.0  ;;  %v21620_v51 = vadd.f32 %v28121_v50, %v21405_v22  ;;  %v804_v9 = vadd.f32 %v803_v17, %v28125_v56 }
  0xd2   :  { %v310_v16 = vpop.permute.xlu1 %309  ;;  %v306_v55 = vpop.permute.xlu0 %305  ;;  %v678_v35 = vadd.f32 %v21612_v63, %v21615_v15  ;;  %v21629_v62 = vadd.f32 %v28124_v39, %v21432_v53  ;;  %v663_v22 = vrot.slane %v662_v25, 2  ;;  %v689_v50 = vadd.f32 %v688_v31, %v687_v20  ;;  %v423_v31 = vld [vmem:[%s27941_s1 + $0xc0] sm:$0xff] }
  0xd3   :  { %v478_v18 = vmul.f32 %v422_v2, %v310_v16  ;;  %v477_v1 = vmul.f32 %v421_v45, %v306_v55  ;;  %v28126_v26 = vrot.slane %v21449_v0, 1  ;;  %v789_v58 = vadd.f32 %v788_v24, %v28127_v52  ;;  %v424_v24 = vld [vmem:[%s27941_s1 + $0xc8] sm:$0xff]  ;;  %v28129_v39 = vld [vmem:[#allocation16_spill] sm:$0xff] }
  0xd4   :  { %v679_v36 = vrot.slane %v678_v35, 4  ;;  %v21649_v19 = vadd.f32 %v620_v12, %v21463_v42  ;;  %v835_v20 = vadd.f32 %v834_v59, %v21435_v30  ;;  %v690_v59 = vrot.slane %v689_v50, 2 }
  0xd5   :  { %v21637_v27 = vadd.f32 %v28126_v26, %v21449_v0  ;;  %v21641_v6 = vsel %vm495_vm0, %v478_v18, 0.0  ;;  %v21644_v53 = vsel %vm495_vm0, %v477_v1, 0.0  ;;  %v820_v0 = vadd.f32 %v819_v48, %v21438_v13 }
  0xd6   :  { %v299_v17 = vpop.permute.xlu1 %298  ;;  %v295_v16 = vpop.permute.xlu0 %294  ;;  %28128 = vst [vmem:[#allocation12_spill] sm:$0xff] %v21649_v19  ;;  %v680_v44 = vadd.f32 %v679_v36, %v678_v35  ;;  %v805_v1 = vadd.f32 %v804_v9, %v21452_v34  ;;  %v705_v55 = vadd.f32 %v21641_v6, %v21644_v53  ;;  %v790_v30 = vadd.f32 %v789_v58, %v28129_v39 }
  0xd7   :  { %v476_v42 = vmul.f32 %v422_v2, %v299_v17  ;;  %v475_v12 = vmul.f32 %v421_v45, %v295_v16  ;;  %v674_v13 = vrot.slane %v21632_v37, 1  ;;  %v21664_v36 = vadd.f32 %v663_v22, %v662_v25 }
  0xd8   :  { %v681_v48 = vrot.slane %v680_v44, 2  ;;  %v706_v35 = vrot.slane %v705_v55, 4  ;;  %v28130_v2 = vrot.slane %v21465_v29, 1  ;;  %v836_v26 = vadd.f32 %v835_v20, %v21468_v46 }
  0xd9   :  { %v21667_v56 = vsel %vm495_vm0, %v476_v42, 0.0  ;;  %v21670_v18 = vsel %vm495_vm0, %v475_v12, 0.0  ;;  %v821_v25 = vadd.f32 %v820_v0, %v21471_v4  ;;  %v806_v52 = vadd.f32 %v805_v1, %v21500_v32 }
  0xda   :  { %v332_v34 = vpop.permute.xlu1 %331  ;;  %v328_v9 = vpop.permute.xlu0 %327  ;;  %v21675_v45 = vadd.f32 %v28130_v2, %v21465_v29  ;;  %v696_v22 = vadd.f32 %v21667_v56, %v21670_v18  ;;  %v707_v58 = vadd.f32 %v706_v35, %v705_v55  ;;  %v28131_v42 = vrot.slane %v21520_v3, 1 }
  0xdb   :  { %v482_v17 = vmul.f32 %v424_v24, %v332_v34  ;;  %v481_v16 = vmul.f32 %v423_v31, %v328_v9  ;;  %v665_v29 = vrot.slane %v21664_v36, 1  ;;  %v691_v39 = vadd.f32 %v690_v59, %v689_v50  ;;  %v426_v59 = vld [vmem:[%s27941_s1 + $0xd8] sm:$0xff] }
  0xdc   :  { %v21685_v12 = vadd.f32 %v28131_v42, %v21520_v3  ;;  %v697_v2 = vrot.slane %v696_v22, 4  ;;  %v21688_v46 = vadd.f32 %v681_v48, %v680_v44  ;;  %v708_v4 = vrot.slane %v707_v58, 2  ;;  %v425_v48 = vld [vmem:[%s27941_s1 + $0xd0] sm:$0xff] }
  0xdd   :  { %v21691_v20 = vsel %vm495_vm0, %v482_v17, 0.0  ;;  %v21694_v32 = vsel %vm495_vm0, %v481_v16, 0.0  ;;  %v28133_v55 = vrot.slane %v21552_v47, 1  ;;  %v791_v35 = vadd.f32 %v790_v30, %v21503_v14 }
  0xde   :  { %28132 = vst [vmem:[#allocation13_spill] sm:$0xff] %v21685_v12  ;;  %v321_v0 = vpop.permute.xlu1 %320  ;;  %v317_v1 = vpop.permute.xlu0 %316  ;;  %v698_v50 = vadd.f32 %v697_v2, %v696_v22  ;;  %v723_v44 = vadd.f32 %v21691_v20, %v21694_v32  ;;  %v837_v34 = vadd.f32 %v836_v26, %v21529_v33  ;;  %v822_v9 = vadd.f32 %v821_v25, %v21532_v61 }
  0xdf   :  { %v21699_v3 = vadd.f32 %v28133_v55, %v21552_v47  ;;  %v480_v47 = vmul.f32 %v424_v24, %v321_v0  ;;  %v479_v17 = vmul.f32 %v423_v31, %v317_v1  ;;  %v28135_v14 = vrot.slane %v21577_v8, 1 }
  0xe0   :  { %v807_v22 = vadd.f32 %v806_v52, %v21555_v60  ;;  %v699_v16 = vrot.slane %v698_v50, 2  ;;  %v724_v42 = vrot.slane %v723_v44, 4  ;;  %v692_v2 = vrot.slane %v691_v39, 1 }
  0xe1   :  { %28134 = vst [vmem:[#allocation14_spill] sm:$0xff] %v21699_v3  ;;  %v21715_v30 = vadd.f32 %v28135_v14, %v21577_v8  ;;  %v683_v55 = vrot.slane %v21688_v46, 1  ;;  %v713_v12 = vsel %vm495_vm0, %v480_v47, 0.0  ;;  %v712_v33 = vsel %vm495_vm0, %v479_v17, 0.0 }
  0xe2   :  { %v354_v26 = vpop.permute.xlu1 %353  ;;  %v350_v61 = vpop.permute.xlu0 %349  ;;  %v28137_v24 = vrot.slane %v21579_v40, 1  ;;  %v792_v8 = vadd.f32 %v791_v35, %v21558_v23  ;;  %v725_v25 = vadd.f32 %v724_v42, %v723_v44  ;;  %v714_v60 = vadd.f32 %v713_v12, %v712_v33 }
  0xe3   :  { %28136 = vst [vmem:[#allocation15_spill] sm:$0xff] %v21715_v30  ;;  %v838_v52 = vadd.f32 %v837_v34, %v21582_v21  ;;  %v823_v0 = vadd.f32 %v822_v9, %v21585_v41  ;;  %v486_v1 = vmul.f32 %v426_v59, %v354_v26  ;;  %v485_v14 = vmul.f32 %v425_v48, %v350_v61 }
  0xe4   :  { %v21724_v31 = vadd.f32 %v28137_v24, %v21579_v40  ;;  %v709_v47 = vadd.f32 %v708_v4, %v707_v58  ;;  %v700_v30 = vadd.f32 %v699_v16, %v698_v50  ;;  %v726_v17 = vrot.slane %v725_v25, 2 }
  0xe5   :  { %v715_v3 = vrot.slane %v714_v60, 4  ;;  %v21730_v19 = vadd.f32 %v674_v13, %v21632_v37  ;;  %v808_v40 = vadd.f32 %v807_v22, %v21612_v63  ;;  %v740_v24 = vsel %vm495_vm0, %v486_v1, 0.0  ;;  %v428_v37 = vld [vmem:[%s27941_s1 + $0xe8] sm:$0xff]  ;;  %v427_v63 = vld [vmem:[%s27941_s1 + $0xe0] sm:$0xff] }
  0xe6   :  { %28138 = vst [vmem:[#allocation16_spill] sm:$0xff] %v21724_v31  ;;  %v739_v23 = vsel %vm495_vm0, %v485_v14, 0.0  ;;  %v343_v35 = vpop.permute.xlu1 %342  ;;  %v339_v44 = vpop.permute.xlu0 %338  ;;  %v21736_v21 = vadd.f32 %v665_v29, %v21664_v36  ;;  %v793_v41 = vadd.f32 %v792_v8, %v21615_v15  ;;  %v839_v58 = vadd.f32 %v838_v52, %v21641_v6 }
  0xe7   :  { %28139 = vst [vmem:[#allocation18_spill] sm:$0xff] %v21730_v19  ;;  %v716_v4 = vadd.f32 %v715_v3, %v714_v60  ;;  %v824_v13 = vadd.f32 %v823_v0, %v21644_v53  ;;  %v741_v50 = vadd.f32 %v740_v24, %v739_v23  ;;  %v484_v34 = vmul.f32 %v426_v59, %v343_v35 }
  0xe8   :  { %28140 = vst [vmem:[#allocation19_spill] sm:$0xff] %v21736_v21  ;;  %v483_v9 = vmul.f32 %v425_v48, %v339_v44  ;;  %v21747_v36 = vadd.f32 %v692_v2, %v691_v39  ;;  %v710_v29 = vrot.slane %v709_v47, 1  ;;  %v701_v15 = vrot.slane %v700_v30, 1 }
  0xe9   :  { %v727_v22 = vadd.f32 %v726_v17, %v725_v25  ;;  %v717_v6 = vrot.slane %v716_v4, 2  ;;  %v742_v3 = vrot.slane %v741_v50, 4  ;;  %v731_v16 = vsel %vm495_vm0, %v484_v34, 0.0 }
  0xea   :  { %28141 = vst [vmem:[#allocation20_spill] sm:$0xff] %v21747_v36  ;;  %v730_v42 = vsel %vm495_vm0, %v483_v9, 0.0  ;;  %v376_v26 = vpop.permute.xlu1 %375  ;;  %v372_v61 = vpop.permute.xlu0 %371  ;;  %v21752_v8 = vadd.f32 %v683_v55, %v21688_v46  ;;  %v809_v53 = vadd.f32 %v808_v40, %v21667_v56  ;;  %v794_v59 = vadd.f32 %v793_v41, %v21670_v18 }
  0xeb   :  { %v732_v39 = vadd.f32 %v731_v16, %v730_v42  ;;  %v840_v48 = vadd.f32 %v839_v58, %v21691_v20  ;;  %v743_v2 = vadd.f32 %v742_v3, %v741_v50  ;;  %v490_v25 = vmul.f32 %v428_v37, %v376_v26  ;;  %v430_v58 = vld [vmem:[%s27941_s1 + $0xf8] sm:$0xff] }
  0xec   :  { %28142 = vst [vmem:[#allocation21_spill] sm:$0xff] %v21752_v8  ;;  %v489_v60 = vmul.f32 %v427_v63, %v372_v61  ;;  %v728_v52 = vrot.slane %v727_v22, 1  ;;  %v825_v0 = vadd.f32 %v824_v13, %v21694_v32  ;;  %v810_v1 = vadd.f32 %v809_v53, %v713_v12  ;;  %v429_v12 = vld [vmem:[%s27941_s1 + $0xf0] sm:$0xff]  ;;  %s21103_s1 = smov 32  }
  0xed   :  { %v733_v14 = vrot.slane %v732_v39, 4  ;;  %v718_v17 = vadd.f32 %v717_v6, %v716_v4  ;;  %v744_v35 = vrot.slane %v743_v2, 2  ;;  %v758_v46 = vsel %vm495_vm0, %v490_v25, 0.0 }
  0xee   :  { %v757_v55 = vsel %vm495_vm0, %v489_v60, 0.0  ;;  %v365_v56 = vpop.permute.xlu1 %364  ;;  %v361_v40 = vpop.permute.xlu0 %360  ;;  %v21760_v18 = vadd.f32 %v710_v29, %v709_v47  ;;  %v795_v44 = vadd.f32 %v794_v59, %v712_v33  ;;  %v21768_v32 = vadd.f32 %v701_v15, %v700_v30 }
  0xef   :  { %v734_v20 = vadd.f32 %v733_v14, %v732_v39  ;;  %v759_v41 = vadd.f32 %v758_v46, %v757_v55  ;;  %v745_v4 = vadd.f32 %v744_v35, %v743_v2  ;;  %v488_v13 = vmul.f32 %v428_v37, %v365_v56 }
  0xf0   :  { %28143 = vst [vmem:[#allocation22_spill] sm:$0xff] %v21760_v18  ;;  %28144 = vst [vmem:[#allocation23_spill] sm:$0xff] %v21768_v32  ;;  %v487_v50 = vmul.f32 %v427_v63, %v361_v40  ;;  %v841_v34 = vadd.f32 %v840_v48, %v740_v24  ;;  %v826_v9 = vadd.f32 %v825_v0, %v739_v23  ;;  %v719_v33 = vrot.slane %v718_v17, 1 }
  0xf1   :  { %v735_v47 = vrot.slane %v734_v20, 2  ;;  %v760_v29 = vrot.slane %v759_v41, 4  ;;  %v746_v6 = vrot.slane %v745_v4, 1  ;;  %v749_v3 = vsel %vm495_vm0, %v488_v13, 0.0 }
  0xf2   :  { %v748_v26 = vsel %vm495_vm0, %v487_v50, 0.0  ;;  %v398_v61 = vpop.permute.xlu1 %397  ;;  %v394_v53 = vpop.permute.xlu0 %393  ;;  %v21772_v59 = vadd.f32 %v728_v52, %v727_v22  ;;  %v811_v2 = vadd.f32 %v810_v1, %v731_v16  ;;  %v796_v37 = vadd.f32 %v795_v44, %v730_v42 }
  0xf3   :  { %v736_v39 = vadd.f32 %v735_v47, %v734_v20  ;;  %v761_v30 = vadd.f32 %v760_v29, %v759_v41  ;;  %v750_v15 = vadd.f32 %v749_v3, %v748_v26  ;;  %v494_v63 = vmul.f32 %v430_v58, %v398_v61 }
  0xf4   :  { %28145 = vst [vmem:[#allocation24_spill] sm:$0xff] %v21772_v59  ;;  %v493_v24 = vmul.f32 %v429_v12, %v394_v53  ;;  %v842_v48 = vadd.f32 %v841_v34, %v758_v46  ;;  %v21774_v0 = vadd.f32 %v719_v33, %v718_v17  ;;  %v827_v14 = vadd.f32 %v826_v9, %v757_v55 }
  0xf5   :  { %v737_v23 = vrot.slane %v736_v39, 1  ;;  %v762_v25 = vrot.slane %v761_v30, 2  ;;  %v751_v60 = vrot.slane %v750_v15, 4  ;;  %v776_v35 = vsel %vm495_vm0, %v494_v63, 0.0 }
  0xf6   :  { %28146 = vst [vmem:[#allocation25_spill] sm:$0xff] %v21774_v0  ;;  %v775_v56 = vsel %vm495_vm0, %v493_v24, 0.0  ;;  %v387_v22 = vpop.permute.xlu1 %386  ;;  %v383_v52 = vpop.permute.xlu0 %382  ;;  %v21778_v40 = vadd.f32 %v746_v6, %v745_v4  ;;  %v812_v20 = vadd.f32 %v811_v2, %v749_v3  ;;  %v21780_v42 = vadd.f32 %v842_v48, %v776_v35 }
  0xf7   :  { %v752_v16 = vadd.f32 %v751_v60, %v750_v15  ;;  %v777_v1 = vadd.f32 %v776_v35, %v775_v56  ;;  %v21782_v44 = vadd.f32 %v827_v14, %v775_v56  ;;  %v492_v46 = vmul.f32 %v430_v58, %v387_v22 }
  0xf8   :  { %28147 = vst [vmem:[#allocation26_spill] sm:$0xff] %v21778_v40  ;;  %v491_v41 = vmul.f32 %v429_v12, %v383_v52  ;;  %v763_v17 = vadd.f32 %v762_v25, %v761_v30  ;;  %v797_v55 = vadd.f32 %v796_v37, %v748_v26  ;;  %v6354_v50 = vadd.f32 %v21780_v42, %v21508_v54 }
  0xf9   :  { %v753_v13 = vrot.slane %v752_v16, 2  ;;  %v778_v34 = vrot.slane %v777_v1, 4  ;;  %v767_v9 = vsel %vm495_vm0, %v492_v46, 0.0  ;;  %v845_v47 = vadd.f32 %v21782_v44, %v21508_v54 }
  0xfa   :  { %v766_v4 = vsel %vm495_vm0, %v491_v41, 0.0  ;;  %v21790_v29 = vadd.f32 %v737_v23, %v736_v39  ;;  %v21792_v6 = vadd.f32 %v812_v20, %v767_v9  ;;  %v764_v61 = vrot.slane %v763_v17, 1 }
  0xfb   :  { %v754_v33 = vadd.f32 %v753_v13, %v752_v16  ;;  %v768_v58 = vadd.f32 %v767_v9, %v766_v4  ;;  %v779_v12 = vadd.f32 %v778_v34, %v777_v1  ;;  %v21794_v3 = vadd.f32 %v797_v55, %v766_v4 }
  0xfc   :  { %28148 = vst [vmem:[#allocation27_spill] sm:$0xff] %v21790_v29  ;;  %vm877_vm1 = vcmp.ge.f32.partialorder %v845_v47, 0.0  ;;  %v909_v26 = vmul.f32 0.33, %v845_v47  ;;  %v6353_v30 = vadd.f32 %v21792_v6, %v21517_v11  ;;  %vm6386_vm2 = vcmp.ge.f32.partialorder %v6354_v50, 0.0 }
  0xfd   :  { %v769_v53 = vrot.slane %v768_v58, 4  ;;  %v780_v15 = vrot.slane %v779_v12, 2  ;;  %v844_v54 = vadd.f32 %v21794_v3, %v21517_v11  ;;  %v6418_v2 = vmul.f32 0.33, %v6354_v50 }
  0xfe   :  { %v941_v39 = vsel %vm877_vm1, %v845_v47, %v909_v26  ;;  %v755_v37 = vrot.slane %v754_v33, 1  ;;  %vm6385_vm3 = vcmp.ge.f32.partialorder %v6353_v30, 0.0  ;;  %v6417_v25 = vmul.f32 0.33, %v6353_v30  ;;  %v28151_v26 = vld [vmem:[#allocation17_spill] sm:$0xff] }
  0xff   :  { %v770_v63 = vadd.f32 %v769_v53, %v768_v58  ;;  %v973_v24 = vpack.c.bf16 %v941_v39, %v941_v39  ;;  %v781_v23 = vadd.f32 %v780_v15, %v779_v12  ;;  %vm876_vm4 = vcmp.ge.f32.partialorder %v844_v54, 0.0 }
 0x100   :  { %v908_v48 = vmul.f32 0.33, %v844_v54  ;;  %v6450_v35 = vsel %vm6386_vm2, %v6354_v50, %v6418_v2  ;;  %v21805_v56 = vadd.f32 %v21780_v42, %v21495_v5  ;;  %v6449_v52 = vsel %vm6385_vm3, %v6353_v30, %v6417_v25 }
 0x101   :  { %v771_v60 = vrot.slane %v770_v63, 2  ;;  %v21801_v14 = vrot.slane %v973_v24, %v21460_v43  ;;  %v782_v11 = vrot.slane %v781_v23, 1  ;;  %v6482_v20 = vpack.c.bf16 %v6450_v35, %v6450_v35 }
 0x102   :  { %v940_v22 = vsel %vm876_vm4, %v844_v54, %v908_v48  ;;  %v6481_v41 = vpack.c.bf16 %v6449_v52, %v6449_v52  ;;  %v21809_v13 = vadd.f32 %v764_v61, %v763_v17  ;;  %v21811_v55 = vadd.f32 %v755_v37, %v754_v33 }
 0x103   :  { %v772_v16 = vadd.f32 %v771_v60, %v770_v63  ;;  %v972_v1 = vpack.c.bf16 %v940_v22, %v940_v22  ;;  %v1063_v46 = vrot.slane %v21801_v14, %v21460_v43  ;;  %v783_v34 = vadd.f32 %v782_v11, %v781_v23 }
 0x104   :  { %28149 = vst [vmem:[#allocation28_spill] sm:$0xff] %v21809_v13  ;;  %28150 = vst [vmem:[#allocation29_spill] sm:$0xff] %v21811_v55  ;;  %v21814_v50 = vrot.slane %v6482_v20, %v21460_v43  ;;  %v21821_v58 = vadd.f32 %v21794_v3, %v21525_v38  ;;  %v2615_v61 = vcombine.high %v21801_v14, %v21801_v14  ;;  %vm6388_vm13 = vcmp.ge.f32.partialorder %v21805_v56, 0.0 }
 0x105   :  { %v773_v9 = vrot.slane %v772_v16, 1  ;;  %v21817_v4 = vrot.slane %v972_v1, %v21460_v43  ;;  %v4018_v47 = vcombine.high %v1063_v46, %v1063_v46  ;;  %v875_v12 = vadd.f32 %v21782_v44, %v783_v34 }
 0x106   :  { %v6384_v17 = vadd.f32 %v21780_v42, %v783_v34  ;;  %v1504_v33 = vrot.slane %v1063_v46, %v28151_v26  ;;  %v21831_v15 = vrot.slane %v6481_v41, %v21460_v43  ;;  %v6572_v54 = vrot.slane %v21814_v50, %v21460_v43 }
 0x107   :  { %v774_v53 = vadd.f32 %v773_v9, %v772_v16  ;;  %v1049_v30 = vrot.slane %v21817_v4, %v21460_v43  ;;  %vm907_vm5 = vcmp.ge.f32.partialorder %v875_v12, 0.0  ;;  %v939_v39 = vmul.f32 0.33, %v875_v12 }
 0x108   :  { %vm6416_vm6 = vcmp.ge.f32.partialorder %v6384_v17, 0.0  ;;  %v6448_v2 = vmul.f32 0.33, %v6384_v17  ;;  %v4069_v23 = vrot.slane %v4018_v47, %v28151_v26  ;;  %v21840_v60 = vrot.slane %v1504_v33, %v28151_v26 }
 0x109   :  { %v874_v37 = vadd.f32 %v21794_v3, %v774_v53  ;;  %v6383_v63 = vadd.f32 %v21792_v6, %v774_v53  ;;  %v1490_v24 = vrot.slane %v1049_v30, %v28151_v26  ;;  %v971_v48 = vsel %vm907_vm5, %v875_v12, %v939_v39 }
 0x10a   :  { %v6480_v25 = vsel %vm6416_vm6, %v6384_v17, %v6448_v2  ;;  %v4017_v35 = vcombine.high %v1049_v30, %v1049_v30  ;;  %v1003_v11 = vpack.c.bf16 %v971_v48, %v971_v48  ;;  %v4076_v9 = vrot.slane %v4069_v23, %v28151_v26 }
 0x10b   :  { %v6512_v22 = vpack.c.bf16 %v6480_v25, %v6480_v25  ;;  %vm906_vm8 = vcmp.ge.f32.partialorder %v874_v37, 0.0  ;;  %v938_v52 = vmul.f32 0.33, %v874_v37  ;;  %vm6415_vm9 = vcmp.ge.f32.partialorder %v6383_v63, 0.0 }
 0x10c   :  { %v6447_v20 = vmul.f32 0.33, %v6383_v63  ;;  %v21843_v16 = vrot.slane %v1490_v24, %v28151_v26  ;;  %v4055_v1 = vrot.slane %v4017_v35, %v28151_v26  ;;  %v21847_v46 = vrot.slane %v1003_v11, %v21460_v43 }
 0x10d   :  { %v21850_v41 = vrot.slane %v6512_v22, %v21460_v43  ;;  %v970_v34 = vsel %vm906_vm8, %v874_v37, %v938_v52  ;;  %v27964_v30 = vunpack.c.l.b16 %v21840_v60  ;;  %v6558_v39 = vrot.slane %v21831_v15, %v21460_v43 }
 0x10e   :  { %28152 = vst [vmem:[#allocation17_spill] sm:$0xff] %v21847_v46  ;;  %v1002_v47 = vpack.c.bf16 %v970_v34, %v970_v34  ;;  %v6479_v12 = vsel %vm6415_vm9, %v6383_v63, %v6447_v20  ;;  %v27961_v17 = vunpack.c.l.b16 %v21843_v16  ;;  %v4062_v33 = vrot.slane %v4055_v1, %v28151_v26 }
 0x10f   :  { %28153 = vst [vmem:[#allocation30_spill] sm:$0xff] %v21850_v41  ;;  %v6511_v53 = vpack.c.bf16 %v6479_v12, %v6479_v12  ;;  %v21860_v2 = vadd.f32 %v21782_v44, %v21495_v5  ;;  %v7013_v23 = vrot.slane %v6572_v54, %v28151_v26  ;;  %v21870_v48 = vunpack.c.l.b16 %v4076_v9 }
 0x110   :  { %v21863_v37 = vrot.slane %v1002_v47, %v21460_v43  ;;  %v2270_v63 = vrot.slane %v27961_v17, 1  ;;  %v21867_v24 = vunpack.c.l.b16 %v4062_v33  ;;  %v6999_v25 = vrot.slane %v6558_v39, %v28151_v26 }
 0x111   :  { %v9521_v35 = vcombine.high %v6558_v39, %v6558_v39  ;;  %v9522_v11 = vcombine.high %v6572_v54, %v6572_v54  ;;  %v21886_v34 = vrot.slane %v6511_v53, %v21460_v43  ;;  %v21894_v12 = vrot.slane %v7013_v23, %v28151_v26 }
 0x112   :  { %28154 = vst [vmem:[#allocation31_spill] sm:$0xff] %v21863_v37  ;;  %v2271_v52 = vsel %vm1965_vm7, %v27964_v30, %v2270_v63  ;;  %v4833_v20 = vrot.slane %v21867_v24, 1  ;;  %v21883_v1 = vrot.slane %v21863_v37, %v21460_v43  ;;  %v21889_v9 = vrot.slane %v6999_v25, %v28151_v26 }
 0x113   :  { %28156 = vst [vmem:[#allocation33_spill] sm:$0xff] %v21886_v34  ;;  %v2302_v54 = vpack.c.b16 %v2271_v52, %v2271_v52  ;;  %v9559_v33 = vrot.slane %v9521_v35, %v28151_v26  ;;  %v9573_v39 = vrot.slane %v9522_v11, %v28151_v26  ;;  %v2607_v52 = vcombine.high %v21817_v4, %v21817_v4 }
 0x114   :  { %28155 = vst [vmem:[#allocation32_spill] sm:$0xff] %v21883_v1  ;;  %v4834_v47 = vsel %vm1965_vm7, %v21870_v48, %v4833_v20  ;;  %v27962_v53 = vunpack.c.l.b16 %v21889_v9  ;;  %v27963_v25 = vunpack.c.l.b16 %v21894_v12  ;;  %v2622_v23 = vrot.slane %v2615_v61, %v21460_v43 }
 0x115   :  { %v2324_v63 = vrot.slane %v2302_v54, %v21460_v43  ;;  %v4865_v22 = vpack.c.b16 %v4834_v47, %v4834_v47  ;;  %v9566_v5 = vrot.slane %v9559_v33, %v28151_v26  ;;  %v9580_v20 = vrot.slane %v9573_v39, %v28151_v26 }
 0x116   :  { %v7777_v54 = vrot.slane %v27962_v53, 1  ;;  %v2614_v4 = vrot.slane %v2607_v52, %v21460_v43  ;;  %v2883_v33 = vrot.slane %v2622_v23, %v28151_v26  ;;  %v5170_v39 = vcombine.high %v2622_v23, %v2622_v23 }
 0x117   :  { %v2331_v35 = vrot.slane %v2324_v63, %v21460_v43  ;;  %v4887_v11 = vrot.slane %v4865_v22, %v21460_v43  ;;  %v21914_v47 = vunpack.c.l.b16 %v9566_v5  ;;  %v21916_v17 = vunpack.c.l.b16 %v9580_v20 }
 0x118   :  { %v7778_v61 = vsel %vm1965_vm7, %v27963_v25, %v7777_v54  ;;  %v2869_v22 = vrot.slane %v2614_v4, %v28151_v26  ;;  %v5169_v63 = vcombine.high %v2614_v4, %v2614_v4  ;;  %v2890_v20 = vrot.slane %v2883_v33, %v28151_v26 }
 0x119   :  { %2542 = vrot.lane.b32.xlu0 %v2331_v35, %s21103_s1  ;;  %v4894_v14 = vrot.slane %v4887_v11, %v21460_v43  ;;  %v7809_v52 = vpack.c.b16 %v7778_v61, %v7778_v61  ;;  %v10337_v5 = vrot.slane %v21914_v47, 1  ;;  %v5221_v53 = vrot.slane %v5170_v39, %v28151_v26 }
 0x11a   :  { %v2876_v23 = vrot.slane %v2869_v22, %v28151_v26  ;;  %v5207_v35 = vrot.slane %v5169_v63, %v28151_v26  ;;  %v8113_v11 = vcombine.high %v21831_v15, %v21831_v15  ;;  %v8121_v54 = vcombine.high %v21814_v50, %v21814_v50 }
 0x11b   :  { %5105 = vrot.lane.b32.xlu1 %v4894_v14, %s21103_s1  ;;  %v7831_v4 = vrot.slane %v7809_v52, %v21460_v43  ;;  %v10338_v61 = vsel %vm1965_vm7, %v21916_v17, %v10337_v5  ;;  %v3312_v33 = vunpack.c.l.b16 %v2890_v20  ;;  %v5228_v39 = vrot.slane %v5221_v53, %v28151_v26 }
 0x11c   :  { %v10369_v25 = vpack.c.b16 %v10338_v61, %v10338_v61  ;;  %v3311_v14 = vunpack.c.l.b16 %v2876_v23  ;;  %v5214_v22 = vrot.slane %v5207_v35, %v28151_v26  ;;  %v8120_v63 = vrot.slane %v8113_v11, %v21460_v43 }
 0x11d   :  { %v7838_v30 = vrot.slane %v7831_v4, %v21460_v43  ;;  %v3343_v15 = vrot.slane %v3312_v33, 7  ;;  %v5650_v41 = vunpack.c.l.b16 %v5228_v39  ;;  %v8128_v50 = vrot.slane %v8121_v54, %v21460_v43 }
 0x11e   :  { %v10391_v52 = vrot.slane %v10369_v25, %v21460_v43  ;;  %v5649_v1 = vunpack.c.l.b16 %v5214_v22  ;;  %v8375_v5 = vrot.slane %v8120_v63, %v28151_v26  ;;  %v10673_v20 = vcombine.high %v8120_v63, %v8120_v63 }
 0x11f   :  { %8049 = vrot.lane.b32.xlu0 %v7838_v30, %s21103_s1  ;;  %v3344_v53 = vsel %vm1965_vm7, %v3343_v15, %v3311_v14  ;;  %v5681_v23 = vrot.slane %v5650_v41, 7  ;;  %v8389_v35 = vrot.slane %v8128_v50, %v28151_v26  ;;  %v10674_v11 = vcombine.high %v8128_v50, %v8128_v50 }
 0x120   :  { %v10398_v4 = vrot.slane %v10391_v52, %v21460_v43  ;;  %v3375_v61 = vpack.c.b16 %v3344_v53, %v3344_v53  ;;  %v8382_v39 = vrot.slane %v8375_v5, %v28151_v26  ;;  %v10711_v54 = vrot.slane %v10673_v20, %v28151_v26 }
 0x121   :  { %v5682_v25 = vsel %vm1965_vm7, %v5681_v23, %v5649_v1  ;;  %v8396_v22 = vrot.slane %v8389_v35, %v28151_v26  ;;  %v10725_v63 = vrot.slane %v10674_v11, %v28151_v26  ;;  %v3680_v30 = vrot.slane %v3311_v14, 1 }
 0x122   :  { %10609 = vrot.lane.b32.xlu1 %v10398_v4, %s21103_s1  ;;  %v3397_v15 = vrot.slane %v3375_v61, %v21460_v43  ;;  %v5713_v46 = vpack.c.b16 %v5682_v25, %v5682_v25  ;;  %v8817_v50 = vunpack.c.l.b16 %v8382_v39  ;;  %v10718_v52 = vrot.slane %v10711_v54, %v28151_v26 }
 0x123   :  { %v8818_v53 = vunpack.c.l.b16 %v8396_v22  ;;  %v10732_v5 = vrot.slane %v10725_v63, %v28151_v26  ;;  %v3681_v20 = vsel %vm1965_vm7, %v3312_v33, %v3680_v30  ;;  %v6017_v13 = vrot.slane %v5649_v1, 1 }
 0x124   :  { %v3404_v23 = vrot.slane %v3397_v15, %v21460_v43  ;;  %v5735_v35 = vrot.slane %v5713_v46, %v21460_v43  ;;  %v11153_v11 = vunpack.c.l.b16 %v10718_v52  ;;  %v3712_v14 = vpack.c.b16 %v3681_v20, %v3681_v20 }
 0x125   :  { %v8849_v55 = vrot.slane %v8818_v53, 7  ;;  %v11154_v4 = vunpack.c.l.b16 %v10732_v5  ;;  %v6018_v61 = vsel %vm1965_vm7, %v5650_v41, %v6017_v13  ;;  %v9185_v25 = vrot.slane %v8817_v50, 1 }
 0x126   :  { %3615 = vrot.lane.b32.xlu0 %v3404_v23, %s21104_s10  ;;  %v5742_v33 = vrot.slane %v5735_v35, %v21460_v43  ;;  %v6049_v1 = vpack.c.b16 %v6018_v61, %v6018_v61  ;;  %v11521_v54 = vrot.slane %v11153_v11, 1  ;;  %vm878_vm10 = vcmp.ge.f32.partialorder %v21821_v58, 0.0 }
 0x127   :  { %v8850_v22 = vsel %vm1965_vm7, %v8849_v55, %v8817_v50  ;;  %v11185_v46 = vrot.slane %v11154_v4, 7  ;;  %v9186_v63 = vsel %vm1965_vm7, %v8818_v53, %v9185_v25  ;;  %v21971_v13 = vrot.slane %v21886_v34, %v21460_v43 }
 0x128   :  { %5953 = vrot.lane.b32.xlu1 %v5742_v33, %s21104_s10  ;;  %v8881_v41 = vpack.c.b16 %v8850_v22, %v8850_v22  ;;  %v3734_v30 = vrot.slane %v3712_v14, %v21460_v43  ;;  %v9217_v15 = vpack.c.b16 %v9186_v63, %v9186_v63  ;;  %v11522_v5 = vsel %vm1965_vm7, %v11154_v4, %v11521_v54 }
 0x129   :  { %28157 = vst [vmem:[#allocation34_spill] sm:$0xff] %v21971_v13  ;;  %v11186_v52 = vsel %vm1965_vm7, %v11185_v46, %v11153_v11  ;;  %vm879_vm11 = vcmp.ge.f32.partialorder %v21860_v2, 0.0  ;;  %v910_v55 = vmul.f32 0.33, %v21821_v58  ;;  %v6071_v20 = vrot.slane %v6049_v1, %v21460_v43 }
 0x12a   :  { %v8903_v50 = vrot.slane %v8881_v41, %v21460_v43  ;;  %v11217_v53 = vpack.c.b16 %v11186_v52, %v11186_v52  ;;  %v9239_v23 = vrot.slane %v9217_v15, %v21460_v43  ;;  %v11553_v35 = vpack.c.b16 %v11522_v5, %v11522_v5 }
 0x12b   :  { %v911_v61 = vmul.f32 0.33, %v21860_v2  ;;  %v942_v11 = vsel %vm878_vm10, %v21821_v58, %v910_v55  ;;  %v6355_v14 = vadd.f32 %v21792_v6, %v21525_v38  ;;  %v3741_v33 = vrot.slane %v3734_v30, %v21460_v43 }
 0x12c   :  { %v8910_v4 = vrot.slane %v8903_v50, %v21460_v43  ;;  %v11239_v25 = vrot.slane %v11217_v53, %v21460_v43  ;;  %v974_v54 = vpack.c.bf16 %v942_v11, %v942_v11  ;;  %v11575_v1 = vrot.slane %v11553_v35, %v21460_v43 }
 0x12d   :  { %v943_v22 = vsel %vm879_vm11, %v21860_v2, %v911_v61  ;;  %vm6387_vm12 = vcmp.ge.f32.partialorder %v6355_v14, 0.0  ;;  %v6419_v63 = vmul.f32 0.33, %v6355_v14  ;;  %v6078_v41 = vrot.slane %v6071_v20, %v21460_v43 }
 0x12e   :  { %9121 = vrot.lane.b32.xlu0 %v8910_v4, %s21104_s10  ;;  %v11246_v58 = vrot.slane %v11239_v25, %v21460_v43  ;;  %v975_v46 = vpack.c.bf16 %v943_v22, %v943_v22  ;;  %v1070_v38 = vrot.slane %v974_v54, %v21460_v43  ;;  %v9246_v30 = vrot.slane %v9239_v23, %v21460_v43 }
 0x12f   :  { %v6420_v15 = vmul.f32 0.33, %v21805_v56  ;;  %v22002_v2 = vadd.f32 %v21794_v3, %v21563_v10  ;;  %v6451_v55 = vsel %vm6387_vm12, %v6355_v14, %v6419_v63  ;;  %v11582_v53 = vrot.slane %v11575_v1, %v21460_v43 }
 0x130   :  { %11457 = vrot.lane.b32.xlu1 %v11246_v58, %s21104_s10  ;;  %v1077_v52 = vrot.slane %v1070_v38, %v21460_v43  ;;  %v1084_v5 = vrot.slane %v975_v46, %v21460_v43  ;;  %v2623_v50 = vcombine.high %v1070_v38, %v1070_v38  ;;  %v6483_v23 = vpack.c.bf16 %v6451_v55, %v6451_v55 }
 0x131   :  { %v6452_v20 = vsel %vm6388_vm13, %v21805_v56, %v6420_v15  ;;  %v22013_v35 = vadd.f32 %v21782_v44, %v21537_v7  ;;  %v22023_v1 = vmul.f32 0.33, %v22002_v2  ;;  %vm880_vm14 = vcmp.ge.f32.partialorder %v22002_v2, 0.0 }
 0x132   :  { %3952 = vrot.lane.b32.xlu0 %v3741_v33, %s21105_s11  ;;  %v1091_v61 = vrot.slane %v1084_v5, %v21460_v43  ;;  %v1518_v11 = vrot.slane %v1077_v52, %v28151_v26  ;;  %v4019_v14 = vcombine.high %v1077_v52, %v1077_v52  ;;  %v6484_v4 = vpack.c.bf16 %v6452_v20, %v6452_v20 }
 0x133   :  { %v22019_v25 = vrot.slane %v6483_v23, %v21460_v43  ;;  %v2630_v54 = vrot.slane %v2623_v50, %v21460_v43  ;;  %v2631_v56 = vcombine.high %v1084_v5, %v1084_v5  ;;  %vm881_vm15 = vcmp.ge.f32.partialorder %v22013_v35, 0.0 }
 0x134   :  { %6289 = vrot.lane.b32.xlu1 %v6078_v41, %s21105_s11  ;;  %v22027_v22 = vrot.slane %v1518_v11, %v28151_v26  ;;  %v1532_v33 = vrot.slane %v1091_v61, %v28151_v26  ;;  %v4020_v58 = vcombine.high %v1091_v61, %v1091_v61  ;;  %v4083_v46 = vrot.slane %v4019_v14, %v28151_v26 }
 0x135   :  { %v6586_v38 = vrot.slane %v22019_v25, %v21460_v43  ;;  %v22034_v63 = vrot.slane %v6484_v4, %v21460_v43  ;;  %v2638_v15 = vrot.slane %v2631_v56, %v21460_v43  ;;  %v2897_v52 = vrot.slane %v2630_v54, %v28151_v26 }
 0x136   :  { %9457 = vrot.lane.b32.xlu0 %v9246_v30, %s21105_s11  ;;  %v22040_v41 = vrot.slane %v1532_v33, %v28151_v26  ;;  %v27972_v5 = vunpack.c.l.b16 %v22027_v22  ;;  %v4090_v55 = vrot.slane %v4083_v46, %v28151_v26  ;;  %v4097_v50 = vrot.slane %v4020_v58, %v28151_v26 }
 0x137   :  { %v6600_v20 = vrot.slane %v22034_v63, %v21460_v43  ;;  %v7027_v23 = vrot.slane %v6586_v38, %v28151_v26  ;;  %v9523_v61 = vcombine.high %v6586_v38, %v6586_v38  ;;  %v2904_v11 = vrot.slane %v2897_v52, %v28151_v26 }
 0x138   :  { %11793 = vrot.lane.b32.xlu1 %v11582_v53, %s21105_s11  ;;  %v27975_v30 = vunpack.c.l.b16 %v22040_v41  ;;  %v2272_v14 = vrot.slane %v27972_v5, 1  ;;  %v4104_v4 = vrot.slane %v4097_v50, %v28151_v26  ;;  %v22054_v56 = vunpack.c.l.b16 %v4090_v55 }
 0x139   :  { %v22057_v33 = vrot.slane %v7027_v23, %v28151_v26  ;;  %v7041_v58 = vrot.slane %v6600_v20, %v28151_v26  ;;  %v9524_v46 = vcombine.high %v6600_v20, %v6600_v20  ;;  %v9587_v38 = vrot.slane %v9523_v61, %v28151_v26 }
 0x13a   :  { %v2273_v53 = vsel %vm1965_vm7, %v27975_v30, %v2272_v14  ;;  %v22064_v52 = vunpack.c.l.b16 %v4104_v4  ;;  %v4835_v39 = vrot.slane %v22054_v56, 1  ;;  %v2911_v50 = vrot.slane %v2638_v15, %v28151_v26 }
 0x13b   :  { %v2303_v55 = vpack.c.b16 %v2273_v53, %v2273_v53  ;;  %v22069_v5 = vrot.slane %v7041_v58, %v28151_v26  ;;  %v27980_v23 = vunpack.c.l.b16 %v22057_v33  ;;  %v9594_v20 = vrot.slane %v9587_v38, %v28151_v26 }
 0x13c   :  { %v4836_v61 = vsel %vm1965_vm7, %v22064_v52, %v4835_v39  ;;  %v9601_v37 = vrot.slane %v9524_v46, %v28151_v26  ;;  %v2918_v14 = vrot.slane %v2911_v50, %v28151_v26  ;;  %v3313_v4 = vunpack.c.l.b16 %v2904_v11 }
 0x13d   :  { %v2338_v30 = vrot.slane %v2303_v55, %v21460_v43  ;;  %v4866_v34 = vpack.c.b16 %v4836_v61, %v4836_v61  ;;  %v27982_v53 = vunpack.c.l.b16 %v22069_v5  ;;  %v7779_v58 = vrot.slane %v27980_v23, 1 }
 0x13e   :  { %v9608_v13 = vrot.slane %v9601_v37, %v28151_v26  ;;  %v22082_v40 = vunpack.c.l.b16 %v9594_v20  ;;  %v3314_v38 = vunpack.c.l.b16 %v2918_v14  ;;  %v5171_v29 = vcombine.high %v2630_v54, %v2630_v54 }
 0x13f   :  { %v2345_v39 = vrot.slane %v2338_v30, %v21460_v43  ;;  %v4901_v46 = vrot.slane %v4866_v34, %v21460_v43  ;;  %v7780_v11 = vsel %vm1965_vm7, %v27982_v53, %v7779_v58  ;;  %v5172_v50 = vcombine.high %v2638_v15, %v2638_v15 }
 0x140   :  { %v7810_v55 = vpack.c.b16 %v7780_v11, %v7780_v11  ;;  %v22089_v61 = vunpack.c.l.b16 %v9608_v13  ;;  %v10339_v23 = vrot.slane %v22082_v40, 1  ;;  %v3345_v59 = vrot.slane %v3314_v38, 7 }
 0x141   :  { %2544 = vrot.lane.b32.xlu0 %v2345_v39, %s21103_s1  ;;  %v4908_v37 = vrot.slane %v4901_v46, %v21460_v43  ;;  %v5235_v54 = vrot.slane %v5171_v29, %v28151_v26  ;;  %v5249_v34 = vrot.slane %v5172_v50, %v28151_v26  ;;  %v8129_v30 = vcombine.high %v22019_v25, %v22019_v25 }
 0x142   :  { %v7845_v15 = vrot.slane %v7810_v55, %v21460_v43  ;;  %v10340_v13 = vsel %vm1965_vm7, %v22089_v61, %v10339_v23  ;;  %v3346_v20 = vsel %vm1965_vm7, %v3345_v59, %v3313_v4  ;;  %v8137_v14 = vcombine.high %v22034_v63, %v22034_v63 }
 0x143   :  { %5107 = vrot.lane.b32.xlu1 %v4908_v37, %s21103_s1  ;;  %v10370_v29 = vpack.c.b16 %v10340_v13, %v10340_v13  ;;  %v3376_v58 = vpack.c.b16 %v3346_v20, %v3346_v20  ;;  %v5242_v39 = vrot.slane %v5235_v54, %v28151_v26  ;;  %v5256_v25 = vrot.slane %v5249_v34, %v28151_v26 }
 0x144   :  { %v7852_v46 = vrot.slane %v7845_v15, %v21460_v43  ;;  %v8136_v11 = vrot.slane %v8129_v30, %v21460_v43  ;;  %v8144_v23 = vrot.slane %v8137_v14, %v21460_v43  ;;  %v3682_v59 = vrot.slane %v3313_v4, 1 }
 0x145   :  { %v10405_v50 = vrot.slane %v10370_v29, %v21460_v43  ;;  %v3411_v63 = vrot.slane %v3376_v58, %v21460_v43  ;;  %v5651_v55 = vunpack.c.l.b16 %v5242_v39  ;;  %v5652_v53 = vunpack.c.l.b16 %v5256_v25 }
 0x146   :  { %8051 = vrot.lane.b32.xlu0 %v7852_v46, %s21103_s1  ;;  %v8403_v37 = vrot.slane %v8136_v11, %v28151_v26  ;;  %v8417_v54 = vrot.slane %v8144_v23, %v28151_v26  ;;  %v10675_v34 = vcombine.high %v8136_v11, %v8136_v11  ;;  %v10676_v13 = vcombine.high %v8144_v23, %v8144_v23 }
 0x147   :  { %v10412_v15 = vrot.slane %v10405_v50, %v21460_v43  ;;  %v3418_v30 = vrot.slane %v3411_v63, %v21460_v43  ;;  %v5683_v20 = vrot.slane %v5652_v53, 7  ;;  %v3683_v4 = vsel %vm1965_vm7, %v3314_v38, %v3682_v59 }
 0x148   :  { %v8410_v14 = vrot.slane %v8403_v37, %v28151_v26  ;;  %v8424_v29 = vrot.slane %v8417_v54, %v28151_v26  ;;  %v10739_v58 = vrot.slane %v10675_v34, %v28151_v26  ;;  %v10753_v39 = vrot.slane %v10676_v13, %v28151_v26 }
 0x149   :  { %10611 = vrot.lane.b32.xlu1 %v10412_v15, %s21103_s1  ;;  %v5684_v25 = vsel %vm1965_vm7, %v5683_v20, %v5651_v55  ;;  %v3713_v46 = vpack.c.b16 %v3683_v4, %v3683_v4  ;;  %v6019_v11 = vrot.slane %v5651_v55, 1  ;;  %v913_v23 = vmul.f32 0.33, %v22013_v35 }
 0x14a   :  { %3617 = vrot.lane.b32.xlu0 %v3418_v30, %s21104_s10  ;;  %v5714_v50 = vpack.c.b16 %v5684_v25, %v5684_v25  ;;  %v8819_v38 = vunpack.c.l.b16 %v8410_v14  ;;  %v8820_v59 = vunpack.c.l.b16 %v8424_v29  ;;  %v10746_v63 = vrot.slane %v10739_v58, %v28151_v26  ;;  %v20470_v25 = vld [vmem:[%s27942_s2 + $0x40] sm:$0xff]  }
 0x14b   :  { %v10760_v37 = vrot.slane %v10753_v39, %v28151_v26  ;;  %v22131_v54 = vrot.slane %v3713_v46, %v21460_v43  ;;  %v6020_v34 = vsel %vm1965_vm7, %v5652_v53, %v6019_v11  ;;  %v944_v55 = vsel %vm880_vm14, %v22002_v2, %v22023_v1  ;;  %v20471_v46 = vld [vmem:[%s27942_s2] sm:$0xff]   ;;  %19571 = vmatprep.subr.bf16.mxu0 %v20470_v25 }
 0x14c   :  { %v5749_v13 = vrot.slane %v5714_v50, %v21460_v43  ;;  %v8851_v15 = vrot.slane %v8820_v59, 7  ;;  %v11155_v30 = vunpack.c.l.b16 %v10746_v63  ;;  %v6050_v20 = vpack.c.b16 %v6020_v34, %v6020_v34  ;;  %19572 = vmatpush3.bf16.msra.mxu0 %v20471_v46 }
 0x14d   :  { %v11156_v4 = vunpack.c.l.b16 %v10760_v37  ;;  %v3755_v14 = vrot.slane %v22131_v54, %v21460_v43  ;;  %v9187_v29 = vrot.slane %v8819_v38, 1  ;;  %v945_v58 = vsel %vm881_vm15, %v22013_v35, %v913_v23 }
 0x14e   :  { %v5756_v53 = vrot.slane %v5749_v13, %v21460_v43  ;;  %v8852_v39 = vsel %vm1965_vm7, %v8851_v15, %v8819_v38  ;;  %v22147_v2 = vrot.slane %v6050_v20, %v21460_v43  ;;  %v11523_v1 = vrot.slane %v11155_v30, 1 }
 0x14f   :  { %v8882_v11 = vpack.c.b16 %v8852_v39, %v8852_v39  ;;  %v11187_v50 = vrot.slane %v11156_v4, 7  ;;  %v9188_v35 = vsel %vm1965_vm7, %v8820_v59, %v9187_v29  ;;  %v976_v23 = vpack.c.bf16 %v944_v55, %v944_v55  ;;  %v20472_v59 = vld [vmem:[%s27942_s2 + $0xc0] sm:$0xff]  }
 0x150   :  { %5955 = vrot.lane.b32.xlu1 %v5756_v53, %s21104_s10  ;;  %v6092_v38 = vrot.slane %v22147_v2, %v21460_v43  ;;  %v9218_v63 = vpack.c.b16 %v9188_v35, %v9188_v35  ;;  %v11524_v37 = vsel %vm1965_vm7, %v11156_v4, %v11523_v1  ;;  %v977_v54 = vpack.c.bf16 %v945_v58, %v945_v58  ;;  %v20473_v55 = vld [vmem:[%s27942_s2 + $0x80] sm:$0xff]  }
 0x151   :  { %v8917_v34 = vrot.slane %v8882_v11, %v21460_v43  ;;  %v11188_v13 = vsel %vm1965_vm7, %v11187_v50, %v11155_v30  ;;  %v11554_v15 = vpack.c.b16 %v11524_v37, %v11524_v37  ;;  %v1098_v20 = vrot.slane %v976_v23, %v21460_v43  ;;  %19593 = vmatprep.subr.bf16.mxu1 %v20472_v59 }
 0x152   :  { %v11218_v29 = vpack.c.b16 %v11188_v13, %v11188_v13  ;;  %v9253_v4 = vrot.slane %v9218_v63, %v21460_v43  ;;  %v1112_v58 = vrot.slane %v977_v54, %v21460_v43  ;;  %v6357_v30 = vadd.f32 %v21792_v6, %v21563_v10  ;;  %19594 = vmatpush3.bf16.msra.mxu1 %v20473_v55 }
 0x153   :  { %v8924_v53 = vrot.slane %v8917_v34, %v21460_v43  ;;  %v11589_v39 = vrot.slane %v11554_v15, %v21460_v43  ;;  %v1105_v2 = vrot.slane %v1098_v20, %v21460_v43  ;;  %v6358_v1 = vadd.f32 %v21780_v42, %v21537_v7 }
 0x154   :  { %v11253_v25 = vrot.slane %v11218_v29, %v21460_v43  ;;  %v9260_v11 = vrot.slane %v9253_v4, %v21460_v43  ;;  %v1119_v50 = vrot.slane %v1112_v58, %v21460_v43  ;;  %vm6389_vm0 = vcmp.ge.f32.partialorder %v6357_v30, 0.0 }
 0x155   :  { %9123 = vrot.lane.b32.xlu0 %v8924_v53, %s21104_s10  ;;  %v11596_v10 = vrot.slane %v11589_v39, %v21460_v43  ;;  %v1546_v46 = vrot.slane %v1105_v2, %v28151_v26  ;;  %v4021_v35 = vcombine.high %v1105_v2, %v1105_v2  ;;  %vm6390_vm1 = vcmp.ge.f32.partialorder %v6358_v1, 0.0 }
 0x156   :  { %v11260_v23 = vrot.slane %v11253_v25, %v21460_v43  ;;  %v1560_v7 = vrot.slane %v1119_v50, %v28151_v26  ;;  %v4022_v63 = vcombine.high %v1119_v50, %v1119_v50  ;;  %v6421_v37 = vmul.f32 0.33, %v6357_v30 }
 0x157   :  { %v22187_v54 = vrot.slane %v1546_v46, %v28151_v26  ;;  %v4111_v34 = vrot.slane %v4021_v35, %v28151_v26  ;;  %v6422_v13 = vmul.f32 0.33, %v6358_v1  ;;  %v2639_v15 = vcombine.high %v1098_v20, %v1098_v20 }
 0x158   :  { %11459 = vrot.lane.b32.xlu1 %v11260_v23, %s21104_s10  ;;  %v22192_v59 = vrot.slane %v1560_v7, %v28151_v26  ;;  %v4125_v55 = vrot.slane %v4022_v63, %v28151_v26  ;;  %v6453_v29 = vsel %vm6389_vm0, %v6357_v30, %v6421_v37  ;;  %v2647_v4 = vcombine.high %v1112_v58, %v1112_v58 }
 0x159   :  { %3954 = vrot.lane.b32.xlu0 %v3755_v14, %s21105_s11  ;;  %v27983_v53 = vunpack.c.l.b16 %v22187_v54  ;;  %v4118_v39 = vrot.slane %v4111_v34, %v28151_v26  ;;  %v6454_v2 = vsel %vm6390_vm1, %v6358_v1, %v6422_v13  ;;  %v6485_v25 = vpack.c.bf16 %v6453_v29, %v6453_v29 }
 0x15a   :  { %v27984_v20 = vunpack.c.l.b16 %v22192_v59  ;;  %v4132_v50 = vrot.slane %v4125_v55, %v28151_v26  ;;  %v6486_v46 = vpack.c.bf16 %v6454_v2, %v6454_v2  ;;  %v2646_v35 = vrot.slane %v2639_v15, %v21460_v43 }
 0x15b   :  { %v2274_v30 = vrot.slane %v27983_v53, 1  ;;  %v22205_v58 = vunpack.c.l.b16 %v4118_v39  ;;  %v22208_v14 = vrot.slane %v6485_v25, %v21460_v43  ;;  %v2654_v23 = vrot.slane %v2647_v4, %v21460_v43 }
 0x15c   :  { %6291 = vrot.lane.b32.xlu1 %v6092_v38, %s21105_s11  ;;  %v22212_v1 = vunpack.c.l.b16 %v4132_v50  ;;  %v22215_v7 = vrot.slane %v6486_v46, %v21460_v43  ;;  %v2925_v63 = vrot.slane %v2646_v35, %v28151_v26  ;;  %v5173_v37 = vcombine.high %v2646_v35, %v2646_v35 }
 0x15d   :  { %9459 = vrot.lane.b32.xlu0 %v9260_v11, %s21105_s11  ;;  %v2275_v34 = vsel %vm1965_vm7, %v27984_v20, %v2274_v30  ;;  %v4837_v13 = vrot.slane %v22205_v58, 1  ;;  %v6614_v15 = vrot.slane %v22208_v14, %v21460_v43  ;;  %v2939_v38 = vrot.slane %v2654_v23, %v28151_v26 }
 0x15e   :  { %v2304_v55 = vpack.c.b16 %v2275_v34, %v2275_v34  ;;  %v6628_v29 = vrot.slane %v22215_v7, %v21460_v43  ;;  %v2932_v4 = vrot.slane %v2925_v63, %v28151_v26  ;;  %v5174_v39 = vcombine.high %v2654_v23, %v2654_v23 }
 0x15f   :  { %v4838_v11 = vsel %vm1965_vm7, %v22212_v1, %v4837_v13  ;;  %v7055_v2 = vrot.slane %v6614_v15, %v28151_v26  ;;  %v9525_v25 = vcombine.high %v6614_v15, %v6614_v15  ;;  %v22233_v50 = vrot.slane %v2939_v38, %v28151_v26  ;;  %v20474_v15 = vld [vmem:[%s27942_s2 + $0x48] sm:$0xff]  }
 0x160   :  { %11795 = vrot.lane.b32.xlu1 %v11596_v10, %s21105_s11  ;;  %v2352_v46 = vrot.slane %v2304_v55, %v21460_v43  ;;  %v4867_v35 = vpack.c.b16 %v4838_v11, %v4838_v11  ;;  %v7069_v30 = vrot.slane %v6628_v29, %v28151_v26  ;;  %v9526_v34 = vcombine.high %v6628_v29, %v6628_v29  ;;  %v20475_v10 = vld [vmem:[%s27942_s2 + $0x8] sm:$0xff]  }
 0x161   :  { %v22239_v63 = vrot.slane %v7055_v2, %v28151_v26  ;;  %v9615_v23 = vrot.slane %v9525_v25, %v28151_v26  ;;  %v3315_v13 = vunpack.c.l.b16 %v2932_v4  ;;  %v27985_v53 = vunpack.c.l.b16 %v22233_v50  ;;  %19573 = vmatprep.subr.bf16.mxu0 %v20474_v15 }
 0x162   :  { %v2359_v38 = vrot.slane %v2352_v46, %v21460_v43  ;;  %v4915_v55 = vrot.slane %v4867_v35, %v21460_v43  ;;  %v22252_v29 = vrot.slane %v7069_v30, %v28151_v26  ;;  %v9629_v11 = vrot.slane %v9526_v34, %v28151_v26  ;;  %v20476_v46 = vld [vmem:[%s27942_s2 + $0xc8] sm:$0xff]   ;;  %19574 = vmatpush3.bf16.msra.mxu0 %v20475_v10  ;;  %v20478_v10 = vld [vmem:[%s27942_s2 + $0x50] sm:$0xff]  }
 0x163   :  { %v27988_v4 = vunpack.c.l.b16 %v22239_v63  ;;  %v9622_v2 = vrot.slane %v9615_v23, %v28151_v26  ;;  %v3347_v25 = vrot.slane %v27985_v53, 7  ;;  %v5263_v20 = vrot.slane %v5173_v37, %v28151_v26  ;;  %v20477_v35 = vld [vmem:[%s27942_s2 + $0x88] sm:$0xff]   ;;  %19595 = vmatprep.subr.bf16.mxu1 %v20476_v46  ;;  %19575 = vmatprep.subr.bf16.mxu0 %v20478_v10 }
 0x164   :  { %2546 = vrot.lane.b32.xlu0 %v2359_v38, %s21103_s1  ;;  %v4922_v30 = vrot.slane %v4915_v55, %v21460_v43  ;;  %v27989_v34 = vunpack.c.l.b16 %v22252_v29  ;;  %v9636_v23 = vrot.slane %v9629_v11, %v28151_v26  ;;  %v5277_v53 = vrot.slane %v5174_v39, %v28151_v26  ;;  %19596 = vmatpush3.bf16.msra.mxu1 %v20477_v35 }
 0x165   :  { %v7781_v37 = vrot.slane %v27988_v4, 1  ;;  %v22273_v15 = vunpack.c.l.b16 %v9622_v2  ;;  %v3348_v0 = vsel %vm1965_vm7, %v3347_v25, %v3315_v13  ;;  %v5270_v18 = vrot.slane %v5263_v20, %v28151_v26  ;;  %v20479_v20 = vld [vmem:[%s27942_s2 + $0x10] sm:$0xff]  }
 0x166   :  { %5109 = vrot.lane.b32.xlu1 %v4922_v30, %s21103_s1  ;;  %v22278_v38 = vunpack.c.l.b16 %v9636_v23  ;;  %v3377_v55 = vpack.c.b16 %v3348_v0, %v3348_v0  ;;  %v5284_v11 = vrot.slane %v5277_v53, %v28151_v26  ;;  %v8145_v39 = vcombine.high %v22208_v14, %v22208_v14  ;;  %v20480_v23 = vld [vmem:[%s27942_s2 + $0xd0] sm:$0xff]   ;;  %19576 = vmatpush3.bf16.msra.mxu0 %v20479_v20 }
 0x167   :  { %28158 = vst [vmem:[#allocation35_spill] sm:$0xff] %v22273_v15  ;;  %v7782_v2 = vsel %vm1965_vm7, %v27989_v34, %v7781_v37  ;;  %v10341_v0 = vrot.slane %v22273_v15, 1  ;;  %v5653_v25 = vunpack.c.l.b16 %v5270_v18  ;;  %v8153_v53 = vcombine.high %v22215_v7, %v22215_v7  ;;  %v20481_v37 = vld [vmem:[%s27942_s2 + $0x90] sm:$0xff]   ;;  %19597 = vmatprep.subr.bf16.mxu1 %v20480_v23  ;;  %v20482_v34 = vld [vmem:[%s27942_s2 + $0x58] sm:$0xff]  }
 0x168   :  { %28159 = vst [vmem:[#allocation36_spill] sm:$0xff] %v22278_v38  ;;  %v7811_v14 = vpack.c.b16 %v7782_v2, %v7782_v2  ;;  %v3425_v46 = vrot.slane %v3377_v55, %v21460_v43  ;;  %v5654_v35 = vunpack.c.l.b16 %v5284_v11  ;;  %v8152_v30 = vrot.slane %v8145_v39, %v21460_v43  ;;  %19598 = vmatpush3.bf16.msra.mxu1 %v20481_v37 }
 0x169   :  { %v10342_v18 = vsel %vm1965_vm7, %v22278_v38, %v10341_v0  ;;  %v8160_v7 = vrot.slane %v8153_v53, %v21460_v43  ;;  %v3684_v2 = vrot.slane %v3315_v13, 1  ;;  %v6021_v4 = vrot.slane %v5653_v25, 1  ;;  %v20483_v0 = vld [vmem:[%s27942_s2 + $0x18] sm:$0xff]   ;;  %19577 = vmatprep.subr.bf16.mxu0 %v20482_v34 }
 0x16a   :  { %v7859_v55 = vrot.slane %v7811_v14, %v21460_v43  ;;  %v10371_v11 = vpack.c.b16 %v10342_v18, %v10342_v18  ;;  %v3432_v39 = vrot.slane %v3425_v46, %v21460_v43  ;;  %v5685_v10 = vrot.slane %v5654_v35, 7  ;;  %19578 = vmatpush3.bf16.msra.mxu0 %v20483_v0  ;;  %v20485_v0 = vld [vmem:[%s27942_s2 + $0x98] sm:$0xff]  }
 0x16b   :  { %v8431_v53 = vrot.slane %v8152_v30, %v28151_v26  ;;  %v8445_v13 = vrot.slane %v8160_v7, %v28151_v26  ;;  %v10677_v20 = vcombine.high %v8152_v30, %v8152_v30  ;;  %v10678_v32 = vcombine.high %v8160_v7, %v8160_v7 }
 0x16c   :  { %v7866_v14 = vrot.slane %v7859_v55, %v21460_v43  ;;  %v10419_v46 = vrot.slane %v10371_v11, %v21460_v43  ;;  %v5686_v23 = vsel %vm1965_vm7, %v5685_v10, %v5653_v25  ;;  %v28160_v18 = vunpack.c.l.b16 %v22233_v50  ;;  %v20484_v10 = vld [vmem:[%s27942_s2 + $0xd8] sm:$0xff]  }
 0x16d   :  { %v5715_v8 = vpack.c.b16 %v5686_v23, %v5686_v23  ;;  %v8438_v19 = vrot.slane %v8431_v53, %v28151_v26  ;;  %v8452_v21 = vrot.slane %v8445_v13, %v28151_v26  ;;  %v10767_v30 = vrot.slane %v10677_v20, %v28151_v26  ;;  %19599 = vmatprep.subr.bf16.mxu1 %v20484_v10 }
 0x16e   :  { %v3685_v36 = vsel %vm1965_vm7, %v28160_v18, %v3684_v2  ;;  %8053 = vrot.lane.b32.xlu0 %v7866_v14, %s21103_s1  ;;  %v10426_v37 = vrot.slane %v10419_v46, %v21460_v43  ;;  %v10781_v7 = vrot.slane %v10678_v32, %v28151_v26  ;;  %v6022_v50 = vsel %vm1965_vm7, %v5654_v35, %v6021_v4 }
 0x16f   :  { %v3714_v25 = vpack.c.b16 %v3685_v36, %v3685_v36  ;;  %v5763_v2 = vrot.slane %v5715_v8, %v21460_v43  ;;  %v8821_v34 = vunpack.c.l.b16 %v8438_v19  ;;  %v8822_v55 = vunpack.c.l.b16 %v8452_v21  ;;  %19600 = vmatpush3.bf16.msra.mxu1 %v20485_v0 }
 0x170   :  { %v10774_v11 = vrot.slane %v10767_v30, %v28151_v26  ;;  %10613 = vrot.lane.b32.xlu1 %v10426_v37, %s21103_s1  ;;  %v10788_v36 = vrot.slane %v10781_v7, %v28151_v26  ;;  %v6051_v8 = vpack.c.b16 %v6022_v50, %v6022_v50  ;;  %v850_v19 = vadd.f32 %v21794_v3, %v21590_v57 }
 0x171   :  { %v22340_v32 = vrot.slane %v3714_v25, %v21460_v43  ;;  %v5770_v21 = vrot.slane %v5763_v2, %v21460_v43  ;;  %v8853_v4 = vrot.slane %v8822_v55, 7  ;;  %v9189_v35 = vrot.slane %v8821_v34, 1 }
 0x172   :  { %v11157_v53 = vunpack.c.l.b16 %v10774_v11  ;;  %3619 = vrot.lane.b32.xlu0 %v3432_v39, %s21104_s10  ;;  %v11158_v13 = vunpack.c.l.b16 %v10788_v36  ;;  %v22349_v14 = vrot.slane %v6051_v8, %v21460_v43  ;;  %v851_v46 = vadd.f32 %v21782_v44, %v21572_v28  ;;  %v20486_v36 = vld [vmem:[%s27942_s2 + $0x60] sm:$0xff]  }
 0x173   :  { %v3769_v20 = vrot.slane %v22340_v32, %v21460_v43  ;;  %v8854_v23 = vsel %vm1965_vm7, %v8853_v4, %v8821_v34  ;;  %v9190_v30 = vsel %vm1965_vm7, %v8822_v55, %v9189_v35  ;;  %vm882_vm2 = vcmp.ge.f32.partialorder %v850_v19, 0.0  ;;  %v20487_v32 = vld [vmem:[%s27942_s2 + $0x20] sm:$0xff]   ;;  %19579 = vmatprep.subr.bf16.mxu0 %v20486_v36 }
 0x174   :  { %v11525_v18 = vrot.slane %v11157_v53, 1  ;;  %5957 = vrot.lane.b32.xlu1 %v5770_v21, %s21104_s10  ;;  %v8883_v39 = vpack.c.b16 %v8854_v23, %v8854_v23  ;;  %v11189_v37 = vrot.slane %v11158_v13, 7  ;;  %v6106_v7 = vrot.slane %v22349_v14, %v21460_v43  ;;  %19580 = vmatpush3.bf16.msra.mxu0 %v20487_v32  ;;  %v20497_v14 = vld [vmem:[%s27942_s2 + $0xb0] sm:$0xff]  }
 0x175   :  { %v9219_v25 = vpack.c.b16 %v9190_v30, %v9190_v30  ;;  %vm883_vm3 = vcmp.ge.f32.partialorder %v851_v46, 0.0  ;;  %v914_v2 = vmul.f32 0.33, %v850_v19  ;;  %v915_v11 = vmul.f32 0.33, %v851_v46 }
 0x176   :  { %v11526_v50 = vsel %vm1965_vm7, %v11158_v13, %v11525_v18  ;;  %v8931_v10 = vrot.slane %v8883_v39, %v21460_v43  ;;  %v11190_v34 = vsel %vm1965_vm7, %v11189_v37, %v11157_v53  ;;  %v6359_v35 = vadd.f32 %v21792_v6, %v21590_v57  ;;  %v20488_v57 = vld [vmem:[%s27942_s2 + $0xe0] sm:$0xff]  }
 0x177   :  { %v22362_v55 = vrot.slane %v9219_v25, %v21460_v43  ;;  %v11555_v0 = vpack.c.b16 %v11526_v50, %v11526_v50  ;;  %v11219_v8 = vpack.c.b16 %v11190_v34, %v11190_v34  ;;  %v946_v21 = vsel %vm882_vm2, %v850_v19, %v914_v2  ;;  %v20490_v2 = vld [vmem:[%s27942_s2 + $0x68] sm:$0xff]   ;;  %19601 = vmatprep.subr.bf16.mxu1 %v20488_v57 }
 0x178   :  { %v947_v4 = vsel %vm883_vm3, %v851_v46, %v915_v11  ;;  %v8938_v53 = vrot.slane %v8931_v10, %v21460_v43  ;;  %v978_v18 = vpack.c.bf16 %v946_v21, %v946_v21  ;;  %v6360_v19 = vadd.f32 %v21780_v42, %v21572_v28  ;;  %v20489_v46 = vld [vmem:[%s27942_s2 + $0xa0] sm:$0xff]   ;;  %19581 = vmatprep.subr.bf16.mxu0 %v20490_v2 }
 0x179   :  { %v9274_v13 = vrot.slane %v22362_v55, %v21460_v43  ;;  %v22377_v23 = vrot.slane %v11555_v0, %v21460_v43  ;;  %v11267_v30 = vrot.slane %v11219_v8, %v21460_v43  ;;  %v979_v39 = vpack.c.bf16 %v947_v4, %v947_v4  ;;  %v20491_v55 = vld [vmem:[%s27942_s2 + $0x28] sm:$0xff]   ;;  %19602 = vmatpush3.bf16.msra.mxu1 %v20489_v46 }
 0x17a   :  { %vm6391_vm4 = vcmp.ge.f32.partialorder %v6359_v35, 0.0  ;;  %9125 = vrot.lane.b32.xlu0 %v8938_v53, %s21104_s10  ;;  %v1126_v25 = vrot.slane %v978_v18, %v21460_v43  ;;  %v6423_v50 = vmul.f32 0.33, %v6359_v35  ;;  %v22394_v28 = vadd.f32 %v21794_v3, %v21620_v51  ;;  %19582 = vmatpush3.bf16.msra.mxu0 %v20491_v55  ;;  %v20496_v55 = vld [vmem:[%s27942_s2 + $0xf0] sm:$0xff]  }
 0x17b   :  { %v11274_v11 = vrot.slane %v11267_v30, %v21460_v43  ;;  %v1140_v10 = vrot.slane %v979_v39, %v21460_v43  ;;  %vm6392_vm5 = vcmp.ge.f32.partialorder %v6360_v19, 0.0  ;;  %v6424_v34 = vmul.f32 0.33, %v6360_v19  ;;  %v20492_v30 = vld [vmem:[%s27942_s2 + $0xe8] sm:$0xff]  }
 0x17c   :  { %v1133_v0 = vrot.slane %v1126_v25, %v21460_v43  ;;  %v6455_v36 = vsel %vm6391_vm4, %v6359_v35, %v6423_v50  ;;  %v2655_v32 = vcombine.high %v1126_v25, %v1126_v25  ;;  %v22408_v8 = vadd.f32 %v21782_v44, %v21605_v49  ;;  %v20493_v35 = vld [vmem:[%s27942_s2 + $0xa8] sm:$0xff]   ;;  %v20495_v50 = vld [vmem:[%s27942_s2 + $0x30] sm:$0xff]   ;;  %19603 = vmatprep.subr.bf16.mxu1 %v20492_v30 }
 0x17d   :  { %11461 = vrot.lane.b32.xlu1 %v11274_v11, %s21104_s10  ;;  %v1147_v21 = vrot.slane %v1140_v10, %v21460_v43  ;;  %v6456_v4 = vsel %vm6392_vm5, %v6360_v19, %v6424_v34  ;;  %v6487_v53 = vpack.c.bf16 %v6455_v36, %v6455_v36  ;;  %v2663_v18 = vcombine.high %v1140_v10, %v1140_v10  ;;  %v20494_v19 = vld [vmem:[%s27942_s2 + $0x70] sm:$0xff]  }
 0x17e   :  { %3956 = vrot.lane.b32.xlu0 %v3769_v20, %s21105_s11  ;;  %v1574_v39 = vrot.slane %v1133_v0, %v28151_v26  ;;  %v4023_v57 = vcombine.high %v1133_v0, %v1133_v0  ;;  %v6488_v46 = vpack.c.bf16 %v6456_v4, %v6456_v4  ;;  %v22421_v25 = vrot.slane %v2655_v32, %v21460_v43 }
 0x17f   :  { %v1588_v11 = vrot.slane %v1147_v21, %v28151_v26  ;;  %v4024_v10 = vcombine.high %v1147_v21, %v1147_v21  ;;  %v22431_v20 = vrot.slane %v6487_v53, %v21460_v43  ;;  %v22434_v34 = vrot.slane %v2663_v18, %v21460_v43  ;;  %19604 = vmatpush3.bf16.msra.mxu1 %v20493_v35 }
 0x180   :  { %v22437_v0 = vrot.slane %v1574_v39, %v28151_v26  ;;  %v4139_v36 = vrot.slane %v4023_v57, %v28151_v26  ;;  %v22441_v32 = vrot.slane %v6488_v46, %v21460_v43  ;;  %v2953_v4 = vrot.slane %v22421_v25, %v28151_v26  ;;  %19583 = vmatprep.subr.bf16.mxu0 %v20494_v19 }
 0x181   :  { %6293 = vrot.lane.b32.xlu1 %v6106_v7, %s21105_s11  ;;  %v22450_v21 = vrot.slane %v1588_v11, %v28151_v26  ;;  %v4153_v2 = vrot.slane %v4024_v10, %v28151_v26  ;;  %v6642_v53 = vrot.slane %v22431_v20, %v21460_v43  ;;  %v2967_v18 = vrot.slane %v22434_v34, %v28151_v26 }
 0x182   :  { %9461 = vrot.lane.b32.xlu0 %v9274_v13, %s21105_s11  ;;  %v27998_v7 = vunpack.c.l.b16 %v22437_v0  ;;  %v4146_v39 = vrot.slane %v4139_v36, %v28151_v26  ;;  %v6656_v57 = vrot.slane %v22441_v32, %v21460_v43  ;;  %v22469_v46 = vrot.slane %v2953_v4, %v28151_v26  ;;  %19584 = vmatpush3.bf16.msra.mxu0 %v20495_v50 }
 0x183   :  { %v28001_v11 = vunpack.c.l.b16 %v22450_v21  ;;  %v4160_v10 = vrot.slane %v4153_v2, %v28151_v26  ;;  %v7083_v37 = vrot.slane %v6642_v53, %v28151_v26  ;;  %v9527_v31 = vcombine.high %v6642_v53, %v6642_v53  ;;  %19605 = vmatprep.subr.bf16.mxu1 %v20496_v55 }
 0x184   :  { %v2276_v13 = vrot.slane %v27998_v7, 1  ;;  %v22476_v36 = vunpack.c.l.b16 %v4146_v39  ;;  %v7097_v15 = vrot.slane %v6656_v57, %v28151_v26  ;;  %v9528_v38 = vcombine.high %v6656_v57, %v6656_v57  ;;  %19606 = vmatpush3.bf16.msra.mxu1 %v20497_v14 }
 0x185   :  { %v28161_v30 = vrot.slane %v22377_v23, %v21460_v43  ;;  %v22483_v4 = vunpack.c.l.b16 %v4160_v10  ;;  %v22486_v35 = vrot.slane %v7083_v37, %v28151_v26  ;;  %v9643_v19 = vrot.slane %v9527_v31, %v28151_v26 }
 0x186   :  { %v22490_v2 = vrot.slane %v2967_v18, %v28151_v26  ;;  %v2277_v50 = vsel %vm1965_vm7, %v28001_v11, %v2276_v13  ;;  %v4839_v53 = vrot.slane %v22476_v36, 1  ;;  %v22497_v55 = vrot.slane %v7097_v15, %v28151_v26 }
 0x187   :  { %11797 = vrot.lane.b32.xlu1 %v28161_v30, %s21105_s11  ;;  %v9657_v23 = vrot.slane %v9528_v38, %v28151_v26  ;;  %v2305_v39 = vpack.c.b16 %v2277_v50, %v2277_v50  ;;  %v27999_v37 = vunpack.c.l.b16 %v22486_v35  ;;  %v9650_v57 = vrot.slane %v9643_v19, %v28151_v26 }
 0x188   :  { %v3317_v31 = vunpack.c.l.b16 %v22469_v46  ;;  %v4840_v18 = vsel %vm1965_vm7, %v22483_v4, %v4839_v53  ;;  %v28000_v10 = vunpack.c.l.b16 %v22497_v55  ;;  %v3318_v15 = vunpack.c.l.b16 %v22490_v2 }
 0x189   :  { %v9664_v13 = vrot.slane %v9657_v23, %v28151_v26  ;;  %v2366_v30 = vrot.slane %v2305_v39, %v21460_v43  ;;  %v4868_v38 = vpack.c.b16 %v4840_v18, %v4840_v18  ;;  %v7783_v50 = vrot.slane %v27999_v37, 1 }
 0x18a   :  { %v22511_v7 = vunpack.c.l.b16 %v9650_v57  ;;  %v3349_v14 = vrot.slane %v3318_v15, 7  ;;  %v5175_v46 = vcombine.high %v22421_v25, %v22421_v25  ;;  %v5176_v53 = vcombine.high %v22434_v34, %v22434_v34  ;;  %v20498_v34 = vld [vmem:[%s27942_s2 + $0x78] sm:$0xff]  }
 0x18b   :  { %v22513_v19 = vunpack.c.l.b16 %v9664_v13  ;;  %v2373_v23 = vrot.slane %v2366_v30, %v21460_v43  ;;  %v4929_v2 = vrot.slane %v4868_v38, %v21460_v43  ;;  %v7784_v39 = vsel %vm1965_vm7, %v28000_v10, %v7783_v50  ;;  %v20499_v30 = vld [vmem:[%s27942_s2 + $0x38] sm:$0xff]   ;;  %19585 = vmatprep.subr.bf16.mxu0 %v20498_v34 }
 0x18c   :  { %28162 = vst [vmem:[#allocation37_spill] sm:$0xff] %v22511_v7  ;;  %v10343_v57 = vrot.slane %v22511_v7, 1  ;;  %v7812_v18 = vpack.c.b16 %v7784_v39, %v7784_v39  ;;  %v3350_v13 = vsel %vm1965_vm7, %v3349_v14, %v3317_v31  ;;  %v5291_v37 = vrot.slane %v5175_v46, %v28151_v26  ;;  %19586 = vmatpush3.bf16.msra.mxu0 %v20499_v30 }
 0x18d   :  { %28163 = vst [vmem:[#allocation38_spill] sm:$0xff] %v22513_v19  ;;  %v5305_v25 = vrot.slane %v5176_v53, %v28151_v26  ;;  %2548 = vrot.lane.b32.xlu0 %v2373_v23, %s21103_s1  ;;  %v4936_v38 = vrot.slane %v4929_v2, %v21460_v43  ;;  %v3378_v14 = vpack.c.b16 %v3350_v13, %v3350_v13  ;;  %v20500_v23 = vld [vmem:[%s27942_s2 + $0xf8] sm:$0xff]   ;;  %vm884_vm6 = vcmp.ge.f32.partialorder %v22394_v28, 0.0 }
 0x18e   :  { %v10344_v50 = vsel %vm1965_vm7, %v22513_v19, %v10343_v57  ;;  %v8161_v46 = vcombine.high %v22431_v20, %v22431_v20  ;;  %v7873_v53 = vrot.slane %v7812_v18, %v21460_v43  ;;  %v5298_v10 = vrot.slane %v5291_v37, %v28151_v26  ;;  %v20501_v2 = vld [vmem:[%s27942_s2 + $0xb8] sm:$0xff]   ;;  %19607 = vmatprep.subr.bf16.mxu1 %v20500_v23 }
 0x18f   :  { %v10372_v39 = vpack.c.b16 %v10344_v50, %v10344_v50  ;;  %v5312_v11 = vrot.slane %v5305_v25, %v28151_v26  ;;  %5111 = vrot.lane.b32.xlu1 %v4936_v38, %s21103_s1  ;;  %v3439_v20 = vrot.slane %v3378_v14, %v21460_v43  ;;  %v8169_v37 = vcombine.high %v22441_v32, %v22441_v32  ;;  %v20502_v38 = vld [vmem:[%s27942_s2 + $0x140] sm:$0xff]  }
 0x190   :  { %v8168_v57 = vrot.slane %v8161_v46, %v21460_v43  ;;  %v3686_v18 = vrot.slane %v3317_v31, 1  ;;  %v7880_v13 = vrot.slane %v7873_v53, %v21460_v43  ;;  %v5655_v34 = vunpack.c.l.b16 %v5298_v10  ;;  %19608 = vmatpush3.bf16.msra.mxu1 %v20501_v2  ;;  %19615 = vmatprep.subr.bf16.mxu0 %v20502_v38  ;;  %v20504_v53 = vld [vmem:[%s27942_s2 + $0x1c0] sm:$0xff]  }
 0x191   :  { %v10433_v25 = vrot.slane %v10372_v39, %v21460_v43  ;;  %v5656_v50 = vunpack.c.l.b16 %v5312_v11  ;;  %v3446_v14 = vrot.slane %v3439_v20, %v21460_v43  ;;  %v8176_v46 = vrot.slane %v8169_v37, %v21460_v43  ;;  %19637 = vmatprep.subr.bf16.mxu1 %v20504_v53 }
 0x192   :  { %v8459_v7 = vrot.slane %v8168_v57, %v28151_v26  ;;  %v10679_v32 = vcombine.high %v8168_v57, %v8168_v57  ;;  %8055 = vrot.lane.b32.xlu0 %v7880_v13, %s21103_s1  ;;  %v3687_v11 = vsel %vm1965_vm7, %v3318_v15, %v3686_v18  ;;  %v6023_v10 = vrot.slane %v5655_v34, 1 }
 0x193   :  { %v10440_v31 = vrot.slane %v10433_v25, %v21460_v43  ;;  %v5687_v30 = vrot.slane %v5656_v50, 7  ;;  %v8473_v23 = vrot.slane %v8176_v46, %v28151_v26  ;;  %v10680_v20 = vcombine.high %v8176_v46, %v8176_v46 }
 0x194   :  { %v8466_v39 = vrot.slane %v8459_v7, %v28151_v26  ;;  %v10795_v2 = vrot.slane %v10679_v32, %v28151_v26  ;;  %v3715_v37 = vpack.c.b16 %v3687_v11, %v3687_v11  ;;  %v6024_v15 = vsel %vm1965_vm7, %v5656_v50, %v6023_v10 }
 0x195   :  { %10615 = vrot.lane.b32.xlu1 %v10440_v31, %s21103_s1  ;;  %v5688_v57 = vsel %vm1965_vm7, %v5687_v30, %v5655_v34  ;;  %v8480_v13 = vrot.slane %v8473_v23, %v28151_v26  ;;  %v10809_v38 = vrot.slane %v10680_v20, %v28151_v26  ;;  %v6052_v34 = vpack.c.b16 %v6024_v15, %v6024_v15 }
 0x196   :  { %v5716_v18 = vpack.c.b16 %v5688_v57, %v5688_v57  ;;  %v8823_v25 = vunpack.c.l.b16 %v8466_v39  ;;  %v10802_v7 = vrot.slane %v10795_v2, %v28151_v26  ;;  %3621 = vrot.lane.b32.xlu0 %v3446_v14, %s21104_s10  ;;  %v22580_v46 = vrot.slane %v3715_v37, %v21460_v43 }
 0x197   :  { %vm885_vm8 = vcmp.ge.f32.partialorder %v22408_v8, 0.0  ;;  %v8824_v32 = vunpack.c.l.b16 %v8480_v13  ;;  %v10816_v11 = vrot.slane %v10809_v38, %v28151_v26  ;;  %v22588_v14 = vrot.slane %v6052_v34, %v21460_v43 }
 0x198   :  { %v5777_v50 = vrot.slane %v5716_v18, %v21460_v43  ;;  %v11159_v31 = vunpack.c.l.b16 %v10802_v7  ;;  %v9191_v30 = vrot.slane %v8823_v25, 1  ;;  %v3783_v10 = vrot.slane %v22580_v46, %v21460_v43 }
 0x199   :  { %v916_v53 = vmul.f32 0.33, %v22394_v28  ;;  %v8855_v23 = vrot.slane %v8824_v32, 7  ;;  %v11160_v57 = vunpack.c.l.b16 %v10816_v11  ;;  %v6120_v37 = vrot.slane %v22588_v14, %v21460_v43 }
 0x19a   :  { %v5784_v39 = vrot.slane %v5777_v50, %v21460_v43  ;;  %v9192_v20 = vsel %vm1965_vm7, %v8824_v32, %v9191_v30  ;;  %v11527_v2 = vrot.slane %v11159_v31, 1  ;;  %v917_v18 = vmul.f32 0.33, %v22408_v8 }
 0x19b   :  { %v9220_v15 = vpack.c.b16 %v9192_v20, %v9192_v20  ;;  %v8856_v13 = vsel %vm1965_vm7, %v8855_v23, %v8823_v25  ;;  %v948_v7 = vsel %vm884_vm6, %v22394_v28, %v916_v53  ;;  %v6361_v38 = vadd.f32 %v21792_v6, %v21620_v51 }
 0x19c   :  { %5959 = vrot.lane.b32.xlu1 %v5784_v39, %s21104_s10  ;;  %v6362_v46 = vadd.f32 %v21780_v42, %v21605_v49  ;;  %v8884_v34 = vpack.c.b16 %v8856_v13, %v8856_v13  ;;  %v11191_v50 = vrot.slane %v11160_v57, 7  ;;  %v11528_v30 = vsel %vm1965_vm7, %v11160_v57, %v11527_v2 }
 0x19d   :  { %v9281_v32 = vrot.slane %v9220_v15, %v21460_v43  ;;  %v11556_v11 = vpack.c.b16 %v11528_v30, %v11528_v30  ;;  %v949_v25 = vsel %vm885_vm8, %v22408_v8, %v917_v18  ;;  %v980_v39 = vpack.c.bf16 %v948_v7, %v948_v7 }
 0x19e   :  { %vm6393_vm9 = vcmp.ge.f32.partialorder %v6361_v38, 0.0  ;;  %v8945_v28 = vrot.slane %v8884_v34, %v21460_v43  ;;  %v11192_v51 = vsel %vm1965_vm7, %v11191_v50, %v11159_v31  ;;  %v981_v49 = vpack.c.bf16 %v949_v25, %v949_v25 }
 0x19f   :  { %v9288_v53 = vrot.slane %v9281_v32, %v21460_v43  ;;  %v11220_v23 = vpack.c.b16 %v11192_v51, %v11192_v51  ;;  %v11617_v20 = vrot.slane %v11556_v11, %v21460_v43  ;;  %v1154_v15 = vrot.slane %v980_v39, %v21460_v43 }
 0x1a0   :  { %vm6394_vm10 = vcmp.ge.f32.partialorder %v6362_v46, 0.0  ;;  %v8952_v2 = vrot.slane %v8945_v28, %v21460_v43  ;;  %v1168_v57 = vrot.slane %v981_v49, %v21460_v43  ;;  %v6425_v8 = vmul.f32 0.33, %v6361_v38 }
 0x1a1   :  { %v6426_v18 = vmul.f32 0.33, %v6362_v46  ;;  %v11281_v13 = vrot.slane %v11220_v23, %v21460_v43  ;;  %v11624_v7 = vrot.slane %v11617_v20, %v21460_v43  ;;  %v1161_v31 = vrot.slane %v1154_v15, %v21460_v43 }
 0x1a2   :  { %v2671_v34 = vcombine.high %v1154_v15, %v1154_v15  ;;  %9127 = vrot.lane.b32.xlu0 %v8952_v2, %s21104_s10  ;;  %v1175_v50 = vrot.slane %v1168_v57, %v21460_v43  ;;  %v6457_v32 = vsel %vm6393_vm9, %v6361_v38, %v6425_v8  ;;  %v2679_v11 = vcombine.high %v1168_v57, %v1168_v57 }
 0x1a3   :  { %v6458_v30 = vsel %vm6394_vm10, %v6362_v46, %v6426_v18  ;;  %v11288_v25 = vrot.slane %v11281_v13, %v21460_v43  ;;  %v1602_v39 = vrot.slane %v1161_v31, %v28151_v26  ;;  %v4025_v28 = vcombine.high %v1161_v31, %v1161_v31 }
 0x1a4   :  { %v6489_v51 = vpack.c.bf16 %v6457_v32, %v6457_v32  ;;  %v1616_v49 = vrot.slane %v1175_v50, %v28151_v26  ;;  %v4026_v23 = vcombine.high %v1175_v50, %v1175_v50  ;;  %v6490_v20 = vpack.c.bf16 %v6458_v30, %v6458_v30 }
 0x1a5   :  { %v2678_v15 = vrot.slane %v2671_v34, %v21460_v43  ;;  %11463 = vrot.lane.b32.xlu1 %v11288_v25, %s21104_s10  ;;  %v22629_v2 = vrot.slane %v1602_v39, %v28151_v26  ;;  %v4167_v38 = vrot.slane %v4025_v28, %v28151_v26  ;;  %v2686_v57 = vrot.slane %v2679_v11, %v21460_v43 }
 0x1a6   :  { %v22633_v46 = vrot.slane %v6489_v51, %v21460_v43  ;;  %3958 = vrot.lane.b32.xlu0 %v3783_v10, %s21105_s11  ;;  %v22638_v8 = vrot.slane %v1616_v49, %v28151_v26  ;;  %v4181_v18 = vrot.slane %v4026_v23, %v28151_v26  ;;  %v22642_v13 = vrot.slane %v6490_v20, %v21460_v43 }
 0x1a7   :  { %28164 = vst [vmem:[#allocation39_spill] sm:$0xff] %v22629_v2  ;;  %v2981_v31 = vrot.slane %v2678_v15, %v28151_v26  ;;  %v28003_v34 = vunpack.c.l.b16 %v22629_v2  ;;  %v4174_v50 = vrot.slane %v4167_v38, %v28151_v26  ;;  %v2995_v30 = vrot.slane %v2686_v57, %v28151_v26 }
 0x1a8   :  { %28165 = vst [vmem:[#allocation40_spill] sm:$0xff] %v22638_v8  ;;  %v6670_v32 = vrot.slane %v22633_v46, %v21460_v43  ;;  %v28004_v10 = vunpack.c.l.b16 %v22638_v8  ;;  %v4188_v11 = vrot.slane %v4181_v18, %v28151_v26  ;;  %v6684_v25 = vrot.slane %v22642_v13, %v21460_v43 }
 0x1a9   :  { %v2988_v39 = vrot.slane %v2981_v31, %v28151_v26  ;;  %6295 = vrot.lane.b32.xlu1 %v6120_v37, %s21105_s11  ;;  %v2278_v28 = vrot.slane %v28003_v34, 1  ;;  %v22661_v51 = vunpack.c.l.b16 %v4174_v50  ;;  %v22669_v31 = vrot.slane %v2995_v30, %v28151_v26 }
 0x1aa   :  { %v7111_v49 = vrot.slane %v6670_v32, %v28151_v26  ;;  %v9529_v23 = vcombine.high %v6670_v32, %v6670_v32  ;;  %9463 = vrot.lane.b32.xlu0 %v9288_v53, %s21105_s11  ;;  %v22665_v20 = vunpack.c.l.b16 %v4188_v11  ;;  %v7125_v38 = vrot.slane %v6684_v25, %v28151_v26 }
 0x1ab   :  { %28166 = vst [vmem:[#allocation41_spill] sm:$0xff] %v22661_v51  ;;  %v9530_v18 = vcombine.high %v6684_v25, %v6684_v25  ;;  %v2279_v14 = vsel %vm1965_vm7, %v28004_v10, %v2278_v28  ;;  %v4841_v37 = vrot.slane %v22661_v51, 1  ;;  %v3319_v34 = vunpack.c.l.b16 %v2988_v39  ;;  %v22689_v51 = vpop.permute.xlu0 %2542 }
 0x1ac   :  { %28167 = vst [vmem:[#allocation42_spill] sm:$0xff] %v22665_v20  ;;  %v22676_v50 = vrot.slane %v7111_v49, %v28151_v26  ;;  %v9671_v32 = vrot.slane %v9529_v23, %v28151_v26  ;;  %v2306_v53 = vpack.c.b16 %v2279_v14, %v2279_v14  ;;  %v22680_v11 = vrot.slane %v7125_v38, %v28151_v26 }
 0x1ad   :  { %v9685_v25 = vrot.slane %v9530_v18, %v28151_v26  ;;  %11799 = vrot.lane.b32.xlu1 %v11624_v7, %s21105_s11  ;;  %v4842_v30 = vsel %vm1965_vm7, %v22665_v20, %v4841_v37  ;;  %v3320_v49 = vunpack.c.l.b16 %v22669_v31  ;;  %v5177_v20 = vcombine.high %v2678_v15, %v2678_v15 }
 0x1ae   :  { %28168 = vst [vmem:[#allocation43_spill] sm:$0xff] %v22676_v50  ;;  %28169 = vst [vmem:[#allocation44_spill] sm:$0xff] %v22680_v11  ;;  %v28009_v28 = vunpack.c.l.b16 %v22676_v50  ;;  %v9678_v10 = vrot.slane %v9671_v32, %v28151_v26  ;;  %v2380_v23 = vrot.slane %v2306_v53, %v21460_v43  ;;  %v4869_v38 = vpack.c.b16 %v4842_v30, %v4842_v30  ;;  %v22702_v53 = vpop.permute.xlu1 %5105 }
 0x1af   :  { %v28011_v14 = vunpack.c.l.b16 %v22680_v11  ;;  %v9692_v39 = vrot.slane %v9685_v25, %v28151_v26  ;;  %v3351_v37 = vrot.slane %v3320_v49, 7  ;;  %v5178_v8 = vcombine.high %v2686_v57, %v2686_v57 }
 0x1b0   :  { %v7785_v7 = vrot.slane %v28009_v28, 1  ;;  %v22696_v18 = vunpack.c.l.b16 %v9678_v10  ;;  %v2387_v32 = vrot.slane %v2380_v23, %v21460_v43  ;;  %v4943_v31 = vrot.slane %v4869_v38, %v21460_v43 }
 0x1b1   :  { %v22700_v2 = vunpack.c.l.b16 %v9692_v39  ;;  %v3352_v10 = vsel %vm1965_vm7, %v3351_v37, %v3319_v34  ;;  %v5319_v28 = vrot.slane %v5177_v20, %v28151_v26  ;;  %v5333_v57 = vrot.slane %v5178_v8, %v28151_v26  ;;  %v22720_v20 = vpop.permute.xlu0 %8049 }
 0x1b2   :  { %28170 = vst [vmem:[#allocation45_spill] sm:$0xff] %v22696_v18  ;;  %v7786_v25 = vsel %vm1965_vm7, %v28011_v14, %v7785_v7  ;;  %v10345_v30 = vrot.slane %v22696_v18, 1  ;;  %2550 = vrot.lane.b32.xlu0 %v2387_v32, %s21103_s1  ;;  %v4950_v15 = vrot.slane %v4943_v31, %v21460_v43  ;;  %v3379_v38 = vpack.c.b16 %v3352_v10, %v3352_v10 }
 0x1b3   :  { %28171 = vst [vmem:[#allocation46_spill] sm:$0xff] %v22700_v2  ;;  %v7813_v23 = vpack.c.b16 %v7786_v25, %v7786_v25  ;;  %v5326_v50 = vrot.slane %v5319_v28, %v28151_v26  ;;  %v8177_v7 = vcombine.high %v22633_v46, %v22633_v46  ;;  %v8185_v37 = vcombine.high %v22642_v13, %v22642_v13 }
 0x1b4   :  { %v10346_v39 = vsel %vm1965_vm7, %v22700_v2, %v10345_v30  ;;  %5113 = vrot.lane.b32.xlu1 %v4950_v15, %s21103_s1  ;;  %v3453_v8 = vrot.slane %v3379_v38, %v21460_v43  ;;  %v5340_v25 = vrot.slane %v5333_v57, %v28151_v26  ;;  %v3688_v46 = vrot.slane %v3319_v34, 1  ;;  %v22731_v2 = vpop.permute.xlu1 %10609 }
 0x1b5   :  { %v7887_v32 = vrot.slane %v7813_v23, %v21460_v43  ;;  %v10373_v31 = vpack.c.b16 %v10346_v39, %v10346_v39  ;;  %v5657_v30 = vunpack.c.l.b16 %v5326_v50  ;;  %v8184_v28 = vrot.slane %v8177_v7, %v21460_v43  ;;  %v22742_v11 = vpop.permute.xlu0 %3615 }
 0x1b6   :  { %v8192_v10 = vrot.slane %v8185_v37, %v21460_v43  ;;  %v3460_v18 = vrot.slane %v3453_v8, %v21460_v43  ;;  %v5658_v15 = vunpack.c.l.b16 %v5340_v25  ;;  %v3689_v7 = vsel %vm1965_vm7, %v3320_v49, %v3688_v46 }
 0x1b7   :  { %v7894_v14 = vrot.slane %v7887_v32, %v21460_v43  ;;  %v10447_v13 = vrot.slane %v10373_v31, %v21460_v43  ;;  %v8487_v23 = vrot.slane %v8184_v28, %v28151_v26  ;;  %v10681_v57 = vcombine.high %v8184_v28, %v8184_v28 }
 0x1b8   :  { %v8501_v38 = vrot.slane %v8192_v10, %v28151_v26  ;;  %v10682_v50 = vcombine.high %v8192_v10, %v8192_v10  ;;  %v5689_v34 = vrot.slane %v5658_v15, 7  ;;  %v6025_v37 = vrot.slane %v5657_v30, 1 }
 0x1b9   :  { %8057 = vrot.lane.b32.xlu0 %v7894_v14, %s21103_s1  ;;  %v10454_v39 = vrot.slane %v10447_v13, %v21460_v43  ;;  %v8494_v32 = vrot.slane %v8487_v23, %v28151_v26  ;;  %v10823_v8 = vrot.slane %v10681_v57, %v28151_v26  ;;  %v3716_v28 = vpack.c.b16 %v3689_v7, %v3689_v7 }
 0x1ba   :  { %v8508_v31 = vrot.slane %v8501_v38, %v28151_v26  ;;  %v10837_v25 = vrot.slane %v10682_v50, %v28151_v26  ;;  %v5690_v14 = vsel %vm1965_vm7, %v5689_v34, %v5657_v30  ;;  %v6026_v10 = vsel %vm1965_vm7, %v5658_v15, %v6025_v37  ;;  %v22755_v30 = vpop.permute.xlu1 %5953 }
 0x1bb   :  { %10617 = vrot.lane.b32.xlu1 %v10454_v39, %s21103_s1  ;;  %v28172_v49 = vunpack.c.l.b16 %v21840_v60  ;;  %v5717_v13 = vpack.c.b16 %v5690_v14, %v5690_v14  ;;  %v8825_v23 = vunpack.c.l.b16 %v8494_v32  ;;  %v10830_v38 = vrot.slane %v10823_v8, %v28151_v26 }
 0x1bc   :  { %v8826_v19 = vunpack.c.l.b16 %v8508_v31  ;;  %v10844_v57 = vrot.slane %v10837_v25, %v28151_v26  ;;  %v22753_v50 = vrot.slane %v3716_v28, %v21460_v43  ;;  %v6053_v39 = vpack.c.b16 %v6026_v10, %v6026_v10  ;;  %v22769_v10 = vpop.permute.xlu0 %9121 }
 0x1bd   :  { %v1964_v46 = vrot.slane %v28172_v49, 7  ;;  %3623 = vrot.lane.b32.xlu0 %v3460_v18, %s21104_s10  ;;  %vm2253_vm11 = vcmask 253952   ;;  %v5791_v15 = vrot.slane %v5717_v13, %v21460_v43  ;;  %v11161_v34 = vunpack.c.l.b16 %v10830_v38 }
 0x1be   :  { %v8857_v60 = vrot.slane %v8826_v19, 7  ;;  %vm2590_vm12 = vcmask 516352   ;;  %v11162_v7 = vunpack.c.l.b16 %v10844_v57  ;;  %v3797_v37 = vrot.slane %v22753_v50, %v21460_v43 }
 0x1bf   :  { %v22761_v18 = vrot.slane %v6053_v39, %v21460_v43  ;;  %v28173_v32 = vunpack.c.l.b16 %v21843_v16  ;;  %v5798_v8 = vrot.slane %v5791_v15, %v21460_v43  ;;  %v4529_v28 = vrot.slane %v21870_v48, 7 }
 0x1c0   :  { %v8858_v25 = vsel %vm1965_vm7, %v8857_v60, %v8825_v23  ;;  %v11193_v13 = vrot.slane %v11162_v7, 7  ;;  %v9193_v57 = vrot.slane %v8825_v23, 1  ;;  %v11529_v50 = vrot.slane %v11161_v34, 1 }
 0x1c1   :  { %v1966_v31 = vsel %vm1965_vm7, %v1964_v46, %v28173_v32  ;;  %v8885_v49 = vpack.c.b16 %v8858_v25, %v8858_v25  ;;  %5961 = vrot.lane.b32.xlu1 %v5798_v8, %s21104_s10  ;;  %v4530_v46 = vsel %vm1965_vm7, %v4529_v28, %v21867_v24  ;;  %v28174_v39 = vunpack.c.l.b16 %v21894_v12  ;;  %v22782_v25 = vpop.permute.xlu1 %11457 }
 0x1c2   :  { %v1997_v14 = vpack.c.b16 %v1966_v31, %v1966_v31  ;;  %v11194_v60 = vsel %vm1965_vm7, %v11193_v13, %v11161_v34  ;;  %v4561_v32 = vpack.c.b16 %v4530_v46, %v4530_v46  ;;  %v9194_v31 = vsel %vm1965_vm7, %v8826_v19, %v9193_v57  ;;  %v3953_v46 = vpop.permute.xlu0 %3952 }
 0x1c3   :  { %v7473_v15 = vrot.slane %v28174_v39, 7  ;;  %v8959_v48 = vrot.slane %v8885_v49, %v21460_v43  ;;  %v11221_v23 = vpack.c.b16 %v11194_v60, %v11194_v60  ;;  %v11530_v38 = vsel %vm1965_vm7, %v11162_v7, %v11529_v50 }
 0x1c4   :  { %v2019_v16 = vrot.slane %v1997_v14, %v21460_v43  ;;  %v9221_v14 = vpack.c.b16 %v9194_v31, %v9194_v31  ;;  %v4583_v12 = vrot.slane %v4561_v32, %v21460_v43  ;;  %v11557_v28 = vpack.c.b16 %v11530_v38, %v11530_v38 }
 0x1c5   :  { %v8966_v24 = vrot.slane %v8959_v48, %v21460_v43  ;;  %v28175_v49 = vunpack.c.l.b16 %v21889_v9  ;;  %v11295_v13 = vrot.slane %v11221_v23, %v21460_v43  ;;  %v854_v38 = vadd.f32 %v21794_v3, %v21637_v27  ;;  %v6290_v32 = vpop.permute.xlu1 %6289 }
 0x1c6   :  { %v2026_v8 = vrot.slane %v2019_v16, %v21460_v43  ;;  %v9295_v19 = vrot.slane %v9221_v14, %v21460_v43  ;;  %v10033_v16 = vrot.slane %v21916_v17, 7  ;;  %v4590_v7 = vrot.slane %v4583_v12, %v21460_v43 }
 0x1c7   :  { %v7474_v34 = vsel %vm1965_vm7, %v7473_v15, %v28175_v49  ;;  %9129 = vrot.lane.b32.xlu0 %v8966_v24, %s21104_s10  ;;  %v22800_v9 = vrot.slane %v11557_v28, %v21460_v43  ;;  %v855_v50 = vadd.f32 %v21782_v44, %v21629_v62  ;;  %v11302_v39 = vrot.slane %v11295_v13, %v21460_v43 }
 0x1c8   :  { %2254 = vst.msk [vmem:[#allocation2] sm:$0x1] %vm2253_vm11, %v2026_v8  ;;  %v7505_v57 = vpack.c.b16 %v7474_v34, %v7474_v34  ;;  %v9302_v17 = vrot.slane %v9295_v19, %v21460_v43  ;;  %4817 = vst.msk [vmem:[#allocation2 + $0x1] sm:$0x1] %vm2253_vm11, %v4590_v7  ;;  %vm886_vm13 = vcmp.ge.f32.partialorder %v854_v38, 0.0  ;;  %vm3663_vm15 = vcmask 778752  }
 0x1c9   :  { %2591 = vst.msk [vmem:[#allocation2] sm:$0x1] %vm2590_vm12, %v22689_v51  ;;  %v10034_v51 = vsel %vm1965_vm7, %v10033_v16, %v21914_v47  ;;  %v11638_v48 = vrot.slane %v22800_v9, %v21460_v43  ;;  %vm887_vm14 = vcmp.ge.f32.partialorder %v855_v50, 0.0  ;;  %11465 = vrot.lane.b32.xlu1 %v11302_v39, %s21104_s10  ;;  %5153 = vst.msk [vmem:[#allocation2 + $0x1] sm:$0x1] %vm2590_vm12, %v22702_v53  ;;  %vm4000_vm0 = vcmask 1041152  }
 0x1ca   :  { %v7527_v15 = vrot.slane %v7505_v57, %v21460_v43  ;;  %v10065_v60 = vpack.c.b16 %v10034_v51, %v10034_v51  ;;  %v918_v23 = vmul.f32 0.33, %v854_v38  ;;  %v919_v8 = vmul.f32 0.33, %v855_v50  ;;  %3664 = vst.msk [vmem:[#allocation2] sm:$0x1] %vm3663_vm15, %v22742_v11  ;;  %v9458_v11 = vpop.permute.xlu0 %9457 }
 0x1cb   :  { %3960 = vrot.lane.b32.xlu0 %v3797_v37, %s21105_s11  ;;  %6001 = vst.msk [vmem:[#allocation2 + $0x1] sm:$0x1] %vm3663_vm15, %v22755_v30  ;;  %v6363_v14 = vadd.f32 %v21792_v6, %v21637_v27  ;;  %v6364_v53 = vadd.f32 %v21780_v42, %v21629_v62  ;;  %v28176_v30 = vunpack.c.l.b16 %v22040_v41  ;;  %v4531_v27 = vrot.slane %v22064_v52, 7 }
 0x1cc   :  { %v7534_v31 = vrot.slane %v7527_v15, %v21460_v43  ;;  %v10087_v47 = vrot.slane %v10065_v60, %v21460_v43  ;;  %v950_v24 = vsel %vm886_vm13, %v854_v38, %v918_v23  ;;  %v951_v37 = vsel %vm887_vm14, %v855_v50, %v919_v8  ;;  %4001 = vst.msk [vmem:[#allocation2] sm:$0x1] %vm4000_vm0, %v3953_v46 }
 0x1cd   :  { %6337 = vst.msk [vmem:[#allocation2 + $0x1] sm:$0x1] %vm4000_vm0, %v6290_v32  ;;  %v1967_v12 = vrot.slane %v28176_v30, 7  ;;  %v982_v28 = vpack.c.bf16 %v950_v24, %v950_v24  ;;  %v983_v49 = vpack.c.bf16 %v951_v37, %v951_v37  ;;  %vm6395_vm1 = vcmp.ge.f32.partialorder %v6363_v14, 0.0 }
 0x1ce   :  { %7761 = vst.msk [vmem:[#allocation2 + $0x2] sm:$0x1] %vm2253_vm11, %v7534_v31  ;;  %v10094_v62 = vrot.slane %v10087_v47, %v21460_v43  ;;  %v28177_v34 = vrot.slane %v22761_v18, %v21460_v43  ;;  %vm6396_vm2 = vcmp.ge.f32.partialorder %v6364_v53, 0.0  ;;  %v6427_v13 = vmul.f32 0.33, %v6363_v14  ;;  %v11794_v18 = vpop.permute.xlu1 %11793  ;;  %v22876_v8 = vpop.permute.xlu0 %2544 }
 0x1cf   :  { %8097 = vst.msk [vmem:[#allocation2 + $0x2] sm:$0x1] %vm2590_vm12, %v22720_v20  ;;  %v6428_v19 = vmul.f32 0.33, %v6364_v53  ;;  %v28178_v41 = vunpack.c.l.b16 %v22027_v22  ;;  %9465 = vrot.lane.b32.xlu0 %v9302_v17, %s21105_s11  ;;  %v1182_v20 = vrot.slane %v982_v28, %v21460_v43  ;;  %v1196_v57 = vrot.slane %v983_v49, %v21460_v43 }
 0x1d0   :  { %6297 = vrot.lane.b32.xlu1 %v28177_v34, %s21105_s11  ;;  %9169 = vst.msk [vmem:[#allocation2 + $0x2] sm:$0x1] %vm3663_vm15, %v22769_v10  ;;  %v4532_v46 = vsel %vm1965_vm7, %v4531_v27, %v22054_v56  ;;  %v6459_v22 = vsel %vm6395_vm1, %v6363_v14, %v6427_v13  ;;  %v28179_v9 = vunpack.c.l.b16 %v22069_v5 }
 0x1d1   :  { %v1968_v52 = vsel %vm1965_vm7, %v1967_v12, %v28178_v41  ;;  %10321 = vst.msk [vmem:[#allocation2 + $0x3] sm:$0x1] %vm2253_vm11, %v10094_v62  ;;  %v6460_v10 = vsel %vm6396_vm2, %v6364_v53, %v6428_v19  ;;  %v4562_v7 = vpack.c.b16 %v4532_v46, %v4532_v46  ;;  %v1189_v50 = vrot.slane %v1182_v20, %v21460_v43 }
 0x1d2   :  { %9505 = vst.msk [vmem:[#allocation2 + $0x2] sm:$0x1] %vm4000_vm0, %v9458_v11  ;;  %v1998_v16 = vpack.c.b16 %v1968_v52, %v1968_v52  ;;  %v22860_v38 = vrot.slane %v28179_v9, 7  ;;  %v1203_v39 = vrot.slane %v1196_v57, %v21460_v43  ;;  %v6491_v17 = vpack.c.bf16 %v6459_v22, %v6459_v22  ;;  %v22894_v30 = vpop.permute.xlu1 %5107 }
 0x1d3   :  { %10657 = vst.msk [vmem:[#allocation2 + $0x3] sm:$0x1] %vm2590_vm12, %v22731_v2  ;;  %v6492_v15 = vpack.c.bf16 %v6460_v10, %v6460_v10  ;;  %v2687_v56 = vcombine.high %v1182_v20, %v1182_v20  ;;  %v2695_v2 = vcombine.high %v1196_v57, %v1196_v57  ;;  %v22872_v5 = vrot.slane %v4562_v7, %v21460_v43  ;;  %v22915_v10 = vpop.permute.xlu0 %8051 }
 0x1d4   :  { %11505 = vst.msk [vmem:[#allocation2 + $0x3] sm:$0x1] %vm3663_vm15, %v22782_v25  ;;  %11801 = vrot.lane.b32.xlu1 %v11638_v48, %s21105_s11  ;;  %v22869_v51 = vrot.slane %v1998_v16, %v21460_v43  ;;  %v1630_v60 = vrot.slane %v1189_v50, %v28151_v26  ;;  %v1644_v32 = vrot.slane %v1203_v39, %v28151_v26 }
 0x1d5   :  { %11841 = vst.msk [vmem:[#allocation2 + $0x3] sm:$0x1] %vm4000_vm0, %v11794_v18  ;;  %v4027_v31 = vcombine.high %v1189_v50, %v1189_v50  ;;  %v4028_v23 = vcombine.high %v1203_v39, %v1203_v39  ;;  %v22879_v25 = vrot.slane %v6491_v17, %v21460_v43  ;;  %v22882_v48 = vrot.slane %v6492_v15, %v21460_v43 }
 0x1d6   :  { %v2694_v47 = vrot.slane %v2687_v56, %v21460_v43  ;;  %v2702_v14 = vrot.slane %v2695_v2, %v21460_v43  ;;  %v22887_v53 = vrot.slane %v1630_v60, %v28151_v26  ;;  %v22890_v24 = vrot.slane %v1644_v32, %v28151_v26  ;;  %v22930_v60 = vpop.permute.xlu1 %10611 }
 0x1d7   :  { %v4195_v37 = vrot.slane %v4027_v31, %v28151_v26  ;;  %v4209_v11 = vrot.slane %v4028_v23, %v28151_v26  ;;  %v6698_v12 = vrot.slane %v22879_v25, %v21460_v43  ;;  %v6712_v27 = vrot.slane %v22882_v48, %v21460_v43 }
 0x1d8   :  { %v3009_v62 = vrot.slane %v2694_v47, %v28151_v26  ;;  %v3023_v28 = vrot.slane %v2702_v14, %v28151_v26  ;;  %v28021_v49 = vunpack.c.l.b16 %v22887_v53  ;;  %v28027_v34 = vunpack.c.l.b16 %v22890_v24 }
 0x1d9   :  { %v4202_v13 = vrot.slane %v4195_v37, %v28151_v26  ;;  %v4216_v19 = vrot.slane %v4209_v11, %v28151_v26  ;;  %v7139_v41 = vrot.slane %v6698_v12, %v28151_v26  ;;  %v7153_v52 = vrot.slane %v6712_v27, %v28151_v26 }
 0x1da   :  { %v9531_v20 = vcombine.high %v6698_v12, %v6698_v12  ;;  %v9532_v57 = vcombine.high %v6712_v27, %v6712_v27  ;;  %v2280_v18 = vrot.slane %v28021_v49, 1  ;;  %v3016_v22 = vrot.slane %v3009_v62, %v28151_v26 }
 0x1db   :  { %v22910_v16 = vunpack.c.l.b16 %v4202_v13  ;;  %v22912_v46 = vunpack.c.l.b16 %v4216_v19  ;;  %v22918_v7 = vrot.slane %v7139_v41, %v28151_v26  ;;  %v22921_v9 = vrot.slane %v7153_v52, %v28151_v26 }
 0x1dc   :  { %v9699_v50 = vrot.slane %v9531_v20, %v28151_v26  ;;  %v9713_v39 = vrot.slane %v9532_v57, %v28151_v26  ;;  %v2281_v17 = vsel %vm1965_vm7, %v28027_v34, %v2280_v18  ;;  %v3030_v56 = vrot.slane %v3023_v28, %v28151_v26 }
 0x1dd   :  { %v4843_v15 = vrot.slane %v22910_v16, 1  ;;  %v3321_v2 = vunpack.c.l.b16 %v3016_v22  ;;  %v2307_v32 = vpack.c.b16 %v2281_v17, %v2281_v17  ;;  %v28016_v31 = vunpack.c.l.b16 %v22918_v7  ;;  %v22946_v22 = vpop.permute.xlu0 %3617 }
 0x1de   :  { %v28022_v23 = vunpack.c.l.b16 %v22921_v9  ;;  %v9706_v37 = vrot.slane %v9699_v50, %v28151_v26  ;;  %v9720_v12 = vrot.slane %v9713_v39, %v28151_v26  ;;  %v3322_v27 = vunpack.c.l.b16 %v3030_v56 }
 0x1df   :  { %v4844_v11 = vsel %vm1965_vm7, %v22912_v46, %v4843_v15  ;;  %v5179_v62 = vcombine.high %v2694_v47, %v2694_v47  ;;  %v2394_v13 = vrot.slane %v2307_v32, %v21460_v43  ;;  %v7787_v19 = vrot.slane %v28016_v31, 1 }
 0x1e0   :  { %v4870_v28 = vpack.c.b16 %v4844_v11, %v4844_v11  ;;  %v22941_v41 = vunpack.c.l.b16 %v9706_v37  ;;  %v22943_v52 = vunpack.c.l.b16 %v9720_v12  ;;  %v3353_v20 = vrot.slane %v3322_v27, 7  ;;  %v22957_v37 = vpop.permute.xlu1 %5955 }
 0x1e1   :  { %v5180_v57 = vcombine.high %v2702_v14, %v2702_v14  ;;  %v5347_v18 = vrot.slane %v5179_v62, %v28151_v26  ;;  %v2401_v50 = vrot.slane %v2394_v13, %v21460_v43  ;;  %v7788_v39 = vsel %vm1965_vm7, %v28022_v23, %v7787_v19 }
 0x1e2   :  { %v4957_v47 = vrot.slane %v4870_v28, %v21460_v43  ;;  %v10347_v17 = vrot.slane %v22941_v41, 1  ;;  %v7814_v15 = vpack.c.b16 %v7788_v39, %v7788_v39  ;;  %v3354_v56 = vsel %vm1965_vm7, %v3353_v20, %v3321_v2 }
 0x1e3   :  { %v5354_v32 = vrot.slane %v5347_v18, %v28151_v26  ;;  %v5361_v14 = vrot.slane %v5180_v57, %v28151_v26  ;;  %2552 = vrot.lane.b32.xlu0 %v2401_v50, %s21103_s1  ;;  %v3380_v62 = vpack.c.b16 %v3354_v56, %v3354_v56  ;;  %v8193_v13 = vcombine.high %v22879_v25, %v22879_v25 }
 0x1e4   :  { %v4964_v11 = vrot.slane %v4957_v47, %v21460_v43  ;;  %v10348_v12 = vsel %vm1965_vm7, %v22943_v52, %v10347_v17  ;;  %v7901_v28 = vrot.slane %v7814_v15, %v21460_v43  ;;  %v8201_v47 = vcombine.high %v22882_v48, %v22882_v48 }
 0x1e5   :  { %v10374_v19 = vpack.c.b16 %v10348_v12, %v10348_v12  ;;  %v5368_v20 = vrot.slane %v5361_v14, %v28151_v26  ;;  %v5659_v18 = vunpack.c.l.b16 %v5354_v32  ;;  %v3467_v57 = vrot.slane %v3380_v62, %v21460_v43  ;;  %v22974_v12 = vpop.permute.xlu0 %9123 }
 0x1e6   :  { %5115 = vrot.lane.b32.xlu1 %v4964_v11, %s21103_s1  ;;  %v8200_v50 = vrot.slane %v8193_v13, %v21460_v43  ;;  %v3690_v39 = vrot.slane %v3321_v2, 1  ;;  %v7908_v17 = vrot.slane %v7901_v28, %v21460_v43  ;;  %v8208_v14 = vrot.slane %v8201_v47, %v21460_v43 }
 0x1e7   :  { %v10461_v25 = vrot.slane %v10374_v19, %v21460_v43  ;;  %v5660_v56 = vunpack.c.l.b16 %v5368_v20  ;;  %v6027_v15 = vrot.slane %v5659_v18, 1  ;;  %v3474_v32 = vrot.slane %v3467_v57, %v21460_v43  ;;  %v22983_v19 = vpop.permute.xlu1 %11459 }
 0x1e8   :  { %v8515_v11 = vrot.slane %v8200_v50, %v28151_v26  ;;  %v10683_v62 = vcombine.high %v8200_v50, %v8200_v50  ;;  %8059 = vrot.lane.b32.xlu0 %v7908_v17, %s21103_s1  ;;  %v3691_v13 = vsel %vm1965_vm7, %v3322_v27, %v3690_v39  ;;  %v8529_v57 = vrot.slane %v8208_v14, %v28151_v26 }
 0x1e9   :  { %v10468_v48 = vrot.slane %v10461_v25, %v21460_v43  ;;  %v5691_v2 = vrot.slane %v5660_v56, 7  ;;  %v6028_v28 = vsel %vm1965_vm7, %v5660_v56, %v6027_v15  ;;  %v10684_v31 = vcombine.high %v8208_v14, %v8208_v14 }
 0x1ea   :  { %v8522_v20 = vrot.slane %v8515_v11, %v28151_v26  ;;  %v10851_v47 = vrot.slane %v10683_v62, %v28151_v26  ;;  %v3717_v17 = vpack.c.b16 %v3691_v13, %v3691_v13  ;;  %v6054_v25 = vpack.c.b16 %v6028_v28, %v6028_v28 }
 0x1eb   :  { %10619 = vrot.lane.b32.xlu1 %v10468_v48, %s21103_s1  ;;  %v5692_v50 = vsel %vm1965_vm7, %v5691_v2, %v5659_v18  ;;  %v2040_v27 = vrot.slane %v22869_v51, %v21460_v43  ;;  %v8536_v56 = vrot.slane %v8529_v57, %v28151_v26  ;;  %v10865_v14 = vrot.slane %v10684_v31, %v28151_v26  ;;  %v3955_v48 = vpop.permute.xlu0 %3954 }
 0x1ec   :  { %v5718_v39 = vpack.c.b16 %v5692_v50, %v5692_v50  ;;  %v8827_v15 = vunpack.c.l.b16 %v8522_v20  ;;  %v10858_v11 = vrot.slane %v10851_v47, %v28151_v26  ;;  %3625 = vrot.lane.b32.xlu0 %v3474_v32, %s21104_s10  ;;  %v22997_v62 = vrot.slane %v3717_v17, %v21460_v43 }
 0x1ed   :  { %v23000_v18 = vrot.slane %v6054_v25, %v21460_v43  ;;  %2255 = vst.msk [vmem:[#allocation2 + $0x4] sm:$0x1] %vm2253_vm11, %v2040_v27  ;;  %v4604_v51 = vrot.slane %v22872_v5, %v21460_v43  ;;  %v8828_v13 = vunpack.c.l.b16 %v8536_v56  ;;  %v10872_v32 = vrot.slane %v10865_v14, %v28151_v26 }
 0x1ee   :  { %v5805_v2 = vrot.slane %v5718_v39, %v21460_v43  ;;  %v11163_v28 = vunpack.c.l.b16 %v10858_v11  ;;  %2592 = vst.msk [vmem:[#allocation2 + $0x4] sm:$0x1] %vm2590_vm12, %v22876_v8  ;;  %v9195_v31 = vrot.slane %v8827_v15, 1  ;;  %v3811_v20 = vrot.slane %v22997_v62, %v21460_v43  ;;  %v6292_v8 = vpop.permute.xlu1 %6291  ;;  %v28181_v11 = vld [vmem:[#allocation12_spill] sm:$0xff] }
 0x1ef   :  { %v6148_v57 = vrot.slane %v23000_v18, %v21460_v43  ;;  %4818 = vst.msk [vmem:[#allocation2 + $0x5] sm:$0x1] %vm2253_vm11, %v4604_v51  ;;  %v28180_v5 = vunpack.c.l.b16 %v22057_v33  ;;  %v8859_v17 = vrot.slane %v8828_v13, 7  ;;  %v11164_v39 = vunpack.c.l.b16 %v10872_v32  ;;  %v20503_v62 = vld [vmem:[%s27942_s2 + $0x100] sm:$0xff]  }
 0x1f0   :  { %3665 = vst.msk [vmem:[#allocation2 + $0x4] sm:$0x1] %vm3663_vm15, %v22946_v22  ;;  %v5812_v50 = vrot.slane %v5805_v2, %v21460_v43  ;;  %v9196_v25 = vsel %vm1965_vm7, %v8828_v13, %v9195_v31  ;;  %v11531_v27 = vrot.slane %v11163_v28, 1  ;;  %v857_v14 = vadd.f32 %v21782_v44, %v28181_v11 }
 0x1f1   :  { %v7476_v47 = vsel %vm1965_vm7, %v22860_v38, %v28180_v5  ;;  %5154 = vst.msk [vmem:[#allocation2 + $0x5] sm:$0x1] %vm2590_vm12, %v22894_v30  ;;  %v9222_v33 = vpack.c.b16 %v9196_v25, %v9196_v25  ;;  %v10035_v38 = vrot.slane %v22089_v61, 7  ;;  %v8860_v22 = vsel %vm1965_vm7, %v8859_v17, %v8827_v15 }
 0x1f2   :  { %4002 = vst.msk [vmem:[#allocation2 + $0x4] sm:$0x1] %vm4000_vm0, %v3955_v48  ;;  %v7506_v56 = vpack.c.b16 %v7476_v47, %v7476_v47  ;;  %5963 = vrot.lane.b32.xlu1 %v5812_v50, %s21104_s10  ;;  %v856_v30 = vadd.f32 %v21794_v3, %v21675_v45  ;;  %v6365_v51 = vadd.f32 %v21792_v6, %v21675_v45  ;;  %v11195_v61 = vrot.slane %v11164_v39, 7 }
 0x1f3   :  { %6002 = vst.msk [vmem:[#allocation2 + $0x5] sm:$0x1] %vm3663_vm15, %v22957_v37  ;;  %v8886_v48 = vpack.c.b16 %v8860_v22, %v8860_v22  ;;  %v23038_v2 = vrot.slane %v9222_v33, %v21460_v43  ;;  %v11532_v37 = vsel %vm1965_vm7, %v11164_v39, %v11531_v27  ;;  %v10036_v31 = vsel %vm1965_vm7, %v10035_v38, %v22082_v40  ;;  %v18976_v25 = vld.sshfl [vmem:[#allocation2] sm:$0x33 pattern:$0x75316420]  ;;  %v9460_v22 = vpop.permute.xlu0 %9459 }
 0x1f4   :  { %6338 = vst.msk [vmem:[#allocation2 + $0x5] sm:$0x1] %vm4000_vm0, %v6292_v8  ;;  %v11558_v13 = vpack.c.b16 %v11532_v37, %v11532_v37  ;;  %v7541_v15 = vrot.slane %v7506_v56, %v21460_v43  ;;  %vm888_vm3 = vcmp.ge.f32.partialorder %v856_v30, 0.0  ;;  %v11196_v45 = vsel %vm1965_vm7, %v11195_v61, %v11163_v28 }
 0x1f5   :  { %v8973_v32 = vrot.slane %v8886_v48, %v21460_v43  ;;  %v9316_v5 = vrot.slane %v23038_v2, %v21460_v43  ;;  %v10066_v47 = vpack.c.b16 %v10036_v31, %v10036_v31  ;;  %v11222_v8 = vpack.c.b16 %v11196_v45, %v11196_v45 }
 0x1f6   :  { %v23049_v50 = vrot.slane %v11558_v13, %v21460_v43  ;;  %v7548_v17 = vrot.slane %v7541_v15, %v21460_v43  ;;  %vm889_vm4 = vcmp.ge.f32.partialorder %v857_v14, 0.0  ;;  %v920_v39 = vmul.f32 0.33, %v856_v30 }
 0x1f7   :  { %v8980_v27 = vrot.slane %v8973_v32, %v21460_v43  ;;  %v10101_v40 = vrot.slane %v10066_v47, %v21460_v43  ;;  %v921_v33 = vmul.f32 0.33, %v857_v14  ;;  %v11309_v28 = vrot.slane %v11222_v8, %v21460_v43 }
 0x1f8   :  { %v11652_v56 = vrot.slane %v23049_v50, %v21460_v43  ;;  %7762 = vst.msk [vmem:[#allocation2 + $0x6] sm:$0x1] %vm2253_vm11, %v7548_v17  ;;  %v6366_v38 = vadd.f32 %v21780_v42, %v28181_v11  ;;  %vm6397_vm5 = vcmp.ge.f32.partialorder %v6365_v51, 0.0  ;;  %v952_v61 = vsel %vm888_vm3, %v856_v30, %v920_v39  ;;  %v11796_v30 = vpop.permute.xlu1 %11795 }
 0x1f9   :  { %9131 = vrot.lane.b32.xlu0 %v8980_v27, %s21104_s10  ;;  %8098 = vst.msk [vmem:[#allocation2 + $0x6] sm:$0x1] %vm2590_vm12, %v22915_v10  ;;  %v10108_v48 = vrot.slane %v10101_v40, %v21460_v43  ;;  %v953_v37 = vsel %vm889_vm4, %v857_v14, %v921_v33  ;;  %v6429_v13 = vmul.f32 0.33, %v6365_v51  ;;  %v11316_v15 = vrot.slane %v11309_v28, %v21460_v43 }
 0x1fa   :  { %v984_v31 = vpack.c.bf16 %v952_v61, %v952_v61  ;;  %v985_v32 = vpack.c.bf16 %v953_v37, %v953_v37  ;;  %vm6398_vm6 = vcmp.ge.f32.partialorder %v6366_v38, 0.0  ;;  %9170 = vst.msk [vmem:[#allocation2 + $0x6] sm:$0x1] %vm3663_vm15, %v22974_v12  ;;  %v6430_v11 = vmul.f32 0.33, %v6366_v38 }
 0x1fb   :  { %10322 = vst.msk [vmem:[#allocation2 + $0x7] sm:$0x1] %vm2253_vm11, %v10108_v48  ;;  %v6461_v45 = vsel %vm6397_vm5, %v6365_v51, %v6429_v13  ;;  %v12912_v10 = vcombine.high %v18976_v25, %v18976_v25  ;;  %v12919_v47 = vrot.slane %v18976_v25, %v21460_v43  ;;  %11467 = vrot.lane.b32.xlu1 %v11316_v15, %s21104_s10  ;;  %v28182_v17 = vunpack.c.l.b16 %v22192_v59 }
 0x1fc   :  { %9506 = vst.msk [vmem:[#allocation2 + $0x6] sm:$0x1] %vm4000_vm0, %v9460_v22  ;;  %v1210_v14 = vrot.slane %v984_v31, %v21460_v43  ;;  %v1224_v8 = vrot.slane %v985_v32, %v21460_v43  ;;  %v6493_v12 = vpack.c.bf16 %v6461_v45, %v6461_v45  ;;  %v6462_v51 = vsel %vm6398_vm6, %v6366_v38, %v6430_v11 }
 0x1fd   :  { %10658 = vst.msk [vmem:[#allocation2 + $0x7] sm:$0x1] %vm2590_vm12, %v22930_v60  ;;  %v1969_v27 = vrot.slane %v28182_v17, 7  ;;  %3962 = vrot.lane.b32.xlu0 %v3811_v20, %s21105_s11  ;;  %v12926_v25 = vrot.slane %v12912_v10, %v21460_v43  ;;  %v12927_v60 = vcombine.high %v12919_v47, %v12919_v47  ;;  %v4533_v40 = vrot.slane %v22212_v1, 7 }
 0x1fe   :  { %11506 = vst.msk [vmem:[#allocation2 + $0x7] sm:$0x1] %vm3663_vm15, %v22983_v19  ;;  %v1217_v39 = vrot.slane %v1210_v14, %v21460_v43  ;;  %v1231_v59 = vrot.slane %v1224_v8, %v21460_v43  ;;  %v6494_v33 = vpack.c.bf16 %v6462_v51, %v6462_v51  ;;  %v23091_v28 = vrot.slane %v6493_v12, %v21460_v43 }
 0x1ff   :  { %11842 = vst.msk [vmem:[#allocation2 + $0x7] sm:$0x1] %vm4000_vm0, %v11796_v30  ;;  %13157 = vmatprep.mubr.bf16.mxu0 %v12926_v25  ;;  %v12928_v20 = vcombine.high %v12926_v25, %v12926_v25  ;;  %v2703_v19 = vcombine.high %v1210_v14, %v1210_v14  ;;  %v2711_v38 = vcombine.high %v1224_v8, %v1224_v8  ;;  %v28183_v22 = vunpack.c.l.b16 %v22187_v54 }
 0x201   :  { %v23100_v48 = vsel %vm1965_vm7, %v1969_v27, %v28183_v22 }
 0x202   :  { %15 = vsyncpa [#allocation7], 0  ;;  %6299 = vrot.lane.b32.xlu1 %v6148_v57, %s21105_s11  ;;  %v1658_v61 = vrot.slane %v1217_v39, %v28151_v26  ;;  %v1672_v37 = vrot.slane %v1231_v59, %v28151_v26  ;;  %v4029_v13 = vcombine.high %v1217_v39, %v1217_v39  ;;  %v4030_v15 = vcombine.high %v1231_v59, %v1231_v59  ;;  %v20505_v57 = vld [vmem:[%s27942_s2 + $0x180] sm:$0xff]   ;;  %v20507_v17 = vld [vmem:[%s27942_s2 + $0x108] sm:$0xff]  }
 0x203   :  { %9467 = vrot.lane.b32.xlu0 %v9316_v5, %s21105_s11  ;;  %v6726_v54 = vrot.slane %v23091_v28, %v21460_v43  ;;  %v23115_v31 = vrot.slane %v6494_v33, %v21460_v43  ;;  %13158 = vmatmul.mubr.bf16.vlgmr.msra.gmra.mrb[0].mxu0 %v12919_v47  ;;  %v23118_v18 = vrot.slane %v2703_v19, %v21460_v43  ;;  %v28184_v32 = vunpack.c.l.b16 %v22252_v29  ;;  %v20506_v47 = vld [vmem:[%s27942_s2 + $0x148] sm:$0xff]   ;;  %v20510_v59 = vld [vmem:[%s27942_s2 + $0x150] sm:$0xff]   ;;  %v23169_v19 = vpop.permute.xlu0 %2546 }
 0x204   :  { %v23128_v2 = vrot.slane %v1658_v61, %v28151_v26  ;;  %v23131_v5 = vrot.slane %v1672_v37, %v28151_v26  ;;  %v4223_v45 = vrot.slane %v4029_v13, %v28151_v26  ;;  %v4237_v10 = vrot.slane %v4030_v15, %v28151_v26  ;;  %19616 = vmatpush3.bf16.msra.mxu0 %v20503_v62  ;;  %v20508_v29 = vld [vmem:[%s27942_s2 + $0x1c8] sm:$0xff]   ;;  %v20512_v37 = vld [vmem:[%s27942_s2 + $0x1d0] sm:$0xff]  }
 0x205   :  { %v23125_v11 = vrot.slane %v28184_v32, 7  ;;  %v6740_v30 = vrot.slane %v23115_v31, %v21460_v43  ;;  %v7167_v14 = vrot.slane %v6726_v54, %v28151_v26  ;;  %v9533_v8 = vcombine.high %v6726_v54, %v6726_v54  ;;  %13197 = vmatprep.mubr.bf16.mxu1 %v12928_v20  ;;  %v20509_v20 = vld [vmem:[%s27942_s2 + $0x188] sm:$0xff]   ;;  %19617 = vmatprep.subr.bf16.mxu0 %v20506_v47  ;;  %v20511_v32 = vld [vmem:[%s27942_s2 + $0x110] sm:$0xff]  }
 0x206   :  { %v23145_v12 = vrot.slane %v2711_v38, %v21460_v43  ;;  %11803 = vrot.lane.b32.xlu1 %v11652_v56, %s21105_s11  ;;  %v28018_v27 = vunpack.c.l.b16 %v23128_v2  ;;  %v28020_v51 = vunpack.c.l.b16 %v23131_v5  ;;  %v4230_v25 = vrot.slane %v4223_v45, %v28151_v26  ;;  %13198 = vmatmul.mubr.bf16.vlgmr.msra.gmra.mrb[0].mxu1 %v12927_v60  ;;  %v23191_v45 = vpop.permute.xlu1 %5109 }
 0x207   :  { %v4244_v39 = vrot.slane %v4237_v10, %v28151_v26  ;;  %v23162_v33 = vrot.slane %v7167_v14, %v28151_v26  ;;  %v7181_v62 = vrot.slane %v6740_v30, %v28151_v26  ;;  %v9534_v50 = vcombine.high %v6740_v30, %v6740_v30  ;;  %19638 = vmatpush3.bf16.msra.mxu1 %v20505_v57  ;;  %v20514_v14 = vld [vmem:[%s27942_s2 + $0x158] sm:$0xff]  }
 0x208   :  { %v9727_v56 = vrot.slane %v9533_v8, %v28151_v26  ;;  %v2282_v60 = vrot.slane %v28018_v27, 1  ;;  %v23173_v38 = vunpack.c.l.b16 %v4230_v25  ;;  %v3037_v61 = vrot.slane %v23118_v18, %v28151_v26  ;;  %19639 = vmatprep.subr.bf16.mxu1 %v20508_v29  ;;  %19618 = vmatpush3.bf16.msra.mxu0 %v20507_v17 }
 0x209   :  { %v23175_v22 = vunpack.c.l.b16 %v4244_v39  ;;  %v23183_v13 = vrot.slane %v7181_v62, %v28151_v26  ;;  %v28017_v15 = vunpack.c.l.b16 %v23162_v33  ;;  %v9741_v57 = vrot.slane %v9534_v50, %v28151_v26  ;;  %19619 = vmatprep.subr.bf16.mxu0 %v20510_v59  ;;  %v20513_v62 = vld [vmem:[%s27942_s2 + $0x190] sm:$0xff]  }
 0x20a   :  { %v9734_v54 = vrot.slane %v9727_v56, %v28151_v26  ;;  %v2283_v10 = vsel %vm1965_vm7, %v28020_v51, %v2282_v60  ;;  %v4845_v47 = vrot.slane %v23173_v38, 1  ;;  %v23198_v29 = vrot.slane %v3037_v61, %v28151_v26  ;;  %v20516_v61 = vld [vmem:[%s27942_s2 + $0x1d8] sm:$0xff]  }
 0x20b   :  { %v3051_v30 = vrot.slane %v23145_v12, %v28151_v26  ;;  %v2308_v8 = vpack.c.b16 %v2283_v10, %v2283_v10  ;;  %v28019_v17 = vunpack.c.l.b16 %v23183_v13  ;;  %v7789_v25 = vrot.slane %v28017_v15, 1  ;;  %19640 = vmatpush3.bf16.msra.mxu1 %v20509_v20 }
 0x20c   :  { %v9748_v39 = vrot.slane %v9741_v57, %v28151_v26  ;;  %v4846_v59 = vsel %vm1965_vm7, %v23175_v22, %v4845_v47  ;;  %v23214_v50 = vunpack.c.l.b16 %v9734_v54  ;;  %v3323_v60 = vunpack.c.l.b16 %v23198_v29  ;;  %19641 = vmatprep.subr.bf16.mxu1 %v20512_v37  ;;  %19620 = vmatpush3.bf16.msra.mxu0 %v20511_v32  ;;  %v23229_v54 = vpop.permute.xlu0 %8053 }
 0x20d   :  { %v23217_v56 = vrot.slane %v3051_v30, %v28151_v26  ;;  %v2408_v20 = vrot.slane %v2308_v8, %v21460_v43  ;;  %v4871_v57 = vpack.c.b16 %v4846_v59, %v4846_v59  ;;  %v7790_v10 = vsel %vm1965_vm7, %v28019_v17, %v7789_v25  ;;  %19621 = vmatprep.subr.bf16.mxu0 %v20514_v14  ;;  %v20515_v8 = vld [vmem:[%s27942_s2 + $0x118] sm:$0xff]  }
 0x20e   :  { %v23227_v47 = vunpack.c.l.b16 %v9748_v39  ;;  %v7815_v30 = vpack.c.b16 %v7790_v10, %v7790_v10  ;;  %v10349_v29 = vrot.slane %v23214_v50, 1  ;;  %v5181_v15 = vcombine.high %v23118_v18, %v23118_v18 }
 0x20f   :  { %v3324_v37 = vunpack.c.l.b16 %v23217_v56  ;;  %v2415_v25 = vrot.slane %v2408_v20, %v21460_v43  ;;  %v4971_v39 = vrot.slane %v4871_v57, %v21460_v43  ;;  %v5182_v32 = vcombine.high %v23145_v12, %v23145_v12  ;;  %19642 = vmatpush3.bf16.msra.mxu1 %v20513_v62  ;;  %v23244_v56 = vpop.permute.xlu1 %10613  ;;  %v20517_v20 = vld [vmem:[%s27942_s2 + $0x198] sm:$0xff]  }
 0x210   :  { %v8209_v59 = vcombine.high %v23091_v28, %v23091_v28  ;;  %v7915_v18 = vrot.slane %v7815_v30, %v21460_v43  ;;  %v10350_v14 = vsel %vm1965_vm7, %v23227_v47, %v10349_v29  ;;  %v5375_v27 = vrot.slane %v5181_v15, %v28151_v26  ;;  %19643 = vmatprep.subr.bf16.mxu1 %v20516_v61  ;;  %v20518_v28 = vld [vmem:[%s27942_s2 + $0x160] sm:$0xff]  }
 0x211   :  { %v3355_v10 = vrot.slane %v3324_v37, 7  ;;  %2554 = vrot.lane.b32.xlu0 %v2415_v25, %s21103_s1  ;;  %v4978_v12 = vrot.slane %v4971_v39, %v21460_v43  ;;  %v10375_v62 = vpack.c.b16 %v10350_v14, %v10350_v14  ;;  %v5389_v57 = vrot.slane %v5182_v32, %v28151_v26  ;;  %v20520_v15 = vld [vmem:[%s27942_s2 + $0x1e0] sm:$0xff]   ;;  %19622 = vmatpush3.bf16.msra.mxu0 %v20515_v8 }
 0x212   :  { %v8216_v30 = vrot.slane %v8209_v59, %v21460_v43  ;;  %v7922_v61 = vrot.slane %v7915_v18, %v21460_v43  ;;  %v5382_v17 = vrot.slane %v5375_v27, %v28151_v26  ;;  %v8217_v25 = vcombine.high %v23115_v31, %v23115_v31  ;;  %v20519_v39 = vld [vmem:[%s27942_s2 + $0x120] sm:$0xff]   ;;  %v20522_v27 = vld [vmem:[%s27942_s2 + $0x168] sm:$0xff]   ;;  %19623 = vmatprep.subr.bf16.mxu0 %v20518_v28 }
 0x213   :  { %v3356_v29 = vsel %vm1965_vm7, %v3355_v10, %v3323_v60  ;;  %5117 = vrot.lane.b32.xlu1 %v4978_v12, %s21103_s1  ;;  %v10475_v32 = vrot.slane %v10375_v62, %v21460_v43  ;;  %v5396_v14 = vrot.slane %v5389_v57, %v28151_v26  ;;  %v23278_v10 = vpop.permute.xlu0 %3619  ;;  %v3692_v49 = vrot.slane %v3323_v60, 1  ;;  %19644 = vmatpush3.bf16.msra.mxu1 %v20517_v20  ;;  %v20521_v12 = vld [vmem:[%s27942_s2 + $0x1a0] sm:$0xff]  }
 0x214   :  { %v3381_v59 = vpack.c.b16 %v3356_v29, %v3356_v29  ;;  %v8543_v18 = vrot.slane %v8216_v30, %v28151_v26  ;;  %v5661_v31 = vunpack.c.l.b16 %v5382_v17  ;;  %v8224_v8 = vrot.slane %v8217_v25, %v21460_v43  ;;  %19645 = vmatprep.subr.bf16.mxu1 %v20520_v15  ;;  %v23288_v17 = vpop.permute.xlu1 %5957  ;;  %v20524_v25 = vld [vmem:[%s27942_s2 + $0x1e8] sm:$0xff]  }
 0x215   :  { %v10685_v51 = vcombine.high %v8216_v30, %v8216_v30  ;;  %8061 = vrot.lane.b32.xlu0 %v7922_v61, %s21103_s1  ;;  %v10482_v62 = vrot.slane %v10475_v32, %v21460_v43  ;;  %v5662_v29 = vunpack.c.l.b16 %v5396_v14  ;;  %v3693_v30 = vsel %vm1965_vm7, %v3324_v37, %v3692_v49  ;;  %19624 = vmatpush3.bf16.msra.mxu0 %v20519_v39  ;;  %v20523_v61 = vld [vmem:[%s27942_s2 + $0x128] sm:$0xff]   ;;  %v20526_v49 = vld [vmem:[%s27942_s2 + $0x170] sm:$0xff]  }
 0x216   :  { %v3481_v57 = vrot.slane %v3381_v59, %v21460_v43  ;;  %v8550_v23 = vrot.slane %v8543_v18, %v28151_v26  ;;  %v8557_v60 = vrot.slane %v8224_v8, %v28151_v26  ;;  %v10686_v20 = vcombine.high %v8224_v8, %v8224_v8  ;;  %19625 = vmatprep.subr.bf16.mxu0 %v20522_v27  ;;  %v20525_v8 = vld [vmem:[%s27942_s2 + $0x1a8] sm:$0xff]  }
 0x217   :  { %v10879_v28 = vrot.slane %v10685_v51, %v28151_v26  ;;  %10621 = vrot.lane.b32.xlu1 %v10482_v62, %s21103_s1  ;;  %v5693_v32 = vrot.slane %v5662_v29, 7  ;;  %v3718_v14 = vpack.c.b16 %v3693_v30, %v3693_v30  ;;  %v6029_v18 = vrot.slane %v5661_v31, 1  ;;  %19646 = vmatpush3.bf16.msra.mxu1 %v20521_v12  ;;  %v23321_v12 = vpop.permute.xlu0 %9125 }
 0x218   :  { %v3488_v15 = vrot.slane %v3481_v57, %v21460_v43  ;;  %v8829_v59 = vunpack.c.l.b16 %v8550_v23  ;;  %v8564_v51 = vrot.slane %v8557_v60, %v28151_v26  ;;  %v10893_v39 = vrot.slane %v10686_v20, %v28151_v26  ;;  %v20528_v60 = vld [vmem:[%s27942_s2 + $0x1f0] sm:$0xff]   ;;  %19647 = vmatprep.subr.bf16.mxu1 %v20524_v25 }
 0x219   :  { %v10886_v37 = vrot.slane %v10879_v28, %v28151_v26  ;;  %v5694_v23 = vsel %vm1965_vm7, %v5693_v32, %v5661_v31  ;;  %v23313_v27 = vrot.slane %v3718_v14, %v21460_v43  ;;  %v1999_v62 = vpack.c.b16 %v23100_v48, %v23100_v48  ;;  %19626 = vmatpush3.bf16.msra.mxu0 %v20523_v61  ;;  %v20527_v48 = vld [vmem:[%s27942_s2 + $0x130] sm:$0xff]   ;;  %v23334_v32 = vpop.permute.xlu1 %11461  ;;  %v20530_v61 = vld [vmem:[%s27942_s2 + $0x178] sm:$0xff]  }
 0x21a   :  { %3627 = vrot.lane.b32.xlu0 %v3488_v15, %s21104_s10  ;;  %v4534_v57 = vsel %vm1965_vm7, %v4533_v40, %v22205_v58  ;;  %v5719_v20 = vpack.c.b16 %v5694_v23, %v5694_v23  ;;  %v8830_v28 = vunpack.c.l.b16 %v8564_v51  ;;  %v10900_v31 = vrot.slane %v10893_v39, %v28151_v26  ;;  %19627 = vmatprep.subr.bf16.mxu0 %v20526_v49  ;;  %v20529_v49 = vld [vmem:[%s27942_s2 + $0x1b0] sm:$0xff]  }
 0x21b   :  { %v11165_v30 = vunpack.c.l.b16 %v10886_v37  ;;  %v3825_v58 = vrot.slane %v23313_v27, %v21460_v43  ;;  %v6030_v1 = vsel %vm1965_vm7, %v5662_v29, %v6029_v18  ;;  %v2047_v40 = vrot.slane %v1999_v62, %v21460_v43  ;;  %19648 = vmatpush3.bf16.msra.mxu1 %v20525_v8  ;;  %v20531_v8 = vld [vmem:[%s27942_s2 + $0x138] sm:$0xff]  }
 0x21c   :  { %v4563_v15 = vpack.c.b16 %v4534_v57, %v4534_v57  ;;  %v5819_v25 = vrot.slane %v5719_v20, %v21460_v43  ;;  %v8861_v14 = vrot.slane %v8830_v28, 7  ;;  %v11166_v51 = vunpack.c.l.b16 %v10900_v31  ;;  %19649 = vmatprep.subr.bf16.mxu1 %v20528_v60 }
 0x21d   :  { %v6055_v37 = vpack.c.b16 %v6030_v1, %v6030_v1  ;;  %v2054_v39 = vrot.slane %v2047_v40, %v21460_v43  ;;  %v9197_v18 = vrot.slane %v8829_v59, 1  ;;  %v11533_v23 = vrot.slane %v11165_v30, 1  ;;  %19628 = vmatpush3.bf16.msra.mxu0 %v20527_v48 }
 0x21e   :  { %v4611_v29 = vrot.slane %v4563_v15, %v21460_v43  ;;  %v5826_v62 = vrot.slane %v5819_v25, %v21460_v43  ;;  %v8862_v57 = vsel %vm1965_vm7, %v8861_v14, %v8829_v59  ;;  %v11197_v20 = vrot.slane %v11166_v51, 7  ;;  %19629 = vmatprep.subr.bf16.mxu0 %v20530_v61  ;;  %v3957_v59 = vpop.permute.xlu0 %3956  ;;  %v20532_v25 = vld [vmem:[%s27942_s2 + $0x1f8] sm:$0xff]   ;;  %v20534_v61 = vld [vmem:[%s27942_s2 + $0x240] sm:$0xff]  }
 0x21f   :  { %v23348_v31 = vrot.slane %v6055_v37, %v21460_v43  ;;  %v8887_v1 = vpack.c.b16 %v8862_v57, %v8862_v57  ;;  %2256 = vst.msk [vmem:[#allocation2 + $0x8] sm:$0x1] %vm2253_vm11, %v2054_v39  ;;  %v9198_v40 = vsel %vm1965_vm7, %v8830_v28, %v9197_v18  ;;  %v11534_v15 = vsel %vm1965_vm7, %v11166_v51, %v11533_v23  ;;  %v28186_v18 = vld [vmem:[#allocation36_spill] sm:$0xff] }
 0x220   :  { %v4618_v60 = vrot.slane %v4611_v29, %v21460_v43  ;;  %5965 = vrot.lane.b32.xlu1 %v5826_v62, %s21104_s10  ;;  %v11198_v48 = vsel %vm1965_vm7, %v11197_v20, %v11165_v30  ;;  %2593 = vst.msk [vmem:[#allocation2 + $0x8] sm:$0x1] %vm2590_vm12, %v23169_v19  ;;  %v9223_v37 = vpack.c.b16 %v9198_v40, %v9198_v40  ;;  %v28185_v29 = vunpack.c.l.b16 %v22239_v63  ;;  %v6294_v19 = vpop.permute.xlu1 %6293  ;;  %v20533_v62 = vld [vmem:[%s27942_s2 + $0x1b8] sm:$0xff]   ;;  %v28187_v20 = vld [vmem:[#allocation14_spill] sm:$0xff] }
 0x221   :  { %v6162_v14 = vrot.slane %v23348_v31, %v21460_v43  ;;  %v11559_v28 = vpack.c.b16 %v11534_v15, %v11534_v15  ;;  %v8987_v51 = vrot.slane %v8887_v1, %v21460_v43  ;;  %v11223_v39 = vpack.c.b16 %v11198_v48, %v11198_v48  ;;  %3666 = vst.msk [vmem:[#allocation2 + $0x8] sm:$0x1] %vm3663_vm15, %v23278_v10  ;;  %v20536_v10 = vld [vmem:[%s27942_s2 + $0x2c0] sm:$0xff]  }
 0x222   :  { %4819 = vst.msk [vmem:[#allocation2 + $0x9] sm:$0x1] %vm2253_vm11, %v4618_v60  ;;  %v7478_v30 = vsel %vm1965_vm7, %v23125_v11, %v28185_v29  ;;  %v10037_v23 = vrot.slane %v28186_v18, 7  ;;  %19650 = vmatpush3.bf16.msra.mxu1 %v20529_v49  ;;  %v23384_v57 = vrot.slane %v9223_v37, %v21460_v43  ;;  %v858_v1 = vadd.f32 %v21794_v3, %v28187_v20  ;;  %v28188_v60 = vld [vmem:[#allocation35_spill] sm:$0xff]  ;;  %v28189_v15 = vld [vmem:[#allocation13_spill] sm:$0xff] }
 0x223   :  { %5155 = vst.msk [vmem:[#allocation2 + $0x9] sm:$0x1] %vm2590_vm12, %v23191_v45  ;;  %v23387_v63 = vrot.slane %v11559_v28, %v21460_v43  ;;  %v7507_v11 = vpack.c.b16 %v7478_v30, %v7478_v30  ;;  %19630 = vmatpush3.bf16.msra.mxu0 %v20531_v8  ;;  %v8994_v49 = vrot.slane %v8987_v51, %v21460_v43  ;;  %v19009_v51 = vld.sshfl [vmem:[#allocation2 + $0x4] sm:$0x33 pattern:$0x75316420] }
 0x224   :  { %4003 = vst.msk [vmem:[#allocation2 + $0x8] sm:$0x1] %vm4000_vm0, %v3957_v59  ;;  %v11323_v45 = vrot.slane %v11223_v39, %v21460_v43  ;;  %v10038_v40 = vsel %vm1965_vm7, %v10037_v23, %v28188_v60  ;;  %v859_v48 = vadd.f32 %v21782_v44, %v28189_v15  ;;  %19651 = vmatprep.subr.bf16.mxu1 %v20532_v25  ;;  %vm890_vm8 = vcmp.ge.f32.partialorder %v858_v1, 0.0 }
 0x225   :  { %6003 = vst.msk [vmem:[#allocation2 + $0x9] sm:$0x1] %vm3663_vm15, %v23288_v17  ;;  %v9330_v8 = vrot.slane %v23384_v57, %v21460_v43  ;;  %v11666_v59 = vrot.slane %v23387_v63, %v21460_v43  ;;  %v7555_v37 = vrot.slane %v7507_v11, %v21460_v43  ;;  %v10067_v28 = vpack.c.b16 %v10038_v40, %v10038_v40 }
 0x226   :  { %6339 = vst.msk [vmem:[#allocation2 + $0x9] sm:$0x1] %vm4000_vm0, %v6294_v19  ;;  %19659 = vmatprep.subr.bf16.mxu0 %v20534_v61  ;;  %9133 = vrot.lane.b32.xlu0 %v8994_v49, %s21104_s10  ;;  %v11330_v39 = vrot.slane %v11323_v45, %v21460_v43  ;;  %vm891_vm9 = vcmp.ge.f32.partialorder %v859_v48, 0.0  ;;  %v922_v17 = vmul.f32 0.33, %v858_v1  ;;  %v6367_v18 = vadd.f32 %v21792_v6, %v28187_v20  ;;  %v9462_v45 = vpop.permute.xlu0 %9461 }
 0x227   :  { %19652 = vmatpush3.bf16.msra.mxu1 %v20533_v62  ;;  %v7562_v25 = vrot.slane %v7555_v37, %v21460_v43  ;;  %v10115_v29 = vrot.slane %v10067_v28, %v21460_v43  ;;  %v923_v30 = vmul.f32 0.33, %v859_v48  ;;  %v6368_v23 = vadd.f32 %v21780_v42, %v28189_v15 }
 0x228   :  { %19681 = vmatprep.subr.bf16.mxu1 %v20536_v10  ;;  %11469 = vrot.lane.b32.xlu1 %v11330_v39, %s21104_s10  ;;  %v954_v61 = vsel %vm890_vm8, %v858_v1, %v922_v17  ;;  %v13213_v19 = vcombine.high %v19009_v51, %v19009_v51  ;;  %v23419_v57 = vrot.slane %v19009_v51, %v21460_v43  ;;  %vm6399_vm10 = vcmp.ge.f32.partialorder %v6367_v18, 0.0 }
 0x229   :  { %7763 = vst.msk [vmem:[#allocation2 + $0xa] sm:$0x1] %vm2253_vm11, %v7562_v25  ;;  %v10122_v62 = vrot.slane %v10115_v29, %v21460_v43  ;;  %v955_v11 = vsel %vm891_vm9, %v859_v48, %v923_v30  ;;  %v986_v49 = vpack.c.bf16 %v954_v61, %v954_v61  ;;  %vm6400_vm13 = vcmp.ge.f32.partialorder %v6368_v23, 0.0 }
 0x22a   :  { %3964 = vrot.lane.b32.xlu0 %v3825_v58, %s21105_s11  ;;  %8099 = vst.msk [vmem:[#allocation2 + $0xa] sm:$0x1] %vm2590_vm12, %v23229_v54  ;;  %v987_v20 = vpack.c.bf16 %v955_v11, %v955_v11  ;;  %v6431_v1 = vmul.f32 0.33, %v6367_v18  ;;  %v6432_v10 = vmul.f32 0.33, %v6368_v23  ;;  %v13227_v40 = vrot.slane %v13213_v19, %v21460_v43  ;;  %v11798_v58 = vpop.permute.xlu1 %11797 }
 0x22b   :  { %10323 = vst.msk [vmem:[#allocation2 + $0xb] sm:$0x1] %vm2253_vm11, %v10122_v62  ;;  %v1238_v60 = vrot.slane %v986_v49, %v21460_v43  ;;  %v13228_v27 = vcombine.high %v23419_v57, %v23419_v57  ;;  %v28190_v15 = vunpack.c.l.b16 %v22450_v21  ;;  %v28191_v29 = vunpack.c.l.b16 %v22497_v55  ;;  %v20538_v55 = vld [vmem:[%s27942_s2 + $0x248] sm:$0xff]  }
 0x22c   :  { %9171 = vst.msk [vmem:[#allocation2 + $0xa] sm:$0x1] %vm3663_vm15, %v23321_v12  ;;  %6301 = vrot.lane.b32.xlu1 %v6162_v14, %s21105_s11  ;;  %v1252_v48 = vrot.slane %v987_v20, %v21460_v43  ;;  %v6463_v12 = vsel %vm6399_vm10, %v6367_v18, %v6431_v1  ;;  %v6464_v37 = vsel %vm6400_vm13, %v6368_v23, %v6432_v10  ;;  %v20537_v23 = vld [vmem:[%s27942_s2 + $0x280] sm:$0xff]   ;;  %v20540_v49 = vld [vmem:[%s27942_s2 + $0x2c8] sm:$0xff]  }
 0x22d   :  { %v23438_v54 = vrot.slane %v28190_v15, 7  ;;  %10659 = vst.msk [vmem:[#allocation2 + $0xb] sm:$0x1] %vm2590_vm12, %v23244_v56  ;;  %v1245_v21 = vrot.slane %v1238_v60, %v21460_v43  ;;  %v6495_v51 = vpack.c.bf16 %v6463_v12, %v6463_v12  ;;  %v6496_v39 = vpack.c.bf16 %v6464_v37, %v6464_v37  ;;  %13458 = vmatprep.mubr.bf16.mxu0 %v13227_v40  ;;  %v20535_v56 = vld [vmem:[%s27942_s2 + $0x200] sm:$0xff]   ;;  %v20539_v1 = vld [vmem:[%s27942_s2 + $0x208] sm:$0xff]   ;;  %v20542_v15 = vld [vmem:[%s27942_s2 + $0x250] sm:$0xff]  }
 0x22e   :  { %9507 = vst.msk [vmem:[#allocation2 + $0xa] sm:$0x1] %vm4000_vm0, %v9462_v45  ;;  %v13229_v17 = vcombine.high %v13227_v40, %v13227_v40  ;;  %9469 = vrot.lane.b32.xlu0 %v9330_v8, %s21105_s11  ;;  %v1259_v31 = vrot.slane %v1252_v48, %v21460_v43  ;;  %v2719_v14 = vcombine.high %v1238_v60, %v1238_v60  ;;  %v23462_v30 = vrot.slane %v28191_v29, 7 }
 0x22f   :  { %11507 = vst.msk [vmem:[#allocation2 + $0xb] sm:$0x1] %vm3663_vm15, %v23334_v32  ;;  %v2727_v25 = vcombine.high %v1252_v48, %v1252_v48  ;;  %13459 = vmatmul.mubr.bf16.vlgmr.msra.gmra.mrb[4].mxu0 %v23419_v57  ;;  %v1686_v32 = vrot.slane %v1245_v21, %v28151_v26  ;;  %v4031_v18 = vcombine.high %v1245_v21, %v1245_v21 }
 0x230   :  { %11843 = vst.msk [vmem:[#allocation2 + $0xb] sm:$0x1] %vm4000_vm0, %v11798_v58  ;;  %v23466_v61 = vrot.slane %v6495_v51, %v21460_v43  ;;  %v23469_v8 = vrot.slane %v6496_v39, %v21460_v43  ;;  %13498 = vmatprep.mubr.bf16.mxu1 %v13229_v17  ;;  %11805 = vrot.lane.b32.xlu1 %v11666_v59, %s21105_s11  ;;  %v20541_v51 = vld [vmem:[%s27942_s2 + $0x288] sm:$0xff]  }
 0x231   :  { %v1700_v19 = vrot.slane %v1259_v31, %v28151_v26  ;;  %v4032_v57 = vcombine.high %v1259_v31, %v1259_v31  ;;  %v23483_v62 = vrot.slane %v2719_v14, %v21460_v43  ;;  %v23486_v11 = vrot.slane %v2727_v25, %v21460_v43  ;;  %19660 = vmatpush3.bf16.msra.mxu0 %v20535_v56  ;;  %v20544_v31 = vld [vmem:[%s27942_s2 + $0x2d0] sm:$0xff]  }
 0x232   :  { %v23492_v45 = vrot.slane %v1686_v32, %v28151_v26  ;;  %v4251_v20 = vrot.slane %v4031_v18, %v28151_v26  ;;  %v6754_v63 = vrot.slane %v23466_v61, %v21460_v43  ;;  %v6768_v59 = vrot.slane %v23469_v8, %v21460_v43  ;;  %13499 = vmatmul.mubr.bf16.vlgmr.msra.gmra.mrb[4].mxu1 %v13228_v27  ;;  %v23535_v18 = vpop.permute.xlu0 %2548 }
 0x233   :  { %v23503_v10 = vrot.slane %v1700_v19, %v28151_v26  ;;  %v4265_v60 = vrot.slane %v4032_v57, %v28151_v26  ;;  %v3065_v40 = vrot.slane %v23483_v62, %v28151_v26  ;;  %v3079_v58 = vrot.slane %v23486_v11, %v28151_v26  ;;  %19682 = vmatpush3.bf16.msra.mxu1 %v20537_v23  ;;  %v20543_v23 = vld [vmem:[%s27942_s2 + $0x210] sm:$0xff]  }
 0x234   :  { %v28023_v48 = vunpack.c.l.b16 %v23492_v45  ;;  %v4258_v12 = vrot.slane %v4251_v20, %v28151_v26  ;;  %v7195_v37 = vrot.slane %v6754_v63, %v28151_v26  ;;  %v7209_v21 = vrot.slane %v6768_v59, %v28151_v26  ;;  %19661 = vmatprep.subr.bf16.mxu0 %v20538_v55  ;;  %19683 = vmatprep.subr.bf16.mxu1 %v20540_v49  ;;  %v20546_v20 = vld [vmem:[%s27942_s2 + $0x258] sm:$0xff]  }
 0x235   :  { %v28026_v27 = vunpack.c.l.b16 %v23503_v10  ;;  %v4272_v39 = vrot.slane %v4265_v60, %v28151_v26  ;;  %v9535_v17 = vcombine.high %v6754_v63, %v6754_v63  ;;  %v9536_v56 = vcombine.high %v6768_v59, %v6768_v59  ;;  %19662 = vmatpush3.bf16.msra.mxu0 %v20539_v1 }
 0x236   :  { %v2284_v14 = vrot.slane %v28023_v48, 1  ;;  %v23527_v25 = vunpack.c.l.b16 %v4258_v12  ;;  %v23530_v29 = vrot.slane %v7195_v37, %v28151_v26  ;;  %v23533_v32 = vrot.slane %v7209_v21, %v28151_v26  ;;  %19663 = vmatprep.subr.bf16.mxu0 %v20542_v15 }
 0x237   :  { %v23540_v55 = vunpack.c.l.b16 %v4272_v39  ;;  %v9755_v19 = vrot.slane %v9535_v17, %v28151_v26  ;;  %v9769_v57 = vrot.slane %v9536_v56, %v28151_v26  ;;  %v23545_v49 = vrot.slane %v3065_v40, %v28151_v26  ;;  %19684 = vmatpush3.bf16.msra.mxu1 %v20541_v51  ;;  %v20545_v40 = vld [vmem:[%s27942_s2 + $0x290] sm:$0xff]   ;;  %v23564_v39 = vpop.permute.xlu1 %5111  ;;  %v20548_v17 = vld [vmem:[%s27942_s2 + $0x2d8] sm:$0xff]  }
 0x238   :  { %v2285_v63 = vsel %vm1965_vm7, %v28026_v27, %v2284_v14  ;;  %v4847_v59 = vrot.slane %v23527_v25, 1  ;;  %v28024_v1 = vunpack.c.l.b16 %v23530_v29  ;;  %v28025_v60 = vunpack.c.l.b16 %v23533_v32  ;;  %19685 = vmatprep.subr.bf16.mxu1 %v20544_v31 }
 0x239   :  { %v2309_v15 = vpack.c.b16 %v2285_v63, %v2285_v63  ;;  %v9762_v12 = vrot.slane %v9755_v19, %v28151_v26  ;;  %v9776_v37 = vrot.slane %v9769_v57, %v28151_v26  ;;  %v23562_v21 = vrot.slane %v3079_v58, %v28151_v26  ;;  %19664 = vmatpush3.bf16.msra.mxu0 %v20543_v23  ;;  %v20547_v58 = vld [vmem:[%s27942_s2 + $0x218] sm:$0xff]  }
 0x23a   :  { %v4848_v51 = vsel %vm1965_vm7, %v23540_v55, %v4847_v59  ;;  %v7791_v56 = vrot.slane %v28024_v1, 1  ;;  %v3325_v14 = vunpack.c.l.b16 %v23545_v49  ;;  %v5183_v19 = vcombine.high %v23483_v62, %v23483_v62  ;;  %19665 = vmatprep.subr.bf16.mxu0 %v20546_v20  ;;  %v23591_v1 = vpop.permute.xlu0 %8055  ;;  %v20550_v20 = vld [vmem:[%s27942_s2 + $0x260] sm:$0xff]  }
 0x23b   :  { %v2422_v31 = vrot.slane %v2309_v15, %v21460_v43  ;;  %v4872_v57 = vpack.c.b16 %v4848_v51, %v4848_v51  ;;  %v23580_v63 = vunpack.c.l.b16 %v9762_v12  ;;  %v23582_v48 = vunpack.c.l.b16 %v9776_v37  ;;  %19686 = vmatpush3.bf16.msra.mxu1 %v20545_v40  ;;  %v20549_v15 = vld [vmem:[%s27942_s2 + $0x298] sm:$0xff]  }
 0x23c   :  { %v7792_v49 = vsel %vm1965_vm7, %v28025_v60, %v7791_v56  ;;  %v3326_v59 = vunpack.c.l.b16 %v23562_v21  ;;  %v5184_v62 = vcombine.high %v23486_v11, %v23486_v11  ;;  %v5403_v23 = vrot.slane %v5183_v19, %v28151_v26  ;;  %19687 = vmatprep.subr.bf16.mxu1 %v20548_v17  ;;  %v20551_v60 = vld [vmem:[%s27942_s2 + $0x220] sm:$0xff]  }
 0x23d   :  { %28192 = vst [vmem:[#allocation12_spill] sm:$0xff] %v23580_v63  ;;  %v2429_v12 = vrot.slane %v2422_v31, %v21460_v43  ;;  %v4985_v37 = vrot.slane %v4872_v57, %v21460_v43  ;;  %v7816_v21 = vpack.c.b16 %v7792_v49, %v7792_v49  ;;  %v10351_v11 = vrot.slane %v23580_v63, 1  ;;  %19666 = vmatpush3.bf16.msra.mxu0 %v20547_v58  ;;  %v20552_v31 = vld [vmem:[%s27942_s2 + $0x2e0] sm:$0xff]   ;;  %v23619_v58 = vpop.permute.xlu1 %10615 }
 0x23e   :  { %v3357_v51 = vrot.slane %v3326_v59, 7  ;;  %v5410_v56 = vrot.slane %v5403_v23, %v28151_v26  ;;  %v5417_v40 = vrot.slane %v5184_v62, %v28151_v26  ;;  %v8225_v19 = vcombine.high %v23466_v61, %v23466_v61  ;;  %19667 = vmatprep.subr.bf16.mxu0 %v20550_v20  ;;  %v23637_v28 = vpop.permute.xlu0 %3621 }
 0x23f   :  { %2556 = vrot.lane.b32.xlu0 %v2429_v12, %s21103_s1  ;;  %v4992_v17 = vrot.slane %v4985_v37, %v21460_v43  ;;  %v7929_v57 = vrot.slane %v7816_v21, %v21460_v43  ;;  %v10352_v49 = vsel %vm1965_vm7, %v23582_v48, %v10351_v11  ;;  %v8233_v61 = vcombine.high %v23469_v8, %v23469_v8  ;;  %v20553_v12 = vld [vmem:[%s27942_s2 + $0x2a0] sm:$0xff]   ;;  %v20554_v37 = vld [vmem:[%s27942_s2 + $0x268] sm:$0xff]  }
 0x240   :  { %v10376_v62 = vpack.c.b16 %v10352_v49, %v10352_v49  ;;  %v3358_v23 = vsel %vm1965_vm7, %v3357_v51, %v3325_v14  ;;  %v5424_v27 = vrot.slane %v5417_v40, %v28151_v26  ;;  %v5663_v34 = vunpack.c.l.b16 %v5410_v56  ;;  %19688 = vmatpush3.bf16.msra.mxu1 %v20549_v15  ;;  %v20556_v15 = vld [vmem:[%s27942_s2 + $0x2e8] sm:$0xff]  }
 0x241   :  { %5119 = vrot.lane.b32.xlu1 %v4992_v17, %s21103_s1  ;;  %v7936_v8 = vrot.slane %v7929_v57, %v21460_v43  ;;  %v3382_v21 = vpack.c.b16 %v3358_v23, %v3358_v23  ;;  %v8232_v11 = vrot.slane %v8225_v19, %v21460_v43  ;;  %v8240_v51 = vrot.slane %v8233_v61, %v21460_v43 }
 0x242   :  { %v10489_v20 = vrot.slane %v10376_v62, %v21460_v43  ;;  %v5664_v56 = vunpack.c.l.b16 %v5424_v27  ;;  %v3694_v40 = vrot.slane %v3325_v14, 1  ;;  %v6031_v49 = vrot.slane %v5663_v34, 1  ;;  %19668 = vmatpush3.bf16.msra.mxu0 %v20551_v60  ;;  %19689 = vmatprep.subr.bf16.mxu1 %v20552_v31  ;;  %v20555_v62 = vld [vmem:[%s27942_s2 + $0x228] sm:$0xff]  }
 0x243   :  { %8063 = vrot.lane.b32.xlu0 %v7936_v8, %s21103_s1  ;;  %v3495_v17 = vrot.slane %v3382_v21, %v21460_v43  ;;  %v8571_v19 = vrot.slane %v8232_v11, %v28151_v26  ;;  %v8585_v57 = vrot.slane %v8240_v51, %v28151_v26  ;;  %v10687_v61 = vcombine.high %v8232_v11, %v8232_v11  ;;  %v20557_v31 = vld [vmem:[%s27942_s2 + $0x2a8] sm:$0xff]  }
 0x244   :  { %v10496_v27 = vrot.slane %v10489_v20, %v21460_v43  ;;  %v5695_v14 = vrot.slane %v5664_v56, 7  ;;  %v10688_v23 = vcombine.high %v8240_v51, %v8240_v51  ;;  %v3695_v60 = vsel %vm1965_vm7, %v3326_v59, %v3694_v40  ;;  %19690 = vmatpush3.bf16.msra.mxu1 %v20553_v12  ;;  %19669 = vmatprep.subr.bf16.mxu0 %v20554_v37  ;;  %v23657_v20 = vpop.permute.xlu1 %5959  ;;  %v20558_v59 = vld [vmem:[%s27942_s2 + $0x270] sm:$0xff]  }
 0x245   :  { %v3502_v8 = vrot.slane %v3495_v17, %v21460_v43  ;;  %v8578_v21 = vrot.slane %v8571_v19, %v28151_v26  ;;  %v23654_v11 = vrot.slane %v8585_v57, %v28151_v26  ;;  %v10907_v63 = vrot.slane %v10687_v61, %v28151_v26  ;;  %19691 = vmatprep.subr.bf16.mxu1 %v20556_v15  ;;  %v20560_v12 = vld [vmem:[%s27942_s2 + $0x2f0] sm:$0xff]  }
 0x246   :  { %10623 = vrot.lane.b32.xlu1 %v10496_v27, %s21103_s1  ;;  %v5696_v37 = vsel %vm1965_vm7, %v5695_v14, %v5663_v34  ;;  %v10921_v51 = vrot.slane %v10688_v23, %v28151_v26  ;;  %v3719_v40 = vpack.c.b16 %v3695_v60, %v3695_v60  ;;  %v6032_v17 = vsel %vm1965_vm7, %v5664_v56, %v6031_v49  ;;  %v20559_v27 = vld [vmem:[%s27942_s2 + $0x230] sm:$0xff]   ;;  %v23683_v60 = vpop.permute.xlu0 %9127 }
 0x247   :  { %3629 = vrot.lane.b32.xlu0 %v3502_v8, %s21104_s10  ;;  %v5720_v15 = vpack.c.b16 %v5696_v37, %v5696_v37  ;;  %v8831_v19 = vunpack.c.l.b16 %v8578_v21  ;;  %v8832_v57 = vunpack.c.l.b16 %v23654_v11  ;;  %v10914_v61 = vrot.slane %v10907_v63, %v28151_v26  ;;  %19670 = vmatpush3.bf16.msra.mxu0 %v20555_v62  ;;  %v20561_v63 = vld [vmem:[%s27942_s2 + $0x2b0] sm:$0xff]   ;;  %v20562_v62 = vld [vmem:[%s27942_s2 + $0x278] sm:$0xff]  }
 0x248   :  { %v10928_v34 = vrot.slane %v10921_v51, %v28151_v26  ;;  %v23677_v14 = vrot.slane %v3719_v40, %v21460_v43  ;;  %v6056_v23 = vpack.c.b16 %v6032_v17, %v6032_v17  ;;  %v28193_v56 = vunpack.c.l.b16 %v22437_v0  ;;  %19692 = vmatpush3.bf16.msra.mxu1 %v20557_v31  ;;  %19671 = vmatprep.subr.bf16.mxu0 %v20558_v59  ;;  %v20564_v0 = vld [vmem:[%s27942_s2 + $0x2f8] sm:$0xff]  }
 0x249   :  { %v5833_v8 = vrot.slane %v5720_v15, %v21460_v43  ;;  %v8863_v21 = vrot.slane %v8832_v57, 7  ;;  %v11167_v11 = vunpack.c.l.b16 %v10914_v61  ;;  %19693 = vmatprep.subr.bf16.mxu1 %v20560_v12  ;;  %v28194_v40 = vrot.slane %v22483_v4, 7 }
 0x24a   :  { %v1972_v49 = vsel %vm1965_vm7, %v23438_v54, %v28193_v56  ;;  %v11168_v54 = vunpack.c.l.b16 %v10928_v34  ;;  %v23698_v51 = vrot.slane %v6056_v23, %v21460_v43  ;;  %v23707_v56 = vpop.permute.xlu1 %11463  ;;  %v20563_v34 = vld [vmem:[%s27942_s2 + $0x238] sm:$0xff]   ;;  %v3959_v4 = vpop.permute.xlu0 %3958 }
 0x24b   :  { %v2000_v37 = vpack.c.b16 %v1972_v49, %v1972_v49  ;;  %v4536_v17 = vsel %vm1965_vm7, %v28194_v40, %v22476_v36  ;;  %v5840_v15 = vrot.slane %v5833_v8, %v21460_v43  ;;  %v8864_v59 = vsel %vm1965_vm7, %v8863_v21, %v8831_v19  ;;  %19672 = vmatpush3.bf16.msra.mxu0 %v20559_v27  ;;  %v20565_v8 = vld [vmem:[%s27942_s2 + $0x2b8] sm:$0xff]   ;;  %v20566_v27 = vld [vmem:[%s27942_s2 + $0x340] sm:$0xff]  }
 0x24c   :  { %v4564_v61 = vpack.c.b16 %v4536_v17, %v4536_v17  ;;  %v8888_v23 = vpack.c.b16 %v8864_v59, %v8864_v59  ;;  %v11199_v49 = vrot.slane %v11168_v54, 7  ;;  %v9199_v36 = vrot.slane %v8831_v19, 1  ;;  %19694 = vmatpush3.bf16.msra.mxu1 %v20561_v63  ;;  %19673 = vmatprep.subr.bf16.mxu0 %v20562_v62  ;;  %v20568_v63 = vld [vmem:[%s27942_s2 + $0x3c0] sm:$0xff]  }
 0x24d   :  { %v2061_v12 = vrot.slane %v2000_v37, %v21460_v43  ;;  %5967 = vrot.lane.b32.xlu1 %v5840_v15, %s21104_s10  ;;  %v11535_v40 = vrot.slane %v11167_v11, 1  ;;  %v28195_v17 = vunpack.c.l.b16 %v22486_v35  ;;  %19695 = vmatprep.subr.bf16.mxu1 %v20564_v0 }
 0x24e   :  { %v4625_v37 = vrot.slane %v4564_v61, %v21460_v43  ;;  %v9001_v62 = vrot.slane %v8888_v23, %v21460_v43  ;;  %v11200_v59 = vsel %vm1965_vm7, %v11199_v49, %v11167_v11  ;;  %v9200_v15 = vsel %vm1965_vm7, %v8832_v57, %v9199_v36  ;;  %v28196_v57 = vld [vmem:[#allocation38_spill] sm:$0xff] }
 0x24f   :  { %v2068_v21 = vrot.slane %v2061_v12, %v21460_v43  ;;  %v7480_v19 = vsel %vm1965_vm7, %v23462_v30, %v28195_v17  ;;  %v11224_v61 = vpack.c.b16 %v11200_v59, %v11200_v59  ;;  %v9224_v31 = vpack.c.b16 %v9200_v15, %v9200_v15  ;;  %19674 = vmatpush3.bf16.msra.mxu0 %v20563_v34 }
 0x250   :  { %v7508_v12 = vpack.c.b16 %v7480_v19, %v7480_v19  ;;  %v4632_v35 = vrot.slane %v4625_v37, %v21460_v43  ;;  %v11536_v30 = vsel %vm1965_vm7, %v11168_v54, %v11535_v40  ;;  %v9008_v0 = vrot.slane %v9001_v62, %v21460_v43  ;;  %19696 = vmatpush3.bf16.msra.mxu1 %v20565_v8  ;;  %v28197_v54 = vld [vmem:[#allocation16_spill] sm:$0xff]  ;;  %v28198_v37 = vld [vmem:[#allocation15_spill] sm:$0xff] }
 0x251   :  { %2257 = vst.msk [vmem:[#allocation2 + $0xc] sm:$0x1] %vm2253_vm11, %v2068_v21  ;;  %v11560_v23 = vpack.c.b16 %v11536_v30, %v11536_v30  ;;  %v10039_v49 = vrot.slane %v28196_v57, 7  ;;  %19703 = vmatprep.subr.bf16.mxu0 %v20566_v27  ;;  %v11337_v36 = vrot.slane %v11224_v61, %v21460_v43  ;;  %v9337_v21 = vrot.slane %v9224_v31, %v21460_v43  ;;  %v28199_v27 = vld [vmem:[#allocation37_spill] sm:$0xff] }
 0x252   :  { %2594 = vst.msk [vmem:[#allocation2 + $0xc] sm:$0x1] %vm2590_vm12, %v23535_v18  ;;  %v7569_v11 = vrot.slane %v7508_v12, %v21460_v43  ;;  %v860_v34 = vadd.f32 %v21794_v3, %v28197_v54  ;;  %v861_v40 = vadd.f32 %v21782_v44, %v28198_v37  ;;  %v6296_v18 = vpop.permute.xlu1 %6295  ;;  %19725 = vmatprep.subr.bf16.mxu1 %v20568_v63 }
 0x253   :  { %4820 = vst.msk [vmem:[#allocation2 + $0xd] sm:$0x1] %vm2253_vm11, %v4632_v35  ;;  %9135 = vrot.lane.b32.xlu0 %v9008_v0, %s21104_s10  ;;  %v23754_v8 = vrot.slane %v11560_v23, %v21460_v43  ;;  %v10040_v17 = vsel %vm1965_vm7, %v10039_v49, %v28199_v27  ;;  %v6369_v19 = vadd.f32 %v21792_v6, %v28197_v54 }
 0x254   :  { %3667 = vst.msk [vmem:[#allocation2 + $0xc] sm:$0x1] %vm3663_vm15, %v23637_v28  ;;  %v7576_v31 = vrot.slane %v7569_v11, %v21460_v43  ;;  %v11344_v28 = vrot.slane %v11337_v36, %v21460_v43  ;;  %v9344_v63 = vrot.slane %v9337_v21, %v21460_v43  ;;  %v10068_v62 = vpack.c.b16 %v10040_v17, %v10040_v17 }
 0x255   :  { %5156 = vst.msk [vmem:[#allocation2 + $0xd] sm:$0x1] %vm2590_vm12, %v23564_v39  ;;  %vm892_vm14 = vcmp.ge.f32.partialorder %v860_v34, 0.0  ;;  %v11680_v59 = vrot.slane %v23754_v8, %v21460_v43  ;;  %vm893_vm1 = vcmp.ge.f32.partialorder %v861_v40, 0.0  ;;  %v924_v15 = vmul.f32 0.33, %v860_v34 }
 0x256   :  { %4004 = vst.msk [vmem:[#allocation2 + $0xc] sm:$0x1] %vm4000_vm0, %v3959_v4  ;;  %v19042_v39 = vld.sshfl [vmem:[#allocation2 + $0x8] sm:$0x33 pattern:$0x75316420]  ;;  %v9464_v4 = vpop.permute.xlu0 %9463  ;;  %11471 = vrot.lane.b32.xlu1 %v11344_v28, %s21104_s10  ;;  %v10129_v61 = vrot.slane %v10068_v62, %v21460_v43  ;;  %v28200_v30 = vrot.slane %v23677_v14, %v21460_v43  ;;  %v11800_v28 = vpop.permute.xlu1 %11799 }
 0x257   :  { %6004 = vst.msk [vmem:[#allocation2 + $0xd] sm:$0x1] %vm3663_vm15, %v23657_v20  ;;  %v925_v12 = vmul.f32 0.33, %v861_v40  ;;  %v6370_v20 = vadd.f32 %v21780_v42, %v28198_v37  ;;  %vm6401_vm2 = vcmp.ge.f32.partialorder %v6369_v19, 0.0  ;;  %v956_v0 = vsel %vm892_vm14, %v860_v34, %v924_v15  ;;  %v28203_v34 = vld [vmem:[#allocation39_spill] sm:$0xff] }
 0x258   :  { %7764 = vst.msk [vmem:[#allocation2 + $0xe] sm:$0x1] %vm2253_vm11, %v7576_v31  ;;  %v6433_v35 = vmul.f32 0.33, %v6369_v19  ;;  %3966 = vrot.lane.b32.xlu0 %v28200_v30, %s21105_s11  ;;  %v13514_v11 = vcombine.high %v19042_v39, %v19042_v39  ;;  %v10136_v36 = vrot.slane %v10129_v61, %v21460_v43  ;;  %v988_v21 = vpack.c.bf16 %v956_v0, %v956_v0 }
 0x259   :  { %6340 = vst.msk [vmem:[#allocation2 + $0xd] sm:$0x1] %vm4000_vm0, %v6296_v18  ;;  %v957_v23 = vsel %vm893_vm1, %v861_v40, %v925_v12  ;;  %vm6402_vm3 = vcmp.ge.f32.partialorder %v6370_v20, 0.0  ;;  %v6434_v37 = vmul.f32 0.33, %v6370_v20  ;;  %v28204_v40 = vunpack.c.l.b16 %v28203_v34  ;;  %v28206_v12 = vld [vmem:[#allocation42_spill] sm:$0xff] }
 0x25a   :  { %8100 = vst.msk [vmem:[#allocation2 + $0xe] sm:$0x1] %vm2590_vm12, %v23591_v1  ;;  %v28201_v1 = vld [vmem:[#allocation40_spill] sm:$0xff]  ;;  %v989_v54 = vpack.c.bf16 %v957_v23, %v957_v23  ;;  %v6465_v14 = vsel %vm6401_vm2, %v6369_v19, %v6433_v35  ;;  %v13528_v18 = vrot.slane %v13514_v11, %v21460_v43  ;;  %v1266_v31 = vrot.slane %v988_v21, %v21460_v43  ;;  %v28207_v23 = vld [vmem:[#allocation41_spill] sm:$0xff] }
 0x25b   :  { %9172 = vst.msk [vmem:[#allocation2 + $0xe] sm:$0x1] %vm3663_vm15, %v23683_v60  ;;  %v28202_v57 = vunpack.c.l.b16 %v28201_v1  ;;  %v28205_v60 = vrot.slane %v23698_v51, %v21460_v43  ;;  %v6497_v17 = vpack.c.bf16 %v6465_v14, %v6465_v14  ;;  %v6466_v62 = vsel %vm6402_vm3, %v6370_v20, %v6434_v37 }
 0x25c   :  { %9508 = vst.msk [vmem:[#allocation2 + $0xe] sm:$0x1] %vm4000_vm0, %v9464_v4  ;;  %v1280_v27 = vrot.slane %v989_v54, %v21460_v43  ;;  %9471 = vrot.lane.b32.xlu0 %v9344_v63, %s21105_s11  ;;  %13759 = vmatprep.mubr.bf16.mxu0 %v13528_v18  ;;  %v13530_v15 = vcombine.high %v13528_v18, %v13528_v18  ;;  %v4537_v51 = vrot.slane %v28206_v12, 7  ;;  %v23840_v18 = vpop.permute.xlu0 %2550 }
 0x25d   :  { %v1973_v49 = vrot.slane %v28202_v57, 7  ;;  %6303 = vrot.lane.b32.xlu1 %v28205_v60, %s21105_s11  ;;  %10324 = vst.msk [vmem:[#allocation2 + $0xf] sm:$0x1] %vm2253_vm11, %v10136_v36  ;;  %v23803_v4 = vrot.slane %v19042_v39, %v21460_v43  ;;  %v1273_v61 = vrot.slane %v1266_v31, %v21460_v43  ;;  %v6498_v30 = vpack.c.bf16 %v6466_v62, %v6466_v62  ;;  %v20571_v60 = vld [vmem:[%s27942_s2 + $0x308] sm:$0xff]  }
 0x25e   :  { %10660 = vst.msk [vmem:[#allocation2 + $0xf] sm:$0x1] %vm2590_vm12, %v23619_v58  ;;  %v1287_v35 = vrot.slane %v1280_v27, %v21460_v43  ;;  %v23808_v0 = vrot.slane %v6497_v17, %v21460_v43  ;;  %v20567_v58 = vld [vmem:[%s27942_s2 + $0x300] sm:$0xff]   ;;  %13799 = vmatprep.mubr.bf16.mxu1 %v13530_v15  ;;  %v2735_v63 = vcombine.high %v1266_v31, %v1266_v31 }
 0x25f   :  { %v1974_v8 = vsel %vm1965_vm7, %v1973_v49, %v28204_v40  ;;  %11508 = vst.msk [vmem:[#allocation2 + $0xf] sm:$0x1] %vm3663_vm15, %v23707_v56  ;;  %v2743_v20 = vcombine.high %v1280_v27, %v1280_v27  ;;  %v23821_v11 = vsel %vm1965_vm7, %v4537_v51, %v28207_v23  ;;  %v20570_v56 = vld [vmem:[%s27942_s2 + $0x348] sm:$0xff]   ;;  %v1714_v1 = vrot.slane %v1273_v61, %v28151_v26 }
 0x260   :  { %v2001_v19 = vpack.c.b16 %v1974_v8, %v1974_v8  ;;  %11844 = vst.msk [vmem:[#allocation2 + $0xf] sm:$0x1] %vm4000_vm0, %v11800_v28  ;;  %v1728_v57 = vrot.slane %v1287_v35, %v28151_v26  ;;  %v4033_v49 = vcombine.high %v1273_v61, %v1273_v61  ;;  %v4034_v36 = vcombine.high %v1287_v35, %v1287_v35 }
 0x261   :  { %11807 = vrot.lane.b32.xlu1 %v11680_v59, %s21105_s11  ;;  %v6782_v21 = vrot.slane %v23808_v0, %v21460_v43  ;;  %v23832_v54 = vrot.slane %v6498_v30, %v21460_v43  ;;  %v23835_v37 = vrot.slane %v2735_v63, %v21460_v43  ;;  %v23838_v14 = vrot.slane %v2743_v20, %v21460_v43 }
 0x262   :  { %v23817_v39 = vrot.slane %v2001_v19, %v21460_v43  ;;  %13760 = vmatmul.mubr.bf16.vlgmr.msra.gmra.mrb[8].mxu0 %v23803_v4  ;;  %v23844_v59 = vrot.slane %v1714_v1, %v28151_v26  ;;  %v23847_v34 = vrot.slane %v1728_v57, %v28151_v26  ;;  %v4279_v40 = vrot.slane %v4033_v49, %v28151_v26  ;;  %v20574_v19 = vld [vmem:[%s27942_s2 + $0x350] sm:$0xff]   ;;  %v23880_v1 = vpop.permute.xlu1 %5113 }
 0x263   :  { %v4293_v8 = vrot.slane %v4034_v36, %v28151_v26  ;;  %19704 = vmatpush3.bf16.msra.mxu0 %v20567_v58  ;;  %v6796_v31 = vrot.slane %v23832_v54, %v21460_v43  ;;  %v7223_v27 = vrot.slane %v6782_v21, %v28151_v26  ;;  %v9537_v17 = vcombine.high %v6782_v21, %v6782_v21  ;;  %v20575_v57 = vld [vmem:[%s27942_s2 + $0x310] sm:$0xff]  }
 0x264   :  { %v3093_v28 = vrot.slane %v23835_v37, %v28151_v26  ;;  %19705 = vmatprep.subr.bf16.mxu0 %v20570_v56  ;;  %v28029_v62 = vunpack.c.l.b16 %v23844_v59  ;;  %v28031_v15 = vunpack.c.l.b16 %v23847_v34  ;;  %v4286_v12 = vrot.slane %v4279_v40, %v28151_v26 }
 0x265   :  { %v4300_v51 = vrot.slane %v4293_v8, %v28151_v26  ;;  %v23867_v61 = vrot.slane %v7223_v27, %v28151_v26  ;;  %v7237_v35 = vrot.slane %v6796_v31, %v28151_v26  ;;  %v9538_v30 = vcombine.high %v6796_v31, %v6796_v31  ;;  %v23891_v8 = vpop.permute.xlu0 %8057 }
 0x266   :  { %v9783_v58 = vrot.slane %v9537_v17, %v28151_v26  ;;  %v2286_v63 = vrot.slane %v28029_v62, 1  ;;  %v23873_v20 = vunpack.c.l.b16 %v4286_v12  ;;  %v23878_v56 = vrot.slane %v3093_v28, %v28151_v26 }
 0x267   :  { %28208 = vst [vmem:[#allocation36_spill] sm:$0xff] %v23867_v61  ;;  %v23875_v23 = vunpack.c.l.b16 %v4300_v51  ;;  %19706 = vmatpush3.bf16.msra.mxu0 %v20571_v60  ;;  %v23886_v49 = vrot.slane %v7237_v35, %v28151_v26  ;;  %v28030_v36 = vunpack.c.l.b16 %v23867_v61  ;;  %v9797_v40 = vrot.slane %v9538_v30, %v28151_v26  ;;  %v20578_v60 = vld [vmem:[%s27942_s2 + $0x358] sm:$0xff]  }
 0x268   :  { %28209 = vst [vmem:[#allocation14_spill] sm:$0xff] %v23873_v20  ;;  %v9790_v21 = vrot.slane %v9783_v58, %v28151_v26  ;;  %19707 = vmatprep.subr.bf16.mxu0 %v20574_v19  ;;  %v2287_v31 = vsel %vm1965_vm7, %v28031_v15, %v2286_v63  ;;  %v4849_v27 = vrot.slane %v23873_v20, 1  ;;  %v3107_v17 = vrot.slane %v23838_v14, %v28151_v26  ;;  %v23929_v15 = vpop.permute.xlu1 %10617 }
 0x269   :  { %28210 = vst [vmem:[#allocation35_spill] sm:$0xff] %v23886_v49  ;;  %v3327_v28 = vunpack.c.l.b16 %v23878_v56  ;;  %v2310_v12 = vpack.c.b16 %v2287_v31, %v2287_v31  ;;  %v28032_v51 = vunpack.c.l.b16 %v23886_v49  ;;  %v7793_v19 = vrot.slane %v28030_v36, 1  ;;  %v20579_v56 = vld [vmem:[%s27942_s2 + $0x318] sm:$0xff]  }
 0x26a   :  { %v9804_v35 = vrot.slane %v9797_v40, %v28151_v26  ;;  %v4850_v30 = vsel %vm1965_vm7, %v23875_v23, %v4849_v27  ;;  %v23909_v58 = vunpack.c.l.b16 %v9790_v21  ;;  %v23912_v63 = vrot.slane %v3107_v17, %v28151_v26 }
 0x26b   :  { %v5185_v62 = vcombine.high %v23835_v37, %v23835_v37  ;;  %19708 = vmatpush3.bf16.msra.mxu0 %v20575_v57  ;;  %v2436_v31 = vrot.slane %v2310_v12, %v21460_v43  ;;  %v4873_v36 = vpack.c.b16 %v4850_v30, %v4850_v30  ;;  %v7794_v40 = vsel %vm1965_vm7, %v28032_v51, %v7793_v19  ;;  %v20582_v12 = vld [vmem:[%s27942_s2 + $0x360] sm:$0xff]  }
 0x26c   :  { %28211 = vst [vmem:[#allocation13_spill] sm:$0xff] %v23909_v58  ;;  %v23923_v21 = vunpack.c.l.b16 %v9804_v35  ;;  %19709 = vmatprep.subr.bf16.mxu0 %v20578_v60  ;;  %v7817_v27 = vpack.c.b16 %v7794_v40, %v7794_v40  ;;  %v10353_v17 = vrot.slane %v23909_v58, 1  ;;  %v3328_v37 = vunpack.c.l.b16 %v23912_v63  ;;  %v23939_v40 = vpop.permute.xlu0 %3623 }
 0x26d   :  { %v5186_v57 = vcombine.high %v23838_v14, %v23838_v14  ;;  %v2443_v30 = vrot.slane %v2436_v31, %v21460_v43  ;;  %v4999_v19 = vrot.slane %v4873_v36, %v21460_v43  ;;  %v5431_v60 = vrot.slane %v5185_v62, %v28151_v26  ;;  %v20583_v36 = vld [vmem:[%s27942_s2 + $0x320] sm:$0xff]  }
 0x26e   :  { %28212 = vst [vmem:[#allocation38_spill] sm:$0xff] %v23923_v21  ;;  %v8241_v35 = vcombine.high %v23808_v0, %v23808_v0  ;;  %v7943_v63 = vrot.slane %v7817_v27, %v21460_v43  ;;  %v10354_v14 = vsel %vm1965_vm7, %v23923_v21, %v10353_v17  ;;  %v3359_v51 = vrot.slane %v3328_v37, 7  ;;  %v20586_v17 = vld [vmem:[%s27942_s2 + $0x368] sm:$0xff]  }
 0x26f   :  { %v5445_v58 = vrot.slane %v5186_v57, %v28151_v26  ;;  %19710 = vmatpush3.bf16.msra.mxu0 %v20579_v56  ;;  %2558 = vrot.lane.b32.xlu0 %v2443_v30, %s21103_s1  ;;  %v5006_v62 = vrot.slane %v4999_v19, %v21460_v43  ;;  %v10377_v0 = vpack.c.b16 %v10354_v14, %v10354_v14  ;;  %v3696_v20 = vrot.slane %v3327_v28, 1 }
 0x270   :  { %v5438_v31 = vrot.slane %v5431_v60, %v28151_v26  ;;  %v8248_v27 = vrot.slane %v8241_v35, %v21460_v43  ;;  %v7950_v57 = vrot.slane %v7943_v63, %v21460_v43  ;;  %v3360_v56 = vsel %vm1965_vm7, %v3359_v51, %v3327_v28  ;;  %19711 = vmatprep.subr.bf16.mxu0 %v20582_v12  ;;  %v23964_v51 = vpop.permute.xlu1 %5961 }
 0x271   :  { %v5452_v21 = vrot.slane %v5445_v58, %v28151_v26  ;;  %v8249_v30 = vcombine.high %v23832_v54, %v23832_v54  ;;  %5121 = vrot.lane.b32.xlu1 %v5006_v62, %s21103_s1  ;;  %v10503_v19 = vrot.slane %v10377_v0, %v21460_v43  ;;  %v3383_v60 = vpack.c.b16 %v3360_v56, %v3360_v56  ;;  %v20587_v54 = vld [vmem:[%s27942_s2 + $0x328] sm:$0xff]   ;;  %v23973_v0 = vpop.permute.xlu0 %9129 }
 0x272   :  { %v5665_v35 = vunpack.c.l.b16 %v5438_v31  ;;  %v8599_v14 = vrot.slane %v8248_v27, %v28151_v26  ;;  %v10689_v63 = vcombine.high %v8248_v27, %v8248_v27 }
 0x273   :  { %v5666_v61 = vunpack.c.l.b16 %v5452_v21  ;;  %v8256_v49 = vrot.slane %v8249_v30, %v21460_v43  ;;  %19712 = vmatpush3.bf16.msra.mxu0 %v20583_v36  ;;  %8065 = vrot.lane.b32.xlu0 %v7950_v57, %s21103_s1  ;;  %v10510_v58 = vrot.slane %v10503_v19, %v21460_v43  ;;  %v3509_v12 = vrot.slane %v3383_v60, %v21460_v43  ;;  %v20590_v57 = vld [vmem:[%s27942_s2 + $0x370] sm:$0xff]  }
 0x274   :  { %v8606_v62 = vrot.slane %v8599_v14, %v28151_v26  ;;  %v6033_v21 = vrot.slane %v5665_v35, 1  ;;  %19713 = vmatprep.subr.bf16.mxu0 %v20586_v17  ;;  %v10935_v27 = vrot.slane %v10689_v63, %v28151_v26  ;;  %v3697_v19 = vsel %vm1965_vm7, %v3328_v37, %v3696_v20  ;;  %v20594_v37 = vld [vmem:[%s27942_s2 + $0x378] sm:$0xff]  }
 0x275   :  { %v5697_v28 = vrot.slane %v5666_v61, 7  ;;  %v8613_v31 = vrot.slane %v8256_v49, %v28151_v26  ;;  %v10690_v36 = vcombine.high %v8256_v49, %v8256_v49  ;;  %10625 = vrot.lane.b32.xlu1 %v10510_v58, %s21103_s1  ;;  %v3516_v56 = vrot.slane %v3509_v12, %v21460_v43  ;;  %v20591_v58 = vld [vmem:[%s27942_s2 + $0x330] sm:$0xff]  }
 0x276   :  { %v8833_v30 = vunpack.c.l.b16 %v8606_v62  ;;  %v6034_v60 = vsel %vm1965_vm7, %v5666_v61, %v6033_v21  ;;  %v10942_v49 = vrot.slane %v10935_v27, %v28151_v26  ;;  %v3720_v62 = vpack.c.b16 %v3697_v19, %v3697_v19  ;;  %v3961_v19 = vpop.permute.xlu0 %3960 }
 0x277   :  { %v5698_v17 = vsel %vm1965_vm7, %v5697_v28, %v5665_v35  ;;  %v8620_v14 = vrot.slane %v8613_v31, %v28151_v26  ;;  %v10949_v63 = vrot.slane %v10690_v36, %v28151_v26  ;;  %19714 = vmatpush3.bf16.msra.mxu0 %v20587_v54  ;;  %3631 = vrot.lane.b32.xlu0 %v3516_v56, %s21104_s10  ;;  %v24000_v31 = vpop.permute.xlu1 %11465 }
 0x278   :  { %v5721_v12 = vpack.c.b16 %v5698_v17, %v5698_v17  ;;  %v6057_v20 = vpack.c.b16 %v6034_v60, %v6034_v60  ;;  %v2082_v61 = vrot.slane %v23817_v39, %v21460_v43  ;;  %v11169_v54 = vunpack.c.l.b16 %v10942_v49  ;;  %19715 = vmatprep.subr.bf16.mxu0 %v20590_v57 }
 0x279   :  { %v8834_v35 = vunpack.c.l.b16 %v8620_v14  ;;  %v10956_v21 = vrot.slane %v10949_v63, %v28151_v26  ;;  %v4565_v28 = vpack.c.b16 %v23821_v11, %v23821_v11  ;;  %v24004_v27 = vrot.slane %v3720_v62, %v21460_v43  ;;  %v20595_v14 = vld [vmem:[%s27942_s2 + $0x338] sm:$0xff]  }
 0x27a   :  { %v5847_v36 = vrot.slane %v5721_v12, %v21460_v43  ;;  %v24007_v39 = vrot.slane %v6057_v20, %v21460_v43  ;;  %2258 = vst.msk [vmem:[#allocation2 + $0x10] sm:$0x1] %vm2253_vm11, %v2082_v61  ;;  %v9201_v56 = vrot.slane %v8833_v30, 1  ;;  %v11537_v57 = vrot.slane %v11169_v54, 1 }
 0x27b   :  { %v8865_v60 = vrot.slane %v8834_v35, 7  ;;  %v11170_v17 = vunpack.c.l.b16 %v10956_v21  ;;  %2595 = vst.msk [vmem:[#allocation2 + $0x10] sm:$0x1] %vm2590_vm12, %v23840_v18  ;;  %v4639_v11 = vrot.slane %v4565_v28, %v21460_v43  ;;  %19716 = vmatpush3.bf16.msra.mxu0 %v20591_v58  ;;  %v3853_v63 = vrot.slane %v24004_v27, %v21460_v43  ;;  %v20569_v21 = vld [vmem:[%s27942_s2 + $0x380] sm:$0xff]  }
 0x27c   :  { %v5854_v49 = vrot.slane %v5847_v36, %v21460_v43  ;;  %v6190_v12 = vrot.slane %v24007_v39, %v21460_v43  ;;  %v9202_v62 = vsel %vm1965_vm7, %v8834_v35, %v9201_v56  ;;  %3668 = vst.msk [vmem:[#allocation2 + $0x10] sm:$0x1] %vm3663_vm15, %v23939_v40  ;;  %19717 = vmatprep.subr.bf16.mxu0 %v20594_v37  ;;  %v28213_v36 = vld [vmem:[#allocation44_spill] sm:$0xff]  ;;  %v20572_v56 = vld [vmem:[%s27942_s2 + $0x3c8] sm:$0xff]  }
 0x27d   :  { %v8866_v18 = vsel %vm1965_vm7, %v8865_v60, %v8833_v30  ;;  %v11201_v58 = vrot.slane %v11170_v17, 7  ;;  %v4646_v20 = vrot.slane %v4639_v11, %v21460_v43  ;;  %v9225_v61 = vpack.c.b16 %v9202_v62, %v9202_v62  ;;  %4005 = vst.msk [vmem:[#allocation2 + $0x10] sm:$0x1] %vm4000_vm0, %v3961_v19  ;;  %v20581_v39 = vld [vmem:[%s27942_s2 + $0x398] sm:$0xff]  }
 0x27e   :  { %5969 = vrot.lane.b32.xlu1 %v5854_v49, %s21104_s10  ;;  %v8889_v28 = vpack.c.b16 %v8866_v18, %v8866_v18  ;;  %v11538_v35 = vsel %vm1965_vm7, %v11170_v17, %v11537_v57  ;;  %v28214_v40 = vunpack.c.l.b16 %v28213_v36  ;;  %v13529_v30 = vcombine.high %v23803_v4, %v23803_v4  ;;  %v28215_v49 = vld [vmem:[#allocation46_spill] sm:$0xff]  ;;  %v6298_v57 = vpop.permute.xlu1 %6297  ;;  %v20598_v4 = vld [vmem:[%s27942_s2 + $0x440] sm:$0xff]  }
 0x27f   :  { %v11202_v60 = vsel %vm1965_vm7, %v11201_v58, %v11169_v54  ;;  %4821 = vst.msk [vmem:[#allocation2 + $0x11] sm:$0x1] %vm2253_vm11, %v4646_v20  ;;  %v24042_v19 = vrot.slane %v9225_v61, %v21460_v43  ;;  %v11561_v11 = vpack.c.b16 %v11538_v35, %v11538_v35  ;;  %v10041_v17 = vrot.slane %v28215_v49, 7  ;;  %19718 = vmatpush3.bf16.msra.mxu0 %v20595_v14  ;;  %v28216_v54 = vld [vmem:[#allocation43_spill] sm:$0xff] }
 0x280   :  { %v7481_v37 = vrot.slane %v28214_v40, 7  ;;  %v9015_v62 = vrot.slane %v8889_v28, %v21460_v43  ;;  %v11225_v18 = vpack.c.b16 %v11202_v60, %v11202_v60  ;;  %5157 = vst.msk [vmem:[#allocation2 + $0x11] sm:$0x1] %vm2590_vm12, %v23880_v1  ;;  %v28217_v58 = vunpack.c.l.b16 %v28216_v54  ;;  %13800 = vmatmul.mubr.bf16.vlgmr.msra.gmra.mrb[8].mxu1 %v13529_v30  ;;  %v28218_v61 = vld [vmem:[#allocation19_spill] sm:$0xff]  ;;  %v28219_v28 = vld [vmem:[#allocation45_spill] sm:$0xff]  ;;  %v28220_v54 = vld [vmem:[#allocation18_spill] sm:$0xff]  ;;  %19747 = vmatprep.subr.bf16.mxu0 %v20598_v4 }
 0x281   :  { %v862_v35 = vadd.f32 %v21794_v3, %v28218_v61  ;;  %v9358_v14 = vrot.slane %v24042_v19, %v21460_v43  ;;  %v24059_v36 = vrot.slane %v11561_v11, %v21460_v43  ;;  %v10042_v60 = vsel %vm1965_vm7, %v10041_v17, %v28219_v28  ;;  %19726 = vmatpush3.bf16.msra.mxu1 %v20569_v21  ;;  %v20573_v1 = vld [vmem:[%s27942_s2 + $0x388] sm:$0xff]   ;;  %v20577_v4 = vld [vmem:[%s27942_s2 + $0x390] sm:$0xff]  }
 0x282   :  { %v7482_v20 = vsel %vm1965_vm7, %v7481_v37, %v28217_v58  ;;  %6005 = vst.msk [vmem:[#allocation2 + $0x11] sm:$0x1] %vm3663_vm15, %v23964_v51  ;;  %v9022_v37 = vrot.slane %v9015_v62, %v21460_v43  ;;  %v11351_v30 = vrot.slane %v11225_v18, %v21460_v43  ;;  %v10069_v49 = vpack.c.b16 %v10042_v60, %v10042_v60  ;;  %v24072_v58 = vld.sshfl [vmem:[#allocation2 + $0xc] sm:$0x33 pattern:$0x75316420] }
 0x283   :  { %v7509_v40 = vpack.c.b16 %v7482_v20, %v7482_v20  ;;  %v863_v11 = vadd.f32 %v21782_v44, %v28220_v54  ;;  %19727 = vmatprep.subr.bf16.mxu1 %v20572_v56  ;;  %6341 = vst.msk [vmem:[#allocation2 + $0x11] sm:$0x1] %vm4000_vm0, %v6298_v57  ;;  %v11694_v51 = vrot.slane %v24059_v36, %v21460_v43  ;;  %vm894_vm4 = vcmp.ge.f32.partialorder %v862_v35, 0.0  ;;  %v20576_v62 = vld [vmem:[%s27942_s2 + $0x3d0] sm:$0xff]  }
 0x284   :  { %v926_v17 = vmul.f32 0.33, %v862_v35  ;;  %9137 = vrot.lane.b32.xlu0 %v9022_v37, %s21104_s10  ;;  %v11358_v56 = vrot.slane %v11351_v30, %v21460_v43  ;;  %v10143_v18 = vrot.slane %v10069_v49, %v21460_v43  ;;  %v6372_v60 = vadd.f32 %v21780_v42, %v28220_v54 }
 0x285   :  { %v7583_v21 = vrot.slane %v7509_v40, %v21460_v43  ;;  %vm895_vm5 = vcmp.ge.f32.partialorder %v863_v11, 0.0  ;;  %v927_v57 = vmul.f32 0.33, %v863_v11  ;;  %v6371_v40 = vadd.f32 %v21792_v6, %v28218_v61  ;;  %19728 = vmatpush3.bf16.msra.mxu1 %v20573_v1  ;;  %v20580_v1 = vld [vmem:[%s27942_s2 + $0x3d8] sm:$0xff]  }
 0x286   :  { %v958_v28 = vsel %vm894_vm4, %v862_v35, %v926_v17  ;;  %11473 = vrot.lane.b32.xlu1 %v11358_v56, %s21104_s10  ;;  %v10150_v37 = vrot.slane %v10143_v18, %v21460_v43  ;;  %v13815_v35 = vcombine.high %v24072_v58, %v24072_v58  ;;  %vm6404_vm8 = vcmp.ge.f32.partialorder %v6372_v60, 0.0  ;;  %19729 = vmatprep.subr.bf16.mxu1 %v20576_v62  ;;  %v11802_v56 = vpop.permute.xlu1 %11801 }
 0x287   :  { %v7590_v20 = vrot.slane %v7583_v21, %v21460_v43  ;;  %v959_v30 = vsel %vm895_vm5, %v863_v11, %v927_v57  ;;  %v990_v49 = vpack.c.bf16 %v958_v28, %v958_v28  ;;  %vm6403_vm6 = vcmp.ge.f32.partialorder %v6371_v40, 0.0  ;;  %v9466_v21 = vpop.permute.xlu0 %9465 }
 0x288   :  { %v991_v61 = vpack.c.bf16 %v959_v30, %v959_v30  ;;  %v6435_v54 = vmul.f32 0.33, %v6371_v40  ;;  %3968 = vrot.lane.b32.xlu0 %v3853_v63, %s21105_s11  ;;  %10325 = vst.msk [vmem:[#allocation2 + $0x13] sm:$0x1] %vm2253_vm11, %v10150_v37  ;;  %v6436_v17 = vmul.f32 0.33, %v6372_v60  ;;  %v13829_v62 = vrot.slane %v13815_v35, %v21460_v43 }
 0x289   :  { %7765 = vst.msk [vmem:[#allocation2 + $0x12] sm:$0x1] %vm2253_vm11, %v7590_v20  ;;  %v1294_v11 = vrot.slane %v990_v49, %v21460_v43  ;;  %v28221_v18 = vunpack.c.l.b16 %v22890_v24  ;;  %19730 = vmatpush3.bf16.msra.mxu1 %v20577_v4  ;;  %v28222_v20 = vunpack.c.l.b16 %v22921_v9  ;;  %v20584_v35 = vld [vmem:[%s27942_s2 + $0x3e0] sm:$0xff]  }
 0x28a   :  { %8101 = vst.msk [vmem:[#allocation2 + $0x12] sm:$0x1] %vm2590_vm12, %v23891_v8  ;;  %10661 = vst.msk [vmem:[#allocation2 + $0x13] sm:$0x1] %vm2590_vm12, %v23929_v15  ;;  %v1308_v27 = vrot.slane %v991_v61, %v21460_v43  ;;  %v6467_v63 = vsel %vm6403_vm6, %v6371_v40, %v6435_v54  ;;  %6305 = vrot.lane.b32.xlu1 %v6190_v12, %s21105_s11  ;;  %v6468_v15 = vsel %vm6404_vm8, %v6372_v60, %v6436_v17  ;;  %v20593_v8 = vld [vmem:[%s27942_s2 + $0x3b0] sm:$0xff]  }
 0x28b   :  { %v24111_v57 = vrot.slane %v28221_v18, 7  ;;  %9173 = vst.msk [vmem:[#allocation2 + $0x12] sm:$0x1] %vm3663_vm15, %v23973_v0  ;;  %v24122_v28 = vrot.slane %v28222_v20, 7  ;;  %v1301_v24 = vrot.slane %v1294_v11, %v21460_v43  ;;  %v6499_v40 = vpack.c.bf16 %v6467_v63, %v6467_v63  ;;  %14060 = vmatprep.mubr.bf16.mxu0 %v13829_v62  ;;  %11509 = vst.msk [vmem:[#allocation2 + $0x13] sm:$0x1] %vm3663_vm15, %v24000_v31 }
 0x28c   :  { %9509 = vst.msk [vmem:[#allocation2 + $0x12] sm:$0x1] %vm4000_vm0, %v9466_v21  ;;  %v1315_v0 = vrot.slane %v1308_v27, %v21460_v43  ;;  %v6500_v4 = vpack.c.bf16 %v6468_v15, %v6468_v15  ;;  %v13831_v37 = vcombine.high %v13829_v62, %v13829_v62  ;;  %v2751_v30 = vcombine.high %v1294_v11, %v1294_v11  ;;  %v20588_v15 = vld [vmem:[%s27942_s2 + $0x3e8] sm:$0xff]  }
 0x28d   :  { %19731 = vmatprep.subr.bf16.mxu1 %v20580_v1  ;;  %11845 = vst.msk [vmem:[#allocation2 + $0x13] sm:$0x1] %vm4000_vm0, %v11802_v56  ;;  %9473 = vrot.lane.b32.xlu0 %v9358_v14, %s21105_s11  ;;  %v1742_v31 = vrot.slane %v1301_v24, %v28151_v26  ;;  %v4035_v12 = vcombine.high %v1301_v24, %v1301_v24 }
 0x28e   :  { %v24145_v60 = vrot.slane %v6499_v40, %v21460_v43  ;;  %v2759_v49 = vcombine.high %v1308_v27, %v1308_v27  ;;  %v1756_v61 = vrot.slane %v1315_v0, %v28151_v26  ;;  %v4036_v54 = vcombine.high %v1315_v0, %v1315_v0  ;;  %14100 = vmatprep.mubr.bf16.mxu1 %v13831_v37 }
 0x28f   :  { %v24152_v1 = vrot.slane %v6500_v4, %v21460_v43  ;;  %v24155_v19 = vrot.slane %v2751_v30, %v21460_v43  ;;  %11809 = vrot.lane.b32.xlu1 %v11694_v51, %s21105_s11  ;;  %v24162_v14 = vrot.slane %v1742_v31, %v28151_v26  ;;  %v4307_v21 = vrot.slane %v4035_v12, %v28151_v26  ;;  %v20585_v51 = vld [vmem:[%s27942_s2 + $0x3a0] sm:$0xff]  }
 0x290   :  { %v6810_v11 = vrot.slane %v24145_v60, %v21460_v43  ;;  %v2766_v17 = vrot.slane %v2759_v49, %v21460_v43  ;;  %v24169_v62 = vrot.slane %v1756_v61, %v28151_v26  ;;  %v4321_v56 = vrot.slane %v4036_v54, %v28151_v26  ;;  %19732 = vmatpush3.bf16.msra.mxu1 %v20581_v39 }
 0x291   :  { %v6824_v18 = vrot.slane %v24152_v1, %v21460_v43  ;;  %v3121_v36 = vrot.slane %v24155_v19, %v28151_v26  ;;  %v28038_v27 = vunpack.c.l.b16 %v24162_v14  ;;  %v4314_v63 = vrot.slane %v4307_v21, %v28151_v26  ;;  %19733 = vmatprep.subr.bf16.mxu1 %v20584_v35  ;;  %v20589_v21 = vld [vmem:[%s27942_s2 + $0x3a8] sm:$0xff]  }
 0x292   :  { %v7251_v20 = vrot.slane %v6810_v11, %v28151_v26  ;;  %v9539_v24 = vcombine.high %v6810_v11, %v6810_v11  ;;  %v28039_v40 = vunpack.c.l.b16 %v24169_v62  ;;  %v4328_v0 = vrot.slane %v4321_v56, %v28151_v26 }
 0x293   :  { %v7265_v4 = vrot.slane %v6824_v18, %v28151_v26  ;;  %v9540_v37 = vcombine.high %v6824_v18, %v6824_v18  ;;  %v2288_v30 = vrot.slane %v28038_v27, 1  ;;  %v24190_v39 = vunpack.c.l.b16 %v4314_v63 }
 0x294   :  { %v24193_v31 = vrot.slane %v7251_v20, %v28151_v26  ;;  %v9811_v12 = vrot.slane %v9539_v24, %v28151_v26  ;;  %v24196_v49 = vunpack.c.l.b16 %v4328_v0  ;;  %v3128_v54 = vrot.slane %v3121_v36, %v28151_v26  ;;  %19734 = vmatpush3.bf16.msra.mxu1 %v20585_v51  ;;  %v24212_v20 = vpop.permute.xlu0 %2552  ;;  %v20592_v36 = vld [vmem:[%s27942_s2 + $0x3f0] sm:$0xff]  }
 0x295   :  { %v24199_v35 = vrot.slane %v7265_v4, %v28151_v26  ;;  %v9825_v61 = vrot.slane %v9540_v37, %v28151_v26  ;;  %v2289_v11 = vsel %vm1965_vm7, %v28039_v40, %v2288_v30  ;;  %v4851_v56 = vrot.slane %v24190_v39, 1  ;;  %19735 = vmatprep.subr.bf16.mxu1 %v20588_v15  ;;  %v24220_v37 = vpop.permute.xlu1 %5115 }
 0x296   :  { %28223 = vst [vmem:[#allocation16_spill] sm:$0xff] %v24193_v31  ;;  %v28040_v18 = vunpack.c.l.b16 %v24193_v31  ;;  %v9818_v63 = vrot.slane %v9811_v12, %v28151_v26  ;;  %v2311_v51 = vpack.c.b16 %v2289_v11, %v2289_v11  ;;  %v3135_v4 = vrot.slane %v2766_v17, %v28151_v26 }
 0x297   :  { %28224 = vst [vmem:[#allocation15_spill] sm:$0xff] %v24199_v35  ;;  %v28041_v24 = vunpack.c.l.b16 %v24199_v35  ;;  %v9832_v0 = vrot.slane %v9825_v61, %v28151_v26  ;;  %v4852_v30 = vsel %vm1965_vm7, %v24196_v49, %v4851_v56  ;;  %v3329_v27 = vunpack.c.l.b16 %v3128_v54 }
 0x298   :  { %v7795_v12 = vrot.slane %v28040_v18, 1  ;;  %v24226_v15 = vunpack.c.l.b16 %v9818_v63  ;;  %v2450_v40 = vrot.slane %v2311_v51, %v21460_v43  ;;  %v4874_v11 = vpack.c.b16 %v4852_v30, %v4852_v30  ;;  %19736 = vmatpush3.bf16.msra.mxu1 %v20589_v21 }
 0x299   :  { %v24229_v9 = vunpack.c.l.b16 %v9832_v0  ;;  %v3142_v61 = vrot.slane %v3135_v4, %v28151_v26  ;;  %v5187_v54 = vcombine.high %v24155_v19, %v24155_v19  ;;  %v5188_v51 = vcombine.high %v2766_v17, %v2766_v17  ;;  %19737 = vmatprep.subr.bf16.mxu1 %v20592_v36  ;;  %v20596_v0 = vld [vmem:[%s27942_s2 + $0x3f8] sm:$0xff]   ;;  %v24252_v17 = vpop.permute.xlu0 %8059 }
 0x29a   :  { %28225 = vst [vmem:[#allocation37_spill] sm:$0xff] %v24226_v15  ;;  %v7796_v56 = vsel %vm1965_vm7, %v28041_v24, %v7795_v12  ;;  %v10355_v63 = vrot.slane %v24226_v15, 1  ;;  %v2457_v21 = vrot.slane %v2450_v40, %v21460_v43  ;;  %v5013_v4 = vrot.slane %v4874_v11, %v21460_v43 }
 0x29b   :  { %28226 = vst [vmem:[#allocation40_spill] sm:$0xff] %v24229_v9  ;;  %v7818_v30 = vpack.c.b16 %v7796_v56, %v7796_v56  ;;  %v3330_v18 = vunpack.c.l.b16 %v3142_v61  ;;  %v5459_v24 = vrot.slane %v5187_v54, %v28151_v26  ;;  %v5473_v15 = vrot.slane %v5188_v51, %v28151_v26  ;;  %v24257_v56 = vpop.permute.xlu1 %10619 }
 0x29c   :  { %v10356_v12 = vsel %vm1965_vm7, %v24229_v9, %v10355_v63  ;;  %v8257_v19 = vcombine.high %v24145_v60, %v24145_v60  ;;  %2560 = vrot.lane.b32.xlu0 %v2457_v21, %s21103_s1  ;;  %v5020_v40 = vrot.slane %v5013_v4, %v21460_v43  ;;  %19738 = vmatpush3.bf16.msra.mxu1 %v20593_v8  ;;  %v20597_v21 = vld [vmem:[%s27942_s2 + $0x3b8] sm:$0xff]  }
 0x29d   :  { %v7957_v36 = vrot.slane %v7818_v30, %v21460_v43  ;;  %v10378_v11 = vpack.c.b16 %v10356_v12, %v10356_v12  ;;  %v3361_v61 = vrot.slane %v3330_v18, 7  ;;  %v5466_v63 = vrot.slane %v5459_v24, %v28151_v26  ;;  %19739 = vmatprep.subr.bf16.mxu1 %v20596_v0 }
 0x29e   :  { %v5480_v54 = vrot.slane %v5473_v15, %v28151_v26  ;;  %v8264_v51 = vrot.slane %v8257_v19, %v21460_v43  ;;  %v8265_v60 = vcombine.high %v24152_v1, %v24152_v1  ;;  %5123 = vrot.lane.b32.xlu1 %v5020_v40, %s21103_s1  ;;  %v3698_v30 = vrot.slane %v3329_v27, 1  ;;  %v20600_v15 = vld [vmem:[%s27942_s2 + $0x4c0] sm:$0xff]  }
 0x29f   :  { %v7964_v4 = vrot.slane %v7957_v36, %v21460_v43  ;;  %v10517_v8 = vrot.slane %v10378_v11, %v21460_v43  ;;  %v3362_v24 = vsel %vm1965_vm7, %v3361_v61, %v3329_v27  ;;  %v5667_v1 = vunpack.c.l.b16 %v5466_v63 }
 0x2a0   :  { %v3384_v12 = vpack.c.b16 %v3362_v24, %v3362_v24  ;;  %v5668_v0 = vunpack.c.l.b16 %v5480_v54  ;;  %v8272_v19 = vrot.slane %v8265_v60, %v21460_v43  ;;  %v8627_v36 = vrot.slane %v8264_v51, %v28151_v26  ;;  %v24281_v24 = vpop.permute.xlu0 %3625  ;;  %19740 = vmatpush3.bf16.msra.mxu1 %v20597_v21 }
 0x2a1   :  { %8067 = vrot.lane.b32.xlu0 %v7964_v4, %s21103_s1  ;;  %v10524_v40 = vrot.slane %v10517_v8, %v21460_v43  ;;  %v10691_v9 = vcombine.high %v8264_v51, %v8264_v51  ;;  %v3699_v11 = vsel %vm1965_vm7, %v3330_v18, %v3698_v30  ;;  %v6035_v4 = vrot.slane %v5667_v1, 1  ;;  %v24286_v51 = vpop.permute.xlu1 %5963  ;;  %19769 = vmatprep.subr.bf16.mxu1 %v20600_v15 }
 0x2a2   :  { %v3523_v27 = vrot.slane %v3384_v12, %v21460_v43  ;;  %v5699_v61 = vrot.slane %v5668_v0, 7  ;;  %v8641_v31 = vrot.slane %v8272_v19, %v28151_v26  ;;  %v10692_v35 = vcombine.high %v8272_v19, %v8272_v19 }
 0x2a3   :  { %10627 = vrot.lane.b32.xlu1 %v10524_v40, %s21103_s1  ;;  %v8634_v63 = vrot.slane %v8627_v36, %v28151_v26  ;;  %v10963_v54 = vrot.slane %v10691_v9, %v28151_v26  ;;  %v3721_v60 = vpack.c.b16 %v3699_v11, %v3699_v11  ;;  %v6036_v11 = vsel %vm1965_vm7, %v5668_v0, %v6035_v4 }
 0x2a4   :  { %v3530_v18 = vrot.slane %v3523_v27, %v21460_v43  ;;  %v5700_v8 = vsel %vm1965_vm7, %v5699_v61, %v5667_v1  ;;  %v8648_v30 = vrot.slane %v8641_v31, %v28151_v26  ;;  %v10977_v12 = vrot.slane %v10692_v35, %v28151_v26  ;;  %v24310_v4 = vpop.permute.xlu0 %9131 }
 0x2a5   :  { %v5722_v21 = vpack.c.b16 %v5700_v8, %v5700_v8  ;;  %v8835_v19 = vunpack.c.l.b16 %v8634_v63  ;;  %v10970_v40 = vrot.slane %v10963_v54, %v28151_v26  ;;  %v24294_v36 = vrot.slane %v3721_v60, %v21460_v43 }
 0x2a6   :  { %3633 = vrot.lane.b32.xlu0 %v3530_v18, %s21104_s10  ;;  %v8836_v9 = vunpack.c.l.b16 %v8648_v30  ;;  %v10984_v15 = vrot.slane %v10977_v12, %v28151_v26  ;;  %v28227_v1 = vunpack.c.l.b16 %v22887_v53  ;;  %v6058_v63 = vpack.c.b16 %v6036_v11, %v6036_v11 }
 0x2a7   :  { %v5861_v35 = vrot.slane %v5722_v21, %v21460_v43  ;;  %v11171_v27 = vunpack.c.l.b16 %v10970_v40  ;;  %v3867_v61 = vrot.slane %v24294_v36, %v21460_v43  ;;  %v28228_v8 = vrot.slane %v22912_v46, 7  ;;  %v24316_v21 = vpop.permute.xlu1 %11467 }
 0x2a8   :  { %v1976_v31 = vsel %vm1965_vm7, %v24111_v57, %v28227_v1  ;;  %v8867_v54 = vrot.slane %v8836_v9, 7  ;;  %v11172_v60 = vunpack.c.l.b16 %v10984_v15  ;;  %v24314_v57 = vrot.slane %v6058_v63, %v21460_v43 }
 0x2a9   :  { %v2002_v18 = vpack.c.b16 %v1976_v31, %v1976_v31  ;;  %v4540_v0 = vsel %vm1965_vm7, %v28228_v8, %v22910_v16  ;;  %v5868_v53 = vrot.slane %v5861_v35, %v21460_v43  ;;  %v9203_v12 = vrot.slane %v8835_v19, 1 }
 0x2aa   :  { %v4566_v30 = vpack.c.b16 %v4540_v0, %v4540_v0  ;;  %v8868_v40 = vsel %vm1965_vm7, %v8867_v54, %v8835_v19  ;;  %v11203_v15 = vrot.slane %v11172_v60, 7  ;;  %v11539_v1 = vrot.slane %v11171_v27, 1 }
 0x2ab   :  { %v2089_v11 = vrot.slane %v2002_v18, %v21460_v43  ;;  %5971 = vrot.lane.b32.xlu1 %v5868_v53, %s21104_s10  ;;  %v8890_v16 = vpack.c.b16 %v8868_v40, %v8868_v40  ;;  %v9204_v35 = vsel %vm1965_vm7, %v8836_v9, %v9203_v12  ;;  %v28229_v9 = vunpack.c.l.b16 %v22918_v7  ;;  %v28231_v12 = vld [vmem:[#allocation21_spill] sm:$0xff] }
 0x2ac   :  { %v4653_v31 = vrot.slane %v4566_v30, %v21460_v43  ;;  %v11204_v63 = vsel %vm1965_vm7, %v11203_v15, %v11171_v27  ;;  %v9226_v0 = vpack.c.b16 %v9204_v35, %v9204_v35  ;;  %v11540_v19 = vsel %vm1965_vm7, %v11172_v60, %v11539_v1  ;;  %v28232_v35 = vld [vmem:[#allocation20_spill] sm:$0xff] }
 0x2ad   :  { %v2096_v8 = vrot.slane %v2089_v11, %v21460_v43  ;;  %v9029_v54 = vrot.slane %v8890_v16, %v21460_v43  ;;  %v11226_v18 = vpack.c.b16 %v11204_v63, %v11204_v63  ;;  %v11562_v40 = vpack.c.b16 %v11540_v19, %v11540_v19  ;;  %v3963_v11 = vpop.permute.xlu0 %3962 }
 0x2ae   :  { %v4660_v53 = vrot.slane %v4653_v31, %v21460_v43  ;;  %v24332_v46 = vrot.slane %v9226_v0, %v21460_v43  ;;  %v7484_v27 = vsel %vm1965_vm7, %v24122_v28, %v28229_v9  ;;  %v28230_v30 = vrot.slane %v22943_v52, 7  ;;  %v6300_v52 = vpop.permute.xlu1 %6299  ;;  %v24382_v9 = vld.sshfl [vmem:[#allocation2 + $0x10] sm:$0x33 pattern:$0x75316420] }
 0x2af   :  { %2259 = vst.msk [vmem:[#allocation2 + $0x14] sm:$0x1] %vm2253_vm11, %v2096_v8  ;;  %v864_v15 = vadd.f32 %v21794_v3, %v28231_v12  ;;  %v9036_v1 = vrot.slane %v9029_v54, %v21460_v43  ;;  %v11365_v16 = vrot.slane %v11226_v18, %v21460_v43  ;;  %v24350_v7 = vrot.slane %v11562_v40, %v21460_v43  ;;  %v20599_v54 = vld [vmem:[%s27942_s2 + $0x400] sm:$0xff]  }
 0x2b0   :  { %v10044_v60 = vsel %vm1965_vm7, %v28230_v30, %v22941_v41  ;;  %2596 = vst.msk [vmem:[#allocation2 + $0x14] sm:$0x1] %vm2590_vm12, %v24212_v20  ;;  %v7510_v28 = vpack.c.b16 %v7484_v27, %v7484_v27  ;;  %v9372_v41 = vrot.slane %v24332_v46, %v21460_v43  ;;  %v865_v63 = vadd.f32 %v21782_v44, %v28232_v35  ;;  %v20602_v27 = vld [vmem:[%s27942_s2 + $0x448] sm:$0xff]  }
 0x2b1   :  { %4822 = vst.msk [vmem:[#allocation2 + $0x15] sm:$0x1] %vm2253_vm11, %v4660_v53  ;;  %v10070_v31 = vpack.c.b16 %v10044_v60, %v10044_v60  ;;  %vm896_vm9 = vcmp.ge.f32.partialorder %v864_v15, 0.0  ;;  %9139 = vrot.lane.b32.xlu0 %v9036_v1, %s21104_s10  ;;  %v11372_v20 = vrot.slane %v11365_v16, %v21460_v43  ;;  %v11708_v8 = vrot.slane %v24350_v7, %v21460_v43  ;;  %v20601_v1 = vld [vmem:[%s27942_s2 + $0x480] sm:$0xff]   ;;  %v9468_v16 = vpop.permute.xlu0 %9467 }
 0x2b2   :  { %5158 = vst.msk [vmem:[#allocation2 + $0x15] sm:$0x1] %vm2590_vm12, %v24220_v37  ;;  %v7597_v37 = vrot.slane %v7510_v28, %v21460_v43  ;;  %v928_v0 = vmul.f32 0.33, %v864_v15  ;;  %vm897_vm10 = vcmp.ge.f32.partialorder %v865_v63, 0.0  ;;  %v6374_v53 = vadd.f32 %v21780_v42, %v28232_v35 }
 0x2b3   :  { %3669 = vst.msk [vmem:[#allocation2 + $0x14] sm:$0x1] %vm3663_vm15, %v24281_v24  ;;  %6006 = vst.msk [vmem:[#allocation2 + $0x15] sm:$0x1] %vm3663_vm15, %v24286_v51  ;;  %v10157_v46 = vrot.slane %v10070_v31, %v21460_v43  ;;  %v929_v19 = vmul.f32 0.33, %v865_v63  ;;  %v6373_v24 = vadd.f32 %v21792_v6, %v28231_v12  ;;  %11475 = vrot.lane.b32.xlu1 %v11372_v20, %s21104_s10  ;;  %v28233_v31 = vunpack.c.l.b16 %v23131_v5 }
 0x2b4   :  { %4006 = vst.msk [vmem:[#allocation2 + $0x14] sm:$0x1] %vm4000_vm0, %v3963_v11  ;;  %6342 = vst.msk [vmem:[#allocation2 + $0x15] sm:$0x1] %vm4000_vm0, %v6300_v52  ;;  %v7604_v18 = vrot.slane %v7597_v37, %v21460_v43  ;;  %v960_v51 = vsel %vm896_vm9, %v864_v15, %v928_v0  ;;  %v13822_v40 = vrot.slane %v24072_v58, %v21460_v43  ;;  %vm6406_vm14 = vcmp.ge.f32.partialorder %v6374_v53, 0.0  ;;  %v11804_v52 = vpop.permute.xlu1 %11803 }
 0x2b5   :  { %v10164_v30 = vrot.slane %v10157_v46, %v21460_v43  ;;  %v961_v60 = vsel %vm897_vm10, %v865_v63, %v929_v19  ;;  %v992_v12 = vpack.c.bf16 %v960_v51, %v960_v51  ;;  %vm6405_vm13 = vcmp.ge.f32.partialorder %v6373_v24, 0.0  ;;  %3970 = vrot.lane.b32.xlu0 %v3867_v61, %s21105_s11 }
 0x2b6   :  { %7766 = vst.msk [vmem:[#allocation2 + $0x16] sm:$0x1] %vm2253_vm11, %v7604_v18  ;;  %v993_v15 = vpack.c.bf16 %v961_v60, %v961_v60  ;;  %v6437_v58 = vmul.f32 0.33, %v6373_v24  ;;  %v6438_v11 = vmul.f32 0.33, %v6374_v53  ;;  %14061 = vmatmul.mubr.bf16.vlgmr.msra.gmra.mrb[12].mxu0 %v13822_v40  ;;  %v14116_v61 = vcombine.high %v24382_v9, %v24382_v9 }
 0x2b7   :  { %8102 = vst.msk [vmem:[#allocation2 + $0x16] sm:$0x1] %vm2590_vm12, %v24252_v17  ;;  %v1322_v36 = vrot.slane %v992_v12, %v21460_v43  ;;  %19748 = vmatpush3.bf16.msra.mxu0 %v20599_v54  ;;  %v13830_v28 = vcombine.high %v13822_v40, %v13822_v40  ;;  %v24404_v35 = vrot.slane %v28233_v31, 7  ;;  %v28234_v63 = vrot.slane %v24314_v57, %v21460_v43  ;;  %v20604_v18 = vld [vmem:[%s27942_s2 + $0x4c8] sm:$0xff]  }
 0x2b8   :  { %10326 = vst.msk [vmem:[#allocation2 + $0x17] sm:$0x1] %vm2253_vm11, %v10164_v30  ;;  %v1336_v17 = vrot.slane %v993_v15, %v21460_v43  ;;  %v6469_v20 = vsel %vm6405_vm13, %v6373_v24, %v6437_v58  ;;  %v6470_v37 = vsel %vm6406_vm14, %v6374_v53, %v6438_v11  ;;  %19749 = vmatprep.subr.bf16.mxu0 %v20602_v27  ;;  %v20605_v30 = vld [vmem:[%s27942_s2 + $0x488] sm:$0xff]   ;;  %v20608_v11 = vld [vmem:[%s27942_s2 + $0x4d0] sm:$0xff]  }
 0x2b9   :  { %6307 = vrot.lane.b32.xlu1 %v28234_v63, %s21105_s11  ;;  %10662 = vst.msk [vmem:[#allocation2 + $0x17] sm:$0x1] %vm2590_vm12, %v24257_v56  ;;  %v1329_v0 = vrot.slane %v1322_v36, %v21460_v43  ;;  %v6501_v46 = vpack.c.bf16 %v6469_v20, %v6469_v20  ;;  %v6502_v57 = vpack.c.bf16 %v6470_v37, %v6470_v37  ;;  %v20603_v56 = vld [vmem:[%s27942_s2 + $0x408] sm:$0xff]   ;;  %v20610_v63 = vld [vmem:[%s27942_s2 + $0x458] sm:$0xff]  }
 0x2ba   :  { %9174 = vst.msk [vmem:[#allocation2 + $0x16] sm:$0x1] %vm3663_vm15, %v24310_v4  ;;  %v24420_v19 = vrot.slane %v14116_v61, %v21460_v43  ;;  %14101 = vmatmul.mubr.bf16.vlgmr.msra.gmra.mrb[12].mxu1 %v13830_v28  ;;  %11510 = vst.msk [vmem:[#allocation2 + $0x17] sm:$0x1] %vm3663_vm15, %v24316_v21  ;;  %9475 = vrot.lane.b32.xlu0 %v9372_v41, %s21105_s11  ;;  %v1343_v4 = vrot.slane %v1336_v17, %v21460_v43  ;;  %v28235_v21 = vunpack.c.l.b16 %v23183_v13  ;;  %v20606_v13 = vld [vmem:[%s27942_s2 + $0x450] sm:$0xff]  }
 0x2bb   :  { %9510 = vst.msk [vmem:[#allocation2 + $0x16] sm:$0x1] %vm4000_vm0, %v9468_v16  ;;  %v2767_v24 = vcombine.high %v1322_v36, %v1322_v36  ;;  %v2775_v54 = vcombine.high %v1336_v17, %v1336_v17  ;;  %19770 = vmatpush3.bf16.msra.mxu1 %v20601_v1  ;;  %11846 = vst.msk [vmem:[#allocation2 + $0x17] sm:$0x1] %vm4000_vm0, %v11804_v52  ;;  %v1770_v53 = vrot.slane %v1329_v0, %v28151_v26  ;;  %v20607_v36 = vld [vmem:[%s27942_s2 + $0x410] sm:$0xff]  }
 0x2bc   :  { %v24436_v51 = vrot.slane %v28235_v21, 7  ;;  %v4037_v40 = vcombine.high %v1329_v0, %v1329_v0  ;;  %v24440_v41 = vrot.slane %v6501_v46, %v21460_v43  ;;  %v24443_v27 = vrot.slane %v6502_v57, %v21460_v43  ;;  %14361 = vmatprep.mubr.bf16.mxu0 %v24420_v19  ;;  %19750 = vmatpush3.bf16.msra.mxu0 %v20603_v56  ;;  %v20609_v46 = vld [vmem:[%s27942_s2 + $0x490] sm:$0xff]  }
 0x2bd   :  { %11811 = vrot.lane.b32.xlu1 %v11708_v8, %s21105_s11  ;;  %v1784_v60 = vrot.slane %v1343_v4, %v28151_v26  ;;  %v4038_v12 = vcombine.high %v1343_v4, %v1343_v4  ;;  %v24458_v15 = vrot.slane %v2767_v24, %v21460_v43  ;;  %v24461_v58 = vrot.slane %v2775_v54, %v21460_v43  ;;  %v20612_v54 = vld [vmem:[%s27942_s2 + $0x4d8] sm:$0xff]  }
 0x2be   :  { %v24467_v1 = vrot.slane %v1770_v53, %v28151_v26  ;;  %v4335_v16 = vrot.slane %v4037_v40, %v28151_v26  ;;  %v6838_v7 = vrot.slane %v24440_v41, %v21460_v43  ;;  %v6852_v8 = vrot.slane %v24443_v27, %v21460_v43  ;;  %19771 = vmatprep.subr.bf16.mxu1 %v20604_v18 }
 0x2bf   :  { %v24478_v61 = vrot.slane %v1784_v60, %v28151_v26  ;;  %v4349_v28 = vrot.slane %v4038_v12, %v28151_v26  ;;  %v3149_v52 = vrot.slane %v24458_v15, %v28151_v26  ;;  %v3163_v31 = vrot.slane %v24461_v58, %v28151_v26  ;;  %19772 = vmatpush3.bf16.msra.mxu1 %v20605_v30  ;;  %v20611_v30 = vld [vmem:[%s27942_s2 + $0x418] sm:$0xff]  }
 0x2c0   :  { %v28046_v17 = vunpack.c.l.b16 %v24467_v1  ;;  %v4342_v20 = vrot.slane %v4335_v16, %v28151_v26  ;;  %v7279_v37 = vrot.slane %v6838_v7, %v28151_v26  ;;  %v7293_v0 = vrot.slane %v6852_v8, %v28151_v26  ;;  %19751 = vmatprep.subr.bf16.mxu0 %v20606_v13  ;;  %19773 = vmatprep.subr.bf16.mxu1 %v20608_v11  ;;  %v20614_v16 = vld [vmem:[%s27942_s2 + $0x460] sm:$0xff]  }
 0x2c1   :  { %v28047_v57 = vunpack.c.l.b16 %v24478_v61  ;;  %v4356_v56 = vrot.slane %v4349_v28, %v28151_v26  ;;  %v9541_v4 = vcombine.high %v6838_v7, %v6838_v7  ;;  %v9542_v24 = vcombine.high %v6852_v8, %v6852_v8  ;;  %19752 = vmatpush3.bf16.msra.mxu0 %v20607_v36 }
 0x2c2   :  { %v2290_v18 = vrot.slane %v28046_v17, 1  ;;  %v24502_v21 = vunpack.c.l.b16 %v4342_v20  ;;  %v24505_v53 = vrot.slane %v7279_v37, %v28151_v26  ;;  %v24508_v40 = vrot.slane %v7293_v0, %v28151_v26  ;;  %19753 = vmatprep.subr.bf16.mxu0 %v20610_v63  ;;  %v24529_v20 = vpop.permute.xlu0 %2554 }
 0x2c3   :  { %v24513_v13 = vunpack.c.l.b16 %v4356_v56  ;;  %v9839_v60 = vrot.slane %v9541_v4, %v28151_v26  ;;  %v9853_v12 = vrot.slane %v9542_v24, %v28151_v26  ;;  %v24518_v11 = vrot.slane %v3149_v52, %v28151_v26  ;;  %19774 = vmatpush3.bf16.msra.mxu1 %v20609_v46  ;;  %v20613_v52 = vld [vmem:[%s27942_s2 + $0x498] sm:$0xff]   ;;  %v24539_v4 = vpop.permute.xlu1 %5117  ;;  %v20616_v46 = vld [vmem:[%s27942_s2 + $0x4e0] sm:$0xff]  }
 0x2c4   :  { %v2291_v7 = vsel %vm1965_vm7, %v28047_v57, %v2290_v18  ;;  %v4853_v8 = vrot.slane %v24502_v21, 1  ;;  %v28048_v36 = vunpack.c.l.b16 %v24505_v53  ;;  %v28049_v28 = vunpack.c.l.b16 %v24508_v40  ;;  %19775 = vmatprep.subr.bf16.mxu1 %v20612_v54 }
 0x2c5   :  { %v2312_v63 = vpack.c.b16 %v2291_v7, %v2291_v7  ;;  %v9846_v37 = vrot.slane %v9839_v60, %v28151_v26  ;;  %v9860_v0 = vrot.slane %v9853_v12, %v28151_v26  ;;  %v24537_v56 = vrot.slane %v3163_v31, %v28151_v26  ;;  %19754 = vmatpush3.bf16.msra.mxu0 %v20611_v30  ;;  %v20615_v31 = vld [vmem:[%s27942_s2 + $0x420] sm:$0xff]  }
 0x2c6   :  { %v4854_v24 = vsel %vm1965_vm7, %v24513_v13, %v4853_v8  ;;  %v7797_v18 = vrot.slane %v28048_v36, 1  ;;  %v3331_v60 = vunpack.c.l.b16 %v24518_v11  ;;  %v14132_v12 = vcombine.high %v24420_v19, %v24420_v19  ;;  %19755 = vmatprep.subr.bf16.mxu0 %v20614_v16 }
 0x2c7   :  { %v2464_v54 = vrot.slane %v2312_v63, %v21460_v43  ;;  %v4875_v7 = vpack.c.b16 %v4854_v24, %v4854_v24  ;;  %v24555_v17 = vunpack.c.l.b16 %v9846_v37  ;;  %v24557_v57 = vunpack.c.l.b16 %v9860_v0  ;;  %19776 = vmatpush3.bf16.msra.mxu1 %v20613_v52  ;;  %v20617_v63 = vld [vmem:[%s27942_s2 + $0x4a0] sm:$0xff]   ;;  %v24577_v52 = vpop.permute.xlu0 %8061 }
 0x2c8   :  { %v7798_v11 = vsel %vm1965_vm7, %v28049_v28, %v7797_v18  ;;  %v3332_v8 = vunpack.c.l.b16 %v24537_v56  ;;  %14401 = vmatprep.mubr.bf16.mxu1 %v14132_v12  ;;  %v5189_v19 = vcombine.high %v24458_v15, %v24458_v15  ;;  %v5190_v30 = vcombine.high %v24461_v58, %v24461_v58  ;;  %19777 = vmatprep.subr.bf16.mxu1 %v20616_v46  ;;  %v20618_v12 = vld [vmem:[%s27942_s2 + $0x468] sm:$0xff]  }
 0x2c9   :  { %28236 = vst [vmem:[#allocation39_spill] sm:$0xff] %v24555_v17  ;;  %28237 = vst [vmem:[#allocation42_spill] sm:$0xff] %v24557_v57  ;;  %v2471_v16 = vrot.slane %v2464_v54, %v21460_v43  ;;  %v5027_v37 = vrot.slane %v4875_v7, %v21460_v43  ;;  %v7819_v0 = vpack.c.b16 %v7798_v11, %v7798_v11  ;;  %v10357_v24 = vrot.slane %v24555_v17, 1  ;;  %v20620_v54 = vld [vmem:[%s27942_s2 + $0x4e8] sm:$0xff]   ;;  %v24592_v11 = vpop.permute.xlu1 %10621 }
 0x2ca   :  { %v3363_v56 = vrot.slane %v3332_v8, 7  ;;  %v5487_v18 = vrot.slane %v5189_v19, %v28151_v26  ;;  %v5501_v15 = vrot.slane %v5190_v30, %v28151_v26  ;;  %v8273_v58 = vcombine.high %v24440_v41, %v24440_v41  ;;  %19756 = vmatpush3.bf16.msra.mxu0 %v20615_v31 }
 0x2cb   :  { %2562 = vrot.lane.b32.xlu0 %v2471_v16, %s21103_s1  ;;  %v5034_v46 = vrot.slane %v5027_v37, %v21460_v43  ;;  %v7971_v7 = vrot.slane %v7819_v0, %v21460_v43  ;;  %v10358_v41 = vsel %vm1965_vm7, %v24557_v57, %v10357_v24  ;;  %v8281_v31 = vcombine.high %v24443_v27, %v24443_v27  ;;  %v20619_v16 = vld [vmem:[%s27942_s2 + $0x428] sm:$0xff]  }
 0x2cc   :  { %v10379_v19 = vpack.c.b16 %v10358_v41, %v10358_v41  ;;  %v3364_v30 = vsel %vm1965_vm7, %v3363_v56, %v3331_v60  ;;  %v5494_v36 = vrot.slane %v5487_v18, %v28151_v26  ;;  %v5508_v28 = vrot.slane %v5501_v15, %v28151_v26  ;;  %19778 = vmatpush3.bf16.msra.mxu1 %v20617_v63  ;;  %v20621_v37 = vld [vmem:[%s27942_s2 + $0x4a8] sm:$0xff]   ;;  %v20622_v63 = vld [vmem:[%s27942_s2 + $0x470] sm:$0xff]  }
 0x2cd   :  { %5125 = vrot.lane.b32.xlu1 %v5034_v46, %s21103_s1  ;;  %v7978_v27 = vrot.slane %v7971_v7, %v21460_v43  ;;  %v3385_v0 = vpack.c.b16 %v3364_v30, %v3364_v30  ;;  %v8280_v24 = vrot.slane %v8273_v58, %v21460_v43  ;;  %v8288_v56 = vrot.slane %v8281_v31, %v21460_v43  ;;  %v20624_v46 = vld [vmem:[%s27942_s2 + $0x4f0] sm:$0xff]   ;;  %v24629_v17 = vpop.permute.xlu1 %5965 }
 0x2ce   :  { %v10531_v18 = vrot.slane %v10379_v19, %v21460_v43  ;;  %v5669_v15 = vunpack.c.l.b16 %v5494_v36  ;;  %v5670_v41 = vunpack.c.l.b16 %v5508_v28  ;;  %v3700_v5 = vrot.slane %v3331_v60, 1  ;;  %19757 = vmatprep.subr.bf16.mxu0 %v20618_v12  ;;  %19779 = vmatprep.subr.bf16.mxu1 %v20620_v54  ;;  %v24620_v12 = vpop.permute.xlu0 %3627  ;;  %v20623_v54 = vld [vmem:[%s27942_s2 + $0x430] sm:$0xff]  }
 0x2cf   :  { %8069 = vrot.lane.b32.xlu0 %v7978_v27, %s21103_s1  ;;  %v3537_v58 = vrot.slane %v3385_v0, %v21460_v43  ;;  %v8655_v7 = vrot.slane %v8280_v24, %v28151_v26  ;;  %v8669_v31 = vrot.slane %v8288_v56, %v28151_v26  ;;  %v10693_v30 = vcombine.high %v8280_v24, %v8280_v24 }
 0x2d0   :  { %v10538_v19 = vrot.slane %v10531_v18, %v21460_v43  ;;  %v5701_v36 = vrot.slane %v5670_v41, 7  ;;  %v10694_v28 = vcombine.high %v8288_v56, %v8288_v56  ;;  %v3701_v60 = vsel %vm1965_vm7, %v3332_v8, %v3700_v5  ;;  %19758 = vmatpush3.bf16.msra.mxu0 %v20619_v16  ;;  %19780 = vmatpush3.bf16.msra.mxu1 %v20621_v37  ;;  %v20625_v5 = vld [vmem:[%s27942_s2 + $0x4b0] sm:$0xff]   ;;  %v20626_v8 = vld [vmem:[%s27942_s2 + $0x478] sm:$0xff]  }
 0x2d1   :  { %v3544_v27 = vrot.slane %v3537_v58, %v21460_v43  ;;  %v8662_v0 = vrot.slane %v8655_v7, %v28151_v26  ;;  %v8676_v24 = vrot.slane %v8669_v31, %v28151_v26  ;;  %v10991_v18 = vrot.slane %v10693_v30, %v28151_v26  ;;  %19759 = vmatprep.subr.bf16.mxu0 %v20622_v63  ;;  %v20628_v63 = vld [vmem:[%s27942_s2 + $0x4f8] sm:$0xff]  }
 0x2d2   :  { %10629 = vrot.lane.b32.xlu1 %v10538_v19, %s21103_s1  ;;  %v5702_v16 = vsel %vm1965_vm7, %v5701_v36, %v5669_v15  ;;  %v11005_v37 = vrot.slane %v10694_v28, %v28151_v26  ;;  %v3722_v56 = vpack.c.b16 %v3701_v60, %v3701_v60  ;;  %v6037_v58 = vrot.slane %v5669_v15, 1  ;;  %19781 = vmatprep.subr.bf16.mxu1 %v20624_v46  ;;  %v20627_v60 = vld [vmem:[%s27942_s2 + $0x438] sm:$0xff]  }
 0x2d3   :  { %3635 = vrot.lane.b32.xlu0 %v3544_v27, %s21104_s10  ;;  %v5723_v7 = vpack.c.b16 %v5702_v16, %v5702_v16  ;;  %v8837_v31 = vunpack.c.l.b16 %v8662_v0  ;;  %v8838_v30 = vunpack.c.l.b16 %v8676_v24  ;;  %v10998_v57 = vrot.slane %v10991_v18, %v28151_v26 }
 0x2d4   :  { %v11012_v19 = vrot.slane %v11005_v37, %v28151_v26  ;;  %v24647_v36 = vrot.slane %v3722_v56, %v21460_v43  ;;  %v6038_v28 = vsel %vm1965_vm7, %v5670_v41, %v6037_v58  ;;  %v28238_v15 = vunpack.c.l.b16 %v23128_v2  ;;  %19760 = vmatpush3.bf16.msra.mxu0 %v20623_v54  ;;  %19782 = vmatpush3.bf16.msra.mxu1 %v20625_v5  ;;  %v20629_v41 = vld [vmem:[%s27942_s2 + $0x4b8] sm:$0xff]   ;;  %v24667_v56 = vpop.permute.xlu0 %9133 }
 0x2d5   :  { %v5875_v27 = vrot.slane %v5723_v7, %v21460_v43  ;;  %v8869_v0 = vrot.slane %v8838_v30, 7  ;;  %v11173_v24 = vunpack.c.l.b16 %v10998_v57  ;;  %v6059_v18 = vpack.c.b16 %v6038_v28, %v6038_v28  ;;  %19761 = vmatprep.subr.bf16.mxu0 %v20626_v8  ;;  %19783 = vmatprep.subr.bf16.mxu1 %v20628_v63  ;;  %v20630_v57 = vld [vmem:[%s27942_s2 + $0x540] sm:$0xff]  }
 0x2d6   :  { %v1978_v46 = vsel %vm1965_vm7, %v24404_v35, %v28238_v15  ;;  %v11174_v2 = vunpack.c.l.b16 %v11012_v19  ;;  %v3881_v35 = vrot.slane %v24647_v36, %v21460_v43  ;;  %v28239_v16 = vrot.slane %v23175_v22, 7  ;;  %v24677_v19 = vpop.permute.xlu1 %11469 }
 0x2d7   :  { %v2003_v54 = vpack.c.b16 %v1978_v46, %v1978_v46  ;;  %v5882_v5 = vrot.slane %v5875_v27, %v21460_v43  ;;  %v8870_v8 = vsel %vm1965_vm7, %v8869_v0, %v8837_v31  ;;  %v24675_v58 = vrot.slane %v6059_v18, %v21460_v43 }
 0x2d8   :  { %v4542_v37 = vsel %vm1965_vm7, %v28239_v16, %v23173_v38  ;;  %v20632_v38 = vld [vmem:[%s27942_s2 + $0x5c0] sm:$0xff]   ;;  %v8891_v22 = vpack.c.b16 %v8870_v8, %v8870_v8  ;;  %v11205_v63 = vrot.slane %v11174_v2, 7  ;;  %v9205_v15 = vrot.slane %v8837_v31, 1  ;;  %19762 = vmatpush3.bf16.msra.mxu0 %v20627_v60  ;;  %19784 = vmatpush3.bf16.msra.mxu1 %v20629_v41 }
 0x2d9   :  { %v4567_v7 = vpack.c.b16 %v4542_v37, %v4542_v37  ;;  %v2103_v28 = vrot.slane %v2003_v54, %v21460_v43  ;;  %5973 = vrot.lane.b32.xlu1 %v5882_v5, %s21104_s10  ;;  %v11541_v0 = vrot.slane %v11173_v24, 1  ;;  %v28240_v18 = vunpack.c.l.b16 %v23162_v33  ;;  %19791 = vmatprep.subr.bf16.mxu0 %v20630_v57 }
 0x2da   :  { %v9043_v37 = vrot.slane %v8891_v22, %v21460_v43  ;;  %v11206_v54 = vsel %vm1965_vm7, %v11205_v63, %v11173_v24  ;;  %v9206_v60 = vsel %vm1965_vm7, %v8838_v30, %v9205_v15  ;;  %19813 = vmatprep.subr.bf16.mxu1 %v20632_v38  ;;  %v10045_v24 = vrot.slane %v23227_v47, 7  ;;  %v3965_v22 = vpop.permute.xlu0 %3964  ;;  %v28242_v38 = vld [vmem:[#allocation22_spill] sm:$0xff]  ;;  %v6302_v15 = vpop.permute.xlu1 %6301 }
 0x2db   :  { %v4667_v27 = vrot.slane %v4567_v7, %v21460_v43  ;;  %v7486_v16 = vsel %vm1965_vm7, %v24436_v51, %v28240_v18  ;;  %v2110_v31 = vrot.slane %v2103_v28, %v21460_v43  ;;  %v11227_v5 = vpack.c.b16 %v11206_v54, %v11206_v54 }
 0x2dc   :  { %v9227_v7 = vpack.c.b16 %v9206_v60, %v9206_v60  ;;  %v11542_v46 = vsel %vm1965_vm7, %v11174_v2, %v11541_v0  ;;  %v9050_v33 = vrot.slane %v9043_v37, %v21460_v43  ;;  %v7511_v41 = vpack.c.b16 %v7486_v16, %v7486_v16  ;;  %v28241_v2 = vld [vmem:[#allocation23_spill] sm:$0xff]  ;;  %v20631_v60 = vld [vmem:[%s27942_s2 + $0x500] sm:$0xff]  }
 0x2dd   :  { %v4674_v8 = vrot.slane %v4667_v27, %v21460_v43  ;;  %2260 = vst.msk [vmem:[#allocation2 + $0x18] sm:$0x1] %vm2253_vm11, %v2110_v31  ;;  %v11563_v51 = vpack.c.b16 %v11542_v46, %v11542_v46  ;;  %v11379_v63 = vrot.slane %v11227_v5, %v21460_v43  ;;  %v866_v57 = vadd.f32 %v21794_v3, %v28241_v2 }
 0x2de   :  { %2597 = vst.msk [vmem:[#allocation2 + $0x18] sm:$0x1] %vm2590_vm12, %v24529_v20  ;;  %v9379_v30 = vrot.slane %v9227_v7, %v21460_v43  ;;  %v867_v28 = vadd.f32 %v21782_v44, %v28242_v38  ;;  %9141 = vrot.lane.b32.xlu0 %v9050_v33, %s21104_s10  ;;  %v7611_v20 = vrot.slane %v7511_v41, %v21460_v43  ;;  %v9470_v33 = vpop.permute.xlu0 %9469 }
 0x2df   :  { %4823 = vst.msk [vmem:[#allocation2 + $0x19] sm:$0x1] %vm2253_vm11, %v4674_v8  ;;  %v24713_v47 = vrot.slane %v11563_v51, %v21460_v43  ;;  %v10046_v46 = vsel %vm1965_vm7, %v10045_v24, %v23214_v50  ;;  %v6375_v27 = vadd.f32 %v21792_v6, %v28241_v2  ;;  %v11386_v0 = vrot.slane %v11379_v63, %v21460_v43 }
 0x2e0   :  { %5159 = vst.msk [vmem:[#allocation2 + $0x19] sm:$0x1] %vm2590_vm12, %v24539_v4  ;;  %v9386_v18 = vrot.slane %v9379_v30, %v21460_v43  ;;  %v10071_v16 = vpack.c.b16 %v10046_v46, %v10046_v46  ;;  %vm898_vm1 = vcmp.ge.f32.partialorder %v866_v57, 0.0  ;;  %vm899_vm2 = vcmp.ge.f32.partialorder %v867_v28, 0.0  ;;  %v20634_v46 = vld [vmem:[%s27942_s2 + $0x548] sm:$0xff]  }
 0x2e1   :  { %3670 = vst.msk [vmem:[#allocation2 + $0x18] sm:$0x1] %vm3663_vm15, %v24620_v12  ;;  %6007 = vst.msk [vmem:[#allocation2 + $0x19] sm:$0x1] %vm3663_vm15, %v24629_v17  ;;  %v11722_v50 = vrot.slane %v24713_v47, %v21460_v43  ;;  %v7618_v12 = vrot.slane %v7611_v20, %v21460_v43  ;;  %v930_v37 = vmul.f32 0.33, %v866_v57  ;;  %11477 = vrot.lane.b32.xlu1 %v11386_v0, %s21104_s10 }
 0x2e2   :  { %4007 = vst.msk [vmem:[#allocation2 + $0x18] sm:$0x1] %vm4000_vm0, %v3965_v22  ;;  %v24727_v4 = vld.sshfl [vmem:[#allocation2 + $0x14] sm:$0x33 pattern:$0x75316420]  ;;  %v10171_v54 = vrot.slane %v10071_v16, %v21460_v43  ;;  %v6376_v17 = vadd.f32 %v21780_v42, %v28242_v38  ;;  %3972 = vrot.lane.b32.xlu0 %v3881_v35, %s21105_s11  ;;  %v14123_v7 = vrot.slane %v24382_v9, %v21460_v43  ;;  %v11806_v38 = vpop.permute.xlu1 %11805 }
 0x2e3   :  { %6343 = vst.msk [vmem:[#allocation2 + $0x19] sm:$0x1] %vm4000_vm0, %v6302_v15  ;;  %v931_v31 = vmul.f32 0.33, %v867_v28  ;;  %vm6407_vm3 = vcmp.ge.f32.partialorder %v6375_v27, 0.0  ;;  %v962_v5 = vsel %vm898_vm1, %v866_v57, %v930_v37  ;;  %v14417_v51 = vcombine.high %v24727_v4, %v24727_v4  ;;  %v20635_v16 = vld [vmem:[%s27942_s2 + $0x508] sm:$0xff]  }
 0x2e4   :  { %7767 = vst.msk [vmem:[#allocation2 + $0x1a] sm:$0x1] %vm2253_vm11, %v7618_v12  ;;  %v6439_v8 = vmul.f32 0.33, %v6375_v27  ;;  %v10178_v41 = vrot.slane %v10171_v54, %v21460_v43  ;;  %v994_v35 = vpack.c.bf16 %v962_v5, %v962_v5  ;;  %vm6408_vm4 = vcmp.ge.f32.partialorder %v6376_v17, 0.0  ;;  %14362 = vmatmul.mubr.bf16.vlgmr.msra.gmra.mrb[16].mxu0 %v14123_v7 }
 0x2e5   :  { %8103 = vst.msk [vmem:[#allocation2 + $0x1a] sm:$0x1] %vm2590_vm12, %v24577_v52  ;;  %v963_v36 = vsel %vm899_vm2, %v867_v28, %v931_v31  ;;  %v6440_v22 = vmul.f32 0.33, %v6376_v17  ;;  %v14431_v9 = vrot.slane %v14417_v51, %v21460_v43  ;;  %v20633_v52 = vld [vmem:[%s27942_s2 + $0x580] sm:$0xff]   ;;  %v28243_v30 = vrot.slane %v24675_v58, %v21460_v43  ;;  %19792 = vmatpush3.bf16.msra.mxu0 %v20631_v60  ;;  %v20637_v51 = vld [vmem:[%s27942_s2 + $0x588] sm:$0xff]  }
 0x2e6   :  { %v995_v24 = vpack.c.bf16 %v963_v36, %v963_v36  ;;  %v6471_v63 = vsel %vm6407_vm3, %v6375_v27, %v6439_v8  ;;  %9175 = vst.msk [vmem:[#allocation2 + $0x1a] sm:$0x1] %vm3663_vm15, %v24667_v56  ;;  %v1350_v2 = vrot.slane %v994_v35, %v21460_v43  ;;  %v14131_v56 = vcombine.high %v14123_v7, %v14123_v7 }
 0x2e7   :  { %6309 = vrot.lane.b32.xlu1 %v28243_v30, %s21105_s11  ;;  %10327 = vst.msk [vmem:[#allocation2 + $0x1b] sm:$0x1] %vm2253_vm11, %v10178_v41  ;;  %v6503_v57 = vpack.c.bf16 %v6471_v63, %v6471_v63  ;;  %v28244_v28 = vunpack.c.l.b16 %v23503_v10  ;;  %9477 = vrot.lane.b32.xlu0 %v9386_v18, %s21105_s11  ;;  %v6472_v47 = vsel %vm6408_vm4, %v6376_v17, %v6440_v22  ;;  %v28245_v54 = vunpack.c.l.b16 %v23492_v45  ;;  %v24834_v30 = vpop.permute.xlu1 %5119 }
 0x2e8   :  { %9511 = vst.msk [vmem:[#allocation2 + $0x1a] sm:$0x1] %vm4000_vm0, %v9470_v33  ;;  %v1364_v58 = vrot.slane %v995_v24, %v21460_v43  ;;  %14662 = vmatprep.mubr.bf16.mxu0 %v14431_v9  ;;  %v14433_v20 = vcombine.high %v14431_v9, %v14431_v9  ;;  %v1357_v10 = vrot.slane %v1350_v2, %v21460_v43  ;;  %v28246_v17 = vunpack.c.l.b16 %v23533_v32  ;;  %v24809_v33 = vpop.permute.xlu0 %2556  ;;  %v20638_v32 = vld [vmem:[%s27942_s2 + $0x550] sm:$0xff]  }
 0x2e9   :  { %v1979_v15 = vrot.slane %v28244_v28, 7  ;;  %10663 = vst.msk [vmem:[#allocation2 + $0x1b] sm:$0x1] %vm2590_vm12, %v24592_v11  ;;  %v6504_v0 = vpack.c.bf16 %v6472_v47, %v6472_v47  ;;  %v24781_v18 = vrot.slane %v6503_v57, %v21460_v43  ;;  %v2783_v11 = vcombine.high %v1350_v2, %v1350_v2  ;;  %14402 = vmatmul.mubr.bf16.vlgmr.msra.gmra.mrb[16].mxu1 %v14131_v56  ;;  %v20640_v24 = vld [vmem:[%s27942_s2 + $0x5d0] sm:$0xff]  }
 0x2ea   :  { %11511 = vst.msk [vmem:[#allocation2 + $0x1b] sm:$0x1] %vm3663_vm15, %v24677_v19  ;;  %v1371_v12 = vrot.slane %v1364_v58, %v21460_v43  ;;  %v2791_v37 = vcombine.high %v1364_v58, %v1364_v58  ;;  %19814 = vmatpush3.bf16.msra.mxu1 %v20633_v52  ;;  %14702 = vmatprep.mubr.bf16.mxu1 %v14433_v20  ;;  %v20636_v19 = vld [vmem:[%s27942_s2 + $0x5c8] sm:$0xff]   ;;  %v24800_v60 = vrot.slane %v28246_v17, 7  ;;  %v20639_v2 = vld [vmem:[%s27942_s2 + $0x510] sm:$0xff]  }
 0x2eb   :  { %11847 = vst.msk [vmem:[#allocation2 + $0x1b] sm:$0x1] %vm4000_vm0, %v11806_v38  ;;  %v24793_v31 = vsel %vm1965_vm7, %v1979_v15, %v28245_v54  ;;  %11813 = vrot.lane.b32.xlu1 %v11722_v50, %s21105_s11  ;;  %v1798_v5 = vrot.slane %v1357_v10, %v28151_v26  ;;  %v4039_v8 = vcombine.high %v1357_v10, %v1357_v10  ;;  %v20642_v15 = vld [vmem:[%s27942_s2 + $0x558] sm:$0xff]   ;;  %v20641_v10 = vld [vmem:[%s27942_s2 + $0x590] sm:$0xff]  }
 0x2ec   :  { %v6866_v7 = vrot.slane %v24781_v18, %v21460_v43  ;;  %v24807_v45 = vrot.slane %v6504_v0, %v21460_v43  ;;  %v1812_v50 = vrot.slane %v1371_v12, %v28151_v26  ;;  %v4040_v41 = vcombine.high %v1371_v12, %v1371_v12  ;;  %19793 = vmatprep.subr.bf16.mxu0 %v20634_v46 }
 0x2ed   :  { %v24819_v36 = vrot.slane %v2783_v11, %v21460_v43  ;;  %v24822_v35 = vrot.slane %v2791_v37, %v21460_v43  ;;  %v24828_v22 = vrot.slane %v1798_v5, %v28151_v26  ;;  %v4363_v63 = vrot.slane %v4039_v8, %v28151_v26  ;;  %19794 = vmatpush3.bf16.msra.mxu0 %v20635_v16  ;;  %v20644_v37 = vld [vmem:[%s27942_s2 + $0x5d8] sm:$0xff]   ;;  %v24871_v8 = vpop.permute.xlu0 %8063 }
 0x2ee   :  { %v6880_v9 = vrot.slane %v24807_v45, %v21460_v43  ;;  %v7307_v52 = vrot.slane %v6866_v7, %v28151_v26  ;;  %v24840_v57 = vrot.slane %v1812_v50, %v28151_v26  ;;  %v4377_v56 = vrot.slane %v4040_v41, %v28151_v26  ;;  %19815 = vmatprep.subr.bf16.mxu1 %v20636_v19 }
 0x2ef   :  { %v9543_v38 = vcombine.high %v6866_v7, %v6866_v7  ;;  %v3177_v28 = vrot.slane %v24819_v36, %v28151_v26  ;;  %v28054_v58 = vunpack.c.l.b16 %v24828_v22  ;;  %v4370_v47 = vrot.slane %v4363_v63, %v28151_v26  ;;  %19816 = vmatpush3.bf16.msra.mxu1 %v20637_v51  ;;  %19795 = vmatprep.subr.bf16.mxu0 %v20638_v32  ;;  %v20643_v7 = vld [vmem:[%s27942_s2 + $0x518] sm:$0xff]  }
 0x2f0   :  { %v24851_v20 = vrot.slane %v7307_v52, %v28151_v26  ;;  %v7321_v46 = vrot.slane %v6880_v9, %v28151_v26  ;;  %v28055_v0 = vunpack.c.l.b16 %v24840_v57  ;;  %v4384_v11 = vrot.slane %v4377_v56, %v28151_v26  ;;  %19817 = vmatprep.subr.bf16.mxu1 %v20640_v24  ;;  %v20646_v24 = vld [vmem:[%s27942_s2 + $0x560] sm:$0xff]   ;;  %v24893_v56 = vpop.permute.xlu1 %10623 }
 0x2f1   :  { %v9544_v16 = vcombine.high %v6880_v9, %v6880_v9  ;;  %v9867_v12 = vrot.slane %v9543_v38, %v28151_v26  ;;  %v2292_v54 = vrot.slane %v28054_v58, 1  ;;  %v24865_v19 = vunpack.c.l.b16 %v4370_v47  ;;  %19796 = vmatpush3.bf16.msra.mxu0 %v20639_v2  ;;  %v20645_v38 = vld [vmem:[%s27942_s2 + $0x598] sm:$0xff]  }
 0x2f2   :  { %v24868_v17 = vrot.slane %v7321_v46, %v28151_v26  ;;  %v28052_v5 = vunpack.c.l.b16 %v24851_v20  ;;  %v24876_v51 = vunpack.c.l.b16 %v4384_v11  ;;  %v24881_v41 = vrot.slane %v3177_v28, %v28151_v26  ;;  %19797 = vmatprep.subr.bf16.mxu0 %v20642_v15  ;;  %v20648_v11 = vld [vmem:[%s27942_s2 + $0x5e0] sm:$0xff]  }
 0x2f3   :  { %v9874_v32 = vrot.slane %v9867_v12, %v28151_v26  ;;  %v9881_v50 = vrot.slane %v9544_v16, %v28151_v26  ;;  %v2293_v63 = vsel %vm1965_vm7, %v28055_v0, %v2292_v54  ;;  %v4855_v9 = vrot.slane %v24865_v19, 1  ;;  %19818 = vmatpush3.bf16.msra.mxu1 %v20641_v10 }
 0x2f4   :  { %v28053_v52 = vunpack.c.l.b16 %v24868_v17  ;;  %v7799_v2 = vrot.slane %v28052_v5, 1  ;;  %v2313_v28 = vpack.c.b16 %v2293_v63, %v2293_v63  ;;  %v3191_v46 = vrot.slane %v24822_v35, %v28151_v26  ;;  %19819 = vmatprep.subr.bf16.mxu1 %v20644_v37  ;;  %v20647_v37 = vld [vmem:[%s27942_s2 + $0x520] sm:$0xff]   ;;  %v24945_v58 = vpop.permute.xlu1 %5967 }
 0x2f5   :  { %v9888_v15 = vrot.slane %v9881_v50, %v28151_v26  ;;  %v24899_v47 = vunpack.c.l.b16 %v9874_v32  ;;  %v4856_v10 = vsel %vm1965_vm7, %v24876_v51, %v4855_v9  ;;  %v3333_v12 = vunpack.c.l.b16 %v24881_v41  ;;  %19798 = vmatpush3.bf16.msra.mxu0 %v20643_v7  ;;  %v24925_v7 = vpop.permute.xlu0 %3629 }
 0x2f6   :  { %v7800_v16 = vsel %vm1965_vm7, %v28053_v52, %v7799_v2  ;;  %v5191_v54 = vcombine.high %v24819_v36, %v24819_v36  ;;  %v2478_v32 = vrot.slane %v2313_v28, %v21460_v43  ;;  %v4876_v50 = vpack.c.b16 %v4856_v10, %v4856_v10  ;;  %19799 = vmatprep.subr.bf16.mxu0 %v20646_v24  ;;  %v20649_v28 = vld [vmem:[%s27942_s2 + $0x5a0] sm:$0xff]   ;;  %v20650_v24 = vld [vmem:[%s27942_s2 + $0x568] sm:$0xff]  }
 0x2f7   :  { %28247 = vst [vmem:[#allocation41_spill] sm:$0xff] %v24899_v47  ;;  %v7820_v63 = vpack.c.b16 %v7800_v16, %v7800_v16  ;;  %v24918_v5 = vunpack.c.l.b16 %v9888_v15  ;;  %v10359_v9 = vrot.slane %v24899_v47, 1  ;;  %v3198_v2 = vrot.slane %v3191_v46, %v28151_v26  ;;  %19820 = vmatpush3.bf16.msra.mxu1 %v20645_v38  ;;  %v20652_v38 = vld [vmem:[%s27942_s2 + $0x5e8] sm:$0xff]  }
 0x2f8   :  { %v5192_v41 = vcombine.high %v24822_v35, %v24822_v35  ;;  %v5515_v36 = vrot.slane %v5191_v54, %v28151_v26  ;;  %v2485_v15 = vrot.slane %v2478_v32, %v21460_v43  ;;  %v5041_v46 = vrot.slane %v4876_v50, %v21460_v43  ;;  %19821 = vmatprep.subr.bf16.mxu1 %v20648_v11 }
 0x2f9   :  { %28248 = vst [vmem:[#allocation44_spill] sm:$0xff] %v24918_v5  ;;  %v7985_v10 = vrot.slane %v7820_v63, %v21460_v43  ;;  %v8289_v35 = vcombine.high %v24781_v18, %v24781_v18  ;;  %v10360_v16 = vsel %vm1965_vm7, %v24918_v5, %v10359_v9  ;;  %v3334_v54 = vunpack.c.l.b16 %v3198_v2  ;;  %19800 = vmatpush3.bf16.msra.mxu0 %v20647_v37  ;;  %v20651_v18 = vld [vmem:[%s27942_s2 + $0x528] sm:$0xff]   ;;  %v24971_v27 = vpop.permute.xlu0 %9135  ;;  %v24985_v5 = vpop.permute.xlu1 %11471 }
 0x2fa   :  { %v5522_v52 = vrot.slane %v5515_v36, %v28151_v26  ;;  %v5529_v32 = vrot.slane %v5192_v41, %v28151_v26  ;;  %2564 = vrot.lane.b32.xlu0 %v2485_v15, %s21103_s1  ;;  %v5048_v11 = vrot.slane %v5041_v46, %v21460_v43  ;;  %v10380_v63 = vpack.c.b16 %v10360_v16, %v10360_v16  ;;  %v20653_v15 = vld [vmem:[%s27942_s2 + $0x5a8] sm:$0xff]   ;;  %v20654_v46 = vld [vmem:[%s27942_s2 + $0x570] sm:$0xff]  }
 0x2fb   :  { %v7992_v50 = vrot.slane %v7985_v10, %v21460_v43  ;;  %v8296_v9 = vrot.slane %v8289_v35, %v21460_v43  ;;  %v3365_v2 = vrot.slane %v3334_v54, 7  ;;  %v8297_v37 = vcombine.high %v24807_v45, %v24807_v45  ;;  %19822 = vmatpush3.bf16.msra.mxu1 %v20649_v28  ;;  %19801 = vmatprep.subr.bf16.mxu0 %v20650_v24  ;;  %v20656_v45 = vld [vmem:[%s27942_s2 + $0x5f0] sm:$0xff]  }
 0x2fc   :  { %v5536_v36 = vrot.slane %v5529_v32, %v28151_v26  ;;  %v5671_v41 = vunpack.c.l.b16 %v5522_v52  ;;  %5127 = vrot.lane.b32.xlu1 %v5048_v11, %s21103_s1  ;;  %v10545_v10 = vrot.slane %v10380_v63, %v21460_v43  ;;  %v3702_v16 = vrot.slane %v3333_v12, 1  ;;  %19823 = vmatprep.subr.bf16.mxu1 %v20652_v38  ;;  %v20655_v11 = vld [vmem:[%s27942_s2 + $0x530] sm:$0xff]  }
 0x2fd   :  { %v8683_v35 = vrot.slane %v8296_v9, %v28151_v26  ;;  %v10695_v52 = vcombine.high %v8296_v9, %v8296_v9  ;;  %v3366_v28 = vsel %vm1965_vm7, %v3365_v2, %v3333_v12  ;;  %v8304_v32 = vrot.slane %v8297_v37, %v21460_v43  ;;  %19802 = vmatpush3.bf16.msra.mxu0 %v20651_v18  ;;  %v20658_v2 = vld [vmem:[%s27942_s2 + $0x578] sm:$0xff]  }
 0x2fe   :  { %v5672_v24 = vunpack.c.l.b16 %v5536_v36  ;;  %v6039_v0 = vrot.slane %v5671_v41, 1  ;;  %8071 = vrot.lane.b32.xlu0 %v7992_v50, %s21103_s1  ;;  %v10552_v38 = vrot.slane %v10545_v10, %v21460_v43  ;;  %v3386_v63 = vpack.c.b16 %v3366_v28, %v3366_v28  ;;  %19803 = vmatprep.subr.bf16.mxu0 %v20654_v46  ;;  %v20657_v50 = vld [vmem:[%s27942_s2 + $0x5b0] sm:$0xff]  }
 0x2ff   :  { %v8690_v9 = vrot.slane %v8683_v35, %v28151_v26  ;;  %v11019_v12 = vrot.slane %v10695_v52, %v28151_v26  ;;  %v8697_v18 = vrot.slane %v8304_v32, %v28151_v26  ;;  %v10696_v37 = vcombine.high %v8304_v32, %v8304_v32  ;;  %19824 = vmatpush3.bf16.msra.mxu1 %v20653_v15 }
 0x300   :  { %v5703_v36 = vrot.slane %v5672_v24, 7  ;;  %v3703_v47 = vsel %vm1965_vm7, %v3334_v54, %v3702_v16  ;;  %10631 = vrot.lane.b32.xlu1 %v10552_v38, %s21103_s1  ;;  %v3551_v10 = vrot.slane %v3386_v63, %v21460_v43  ;;  %19825 = vmatprep.subr.bf16.mxu1 %v20656_v45  ;;  %v20660_v54 = vld [vmem:[%s27942_s2 + $0x5f8] sm:$0xff]   ;;  %v6040_v32 = vsel %vm1965_vm7, %v5672_v24, %v6039_v0 }
 0x301   :  { %v8839_v35 = vunpack.c.l.b16 %v8690_v9  ;;  %v11026_v52 = vrot.slane %v11019_v12, %v28151_v26  ;;  %v3723_v28 = vpack.c.b16 %v3703_v47, %v3703_v47  ;;  %v8704_v46 = vrot.slane %v8697_v18, %v28151_v26  ;;  %19804 = vmatpush3.bf16.msra.mxu0 %v20655_v11  ;;  %v20659_v38 = vld [vmem:[%s27942_s2 + $0x538] sm:$0xff]  }
 0x302   :  { %v5704_v15 = vsel %vm1965_vm7, %v5703_v36, %v5671_v41  ;;  %v11033_v16 = vrot.slane %v10696_v37, %v28151_v26  ;;  %v3558_v47 = vrot.slane %v3551_v10, %v21460_v43  ;;  %19805 = vmatprep.subr.bf16.mxu0 %v20658_v2  ;;  %v20662_v41 = vld [vmem:[%s27942_s2 + $0x640] sm:$0xff]   ;;  %v6060_v24 = vpack.c.b16 %v6040_v32, %v6040_v32  ;;  %v3967_v36 = vpop.permute.xlu0 %3966  ;;  %v20661_v18 = vld [vmem:[%s27942_s2 + $0x5b8] sm:$0xff]  }
 0x303   :  { %v5724_v45 = vpack.c.b16 %v5704_v15, %v5704_v15  ;;  %v11175_v63 = vunpack.c.l.b16 %v11026_v52  ;;  %v25005_v9 = vrot.slane %v3723_v28, %v21460_v43  ;;  %v8840_v12 = vunpack.c.l.b16 %v8704_v46  ;;  %19826 = vmatpush3.bf16.msra.mxu1 %v20657_v50  ;;  %v20664_v32 = vld [vmem:[%s27942_s2 + $0x6c0] sm:$0xff]  }
 0x304   :  { %v11040_v0 = vrot.slane %v11033_v16, %v28151_v26  ;;  %v2004_v11 = vpack.c.b16 %v24793_v31, %v24793_v31  ;;  %3637 = vrot.lane.b32.xlu0 %v3558_v47, %s21104_s10  ;;  %v28249_v10 = vrot.slane %v23540_v55, 7  ;;  %v9207_v28 = vrot.slane %v8839_v35, 1  ;;  %19827 = vmatprep.subr.bf16.mxu1 %v20660_v54  ;;  %v6304_v16 = vpop.permute.xlu1 %6303 }
 0x305   :  { %v5889_v2 = vrot.slane %v5724_v45, %v21460_v43  ;;  %v3895_v37 = vrot.slane %v25005_v9, %v21460_v43  ;;  %v8871_v31 = vrot.slane %v8840_v12, 7  ;;  %v25025_v15 = vrot.slane %v6060_v24, %v21460_v43  ;;  %19806 = vmatpush3.bf16.msra.mxu0 %v20659_v38 }
 0x306   :  { %v4544_v52 = vsel %vm1965_vm7, %v28249_v10, %v23527_v25  ;;  %v11176_v50 = vunpack.c.l.b16 %v11040_v0  ;;  %v2117_v46 = vrot.slane %v2004_v11, %v21460_v43  ;;  %v9208_v25 = vsel %vm1965_vm7, %v8840_v12, %v9207_v28  ;;  %19835 = vmatprep.subr.bf16.mxu0 %v20662_v41 }
 0x307   :  { %v5896_v47 = vrot.slane %v5889_v2, %v21460_v43  ;;  %v4568_v55 = vpack.c.b16 %v4544_v52, %v4544_v52  ;;  %v11543_v45 = vrot.slane %v11175_v63, 1  ;;  %v8872_v54 = vsel %vm1965_vm7, %v8871_v31, %v8839_v35  ;;  %19828 = vmatpush3.bf16.msra.mxu1 %v20661_v18  ;;  %v25047_v31 = vpop.permute.xlu0 %9471 }
 0x308   :  { %v11207_v0 = vrot.slane %v11176_v50, 7  ;;  %v6232_v24 = vrot.slane %v25025_v15, %v21460_v43  ;;  %v2124_v11 = vrot.slane %v2117_v46, %v21460_v43  ;;  %v8892_v38 = vpack.c.b16 %v8872_v54, %v8872_v54  ;;  %19857 = vmatprep.subr.bf16.mxu1 %v20664_v32 }
 0x309   :  { %5975 = vrot.lane.b32.xlu1 %v5896_v47, %s21104_s10  ;;  %v4681_v10 = vrot.slane %v4568_v55, %v21460_v43  ;;  %v9228_v2 = vpack.c.b16 %v9208_v25, %v9208_v25  ;;  %v11544_v52 = vsel %vm1965_vm7, %v11176_v50, %v11543_v45  ;;  %v28250_v41 = vunpack.c.l.b16 %v23530_v29  ;;  %v28251_v55 = vld [vmem:[#allocation12_spill] sm:$0xff]  ;;  %v28252_v25 = vld [vmem:[#allocation25_spill] sm:$0xff]  ;;  %v11808_v45 = vpop.permute.xlu1 %11807 }
 0x30a   :  { %v11208_v12 = vsel %vm1965_vm7, %v11207_v0, %v11175_v63  ;;  %2261 = vst.msk [vmem:[#allocation2 + $0x1c] sm:$0x1] %vm2253_vm11, %v2124_v11  ;;  %v11564_v35 = vpack.c.b16 %v11544_v52, %v11544_v52  ;;  %v10047_v18 = vrot.slane %v23582_v48, 7  ;;  %v9057_v46 = vrot.slane %v8892_v38, %v21460_v43 }
 0x30b   :  { %v7488_v28 = vsel %vm1965_vm7, %v24800_v60, %v28250_v41  ;;  %v11228_v47 = vpack.c.b16 %v11208_v12, %v11208_v12  ;;  %2598 = vst.msk [vmem:[#allocation2 + $0x1c] sm:$0x1] %vm2590_vm12, %v24809_v33  ;;  %v4688_v63 = vrot.slane %v4681_v10, %v21460_v43  ;;  %v25054_v50 = vrot.slane %v9228_v2, %v21460_v43  ;;  %v28253_v10 = vld [vmem:[#allocation24_spill] sm:$0xff] }
 0x30c   :  { %v25057_v29 = vrot.slane %v11564_v35, %v21460_v43  ;;  %v7512_v60 = vpack.c.b16 %v7488_v28, %v7488_v28  ;;  %v10048_v48 = vsel %vm1965_vm7, %v10047_v18, %v28251_v55  ;;  %v868_v32 = vadd.f32 %v21794_v3, %v28252_v25  ;;  %3671 = vst.msk [vmem:[#allocation2 + $0x1c] sm:$0x1] %vm3663_vm15, %v24925_v7  ;;  %v25089_v18 = vpop.permute.xlu0 %2558 }
 0x30d   :  { %v9064_v33 = vrot.slane %v9057_v46, %v21460_v43  ;;  %v11393_v54 = vrot.slane %v11228_v47, %v21460_v43  ;;  %4824 = vst.msk [vmem:[#allocation2 + $0x1d] sm:$0x1] %vm2253_vm11, %v4688_v63  ;;  %v9400_v0 = vrot.slane %v25054_v50, %v21460_v43  ;;  %v10072_v11 = vpack.c.b16 %v10048_v48, %v10048_v48  ;;  %v25094_v55 = vpop.permute.xlu1 %5121 }
 0x30e   :  { %4008 = vst.msk [vmem:[#allocation2 + $0x1c] sm:$0x1] %vm4000_vm0, %v3967_v36  ;;  %v11736_v38 = vrot.slane %v25057_v29, %v21460_v43  ;;  %v7625_v7 = vrot.slane %v7512_v60, %v21460_v43  ;;  %v869_v2 = vadd.f32 %v21782_v44, %v28253_v10  ;;  %vm900_vm5 = vcmp.ge.f32.partialorder %v868_v32, 0.0 }
 0x30f   :  { %5160 = vst.msk [vmem:[#allocation2 + $0x1d] sm:$0x1] %vm2590_vm12, %v24834_v30  ;;  %9143 = vrot.lane.b32.xlu0 %v9064_v33, %s21104_s10  ;;  %v11400_v52 = vrot.slane %v11393_v54, %v21460_v43  ;;  %v10185_v12 = vrot.slane %v10072_v11, %v21460_v43  ;;  %v932_v35 = vmul.f32 0.33, %v868_v32  ;;  %v6377_v30 = vadd.f32 %v21792_v6, %v28252_v25 }
 0x310   :  { %6008 = vst.msk [vmem:[#allocation2 + $0x1d] sm:$0x1] %vm3663_vm15, %v24945_v58  ;;  %v7632_v36 = vrot.slane %v7625_v7, %v21460_v43  ;;  %vm901_vm6 = vcmp.ge.f32.partialorder %v869_v2, 0.0  ;;  %v933_v41 = vmul.f32 0.33, %v869_v2  ;;  %v6378_v28 = vadd.f32 %v21780_v42, %v28253_v10 }
 0x311   :  { %6344 = vst.msk [vmem:[#allocation2 + $0x1d] sm:$0x1] %vm4000_vm0, %v6304_v16  ;;  %11479 = vrot.lane.b32.xlu1 %v11400_v52, %s21104_s10  ;;  %v10192_v46 = vrot.slane %v10185_v12, %v21460_v43  ;;  %v964_v47 = vsel %vm900_vm5, %v868_v32, %v932_v35  ;;  %vm6409_vm8 = vcmp.ge.f32.partialorder %v6377_v30, 0.0  ;;  %v6441_v58 = vmul.f32 0.33, %v6377_v30 }
 0x312   :  { %7768 = vst.msk [vmem:[#allocation2 + $0x1e] sm:$0x1] %vm2253_vm11, %v7632_v36  ;;  %v965_v63 = vsel %vm901_vm6, %v869_v2, %v933_v41  ;;  %v996_v50 = vpack.c.bf16 %v964_v47, %v964_v47  ;;  %vm6410_vm9 = vcmp.ge.f32.partialorder %v6378_v28, 0.0  ;;  %v6442_v60 = vmul.f32 0.33, %v6378_v28 }
 0x313   :  { %3974 = vrot.lane.b32.xlu0 %v3895_v37, %s21105_s11  ;;  %8104 = vst.msk [vmem:[#allocation2 + $0x1e] sm:$0x1] %vm2590_vm12, %v24871_v8  ;;  %v997_v16 = vpack.c.bf16 %v965_v63, %v965_v63  ;;  %v6473_v48 = vsel %vm6409_vm8, %v6377_v30, %v6441_v58  ;;  %v28254_v25 = vunpack.c.l.b16 %v23847_v34  ;;  %v4545_v33 = vrot.slane %v23875_v23, 7  ;;  %v20663_v34 = vld [vmem:[%s27942_s2 + $0x600] sm:$0xff]   ;;  %v28256_v37 = vld [vmem:[#allocation14_spill] sm:$0xff] }
 0x314   :  { %10328 = vst.msk [vmem:[#allocation2 + $0x1f] sm:$0x1] %vm2253_vm11, %v10192_v46  ;;  %v1378_v54 = vrot.slane %v996_v50, %v21460_v43  ;;  %v6474_v11 = vsel %vm6410_vm9, %v6378_v28, %v6442_v60  ;;  %v6505_v9 = vpack.c.bf16 %v6473_v48, %v6473_v48  ;;  %v25113_v8 = vrot.slane %v24727_v4, %v21460_v43  ;;  %v20667_v28 = vld [vmem:[%s27942_s2 + $0x608] sm:$0xff]   ;;  %v20670_v50 = vld [vmem:[%s27942_s2 + $0x650] sm:$0xff]  }
 0x315   :  { %v1981_v32 = vrot.slane %v28254_v25, 7  ;;  %10664 = vst.msk [vmem:[#allocation2 + $0x1f] sm:$0x1] %vm2590_vm12, %v24893_v56  ;;  %6311 = vrot.lane.b32.xlu1 %v6232_v24, %s21105_s11  ;;  %v1392_v23 = vrot.slane %v997_v16, %v21460_v43  ;;  %v6506_v56 = vpack.c.bf16 %v6474_v11, %v6474_v11  ;;  %v28255_v4 = vunpack.c.l.b16 %v23844_v59  ;;  %v25144_v59 = vpop.permute.xlu0 %8065 }
 0x316   :  { %9176 = vst.msk [vmem:[#allocation2 + $0x1e] sm:$0x1] %vm3663_vm15, %v24971_v27  ;;  %11512 = vst.msk [vmem:[#allocation2 + $0x1f] sm:$0x1] %vm3663_vm15, %v24985_v5  ;;  %v25134_v7 = vsel %vm1965_vm7, %v4545_v33, %v28256_v37  ;;  %v1385_v15 = vrot.slane %v1378_v54, %v21460_v43  ;;  %v25138_v24 = vrot.slane %v6505_v9, %v21460_v43  ;;  %14663 = vmatmul.mubr.bf16.vlgmr.msra.gmra.mrb[20].mxu0 %v25113_v8 }
 0x317   :  { %9512 = vst.msk [vmem:[#allocation2 + $0x1e] sm:$0x1] %vm4000_vm0, %v25047_v31  ;;  %v25130_v27 = vsel %vm1965_vm7, %v1981_v32, %v28255_v4  ;;  %v2799_v10 = vcombine.high %v1378_v54, %v1378_v54  ;;  %11848 = vst.msk [vmem:[#allocation2 + $0x1f] sm:$0x1] %vm4000_vm0, %v11808_v45  ;;  %v20666_v31 = vld [vmem:[%s27942_s2 + $0x648] sm:$0xff]   ;;  %9479 = vrot.lane.b32.xlu0 %v9400_v0, %s21105_s11  ;;  %v1399_v2 = vrot.slane %v1392_v23, %v21460_v43  ;;  %v25162_v0 = vpop.permute.xlu1 %10625 }
 0x318   :  { %v25152_v52 = vrot.slane %v6506_v56, %v21460_v43  ;;  %v2807_v12 = vcombine.high %v1392_v23, %v1392_v23  ;;  %v1826_v35 = vrot.slane %v1385_v15, %v28151_v26  ;;  %v4041_v30 = vcombine.high %v1385_v15, %v1385_v15  ;;  %19836 = vmatpush3.bf16.msra.mxu0 %v20663_v34  ;;  %v20671_v56 = vld [vmem:[%s27942_s2 + $0x610] sm:$0xff]  }
 0x319   :  { %v6894_v36 = vrot.slane %v25138_v24, %v21460_v43  ;;  %v25160_v41 = vrot.slane %v2799_v10, %v21460_v43  ;;  %11815 = vrot.lane.b32.xlu1 %v11736_v38, %s21105_s11  ;;  %v1840_v46 = vrot.slane %v1399_v2, %v28151_v26  ;;  %v4042_v47 = vcombine.high %v1399_v2, %v1399_v2  ;;  %v25196_v23 = vpop.permute.xlu0 %3631 }
 0x31a   :  { %v6908_v58 = vrot.slane %v25152_v52, %v21460_v43  ;;  %v25175_v63 = vrot.slane %v2807_v12, %v21460_v43  ;;  %v25181_v60 = vrot.slane %v1826_v35, %v28151_v26  ;;  %v4391_v16 = vrot.slane %v4041_v30, %v28151_v26  ;;  %19837 = vmatprep.subr.bf16.mxu0 %v20666_v31  ;;  %v20674_v31 = vld [vmem:[%s27942_s2 + $0x658] sm:$0xff]  }
 0x31b   :  { %v7335_v29 = vrot.slane %v6894_v36, %v28151_v26  ;;  %v9545_v38 = vcombine.high %v6894_v36, %v6894_v36  ;;  %v25186_v48 = vrot.slane %v1840_v46, %v28151_v26  ;;  %v4405_v25 = vrot.slane %v4042_v47, %v28151_v26  ;;  %v25216_v36 = vpop.permute.xlu1 %5969 }
 0x31c   :  { %28257 = vst [vmem:[#allocation46_spill] sm:$0xff] %v25181_v60  ;;  %v7349_v32 = vrot.slane %v6908_v58, %v28151_v26  ;;  %v9546_v33 = vcombine.high %v6908_v58, %v6908_v58  ;;  %v28059_v54 = vunpack.c.l.b16 %v25181_v60  ;;  %v4398_v11 = vrot.slane %v4391_v16, %v28151_v26  ;;  %19838 = vmatpush3.bf16.msra.mxu0 %v20667_v28 }
 0x31d   :  { %28258 = vst [vmem:[#allocation43_spill] sm:$0xff] %v25186_v48  ;;  %v25193_v9 = vrot.slane %v7335_v29, %v28151_v26  ;;  %v9895_v34 = vrot.slane %v9545_v38, %v28151_v26  ;;  %v28060_v4 = vunpack.c.l.b16 %v25186_v48  ;;  %v4412_v37 = vrot.slane %v4405_v25, %v28151_v26  ;;  %19839 = vmatprep.subr.bf16.mxu0 %v20670_v50  ;;  %v20675_v25 = vld [vmem:[%s27942_s2 + $0x618] sm:$0xff]  }
 0x31e   :  { %v25204_v15 = vrot.slane %v7349_v32, %v28151_v26  ;;  %v9909_v10 = vrot.slane %v9546_v33, %v28151_v26  ;;  %v2294_v2 = vrot.slane %v28059_v54, 1  ;;  %v25212_v12 = vunpack.c.l.b16 %v4398_v11  ;;  %v25235_v32 = vpop.f32.mrb[0].mxu0 }
 0x31f   :  { %28259 = vst [vmem:[#allocation19_spill] sm:$0xff] %v25193_v9  ;;  %v28058_v35 = vunpack.c.l.b16 %v25193_v9  ;;  %v9902_v30 = vrot.slane %v9895_v34, %v28151_v26  ;;  %v25218_v28 = vunpack.c.l.b16 %v4412_v37  ;;  %v3205_v58 = vrot.slane %v25160_v41, %v28151_v26 }
 0x320   :  { %28260 = vst [vmem:[#allocation45_spill] sm:$0xff] %v25204_v15  ;;  %28261 = vst [vmem:[#allocation18_spill] sm:$0xff] %v25212_v12  ;;  %v28062_v46 = vunpack.c.l.b16 %v25204_v15  ;;  %v9916_v47 = vrot.slane %v9909_v10, %v28151_v26  ;;  %v2295_v50 = vsel %vm1965_vm7, %v28060_v4, %v2294_v2  ;;  %v4857_v16 = vrot.slane %v25212_v12, 1  ;;  %19840 = vmatpush3.bf16.msra.mxu0 %v20671_v56  ;;  %v20678_v10 = vld [vmem:[%s27942_s2 + $0x660] sm:$0xff]   ;;  %v25245_v56 = vpop.f32.mrb[1].mxu0 }
 0x321   :  { %28262 = vst [vmem:[#allocation21_spill] sm:$0xff] %v25218_v28  ;;  %v7801_v29 = vrot.slane %v28058_v35, 1  ;;  %v25230_v38 = vunpack.c.l.b16 %v9902_v30  ;;  %v2314_v33 = vpack.c.b16 %v2295_v50, %v2295_v50  ;;  %v3212_v34 = vrot.slane %v3205_v58, %v28151_v26  ;;  %19841 = vmatprep.subr.bf16.mxu0 %v20674_v31  ;;  %v25255_v50 = vpop.permute.xlu0 %9137  ;;  %v19590_v31 = vpop.f32.mrb[2].mxu0 }
 0x322   :  { %v25237_v11 = vunpack.c.l.b16 %v9916_v47  ;;  %v3219_v37 = vrot.slane %v25175_v63, %v28151_v26  ;;  %v4858_v2 = vsel %vm1965_vm7, %v25218_v28, %v4857_v16  ;;  %v5193_v58 = vcombine.high %v25160_v41, %v25160_v41  ;;  %v19591_v5 = vpop.f32.mrb[3].mxu0  ;;  %v25264_v41 = vpop.permute.xlu1 %11473 }
 0x323   :  { %28263 = vst [vmem:[#allocation20_spill] sm:$0xff] %v25230_v38  ;;  %v7802_v30 = vsel %vm1965_vm7, %v28062_v46, %v7801_v29  ;;  %v10361_v47 = vrot.slane %v25230_v38, 1  ;;  %v2492_v35 = vrot.slane %v2314_v33, %v21460_v43  ;;  %v4877_v54 = vpack.c.b16 %v4858_v2, %v4858_v2  ;;  %v20679_v33 = vld [vmem:[%s27942_s2 + $0x620] sm:$0xff]   ;;  %v25269_v2 = vpop.f32.mrb[0].mxu1 }
 0x324   :  { %28264 = vst [vmem:[#allocation23_spill] sm:$0xff] %v25237_v11  ;;  %v7821_v4 = vpack.c.b16 %v7802_v30, %v7802_v30  ;;  %v3226_v45 = vrot.slane %v3219_v37, %v28151_v26  ;;  %v3335_v9 = vunpack.c.l.b16 %v3212_v34  ;;  %v5194_v29 = vcombine.high %v25175_v63, %v25175_v63  ;;  %19842 = vmatpush3.bf16.msra.mxu0 %v20675_v25  ;;  %v20682_v63 = vld [vmem:[%s27942_s2 + $0x668] sm:$0xff]  }
 0x325   :  { %v10362_v16 = vsel %vm1965_vm7, %v25237_v11, %v10361_v47  ;;  %v5543_v46 = vrot.slane %v5193_v58, %v28151_v26  ;;  %v2499_v5 = vrot.slane %v2492_v35, %v21460_v43  ;;  %v5055_v37 = vrot.slane %v4877_v54, %v21460_v43  ;;  %19843 = vmatprep.subr.bf16.mxu0 %v20678_v10  ;;  %v25277_v47 = vpop.f32.mrb[1].mxu1 }
 0x326   :  { %v7999_v34 = vrot.slane %v7821_v4, %v21460_v43  ;;  %v10381_v30 = vpack.c.b16 %v10362_v16, %v10362_v16  ;;  %v3336_v25 = vunpack.c.l.b16 %v3226_v45  ;;  %v5557_v31 = vrot.slane %v5194_v29, %v28151_v26  ;;  %v19612_v38 = vpop.f32.mrb[2].mxu1 }
 0x327   :  { %v5550_v58 = vrot.slane %v5543_v46, %v28151_v26  ;;  %v8305_v35 = vcombine.high %v25138_v24, %v25138_v24  ;;  %2566 = vrot.lane.b32.xlu0 %v2499_v5, %s21103_s1  ;;  %v5062_v54 = vrot.slane %v5055_v37, %v21460_v43  ;;  %v8313_v16 = vcombine.high %v25152_v52, %v25152_v52  ;;  %v19613_v45 = vpop.f32.mrb[3].mxu1  ;;  %v25291_v24 = vpop.permute.xlu0 %3968  ;;  %v20683_v38 = vld [vmem:[%s27942_s2 + $0x628] sm:$0xff]  }
 0x328   :  { %v8006_v4 = vrot.slane %v7999_v34, %v21460_v43  ;;  %v10559_v10 = vrot.slane %v10381_v30, %v21460_v43  ;;  %v3367_v11 = vrot.slane %v3336_v25, 7  ;;  %v5564_v46 = vrot.slane %v5557_v31, %v28151_v26  ;;  %19844 = vmatpush3.bf16.msra.mxu0 %v20679_v33  ;;  %v20686_v33 = vld [vmem:[%s27942_s2 + $0x670] sm:$0xff]  }
 0x329   :  { %v5673_v29 = vunpack.c.l.b16 %v5550_v58  ;;  %v8312_v12 = vrot.slane %v8305_v35, %v21460_v43  ;;  %5129 = vrot.lane.b32.xlu1 %v5062_v54, %s21103_s1  ;;  %v8320_v52 = vrot.slane %v8313_v16, %v21460_v43  ;;  %v3704_v37 = vrot.slane %v3335_v9, 1  ;;  %19845 = vmatprep.subr.bf16.mxu0 %v20682_v63 }
 0x32a   :  { %v10566_v5 = vrot.slane %v10559_v10, %v21460_v43  ;;  %v28265_v34 = vpack.c.b16 %v25130_v27, %v25130_v27  ;;  %v3368_v58 = vsel %vm1965_vm7, %v3367_v11, %v3335_v9  ;;  %v5674_v31 = vunpack.c.l.b16 %v5564_v46  ;;  %v25308_v10 = vpop.permute.xlu1 %6305 }
 0x32b   :  { %v8711_v35 = vrot.slane %v8312_v12, %v28151_v26  ;;  %v10697_v54 = vcombine.high %v8312_v12, %v8312_v12  ;;  %8073 = vrot.lane.b32.xlu0 %v8006_v4, %s21103_s1  ;;  %v3387_v16 = vpack.c.b16 %v3368_v58, %v3368_v58  ;;  %v8725_v45 = vrot.slane %v8320_v52, %v28151_v26  ;;  %v20687_v12 = vld [vmem:[%s27942_s2 + $0x630] sm:$0xff]  }
 0x32c   :  { %v2131_v30 = vrot.slane %v28265_v34, %v21460_v43  ;;  %v10698_v27 = vcombine.high %v8320_v52, %v8320_v52  ;;  %v3705_v63 = vsel %vm1965_vm7, %v3336_v25, %v3704_v37  ;;  %v5705_v34 = vrot.slane %v5674_v31, 7  ;;  %19846 = vmatpush3.bf16.msra.mxu0 %v20683_v38  ;;  %v20690_v52 = vld [vmem:[%s27942_s2 + $0x678] sm:$0xff]  }
 0x32d   :  { %v8718_v15 = vrot.slane %v8711_v35, %v28151_v26  ;;  %v11047_v60 = vrot.slane %v10697_v54, %v28151_v26  ;;  %v3724_v9 = vpack.c.b16 %v3705_v63, %v3705_v63  ;;  %10633 = vrot.lane.b32.xlu1 %v10566_v5, %s21103_s1  ;;  %v3565_v11 = vrot.slane %v3387_v16, %v21460_v43  ;;  %v25330_v5 = vpop.permute.xlu0 %9473 }
 0x32e   :  { %v8732_v4 = vrot.slane %v8725_v45, %v28151_v26  ;;  %v11061_v46 = vrot.slane %v10698_v27, %v28151_v26  ;;  %v6041_v25 = vrot.slane %v5673_v29, 1  ;;  %19847 = vmatprep.subr.bf16.mxu0 %v20686_v33  ;;  %v5706_v38 = vsel %vm1965_vm7, %v5705_v34, %v5673_v29  ;;  %v20691_v34 = vld [vmem:[%s27942_s2 + $0x638] sm:$0xff]  }
 0x32f   :  { %v8841_v37 = vunpack.c.l.b16 %v8718_v15  ;;  %v11054_v58 = vrot.slane %v11047_v60, %v28151_v26  ;;  %v25328_v35 = vrot.slane %v3724_v9, %v21460_v43  ;;  %v3572_v54 = vrot.slane %v3565_v11, %v21460_v43  ;;  %v25338_v60 = vpop.permute.xlu1 %11809 }
 0x330   :  { %v5725_v16 = vpack.c.b16 %v5706_v38, %v5706_v38  ;;  %v8842_v45 = vunpack.c.l.b16 %v8732_v4  ;;  %v11068_v33 = vrot.slane %v11061_v46, %v28151_v26  ;;  %v6042_v29 = vsel %vm1965_vm7, %v5674_v31, %v6041_v25  ;;  %19848 = vmatpush3.bf16.msra.mxu0 %v20687_v12  ;;  %v28267_v38 = vld [vmem:[#allocation35_spill] sm:$0xff] }
 0x331   :  { %v11177_v27 = vunpack.c.l.b16 %v11054_v58  ;;  %v2138_v15 = vrot.slane %v2131_v30, %v21460_v43  ;;  %3639 = vrot.lane.b32.xlu0 %v3572_v54, %s21104_s10  ;;  %v6061_v46 = vpack.c.b16 %v6042_v29, %v6042_v29  ;;  %19849 = vmatprep.subr.bf16.mxu0 %v20690_v52  ;;  %v28266_v30 = vpack.c.b16 %v25134_v7, %v25134_v7  ;;  %v20694_v54 = vld [vmem:[%s27942_s2 + $0x740] sm:$0xff]   ;;  %v25362_v7 = vld.sshfl [vmem:[#allocation2 + $0x18] sm:$0x33 pattern:$0x75316420] }
 0x332   :  { %v5903_v9 = vrot.slane %v5725_v16, %v21460_v43  ;;  %v8873_v11 = vrot.slane %v8842_v45, 7  ;;  %v11178_v4 = vunpack.c.l.b16 %v11068_v33  ;;  %v9209_v12 = vrot.slane %v8841_v37, 1 }
 0x333   :  { %2262 = vst.msk [vmem:[#allocation2 + $0x20] sm:$0x1] %vm2253_vm11, %v2138_v15  ;;  %v4695_v31 = vrot.slane %v28266_v30, %v21460_v43  ;;  %v11545_v25 = vrot.slane %v11177_v27, 1  ;;  %v28268_v58 = vunpack.c.l.b16 %v28267_v38  ;;  %v25358_v29 = vrot.slane %v6061_v46, %v21460_v43 }
 0x334   :  { %v5910_v16 = vrot.slane %v5903_v9, %v21460_v43  ;;  %v8874_v52 = vsel %vm1965_vm7, %v8873_v11, %v8841_v37  ;;  %v11209_v33 = vrot.slane %v11178_v4, 7  ;;  %2599 = vst.msk [vmem:[#allocation2 + $0x20] sm:$0x1] %vm2590_vm12, %v25089_v18  ;;  %v9210_v38 = vsel %vm1965_vm7, %v8842_v45, %v9209_v12  ;;  %v25369_v37 = vpop.permute.xlu0 %2560  ;;  %19850 = vmatpush3.bf16.msra.mxu0 %v20691_v34  ;;  %v25384_v12 = vpop.permute.xlu1 %5123 }
 0x335   :  { %v7489_v63 = vrot.slane %v28268_v58, 7  ;;  %v8893_v15 = vpack.c.b16 %v8874_v52, %v8874_v52  ;;  %v4702_v30 = vrot.slane %v4695_v31, %v21460_v43  ;;  %v11546_v58 = vsel %vm1965_vm7, %v11178_v4, %v11545_v25  ;;  %3672 = vst.msk [vmem:[#allocation2 + $0x20] sm:$0x1] %vm3663_vm15, %v25196_v23  ;;  %v28269_v23 = vld [vmem:[#allocation36_spill] sm:$0xff]  ;;  %19879 = vmatprep.subr.bf16.mxu0 %v20694_v54 }
 0x336   :  { %5977 = vrot.lane.b32.xlu1 %v5910_v16, %s21104_s10  ;;  %v11210_v9 = vsel %vm1965_vm7, %v11209_v33, %v11177_v27  ;;  %v6246_v18 = vrot.slane %v25358_v29, %v21460_v43  ;;  %v9229_v11 = vpack.c.b16 %v9210_v38, %v9210_v38  ;;  %v11565_v46 = vpack.c.b16 %v11546_v58, %v11546_v58  ;;  %v20668_v38 = vld [vmem:[%s27942_s2 + $0x6c8] sm:$0xff]   ;;  %v20676_v29 = vld [vmem:[%s27942_s2 + $0x6d8] sm:$0xff]  }
 0x337   :  { %4009 = vst.msk [vmem:[#allocation2 + $0x20] sm:$0x1] %vm4000_vm0, %v25291_v24  ;;  %v9071_v45 = vrot.slane %v8893_v15, %v21460_v43  ;;  %v11229_v4 = vpack.c.b16 %v11210_v9, %v11210_v9  ;;  %v28270_v31 = vunpack.c.l.b16 %v28269_v23  ;;  %v14718_v27 = vcombine.high %v25362_v7, %v25362_v7  ;;  %v28271_v15 = vld [vmem:[#allocation38_spill] sm:$0xff] }
 0x338   :  { %4825 = vst.msk [vmem:[#allocation2 + $0x21] sm:$0x1] %vm2253_vm11, %v4702_v30  ;;  %v25389_v24 = vrot.slane %v9229_v11, %v21460_v43  ;;  %v25392_v25 = vrot.slane %v11565_v46, %v21460_v43  ;;  %v14432_v52 = vcombine.high %v25113_v8, %v25113_v8  ;;  %v10049_v30 = vrot.slane %v28271_v15, 7  ;;  %v28272_v11 = vld [vmem:[#allocation27_spill] sm:$0xff]  ;;  %v28274_v23 = vld [vmem:[#allocation26_spill] sm:$0xff] }
 0x339   :  { %v7490_v34 = vsel %vm1965_vm7, %v7489_v63, %v28270_v31  ;;  %5161 = vst.msk [vmem:[#allocation2 + $0x21] sm:$0x1] %vm2590_vm12, %v25094_v55  ;;  %v20665_v63 = vld [vmem:[%s27942_s2 + $0x680] sm:$0xff]   ;;  %v9078_v33 = vrot.slane %v9071_v45, %v21460_v43  ;;  %v11407_v54 = vrot.slane %v11229_v4, %v21460_v43  ;;  %v14732_v55 = vrot.slane %v14718_v27, %v21460_v43 }
 0x33a   :  { %v7513_v16 = vpack.c.b16 %v7490_v34, %v7490_v34  ;;  %6009 = vst.msk [vmem:[#allocation2 + $0x21] sm:$0x1] %vm3663_vm15, %v25216_v36  ;;  %v9414_v8 = vrot.slane %v25389_v24, %v21460_v43  ;;  %v11750_v58 = vrot.slane %v25392_v25, %v21460_v43  ;;  %14703 = vmatmul.mubr.bf16.vlgmr.msra.gmra.mrb[20].mxu1 %v14432_v52  ;;  %v28273_v36 = vld [vmem:[#allocation13_spill] sm:$0xff]  ;;  %v28275_v34 = vunpack.c.l.b16 %v24169_v62  ;;  %v25425_v24 = vpop.permute.xlu0 %8067 }
 0x33b   :  { %v870_v46 = vadd.f32 %v21794_v3, %v28272_v11  ;;  %6345 = vst.msk [vmem:[#allocation2 + $0x21] sm:$0x1] %vm4000_vm0, %v25308_v10  ;;  %9145 = vrot.lane.b32.xlu0 %v9078_v33, %s21104_s10  ;;  %v11414_v45 = vrot.slane %v11407_v54, %v21460_v43  ;;  %14963 = vmatprep.mubr.bf16.mxu0 %v14732_v55  ;;  %v20669_v33 = vld [vmem:[%s27942_s2 + $0x688] sm:$0xff]  }
 0x33c   :  { %v7639_v9 = vrot.slane %v7513_v16, %v21460_v43  ;;  %v10050_v4 = vsel %vm1965_vm7, %v10049_v30, %v28273_v36  ;;  %v871_v31 = vadd.f32 %v21782_v44, %v28274_v23  ;;  %v1983_v27 = vrot.slane %v28275_v34, 7  ;;  %19858 = vmatpush3.bf16.msra.mxu1 %v20665_v63  ;;  %v20672_v30 = vld [vmem:[%s27942_s2 + $0x6d0] sm:$0xff]  }
 0x33d   :  { %v10073_v52 = vpack.c.b16 %v10050_v4, %v10050_v4  ;;  %vm902_vm10 = vcmp.ge.f32.partialorder %v870_v46, 0.0  ;;  %v934_v10 = vmul.f32 0.33, %v870_v46  ;;  %11481 = vrot.lane.b32.xlu1 %v11414_v45, %s21104_s10  ;;  %v14734_v15 = vcombine.high %v14732_v55, %v14732_v55  ;;  %19859 = vmatprep.subr.bf16.mxu1 %v20668_v38 }
 0x33e   :  { %v7646_v16 = vrot.slane %v7639_v9, %v21460_v43  ;;  %vm903_vm13 = vcmp.ge.f32.partialorder %v871_v31, 0.0  ;;  %v935_v54 = vmul.f32 0.33, %v871_v31  ;;  %v6379_v62 = vadd.f32 %v21792_v6, %v28272_v11  ;;  %v25437_v9 = vpop.permute.xlu1 %10627 }
 0x33f   :  { %v10199_v63 = vrot.slane %v10073_v52, %v21460_v43  ;;  %v966_v36 = vsel %vm902_vm10, %v870_v46, %v934_v10  ;;  %v6380_v45 = vadd.f32 %v21780_v42, %v28274_v23  ;;  %v28276_v55 = vunpack.c.l.b16 %v24162_v14  ;;  %15003 = vmatprep.mubr.bf16.mxu1 %v14734_v15  ;;  %v25465_v52 = vpop.permute.xlu0 %3633 }
 0x340   :  { %7769 = vst.msk [vmem:[#allocation2 + $0x22] sm:$0x1] %vm2253_vm11, %v7646_v16  ;;  %v28277_v11 = vrot.slane %v25328_v35, %v21460_v43  ;;  %v967_v4 = vsel %vm903_vm13, %v871_v31, %v935_v54  ;;  %v998_v34 = vpack.c.bf16 %v966_v36, %v966_v36  ;;  %vm6411_vm14 = vcmp.ge.f32.partialorder %v6379_v62, 0.0  ;;  %19860 = vmatpush3.bf16.msra.mxu1 %v20669_v33  ;;  %v20673_v35 = vld [vmem:[%s27942_s2 + $0x690] sm:$0xff]  }
 0x341   :  { %v1984_v38 = vsel %vm1965_vm7, %v1983_v27, %v28276_v55  ;;  %8105 = vst.msk [vmem:[#allocation2 + $0x22] sm:$0x1] %vm2590_vm12, %v25144_v59  ;;  %v6443_v46 = vmul.f32 0.33, %v6379_v62  ;;  %v10206_v16 = vrot.slane %v10199_v63, %v21460_v43  ;;  %v999_v23 = vpack.c.bf16 %v967_v4, %v967_v4  ;;  %6313 = vrot.lane.b32.xlu1 %v6246_v18, %s21105_s11 }
 0x342   :  { %3976 = vrot.lane.b32.xlu0 %v28277_v11, %s21105_s11  ;;  %vm6412_vm1 = vcmp.ge.f32.partialorder %v6380_v45, 0.0  ;;  %v6444_v14 = vmul.f32 0.33, %v6380_v45  ;;  %9177 = vst.msk [vmem:[#allocation2 + $0x22] sm:$0x1] %vm3663_vm15, %v25255_v50  ;;  %v1406_v59 = vrot.slane %v998_v34, %v21460_v43  ;;  %19861 = vmatprep.subr.bf16.mxu1 %v20672_v30  ;;  %v2006_v27 = vpack.c.b16 %v1984_v38, %v1984_v38  ;;  %v25467_v50 = vpop.f32.mrb[4].mxu0 }
 0x343   :  { %v6475_v31 = vsel %vm6411_vm14, %v6379_v62, %v6443_v46  ;;  %9513 = vst.msk [vmem:[#allocation2 + $0x22] sm:$0x1] %vm4000_vm0, %v25330_v5  ;;  %v1420_v10 = vrot.slane %v999_v23, %v21460_v43  ;;  %v4547_v18 = vrot.slane %v24196_v49, 7  ;;  %v25475_v15 = vpop.f32.mrb[5].mxu0  ;;  %v25477_v5 = vpop.f32.mrb[4].mxu1 }
 0x344   :  { %10329 = vst.msk [vmem:[#allocation2 + $0x23] sm:$0x1] %vm2253_vm11, %v10206_v16  ;;  %v6476_v33 = vsel %vm6412_vm1, %v6380_v45, %v6444_v14  ;;  %v6507_v54 = vpack.c.bf16 %v6475_v31, %v6475_v31  ;;  %v1413_v62 = vrot.slane %v1406_v59, %v21460_v43  ;;  %v2815_v63 = vcombine.high %v1406_v59, %v1406_v59  ;;  %v25486_v45 = vpop.permute.xlu1 %5971  ;;  %v19634_v55 = vpop.f32.mrb[6].mxu0 }
 0x345   :  { %10665 = vst.msk [vmem:[#allocation2 + $0x23] sm:$0x1] %vm2590_vm12, %v25162_v0  ;;  %v6508_v30 = vpack.c.bf16 %v6476_v33, %v6476_v33  ;;  %v25484_v36 = vrot.slane %v2006_v27, %v21460_v43  ;;  %v1427_v49 = vrot.slane %v1420_v10, %v21460_v43  ;;  %19862 = vmatpush3.bf16.msra.mxu1 %v20673_v35  ;;  %v20677_v0 = vld [vmem:[%s27942_s2 + $0x698] sm:$0xff]   ;;  %v19635_v4 = vpop.f32.mrb[7].mxu0  ;;  %v25501_v34 = vpop.f32.mrb[5].mxu1 }
 0x346   :  { %9481 = vrot.lane.b32.xlu0 %v9414_v8, %s21105_s11  ;;  %v25490_v38 = vrot.slane %v6507_v54, %v21460_v43  ;;  %11513 = vst.msk [vmem:[#allocation2 + $0x23] sm:$0x1] %vm3663_vm15, %v25264_v41  ;;  %v2823_v8 = vcombine.high %v1420_v10, %v1420_v10  ;;  %v25499_v11 = vsel %vm1965_vm7, %v4547_v18, %v24190_v39  ;;  %28278 = vst [vmem:[#allocation22_spill] sm:$0xff] %v25501_v34  ;;  %v20680_v39 = vld [vmem:[%s27942_s2 + $0x6e0] sm:$0xff]   ;;  %v19656_v14 = vpop.f32.mrb[6].mxu1  ;;  %v25533_v54 = vpop.permute.xlu0 %9139 }
 0x347   :  { %11817 = vrot.lane.b32.xlu1 %v11750_v58, %s21105_s11  ;;  %v1854_v41 = vrot.slane %v1413_v62, %v28151_v26  ;;  %v4043_v46 = vcombine.high %v1413_v62, %v1413_v62  ;;  %v25509_v16 = vrot.slane %v6508_v30, %v21460_v43  ;;  %v25512_v23 = vrot.slane %v2815_v63, %v21460_v43  ;;  %v19657_v31 = vpop.f32.mrb[7].mxu1  ;;  %v20681_v63 = vld [vmem:[%s27942_s2 + $0x6a0] sm:$0xff]  }
 0x348   :  { %11849 = vst.msk [vmem:[#allocation2 + $0x23] sm:$0x1] %vm4000_vm0, %v25338_v60  ;;  %v1868_v25 = vrot.slane %v1427_v49, %v28151_v26  ;;  %v4044_v58 = vcombine.high %v1427_v49, %v1427_v49  ;;  %v6922_v35 = vrot.slane %v25490_v38, %v21460_v43  ;;  %v25523_v59 = vrot.slane %v2823_v8, %v21460_v43 }
 0x349   :  { %19863 = vmatprep.subr.bf16.mxu1 %v20676_v29  ;;  %v25526_v27 = vrot.slane %v1854_v41, %v28151_v26  ;;  %v4419_v10 = vrot.slane %v4043_v46, %v28151_v26  ;;  %v6936_v60 = vrot.slane %v25509_v16, %v21460_v43  ;;  %v3233_v33 = vrot.slane %v25512_v23, %v28151_v26  ;;  %v20684_v41 = vld [vmem:[%s27942_s2 + $0x6e8] sm:$0xff]  }
 0x34a   :  { %v25536_v18 = vrot.slane %v1868_v25, %v28151_v26  ;;  %v4433_v62 = vrot.slane %v4044_v58, %v28151_v26  ;;  %v7363_v29 = vrot.slane %v6922_v35, %v28151_v26  ;;  %v9547_v30 = vcombine.high %v6922_v35, %v6922_v35  ;;  %19864 = vmatpush3.bf16.msra.mxu1 %v20677_v0  ;;  %v25555_v58 = vpop.permute.xlu1 %11475 }
 0x34b   :  { %28279 = vst [vmem:[#allocation12_spill] sm:$0xff] %v25526_v27  ;;  %v28068_v55 = vunpack.c.l.b16 %v25526_v27  ;;  %v4426_v49 = vrot.slane %v4419_v10, %v28151_v26  ;;  %v7377_v8 = vrot.slane %v6936_v60, %v28151_v26  ;;  %v9548_v4 = vcombine.high %v6936_v60, %v6936_v60  ;;  %19865 = vmatprep.subr.bf16.mxu1 %v20680_v39 }
 0x34c   :  { %28280 = vst [vmem:[#allocation25_spill] sm:$0xff] %v25536_v18  ;;  %v28071_v46 = vunpack.c.l.b16 %v25536_v18  ;;  %v4440_v0 = vrot.slane %v4433_v62, %v28151_v26  ;;  %v25552_v14 = vrot.slane %v7363_v29, %v28151_v26  ;;  %v9923_v25 = vrot.slane %v9547_v30, %v28151_v26 }
 0x34d   :  { %v2296_v35 = vrot.slane %v28068_v55, 1  ;;  %v25559_v31 = vunpack.c.l.b16 %v4426_v49  ;;  %v25562_v39 = vrot.slane %v7377_v8, %v28151_v26  ;;  %v9937_v10 = vrot.slane %v9548_v4, %v28151_v26  ;;  %v20685_v55 = vld [vmem:[%s27942_s2 + $0x6a8] sm:$0xff]  }
 0x34e   :  { %28281 = vst [vmem:[#allocation24_spill] sm:$0xff] %v25552_v14  ;;  %v25565_v60 = vunpack.c.l.b16 %v4440_v0  ;;  %v28074_v62 = vunpack.c.l.b16 %v25552_v14  ;;  %v9930_v29 = vrot.slane %v9923_v25, %v28151_v26  ;;  %v3240_v30 = vrot.slane %v3233_v33, %v28151_v26  ;;  %19866 = vmatpush3.bf16.msra.mxu1 %v20681_v63  ;;  %v20688_v33 = vld [vmem:[%s27942_s2 + $0x6f0] sm:$0xff]   ;;  %v25582_v63 = vpop.permute.xlu0 %3970  ;;  %v25601_v28 = vpop.permute.xlu1 %6307 }
 0x34f   :  { %28282 = vst [vmem:[#allocation14_spill] sm:$0xff] %v25559_v31  ;;  %28283 = vst [vmem:[#allocation35_spill] sm:$0xff] %v25562_v39  ;;  %v2297_v49 = vsel %vm1965_vm7, %v28071_v46, %v2296_v35  ;;  %v4859_v8 = vrot.slane %v25559_v31, 1  ;;  %v9944_v0 = vrot.slane %v9937_v10, %v28151_v26  ;;  %19867 = vmatprep.subr.bf16.mxu1 %v20684_v41  ;;  %v28287_v14 = vunpack.c.l.b16 %v25562_v39 }
 0x350   :  { %28284 = vst [vmem:[#allocation36_spill] sm:$0xff] %v25565_v60  ;;  %v2315_v25 = vpack.c.b16 %v2297_v49, %v2297_v49  ;;  %v7803_v27 = vrot.slane %v28074_v62, 1  ;;  %v25586_v18 = vunpack.c.l.b16 %v9930_v29  ;;  %v3247_v35 = vrot.slane %v25523_v59, %v28151_v26 }
 0x351   :  { %v4860_v46 = vsel %vm1965_vm7, %v25565_v60, %v4859_v8  ;;  %v25592_v10 = vunpack.c.l.b16 %v9944_v0  ;;  %v3337_v41 = vunpack.c.l.b16 %v3240_v30  ;;  %v5195_v4 = vcombine.high %v25512_v23, %v25512_v23 }
 0x352   :  { %28285 = vst [vmem:[#allocation38_spill] sm:$0xff] %v25586_v18  ;;  %v2506_v31 = vrot.slane %v2315_v25, %v21460_v43  ;;  %v4878_v49 = vpack.c.b16 %v4860_v46, %v4860_v46  ;;  %v7804_v29 = vsel %vm1965_vm7, %v28287_v14, %v7803_v27  ;;  %v10363_v62 = vrot.slane %v25586_v18, 1  ;;  %19868 = vmatpush3.bf16.msra.mxu1 %v20685_v55  ;;  %v20689_v46 = vld [vmem:[%s27942_s2 + $0x6b0] sm:$0xff]  }
 0x353   :  { %28286 = vst [vmem:[#allocation27_spill] sm:$0xff] %v25592_v10  ;;  %v7822_v48 = vpack.c.b16 %v7804_v29, %v7804_v29  ;;  %v3254_v8 = vrot.slane %v3247_v35, %v28151_v26  ;;  %v5196_v30 = vcombine.high %v25523_v59, %v25523_v59  ;;  %v5571_v23 = vrot.slane %v5195_v4, %v28151_v26  ;;  %v25621_v29 = vpop.permute.xlu0 %9475 }
 0x354   :  { %19869 = vmatprep.subr.bf16.mxu1 %v20688_v33  ;;  %v2513_v27 = vrot.slane %v2506_v31, %v21460_v43  ;;  %v5069_v14 = vrot.slane %v4878_v49, %v21460_v43  ;;  %v10364_v55 = vsel %vm1965_vm7, %v25592_v10, %v10363_v62  ;;  %v8321_v0 = vcombine.high %v25490_v38, %v25490_v38  ;;  %v20692_v33 = vld [vmem:[%s27942_s2 + $0x6f8] sm:$0xff]  }
 0x355   :  { %v8013_v25 = vrot.slane %v7822_v48, %v21460_v43  ;;  %v10382_v59 = vpack.c.b16 %v10364_v55, %v10364_v55  ;;  %v3338_v35 = vunpack.c.l.b16 %v3254_v8  ;;  %v5578_v4 = vrot.slane %v5571_v23, %v28151_v26 }
 0x356   :  { %2568 = vrot.lane.b32.xlu0 %v2513_v27, %s21103_s1  ;;  %v5076_v31 = vrot.slane %v5069_v14, %v21460_v43  ;;  %v5585_v62 = vrot.slane %v5196_v30, %v28151_v26  ;;  %v8328_v38 = vrot.slane %v8321_v0, %v21460_v43  ;;  %v8329_v48 = vcombine.high %v25509_v16, %v25509_v16  ;;  %v20693_v27 = vld [vmem:[%s27942_s2 + $0x6b8] sm:$0xff]  }
 0x357   :  { %v8020_v49 = vrot.slane %v8013_v25, %v21460_v43  ;;  %v10573_v8 = vrot.slane %v10382_v59, %v21460_v43  ;;  %v3369_v23 = vrot.slane %v3338_v35, 7  ;;  %v5675_v55 = vunpack.c.l.b16 %v5578_v4  ;;  %19870 = vmatpush3.bf16.msra.mxu1 %v20689_v46  ;;  %v20696_v25 = vld [vmem:[%s27942_s2 + $0x7c0] sm:$0xff]   ;;  %v25641_v59 = vpop.permute.xlu1 %11811 }
 0x358   :  { %5131 = vrot.lane.b32.xlu1 %v5076_v31, %s21103_s1  ;;  %v5592_v30 = vrot.slane %v5585_v62, %v28151_v26  ;;  %v8336_v14 = vrot.slane %v8329_v48, %v21460_v43  ;;  %v8739_v0 = vrot.slane %v8328_v38, %v28151_v26  ;;  %v10699_v16 = vcombine.high %v8328_v38, %v8328_v38 }
 0x359   :  { %v10580_v46 = vrot.slane %v10573_v8, %v21460_v43  ;;  %v3370_v4 = vsel %vm1965_vm7, %v3369_v23, %v3337_v41  ;;  %v3706_v18 = vrot.slane %v3337_v41, 1  ;;  %v6043_v10 = vrot.slane %v5675_v55, 1  ;;  %19871 = vmatprep.subr.bf16.mxu1 %v20692_v33  ;;  %v25652_v41 = vpop.permute.xlu0 %2562 }
 0x35a   :  { %8075 = vrot.lane.b32.xlu0 %v8020_v49, %s21103_s1  ;;  %v3388_v31 = vpack.c.b16 %v3370_v4, %v3370_v4  ;;  %v5676_v62 = vunpack.c.l.b16 %v5592_v30  ;;  %v8746_v48 = vrot.slane %v8739_v0, %v28151_v26  ;;  %v8753_v38 = vrot.slane %v8336_v14, %v28151_v26 }
 0x35b   :  { %v10700_v39 = vcombine.high %v8336_v14, %v8336_v14  ;;  %v11075_v60 = vrot.slane %v10699_v16, %v28151_v26  ;;  %v3707_v34 = vsel %vm1965_vm7, %v3338_v35, %v3706_v18  ;;  %v2152_v8 = vrot.slane %v25484_v36, %v21460_v43  ;;  %19872 = vmatpush3.bf16.msra.mxu1 %v20693_v27  ;;  %v25661_v36 = vpop.f32.mrb[8].mxu0 }
 0x35c   :  { %10635 = vrot.lane.b32.xlu1 %v10580_v46, %s21103_s1  ;;  %v3579_v33 = vrot.slane %v3388_v31, %v21460_v43  ;;  %v5707_v49 = vrot.slane %v5676_v62, 7  ;;  %v8760_v23 = vrot.slane %v8753_v38, %v28151_v26  ;;  %v8843_v30 = vunpack.c.l.b16 %v8746_v48  ;;  %19901 = vmatprep.subr.bf16.mxu1 %v20696_v25  ;;  %28288 = vst [vmem:[#allocation13_spill] sm:$0xff] %v25661_v36  ;;  %v25667_v25 = vpop.permute.xlu1 %5125 }
 0x35d   :  { %v11082_v14 = vrot.slane %v11075_v60, %v28151_v26  ;;  %v11089_v0 = vrot.slane %v10700_v39, %v28151_v26  ;;  %v3725_v18 = vpack.c.b16 %v3707_v34, %v3707_v34  ;;  %v6044_v35 = vsel %vm1965_vm7, %v5676_v62, %v6043_v10  ;;  %2263 = vst.msk [vmem:[#allocation2 + $0x24] sm:$0x1] %vm2253_vm11, %v2152_v8  ;;  %v25682_v8 = vpop.f32.mrb[9].mxu0 }
 0x35e   :  { %v3586_v27 = vrot.slane %v3579_v33, %v21460_v43  ;;  %v5708_v16 = vsel %vm1965_vm7, %v5707_v49, %v5675_v55  ;;  %v8844_v46 = vunpack.c.l.b16 %v8760_v23  ;;  %v6062_v4 = vpack.c.b16 %v6044_v35, %v6044_v35  ;;  %2600 = vst.msk [vmem:[#allocation2 + $0x24] sm:$0x1] %vm2590_vm12, %v25369_v37  ;;  %v28289_v37 = vld [vmem:[#allocation15_spill] sm:$0xff]  ;;  %28291 = vst [vmem:[#allocation26_spill] sm:$0xff] %v25682_v8  ;;  %v25684_v33 = vpop.f32.mrb[8].mxu1 }
 0x35f   :  { %v5726_v60 = vpack.c.b16 %v5708_v16, %v5708_v16  ;;  %v11096_v34 = vrot.slane %v11089_v0, %v28151_v26  ;;  %v11179_v39 = vunpack.c.l.b16 %v11082_v14  ;;  %v25671_v10 = vrot.slane %v3725_v18, %v21460_v43  ;;  %3673 = vst.msk [vmem:[#allocation2 + $0x24] sm:$0x1] %vm3663_vm15, %v25465_v52  ;;  %28292 = vst [vmem:[#allocation15_spill] sm:$0xff] %v25684_v33  ;;  %v25690_v0 = vpop.permute.xlu0 %8069 }
 0x360   :  { %3641 = vrot.lane.b32.xlu0 %v3586_v27, %s21104_s10  ;;  %v8875_v55 = vrot.slane %v8844_v46, 7  ;;  %v4570_v31 = vpack.c.b16 %v25499_v11, %v25499_v11  ;;  %v9211_v62 = vrot.slane %v8843_v30, 1  ;;  %v28290_v48 = vunpack.c.l.b16 %v28289_v37  ;;  %4010 = vst.msk [vmem:[#allocation2 + $0x24] sm:$0x1] %vm4000_vm0, %v25582_v63  ;;  %v19678_v11 = vpop.f32.mrb[10].mxu0  ;;  %v25697_v37 = vpop.f32.mrb[9].mxu1 }
 0x361   :  { %v5917_v49 = vrot.slane %v5726_v60, %v21460_v43  ;;  %v11180_v52 = vunpack.c.l.b16 %v11096_v34  ;;  %v25688_v23 = vrot.slane %v6062_v4, %v21460_v43  ;;  %v11547_v14 = vrot.slane %v11179_v39, 1  ;;  %v19679_v16 = vpop.f32.mrb[11].mxu0  ;;  %v19700_v33 = vpop.f32.mrb[10].mxu1 }
 0x362   :  { %v7491_v38 = vrot.slane %v28290_v48, 7  ;;  %v8876_v18 = vsel %vm1965_vm7, %v8875_v55, %v8843_v30  ;;  %v3923_v35 = vrot.slane %v25671_v10, %v21460_v43  ;;  %v4709_v63 = vrot.slane %v4570_v31, %v21460_v43  ;;  %v28293_v55 = vld [vmem:[#allocation16_spill] sm:$0xff] }
 0x363   :  { %v9212_v27 = vsel %vm1965_vm7, %v8844_v46, %v9211_v62  ;;  %v5924_v60 = vrot.slane %v5917_v49, %v21460_v43  ;;  %v8894_v4 = vpack.c.b16 %v8876_v18, %v8876_v18  ;;  %v11211_v34 = vrot.slane %v11180_v52, 7  ;;  %v28295_v31 = vld [vmem:[#allocation40_spill] sm:$0xff]  ;;  %v25706_v46 = vpop.permute.xlu1 %10629  ;;  %v19701_v62 = vpop.f32.mrb[11].mxu1 }
 0x364   :  { %v9230_v48 = vpack.c.b16 %v9212_v27, %v9212_v27  ;;  %v4716_v11 = vrot.slane %v4709_v63, %v21460_v43  ;;  %v11548_v30 = vsel %vm1965_vm7, %v11180_v52, %v11547_v14  ;;  %v28294_v8 = vunpack.c.l.b16 %v28293_v55  ;;  %v28297_v27 = vld [vmem:[#allocation29_spill] sm:$0xff] }
 0x365   :  { %v10051_v36 = vrot.slane %v28295_v31, 7  ;;  %5979 = vrot.lane.b32.xlu1 %v5924_v60, %s21104_s10  ;;  %v9085_v49 = vrot.slane %v8894_v4, %v21460_v43  ;;  %v11212_v18 = vsel %vm1965_vm7, %v11211_v34, %v11179_v39  ;;  %v11566_v63 = vpack.c.b16 %v11548_v30, %v11548_v30  ;;  %v25741_v31 = vld.sshfl [vmem:[#allocation2 + $0x1c] sm:$0x33 pattern:$0x75316420] }
 0x366   :  { %v7492_v10 = vsel %vm1965_vm7, %v7491_v38, %v28294_v8  ;;  %v25712_v33 = vrot.slane %v9230_v48, %v21460_v43  ;;  %v11230_v52 = vpack.c.b16 %v11212_v18, %v11212_v18  ;;  %4826 = vst.msk [vmem:[#allocation2 + $0x25] sm:$0x1] %vm2253_vm11, %v4716_v11  ;;  %v28296_v38 = vld [vmem:[#allocation37_spill] sm:$0xff]  ;;  %v872_v16 = vadd.f32 %v21794_v3, %v28297_v27  ;;  %v25732_v3 = vpop.permute.xlu0 %3635 }
 0x367   :  { %v7514_v14 = vpack.c.b16 %v7492_v10, %v7492_v10  ;;  %v10052_v8 = vsel %vm1965_vm7, %v10051_v36, %v28296_v38  ;;  %v9092_v60 = vrot.slane %v9085_v49, %v21460_v43  ;;  %v6260_v4 = vrot.slane %v25688_v23, %v21460_v43  ;;  %5162 = vst.msk [vmem:[#allocation2 + $0x25] sm:$0x1] %vm2590_vm12, %v25384_v12  ;;  %v28298_v36 = vld [vmem:[#allocation28_spill] sm:$0xff]  ;;  %v25747_v49 = vpop.permute.xlu1 %5973 }
 0x368   :  { %v9428_v39 = vrot.slane %v25712_v33, %v21460_v43  ;;  %v10074_v34 = vpack.c.b16 %v10052_v8, %v10052_v8  ;;  %v11421_v48 = vrot.slane %v11230_v52, %v21460_v43  ;;  %v873_v30 = vadd.f32 %v21782_v44, %v28298_v36  ;;  %6010 = vst.msk [vmem:[#allocation2 + $0x25] sm:$0x1] %vm3663_vm15, %v25486_v45 }
 0x369   :  { %v7653_v11 = vrot.slane %v7514_v14, %v21460_v43  ;;  %vm904_vm2 = vcmp.ge.f32.partialorder %v872_v16, 0.0  ;;  %9147 = vrot.lane.b32.xlu0 %v9092_v60, %s21104_s10  ;;  %v25736_v12 = vrot.slane %v11566_v63, %v21460_v43  ;;  %v936_v55 = vmul.f32 0.33, %v872_v16  ;;  %6346 = vst.msk [vmem:[#allocation2 + $0x25] sm:$0x1] %vm4000_vm0, %v25601_v28  ;;  %v20695_v28 = vld [vmem:[%s27942_s2 + $0x700] sm:$0xff]  }
 0x36a   :  { %v10213_v23 = vrot.slane %v10074_v34, %v21460_v43  ;;  %v6381_v10 = vadd.f32 %v21792_v6, %v28297_v27  ;;  %v11428_v44 = vrot.slane %v11421_v48, %v21460_v43  ;;  %vm905_vm3 = vcmp.ge.f32.partialorder %v873_v30, 0.0  ;;  %v20697_v60 = vld [vmem:[%s27942_s2 + $0x780] sm:$0xff]   ;;  %v25777_v34 = vpop.permute.xlu0 %9141 }
 0x36b   :  { %v7660_v45 = vrot.slane %v7653_v11, %v21460_v43  ;;  %v937_v62 = vmul.f32 0.33, %v873_v30  ;;  %v968_v33 = vsel %vm904_vm2, %v872_v16, %v936_v55  ;;  %v6382_v6 = vadd.f32 %v21780_v42, %v28298_v36 }
 0x36c   :  { %v10220_v18 = vrot.slane %v10213_v23, %v21460_v43  ;;  %vm6413_vm4 = vcmp.ge.f32.partialorder %v6381_v10, 0.0  ;;  %11483 = vrot.lane.b32.xlu1 %v11428_v44, %s21104_s10  ;;  %v1000_v52 = vpack.c.bf16 %v968_v33, %v968_v33  ;;  %v6445_v14 = vmul.f32 0.33, %v6381_v10  ;;  %v20700_v33 = vld [vmem:[%s27942_s2 + $0x7c8] sm:$0xff]  }
 0x36d   :  { %7770 = vst.msk [vmem:[#allocation2 + $0x26] sm:$0x1] %vm2253_vm11, %v7660_v45  ;;  %v969_v63 = vsel %vm905_vm3, %v873_v30, %v937_v62  ;;  %v14725_v38 = vrot.slane %v25362_v7, %v21460_v43  ;;  %3978 = vrot.lane.b32.xlu0 %v3923_v35, %s21105_s11  ;;  %vm6414_vm5 = vcmp.ge.f32.partialorder %v6382_v6, 0.0  ;;  %v6446_v8 = vmul.f32 0.33, %v6382_v6 }
 0x36e   :  { %8106 = vst.msk [vmem:[#allocation2 + $0x26] sm:$0x1] %vm2590_vm12, %v25425_v24  ;;  %v1001_v42 = vpack.c.bf16 %v969_v63, %v969_v63  ;;  %v15019_v27 = vcombine.high %v25741_v31, %v25741_v31  ;;  %v11764_v16 = vrot.slane %v25736_v12, %v21460_v43  ;;  %v1434_v7 = vrot.slane %v1000_v52, %v21460_v43 }
 0x36f   :  { %10330 = vst.msk [vmem:[#allocation2 + $0x27] sm:$0x1] %vm2253_vm11, %v10220_v18  ;;  %v6477_v35 = vsel %vm6413_vm4, %v6381_v10, %v6445_v14  ;;  %14964 = vmatmul.mubr.bf16.vlgmr.msra.gmra.mrb[24].mxu0 %v14725_v38  ;;  %v14733_v24 = vcombine.high %v14725_v38, %v14725_v38  ;;  %v6478_v11 = vsel %vm6414_vm5, %v6382_v6, %v6446_v8  ;;  %v28299_v55 = vunpack.c.l.b16 %v24478_v61  ;;  %v25798_v10 = vpop.permute.xlu1 %11477  ;;  %v20702_v6 = vld [vmem:[%s27942_s2 + $0x750] sm:$0xff]   ;;  %v20701_v38 = vld [vmem:[%s27942_s2 + $0x788] sm:$0xff]  }
 0x370   :  { %10666 = vst.msk [vmem:[#allocation2 + $0x27] sm:$0x1] %vm2590_vm12, %v25437_v9  ;;  %v1448_v48 = vrot.slane %v1001_v42, %v21460_v43  ;;  %v6509_v36 = vpack.c.bf16 %v6477_v35, %v6477_v35  ;;  %19880 = vmatpush3.bf16.msra.mxu0 %v20695_v28  ;;  %v25781_v9 = vrot.slane %v15019_v27, %v21460_v43  ;;  %v20704_v35 = vld [vmem:[%s27942_s2 + $0x7d0] sm:$0xff]  }
 0x371   :  { %9178 = vst.msk [vmem:[#allocation2 + $0x26] sm:$0x1] %vm3663_vm15, %v25533_v54  ;;  %11514 = vst.msk [vmem:[#allocation2 + $0x27] sm:$0x1] %vm3663_vm15, %v25555_v58  ;;  %v20698_v54 = vld [vmem:[%s27942_s2 + $0x748] sm:$0xff]   ;;  %6315 = vrot.lane.b32.xlu1 %v6260_v4, %s21105_s11  ;;  %v1441_v30 = vrot.slane %v1434_v7, %v21460_v43  ;;  %v6510_v12 = vpack.c.bf16 %v6478_v11, %v6478_v11  ;;  %15004 = vmatmul.mubr.bf16.vlgmr.msra.gmra.mrb[24].mxu1 %v14733_v24  ;;  %v25796_v58 = vrot.slane %v28299_v55, 7  ;;  %v25844_v24 = vpop.permute.xlu0 %3972 }
 0x372   :  { %9514 = vst.msk [vmem:[#allocation2 + $0x26] sm:$0x1] %vm4000_vm0, %v25621_v29  ;;  %v2831_v23 = vcombine.high %v1434_v7, %v1434_v7  ;;  %11850 = vst.msk [vmem:[#allocation2 + $0x27] sm:$0x1] %vm4000_vm0, %v25641_v59  ;;  %9483 = vrot.lane.b32.xlu0 %v9428_v39, %s21105_s11  ;;  %v1455_v29 = vrot.slane %v1448_v48, %v21460_v43  ;;  %v25803_v4 = vrot.slane %v6509_v36, %v21460_v43  ;;  %v20699_v59 = vld [vmem:[%s27942_s2 + $0x708] sm:$0xff]   ;;  %v20703_v36 = vld [vmem:[%s27942_s2 + $0x710] sm:$0xff]  }
 0x373   :  { %15264 = vmatprep.mubr.bf16.mxu0 %v25781_v9  ;;  %v2839_v44 = vcombine.high %v1448_v48, %v1448_v48  ;;  %v1882_v45 = vrot.slane %v1441_v30, %v28151_v26  ;;  %v4045_v62 = vcombine.high %v1441_v30, %v1441_v30  ;;  %v25812_v18 = vrot.slane %v6510_v12, %v21460_v43  ;;  %v20706_v55 = vld [vmem:[%s27942_s2 + $0x758] sm:$0xff]  }
 0x374   :  { %v25815_v39 = vrot.slane %v2831_v23, %v21460_v43  ;;  %19902 = vmatpush3.bf16.msra.mxu1 %v20697_v60  ;;  %v1896_v28 = vrot.slane %v1455_v29, %v28151_v26  ;;  %v4046_v63 = vcombine.high %v1455_v29, %v1455_v29  ;;  %v6950_v52 = vrot.slane %v25803_v4, %v21460_v43  ;;  %v25860_v29 = vpop.permute.xlu1 %6309 }
 0x375   :  { %v25827_v14 = vrot.slane %v2839_v44, %v21460_v43  ;;  %19881 = vmatprep.subr.bf16.mxu0 %v20698_v54  ;;  %11819 = vrot.lane.b32.xlu1 %v11764_v16, %s21105_s11  ;;  %v25834_v42 = vrot.slane %v1882_v45, %v28151_v26  ;;  %v4447_v8 = vrot.slane %v4045_v62, %v28151_v26 }
 0x376   :  { %v6964_v27 = vrot.slane %v25812_v18, %v21460_v43  ;;  %v3261_v7 = vrot.slane %v25815_v39, %v28151_v26  ;;  %v25847_v60 = vrot.slane %v1896_v28, %v28151_v26  ;;  %v4461_v16 = vrot.slane %v4046_v63, %v28151_v26  ;;  %19882 = vmatpush3.bf16.msra.mxu0 %v20699_v59 }
 0x377   :  { %28300 = vst [vmem:[#allocation16_spill] sm:$0xff] %v25834_v42  ;;  %v7391_v48 = vrot.slane %v6950_v52, %v28151_v26  ;;  %v9549_v11 = vcombine.high %v6950_v52, %v6950_v52  ;;  %v28081_v54 = vunpack.c.l.b16 %v25834_v42  ;;  %v4454_v30 = vrot.slane %v4447_v8, %v28151_v26  ;;  %19903 = vmatprep.subr.bf16.mxu1 %v20700_v33  ;;  %v20705_v33 = vld [vmem:[%s27942_s2 + $0x790] sm:$0xff]   ;;  %v20708_v8 = vld [vmem:[%s27942_s2 + $0x7d8] sm:$0xff]  }
 0x378   :  { %v7405_v12 = vrot.slane %v6964_v27, %v28151_v26  ;;  %v9550_v23 = vcombine.high %v6964_v27, %v6964_v27  ;;  %19883 = vmatprep.subr.bf16.mxu0 %v20702_v6  ;;  %v28083_v44 = vunpack.c.l.b16 %v25847_v60  ;;  %v4468_v59 = vrot.slane %v4461_v16, %v28151_v26  ;;  %19904 = vmatpush3.bf16.msra.mxu1 %v20701_v38 }
 0x379   :  { %v25865_v45 = vrot.slane %v7391_v48, %v28151_v26  ;;  %v9951_v62 = vrot.slane %v9549_v11, %v28151_v26  ;;  %v2298_v6 = vrot.slane %v28081_v54, 1  ;;  %v25873_v28 = vunpack.c.l.b16 %v4454_v30  ;;  %19905 = vmatprep.subr.bf16.mxu1 %v20704_v35  ;;  %v20707_v11 = vld [vmem:[%s27942_s2 + $0x718] sm:$0xff]  }
 0x37a   :  { %v25876_v63 = vrot.slane %v7405_v12, %v28151_v26  ;;  %v9965_v52 = vrot.slane %v9550_v23, %v28151_v26  ;;  %v25882_v38 = vunpack.c.l.b16 %v4468_v59  ;;  %v25887_v48 = vrot.slane %v3261_v7, %v28151_v26  ;;  %19884 = vmatpush3.bf16.msra.mxu0 %v20703_v36  ;;  %v25898_v59 = vpop.permute.xlu0 %9477 }
 0x37b   :  { %28301 = vst [vmem:[#allocation40_spill] sm:$0xff] %v25865_v45  ;;  %28302 = vst [vmem:[#allocation37_spill] sm:$0xff] %v25873_v28  ;;  %v28082_v27 = vunpack.c.l.b16 %v25865_v45  ;;  %v9958_v16 = vrot.slane %v9951_v62, %v28151_v26  ;;  %v2299_v35 = vsel %vm1965_vm7, %v28083_v44, %v2298_v6  ;;  %v4861_v30 = vrot.slane %v25873_v28, 1  ;;  %19885 = vmatprep.subr.bf16.mxu0 %v20706_v55  ;;  %v20709_v6 = vld [vmem:[%s27942_s2 + $0x798] sm:$0xff]   ;;  %v25922_v44 = vpop.permute.xlu1 %11813 }
 0x37c   :  { %28303 = vst [vmem:[#allocation29_spill] sm:$0xff] %v25876_v63  ;;  %v28086_v12 = vunpack.c.l.b16 %v25876_v63  ;;  %v9972_v23 = vrot.slane %v9965_v52, %v28151_v26  ;;  %v2316_v7 = vpack.c.b16 %v2299_v35, %v2299_v35  ;;  %v3275_v54 = vrot.slane %v25827_v14, %v28151_v26  ;;  %19906 = vmatpush3.bf16.msra.mxu1 %v20705_v33  ;;  %v20712_v33 = vld [vmem:[%s27942_s2 + $0x7e0] sm:$0xff]  }
 0x37d   :  { %v7805_v36 = vrot.slane %v28082_v27, 1  ;;  %v25902_v62 = vunpack.c.l.b16 %v9958_v16  ;;  %v4862_v52 = vsel %vm1965_vm7, %v25882_v38, %v4861_v30  ;;  %v3339_v35 = vunpack.c.l.b16 %v25887_v48  ;;  %19907 = vmatprep.subr.bf16.mxu1 %v20708_v8  ;;  %v20710_v16 = vld [vmem:[%s27942_s2 + $0x760] sm:$0xff]  }
 0x37e   :  { %v25911_v55 = vunpack.c.l.b16 %v9972_v23  ;;  %v15035_v27 = vcombine.high %v25781_v9, %v25781_v9  ;;  %v2520_v30 = vrot.slane %v2316_v7, %v21460_v43  ;;  %v4879_v23 = vpack.c.b16 %v4862_v52, %v4862_v52  ;;  %19886 = vmatpush3.bf16.msra.mxu0 %v20707_v11  ;;  %v20711_v7 = vld [vmem:[%s27942_s2 + $0x720] sm:$0xff]  }
 0x37f   :  { %28304 = vst [vmem:[#allocation28_spill] sm:$0xff] %v25902_v62  ;;  %v7806_v48 = vsel %vm1965_vm7, %v28086_v12, %v7805_v36  ;;  %v10365_v9 = vrot.slane %v25902_v62, 1  ;;  %v3282_v61 = vrot.slane %v3275_v54, %v28151_v26  ;;  %v5197_v45 = vcombine.high %v25815_v39, %v25815_v39  ;;  %19887 = vmatprep.subr.bf16.mxu0 %v20710_v16  ;;  %v20716_v16 = vld [vmem:[%s27942_s2 + $0x7e8] sm:$0xff]  }
 0x380   :  { %28305 = vst [vmem:[#allocation47_spill] sm:$0xff] %v25911_v55  ;;  %v7823_v8 = vpack.c.b16 %v7806_v48, %v7806_v48  ;;  %15304 = vmatprep.mubr.bf16.mxu1 %v15035_v27  ;;  %v5198_v28 = vcombine.high %v25827_v14, %v25827_v14  ;;  %v2527_v52 = vrot.slane %v2520_v30, %v21460_v43  ;;  %v20713_v30 = vld [vmem:[%s27942_s2 + $0x7a0] sm:$0xff]  }
 0x381   :  { %v5083_v36 = vrot.slane %v4879_v23, %v21460_v43  ;;  %v10366_v11 = vsel %vm1965_vm7, %v25911_v55, %v10365_v9  ;;  %v8337_v54 = vcombine.high %v25803_v4, %v25803_v4  ;;  %19908 = vmatpush3.bf16.msra.mxu1 %v20709_v6  ;;  %v3340_v48 = vunpack.c.l.b16 %v3282_v61  ;;  %v20714_v23 = vld [vmem:[%s27942_s2 + $0x768] sm:$0xff]   ;;  %v25951_v9 = vpop.permute.xlu0 %2564 }
 0x382   :  { %v8027_v39 = vrot.slane %v7823_v8, %v21460_v43  ;;  %v10383_v27 = vpack.c.b16 %v10366_v11, %v10366_v11  ;;  %v5599_v14 = vrot.slane %v5197_v45, %v28151_v26  ;;  %19909 = vmatprep.subr.bf16.mxu1 %v20712_v33  ;;  %2570 = vrot.lane.b32.xlu0 %v2527_v52, %s21103_s1  ;;  %v3708_v55 = vrot.slane %v3339_v35, 1 }
 0x383   :  { %v5090_v4 = vrot.slane %v5083_v36, %v21460_v43  ;;  %v5613_v61 = vrot.slane %v5198_v28, %v28151_v26  ;;  %v8344_v45 = vrot.slane %v8337_v54, %v21460_v43  ;;  %v8345_v6 = vcombine.high %v25812_v18, %v25812_v18  ;;  %19888 = vmatpush3.bf16.msra.mxu0 %v20711_v7  ;;  %v20715_v28 = vld [vmem:[%s27942_s2 + $0x728] sm:$0xff]   ;;  %v25968_v36 = vpop.permute.xlu1 %5127 }
 0x384   :  { %v8034_v33 = vrot.slane %v8027_v39, %v21460_v43  ;;  %v10587_v8 = vrot.slane %v10383_v27, %v21460_v43  ;;  %v3371_v11 = vrot.slane %v3340_v48, 7  ;;  %v5606_v52 = vrot.slane %v5599_v14, %v28151_v26  ;;  %v20718_v27 = vld [vmem:[%s27942_s2 + $0x770] sm:$0xff]   ;;  %19889 = vmatprep.subr.bf16.mxu0 %v20714_v23 }
 0x385   :  { %5133 = vrot.lane.b32.xlu1 %v5090_v4, %s21103_s1  ;;  %v5620_v18 = vrot.slane %v5613_v61, %v28151_v26  ;;  %v8352_v54 = vrot.slane %v8345_v6, %v21460_v43  ;;  %v8767_v39 = vrot.slane %v8344_v45, %v28151_v26  ;;  %v10701_v12 = vcombine.high %v8344_v45, %v8344_v45  ;;  %v20717_v4 = vld [vmem:[%s27942_s2 + $0x7a8] sm:$0xff]  }
 0x386   :  { %v10594_v7 = vrot.slane %v10587_v8, %v21460_v43  ;;  %v3372_v14 = vsel %vm1965_vm7, %v3371_v11, %v3339_v35  ;;  %v5677_v62 = vunpack.c.l.b16 %v5606_v52  ;;  %19910 = vmatpush3.bf16.msra.mxu1 %v20713_v30  ;;  %8077 = vrot.lane.b32.xlu0 %v8034_v33, %s21103_s1  ;;  %v20720_v8 = vld [vmem:[%s27942_s2 + $0x7f0] sm:$0xff]   ;;  %v3709_v23 = vsel %vm1965_vm7, %v3340_v48, %v3708_v55  ;;  %v25993_v52 = vpop.permute.xlu0 %8071 }
 0x387   :  { %v3389_v61 = vpack.c.b16 %v3372_v14, %v3372_v14  ;;  %v5678_v45 = vunpack.c.l.b16 %v5620_v18  ;;  %v8774_v6 = vrot.slane %v8767_v39, %v28151_v26  ;;  %v8781_v63 = vrot.slane %v8352_v54, %v28151_v26  ;;  %19911 = vmatprep.subr.bf16.mxu1 %v20716_v16  ;;  %19890 = vmatpush3.bf16.msra.mxu0 %v20715_v28  ;;  %v20719_v33 = vld [vmem:[%s27942_s2 + $0x730] sm:$0xff]  }
 0x388   :  { %v10702_v35 = vcombine.high %v8352_v54, %v8352_v54  ;;  %v11103_v30 = vrot.slane %v10701_v12, %v28151_v26  ;;  %v6045_v11 = vrot.slane %v5677_v62, 1  ;;  %19891 = vmatprep.subr.bf16.mxu0 %v20718_v27  ;;  %v20722_v12 = vld [vmem:[%s27942_s2 + $0x778] sm:$0xff]   ;;  %v3726_v28 = vpack.c.b16 %v3709_v23, %v3709_v23 }
 0x389   :  { %10637 = vrot.lane.b32.xlu1 %v10594_v7, %s21103_s1  ;;  %v3593_v16 = vrot.slane %v3389_v61, %v21460_v43  ;;  %v5709_v18 = vrot.slane %v5678_v45, 7  ;;  %v8788_v39 = vrot.slane %v8781_v63, %v28151_v26  ;;  %v8845_v54 = vunpack.c.l.b16 %v8774_v6  ;;  %v20721_v7 = vld [vmem:[%s27942_s2 + $0x7b0] sm:$0xff]   ;;  %v26007_v61 = vpop.permute.xlu1 %10631 }
 0x38a   :  { %v11110_v55 = vrot.slane %v11103_v30, %v28151_v26  ;;  %v11117_v48 = vrot.slane %v10702_v35, %v28151_v26  ;;  %v6046_v14 = vsel %vm1965_vm7, %v5678_v45, %v6045_v11  ;;  %19912 = vmatpush3.bf16.msra.mxu1 %v20717_v4  ;;  %v20724_v35 = vld [vmem:[%s27942_s2 + $0x7f8] sm:$0xff]   ;;  %v26016_v45 = vrot.slane %v3726_v28, %v21460_v43 }
 0x38b   :  { %v3600_v63 = vrot.slane %v3593_v16, %v21460_v43  ;;  %v5710_v27 = vsel %vm1965_vm7, %v5709_v18, %v5677_v62  ;;  %v8846_v6 = vunpack.c.l.b16 %v8788_v39  ;;  %v6063_v42 = vpack.c.b16 %v6046_v14, %v6046_v14  ;;  %19913 = vmatprep.subr.bf16.mxu1 %v20720_v8  ;;  %19892 = vmatpush3.bf16.msra.mxu0 %v20719_v33  ;;  %v20723_v62 = vld [vmem:[%s27942_s2 + $0x738] sm:$0xff]   ;;  %v20726_v33 = vld [vmem:[%s27942_s2 + $0x840] sm:$0xff]  }
 0x38c   :  { %v5727_v30 = vpack.c.b16 %v5710_v27, %v5710_v27  ;;  %v11124_v4 = vrot.slane %v11117_v48, %v28151_v26  ;;  %v28306_v23 = vunpack.c.l.b16 %v24508_v40  ;;  %v11181_v16 = vunpack.c.l.b16 %v11110_v55  ;;  %19893 = vmatprep.subr.bf16.mxu0 %v20722_v12  ;;  %v20725_v27 = vld [vmem:[%s27942_s2 + $0x7b8] sm:$0xff]  }
 0x38d   :  { %3643 = vrot.lane.b32.xlu0 %v3600_v63, %s21104_s10  ;;  %v8877_v8 = vrot.slane %v8846_v6, 7  ;;  %v28307_v18 = vunpack.c.l.b16 %v24467_v1  ;;  %v28308_v48 = vrot.slane %v24513_v13, 7  ;;  %v26037_v55 = vrot.slane %v6063_v42, %v21460_v43  ;;  %v26039_v63 = vpop.permute.xlu0 %3637 }
 0x38e   :  { %v7493_v11 = vrot.slane %v28306_v23, 7  ;;  %v5931_v28 = vrot.slane %v5727_v30, %v21460_v43  ;;  %v11182_v14 = vunpack.c.l.b16 %v11124_v4  ;;  %19914 = vmatpush3.bf16.msra.mxu1 %v20721_v7  ;;  %v9213_v12 = vrot.slane %v8845_v54, 1  ;;  %v20728_v23 = vld [vmem:[%s27942_s2 + $0x8c0] sm:$0xff]  }
 0x38f   :  { %v1986_v39 = vsel %vm1965_vm7, %v25796_v58, %v28307_v18  ;;  %v4550_v40 = vsel %vm1965_vm7, %v28308_v48, %v24502_v21  ;;  %v8878_v58 = vsel %vm1965_vm7, %v8877_v8, %v8845_v54  ;;  %v3937_v21 = vrot.slane %v26016_v45, %v21460_v43  ;;  %19915 = vmatprep.subr.bf16.mxu1 %v20724_v35  ;;  %v26052_v8 = vpop.permute.xlu1 %5975 }
 0x390   :  { %v2007_v1 = vpack.c.b16 %v1986_v39, %v1986_v39  ;;  %v4571_v13 = vpack.c.b16 %v4550_v40, %v4550_v40  ;;  %v5938_v30 = vrot.slane %v5931_v28, %v21460_v43  ;;  %v8895_v42 = vpack.c.b16 %v8878_v58, %v8878_v58  ;;  %19894 = vmatpush3.bf16.msra.mxu0 %v20723_v62  ;;  %v26063_v58 = vpop.f32.mrb[12].mxu0 }
 0x391   :  { %v11213_v4 = vrot.slane %v11182_v14, 7  ;;  %v9214_v35 = vsel %vm1965_vm7, %v8846_v6, %v9213_v12  ;;  %v11549_v18 = vrot.slane %v11181_v16, 1  ;;  %v28309_v39 = vunpack.c.l.b16 %v24505_v53  ;;  %19923 = vmatprep.subr.bf16.mxu0 %v20726_v33 }
 0x392   :  { %v2159_v7 = vrot.slane %v2007_v1, %v21460_v43  ;;  %v4723_v54 = vrot.slane %v4571_v13, %v21460_v43  ;;  %5981 = vrot.lane.b32.xlu1 %v5938_v30, %s21104_s10  ;;  %v9099_v62 = vrot.slane %v8895_v42, %v21460_v43  ;;  %v9231_v1 = vpack.c.b16 %v9214_v35, %v9214_v35  ;;  %v28310_v42 = vld [vmem:[#allocation42_spill] sm:$0xff]  ;;  %v28311_v35 = vld [vmem:[#allocation17_spill] sm:$0xff] }
 0x393   :  { %v7494_v48 = vsel %vm1965_vm7, %v7493_v11, %v28309_v39  ;;  %v11214_v40 = vsel %vm1965_vm7, %v11213_v4, %v11181_v16  ;;  %v11550_v12 = vsel %vm1965_vm7, %v11182_v14, %v11549_v18  ;;  %19916 = vmatpush3.bf16.msra.mxu1 %v20725_v27  ;;  %v26067_v11 = vpop.f32.mrb[13].mxu0  ;;  %v10053_v4 = vrot.slane %v28310_v42, 7  ;;  %v28312_v39 = vld [vmem:[#allocation32_spill] sm:$0xff] }
 0x394   :  { %v2166_v28 = vrot.slane %v2159_v7, %v21460_v43  ;;  %v11231_v13 = vpack.c.b16 %v11214_v40, %v11214_v40  ;;  %v4730_v6 = vrot.slane %v4723_v54, %v21460_v43  ;;  %v7515_v53 = vpack.c.b16 %v7494_v48, %v7494_v48  ;;  %19945 = vmatprep.subr.bf16.mxu1 %v20728_v23  ;;  %v26075_v7 = vpop.permute.xlu0 %9143  ;;  %v19722_v54 = vpop.f32.mrb[14].mxu0  ;;  %v26089_v23 = vld [vmem:[%s27946_s6] ss:$0 sm:$0xff] }
 0x395   :  { %v9106_v33 = vrot.slane %v9099_v62, %v21460_v43  ;;  %v26072_v16 = vrot.slane %v9231_v1, %v21460_v43  ;;  %v11567_v30 = vpack.c.b16 %v11550_v12, %v11550_v12  ;;  %v1483_v18 = vrot.slane %v28311_v35, %v21460_v43  ;;  %v26091_v62 = vpop.f32.mrb[12].mxu1  ;;  %v19723_v40 = vpop.f32.mrb[15].mxu0  ;;  %v28313_v1 = vld [vmem:[#allocation39_spill] sm:$0xff] }
 0x396   :  { %2264 = vst.msk [vmem:[#allocation2 + $0x28] sm:$0x1] %vm2253_vm11, %v2166_v28  ;;  %v11435_v14 = vrot.slane %v11231_v13, %v21460_v43  ;;  %4827 = vst.msk [vmem:[#allocation2 + $0x29] sm:$0x1] %vm2253_vm11, %v4730_v6  ;;  %v7667_v27 = vrot.slane %v7515_v53, %v21460_v43  ;;  %v1910_v48 = vrot.slane %v28312_v39, %v28151_v26  ;;  %v26106_v12 = vpop.permute.xlu1 %11479  ;;  %v26108_v53 = vpop.f32.mrb[13].mxu1 }
 0x397   :  { %2601 = vst.msk [vmem:[#allocation2 + $0x28] sm:$0x1] %vm2590_vm12, %v25652_v41  ;;  %9149 = vrot.lane.b32.xlu0 %v9106_v33, %s21104_s10  ;;  %v6274_v41 = vrot.slane %v26037_v55, %v21460_v43  ;;  %5163 = vst.msk [vmem:[#allocation2 + $0x29] sm:$0x1] %vm2590_vm12, %v25667_v25  ;;  %v9442_v28 = vrot.slane %v26072_v16, %v21460_v43  ;;  %v10054_v13 = vsel %vm1965_vm7, %v10053_v4, %v28313_v1 }
 0x398   :  { %3674 = vst.msk [vmem:[#allocation2 + $0x28] sm:$0x1] %vm3663_vm15, %v25732_v3  ;;  %v19589_v6 = vadd.f32 %v25245_v56, %v25235_v32  ;;  %v11442_v55 = vrot.slane %v11435_v14, %v21460_v43  ;;  %v7674_v25 = vrot.slane %v7667_v27, %v21460_v43  ;;  %v10075_v33 = vpack.c.b16 %v10054_v13, %v10054_v13  ;;  %v19744_v3 = vpop.f32.mrb[14].mxu1 }
 0x399   :  { %v26113_v16 = vrot.slane %v1910_v48, %v28151_v26  ;;  %6011 = vst.msk [vmem:[#allocation2 + $0x29] sm:$0x1] %vm3663_vm15, %v25747_v49  ;;  %v11771_v32 = vrot.slane %v11567_v30, %v21460_v43  ;;  %v1924_v56 = vrot.slane %v1483_v18, %v28151_v26  ;;  %v4047_v4 = vcombine.high %v28312_v39, %v28312_v39  ;;  %v19745_v54 = vpop.f32.mrb[15].mxu1  ;;  %v28315_v39 = vld [vmem:[#allocation30_spill] sm:$0xff] }
 0x39a   :  { %4011 = vst.msk [vmem:[#allocation2 + $0x28] sm:$0x1] %vm4000_vm0, %v25844_v24  ;;  %v13160_v42 = vadd.f32 %v19589_v6, %v26089_v23  ;;  %6347 = vst.msk [vmem:[#allocation2 + $0x29] sm:$0x1] %vm4000_vm0, %v25860_v29  ;;  %11485 = vrot.lane.b32.xlu1 %v11442_v55, %s21104_s10  ;;  %v10227_v49 = vrot.slane %v10075_v33, %v21460_v43  ;;  %v4048_v30 = vcombine.high %v1483_v18, %v1483_v18  ;;  %v28316_v18 = vld [vmem:[#allocation34_spill] sm:$0xff]  ;;  %v28319_v33 = vld [vmem:[#allocation33_spill] sm:$0xff] }
 0x39b   :  { %28314 = vst [vmem:[#allocation42_spill] sm:$0xff] %v26113_v16  ;;  %7771 = vst.msk [vmem:[#allocation2 + $0x2a] sm:$0x1] %vm2253_vm11, %v7674_v25  ;;  %v28093_v24 = vunpack.c.l.b16 %v26113_v16  ;;  %v19611_v14 = vadd.f32 %v25277_v47, %v25269_v2  ;;  %3980 = vrot.lane.b32.xlu0 %v3937_v21, %s21105_s11  ;;  %v26139_v29 = vrot.slane %v1924_v56, %v28151_v26  ;;  %v26146_v2 = vpop.permute.xlu0 %3974  ;;  %v26164_v25 = vpop.permute.xlu1 %6311 }
 0x39c   :  { %8107 = vst.msk [vmem:[#allocation2 + $0x2a] sm:$0x1] %vm2590_vm12, %v25690_v0  ;;  %v4475_v27 = vrot.slane %v4047_v4, %v28151_v26  ;;  %v6992_v48 = vrot.slane %v28315_v39, %v21460_v43  ;;  %v7419_v40 = vrot.slane %v28316_v18, %v28151_v26  ;;  %v10234_v47 = vrot.slane %v10227_v49, %v21460_v43 }
 0x39d   :  { %v2300_v45 = vrot.slane %v28093_v24, 1  ;;  %v4489_v0 = vrot.slane %v4048_v30, %v28151_v26  ;;  %v26152_v21 = vadd.f32 %v19611_v14, %v13160_v42  ;;  %9179 = vst.msk [vmem:[#allocation2 + $0x2a] sm:$0x1] %vm3663_vm15, %v25777_v34  ;;  %v28094_v1 = vunpack.c.l.b16 %v26139_v29 }
 0x39e   :  { %v4482_v13 = vrot.slane %v4475_v27, %v28151_v26  ;;  %v26159_v6 = vrot.slane %v7419_v40, %v28151_v26  ;;  %v7433_v55 = vrot.slane %v6992_v48, %v28151_v26  ;;  %9515 = vst.msk [vmem:[#allocation2 + $0x2a] sm:$0x1] %vm4000_vm0, %v25898_v59  ;;  %v8353_v3 = vcombine.high %v28319_v33, %v28319_v33 }
 0x39f   :  { %28317 = vst [vmem:[#allocation17_spill] sm:$0xff] %v26152_v21  ;;  %6317 = vrot.lane.b32.xlu1 %v6274_v41, %s21105_s11  ;;  %v11778_v34 = vrot.slane %v11771_v32, %v21460_v43  ;;  %10331 = vst.msk [vmem:[#allocation2 + $0x2b] sm:$0x1] %vm2253_vm11, %v10234_v47  ;;  %v4496_v56 = vrot.slane %v4489_v0, %v28151_v26  ;;  %v9551_v42 = vcombine.high %v28316_v18, %v28316_v18  ;;  %v28323_v18 = vld [vmem:[#allocation31_spill] sm:$0xff] }
 0x3a0   :  { %28318 = vst [vmem:[#allocation32_spill] sm:$0xff] %v26159_v6  ;;  %9485 = vrot.lane.b32.xlu0 %v9442_v28, %s21105_s11  ;;  %10667 = vst.msk [vmem:[#allocation2 + $0x2b] sm:$0x1] %vm2590_vm12, %v25706_v46  ;;  %v2301_v59 = vsel %vm1965_vm7, %v28094_v1, %v2300_v45  ;;  %v26180_v4 = vunpack.c.l.b16 %v4482_v13  ;;  %v26183_v41 = vrot.slane %v7433_v55, %v28151_v26  ;;  %v28091_v32 = vunpack.c.l.b16 %v26159_v6 }
 0x3a1   :  { %v2317_v54 = vpack.c.b16 %v2301_v59, %v2301_v59  ;;  %v26186_v49 = vunpack.c.l.b16 %v4496_v56  ;;  %v9552_v30 = vcombine.high %v6992_v48, %v6992_v48  ;;  %v9979_v28 = vrot.slane %v9551_v42, %v28151_v26  ;;  %11515 = vst.msk [vmem:[#allocation2 + $0x2b] sm:$0x1] %vm3663_vm15, %v25798_v10  ;;  %v26201_v48 = vpop.permute.xlu0 %9479  ;;  %v26217_v42 = vpop.permute.xlu1 %11815 }
 0x3a2   :  { %28320 = vst [vmem:[#allocation39_spill] sm:$0xff] %v26180_v4  ;;  %28321 = vst [vmem:[#allocation30_spill] sm:$0xff] %v26183_v41  ;;  %v4863_v46 = vrot.slane %v26180_v4, 1  ;;  %v28092_v14 = vunpack.c.l.b16 %v26183_v41  ;;  %v7807_v27 = vrot.slane %v28091_v32, 1  ;;  %v28324_v40 = vcombine.high %v28323_v18, %v28323_v18 }
 0x3a3   :  { %28322 = vst [vmem:[#allocation34_spill] sm:$0xff] %v26186_v49  ;;  %11851 = vst.msk [vmem:[#allocation2 + $0x2b] sm:$0x1] %vm4000_vm0, %v25922_v44  ;;  %11821 = vrot.lane.b32.xlu1 %v11778_v34, %s21105_s11  ;;  %v2534_v10 = vrot.slane %v2317_v54, %v21460_v43  ;;  %v9986_v45 = vrot.slane %v9979_v28, %v28151_v26  ;;  %v9993_v0 = vrot.slane %v9552_v30, %v28151_v26 }
 0x3a4   :  { %v2854_v47 = vrot.slane %v28324_v40, %v21460_v43  ;;  %v28325_v13 = vcombine.high %v28311_v35, %v28311_v35  ;;  %v4864_v33 = vsel %vm1965_vm7, %v26186_v49, %v4863_v46  ;;  %v7808_v44 = vsel %vm1965_vm7, %v28092_v14, %v7807_v27  ;;  %v20735_v49 = vld [vmem:[%s27942_s2 + $0x810] sm:$0xff]  }
 0x3a5   :  { %v2541_v59 = vrot.slane %v2534_v10, %v21460_v43  ;;  %v4880_v54 = vpack.c.b16 %v4864_v33, %v4864_v33  ;;  %v7824_v30 = vpack.c.b16 %v7808_v44, %v7808_v44  ;;  %v10000_v28 = vrot.slane %v9993_v0, %v28151_v26 }
 0x3a6   :  { %v2862_v55 = vrot.slane %v28325_v13, %v21460_v43  ;;  %v3289_v34 = vrot.slane %v2854_v47, %v28151_v26  ;;  %v5199_v56 = vcombine.high %v2854_v47, %v2854_v47  ;;  %v26221_v35 = vunpack.c.l.b16 %v9986_v45 }
 0x3a7   :  { %2572 = vrot.lane.b32.xlu0 %v2541_v59, %s21103_s1  ;;  %v5097_v27 = vrot.slane %v4880_v54, %v21460_v43  ;;  %v8041_v47 = vrot.slane %v7824_v30, %v21460_v43  ;;  %v26230_v13 = vunpack.c.l.b16 %v10000_v28  ;;  %v8360_v30 = vrot.slane %v8353_v3, %v21460_v43 }
 0x3a8   :  { %28326 = vst [vmem:[#allocation33_spill] sm:$0xff] %v26221_v35  ;;  %v26224_v18 = vrot.slane %v3289_v34, %v28151_v26  ;;  %v3303_v46 = vrot.slane %v2862_v55, %v28151_v26  ;;  %v5200_v40 = vcombine.high %v2862_v55, %v2862_v55  ;;  %v5627_v10 = vrot.slane %v5199_v56, %v28151_v26  ;;  %v26239_v55 = vpop.permute.xlu0 %2566  ;;  %v26245_v56 = vld.sshfl [vmem:[#allocation2 + $0x20] sm:$0x33 pattern:$0x75316420] }
 0x3a9   :  { %28327 = vst [vmem:[#allocation31_spill] sm:$0xff] %v26230_v13  ;;  %v10367_v0 = vrot.slane %v26221_v35, 1  ;;  %v5104_v34 = vrot.slane %v5097_v27, %v21460_v43  ;;  %v8048_v59 = vrot.slane %v8041_v47, %v21460_v43  ;;  %v20727_v47 = vld [vmem:[%s27942_s2 + $0x800] sm:$0xff]   ;;  %v15026_v32 = vrot.slane %v25741_v31, %v21460_v43 }
 0x3aa   :  { %v26235_v45 = vrot.slane %v3303_v46, %v28151_v26  ;;  %v3341_v33 = vunpack.c.l.b16 %v26224_v18  ;;  %v5641_v44 = vrot.slane %v5200_v40, %v28151_v26  ;;  %v5634_v54 = vrot.slane %v5627_v10, %v28151_v26  ;;  %v26258_v10 = vpop.permute.xlu1 %5129 }
 0x3ab   :  { %v10368_v28 = vsel %vm1965_vm7, %v26230_v13, %v10367_v0  ;;  %v28328_v40 = vcombine.high %v28315_v39, %v28315_v39  ;;  %5135 = vrot.lane.b32.xlu1 %v5104_v34, %s21103_s1  ;;  %8079 = vrot.lane.b32.xlu0 %v8048_v59, %s21103_s1  ;;  %v20730_v39 = vld [vmem:[%s27942_s2 + $0x848] sm:$0xff]   ;;  %v15320_v59 = vcombine.high %v26245_v56, %v26245_v56  ;;  %v28329_v4 = vunpack.c.l.b16 %v24840_v57 }
 0x3ac   :  { %v28096_v46 = vunpack.c.l.b16 %v26235_v45  ;;  %v5648_v18 = vrot.slane %v5641_v44, %v28151_v26  ;;  %v10384_v3 = vpack.c.b16 %v10368_v28, %v10368_v28  ;;  %v26262_v0 = vunpack.c.l.b16 %v5634_v54  ;;  %15265 = vmatmul.mubr.bf16.vlgmr.msra.gmra.mrb[28].mxu0 %v15026_v32  ;;  %v20731_v13 = vld [vmem:[%s27942_s2 + $0x808] sm:$0xff]  }
 0x3ad   :  { %v8368_v27 = vrot.slane %v28328_v40, %v21460_v43  ;;  %v8795_v44 = vrot.slane %v8360_v30, %v28151_v26  ;;  %v10703_v31 = vcombine.high %v8360_v30, %v8360_v30  ;;  %19924 = vmatpush3.bf16.msra.mxu0 %v20727_v47  ;;  %v15034_v41 = vcombine.high %v15026_v32, %v15026_v32 }
 0x3ae   :  { %v3373_v40 = vrot.slane %v28096_v46, 7  ;;  %v26272_v14 = vunpack.c.l.b16 %v5648_v18  ;;  %v10601_v54 = vrot.slane %v10384_v3, %v21460_v43  ;;  %v15334_v18 = vrot.slane %v15320_v59, %v21460_v43  ;;  %v26288_v3 = vpop.permute.xlu0 %8073  ;;  %19925 = vmatprep.subr.bf16.mxu0 %v20730_v39 }
 0x3af   :  { %v8809_v34 = vrot.slane %v8368_v27, %v28151_v26  ;;  %v8802_v28 = vrot.slane %v8795_v44, %v28151_v26  ;;  %v10704_v24 = vcombine.high %v8368_v27, %v8368_v27  ;;  %15305 = vmatmul.mubr.bf16.vlgmr.msra.gmra.mrb[28].mxu1 %v15034_v41  ;;  %v3710_v21 = vrot.slane %v3341_v33, 1 }
 0x3b0   :  { %v3374_v1 = vsel %vm1965_vm7, %v3373_v40, %v3341_v33  ;;  %v5711_v35 = vrot.slane %v26272_v14, 7  ;;  %v10608_v44 = vrot.slane %v10601_v54, %v21460_v43  ;;  %v11131_v40 = vrot.slane %v10703_v31, %v28151_v26  ;;  %15565 = vmatprep.mubr.bf16.mxu0 %v15334_v18  ;;  %v20734_v54 = vld [vmem:[%s27942_s2 + $0x850] sm:$0xff]  }
 0x3b1   :  { %v26282_v46 = vrot.slane %v8809_v34, %v28151_v26  ;;  %v3390_v30 = vpack.c.b16 %v3374_v1, %v3374_v1  ;;  %v8847_v27 = vunpack.c.l.b16 %v8802_v28  ;;  %v20729_v34 = vld [vmem:[%s27942_s2 + $0x880] sm:$0xff]   ;;  %v11145_v6 = vrot.slane %v10704_v24, %v28151_v26  ;;  %v20732_v1 = vld [vmem:[%s27942_s2 + $0x8c8] sm:$0xff]   ;;  %v26305_v28 = vpop.permute.xlu1 %10633  ;;  %19926 = vmatpush3.bf16.msra.mxu0 %v20731_v13 }
 0x3b2   :  { %v5712_v47 = vsel %vm1965_vm7, %v5711_v35, %v26262_v0  ;;  %10639 = vrot.lane.b32.xlu1 %v10608_v44, %s21103_s1  ;;  %v15336_v31 = vcombine.high %v15334_v18, %v15334_v18  ;;  %v1987_v16 = vrot.slane %v28329_v4, 7  ;;  %19946 = vmatpush3.bf16.msra.mxu1 %v20729_v34  ;;  %v28330_v57 = vunpack.c.l.b16 %v26235_v45  ;;  %v20733_v18 = vld [vmem:[%s27942_s2 + $0x888] sm:$0xff]  }
 0x3b3   :  { %v8848_v59 = vunpack.c.l.b16 %v26282_v46  ;;  %v3607_v35 = vrot.slane %v3390_v30, %v21460_v43  ;;  %v5728_v39 = vpack.c.b16 %v5712_v47, %v5712_v47  ;;  %v11138_v46 = vrot.slane %v11131_v40, %v28151_v26  ;;  %19947 = vmatprep.subr.bf16.mxu1 %v20732_v1  ;;  %19927 = vmatprep.subr.bf16.mxu0 %v20734_v54  ;;  %v26336_v40 = vpop.permute.xlu0 %3639 }
 0x3b4   :  { %v11152_v32 = vrot.slane %v11145_v6, %v28151_v26  ;;  %15605 = vmatprep.mubr.bf16.mxu1 %v15336_v31  ;;  %v6047_v26 = vrot.slane %v26262_v0, 1  ;;  %v3711_v4 = vsel %vm1965_vm7, %v28330_v57, %v3710_v21  ;;  %v28331_v13 = vunpack.c.l.b16 %v24828_v22  ;;  %v20738_v0 = vld [vmem:[%s27942_s2 + $0x858] sm:$0xff]   ;;  %v20737_v57 = vld [vmem:[%s27942_s2 + $0x890] sm:$0xff]  }
 0x3b5   :  { %v8879_v24 = vrot.slane %v8848_v59, 7  ;;  %v3614_v44 = vrot.slane %v3607_v35, %v21460_v43  ;;  %v5945_v30 = vrot.slane %v5728_v39, %v21460_v43  ;;  %v26318_v47 = vunpack.c.l.b16 %v11138_v46  ;;  %19928 = vmatpush3.bf16.msra.mxu0 %v20735_v49  ;;  %v20739_v46 = vld [vmem:[%s27942_s2 + $0x818] sm:$0xff]   ;;  %v26350_v31 = vpop.permute.xlu1 %5977 }
 0x3b6   :  { %v26322_v41 = vunpack.c.l.b16 %v11152_v32  ;;  %v1988_v33 = vsel %vm1965_vm7, %v1987_v16, %v28331_v13  ;;  %v3727_v22 = vpack.c.b16 %v3711_v4, %v3711_v4  ;;  %v20736_v16 = vld [vmem:[%s27942_s2 + $0x8d0] sm:$0xff]   ;;  %v6048_v54 = vsel %vm1965_vm7, %v26272_v14, %v6047_v26  ;;  %19948 = vmatpush3.bf16.msra.mxu1 %v20733_v18  ;;  %19929 = vmatprep.subr.bf16.mxu0 %v20738_v0  ;;  %v20743_v0 = vld [vmem:[%s27942_s2 + $0x820] sm:$0xff]  }
 0x3b7   :  { %v8880_v6 = vsel %vm1965_vm7, %v8879_v24, %v8847_v27  ;;  %3645 = vrot.lane.b32.xlu0 %v3614_v44, %s21104_s10  ;;  %v5952_v21 = vrot.slane %v5945_v30, %v21460_v43  ;;  %v2008_v34 = vpack.c.b16 %v1988_v33, %v1988_v33  ;;  %v4551_v35 = vrot.slane %v24876_v51, 7  ;;  %v20742_v51 = vld [vmem:[%s27942_s2 + $0x860] sm:$0xff]   ;;  %19949 = vmatprep.subr.bf16.mxu1 %v20736_v16 }
 0x3b8   :  { %v8896_v45 = vpack.c.b16 %v8880_v6, %v8880_v6  ;;  %v11215_v1 = vrot.slane %v26322_v41, 7  ;;  %v9215_v39 = vrot.slane %v8847_v27, 1  ;;  %v3944_v32 = vrot.slane %v3727_v22, %v21460_v43  ;;  %v26381_v22 = vpop.permute.xlu0 %9145 }
 0x3b9   :  { %5983 = vrot.lane.b32.xlu1 %v5952_v21, %s21104_s10  ;;  %v2173_v44 = vrot.slane %v2008_v34, %v21460_v43  ;;  %v6064_v30 = vpack.c.b16 %v6048_v54, %v6048_v54  ;;  %v4552_v14 = vsel %vm1965_vm7, %v4551_v35, %v24865_v19  ;;  %v28332_v26 = vunpack.c.l.b16 %v24868_v17  ;;  %v20740_v19 = vld [vmem:[%s27942_s2 + $0x8d8] sm:$0xff]   ;;  %19930 = vmatpush3.bf16.msra.mxu0 %v20739_v46 }
 0x3ba   :  { %v9113_v24 = vrot.slane %v8896_v45, %v21460_v43  ;;  %v11216_v49 = vsel %vm1965_vm7, %v11215_v1, %v26318_v47  ;;  %v9216_v27 = vsel %vm1965_vm7, %v8848_v59, %v9215_v39  ;;  %v3951_v59 = vrot.slane %v3944_v32, %v21460_v43  ;;  %v28334_v54 = vld [vmem:[#allocation44_spill] sm:$0xff]  ;;  %19931 = vmatprep.subr.bf16.mxu0 %v20742_v51  ;;  %v20746_v32 = vld [vmem:[%s27942_s2 + $0x868] sm:$0xff]  }
 0x3bb   :  { %v7495_v6 = vrot.slane %v28332_v26, 7  ;;  %v11232_v13 = vpack.c.b16 %v11216_v49, %v11216_v49  ;;  %v2180_v33 = vrot.slane %v2173_v44, %v21460_v43  ;;  %v4572_v18 = vpack.c.b16 %v4552_v14, %v4552_v14  ;;  %19950 = vmatpush3.bf16.msra.mxu1 %v20737_v57  ;;  %v26401_v44 = vpop.permute.xlu1 %11481  ;;  %v28335_v49 = vld [vmem:[#allocation41_spill] sm:$0xff]  ;;  %v28336_v57 = vld [vmem:[#allocation22_spill] sm:$0xff] }
 0x3bc   :  { %v9120_v4 = vrot.slane %v9113_v24, %v21460_v43  ;;  %v9232_v17 = vpack.c.b16 %v9216_v27, %v9216_v27  ;;  %v28333_v21 = vunpack.c.l.b16 %v24851_v20  ;;  %v11551_v1 = vrot.slane %v26318_v47, 1  ;;  %v20741_v24 = vld [vmem:[%s27942_s2 + $0x898] sm:$0xff]   ;;  %19951 = vmatprep.subr.bf16.mxu1 %v20740_v19 }
 0x3bd   :  { %v11449_v34 = vrot.slane %v11232_v13, %v21460_v43  ;;  %2265 = vst.msk [vmem:[#allocation2 + $0x2c] sm:$0x1] %vm2253_vm11, %v2180_v33  ;;  %v10055_v20 = vrot.slane %v28334_v54, 7  ;;  %v6281_v35 = vrot.slane %v6064_v30, %v21460_v43  ;;  %v4737_v39 = vrot.slane %v4572_v18, %v21460_v43  ;;  %19932 = vmatpush3.bf16.msra.mxu0 %v20743_v0  ;;  %v28337_v13 = vld [vmem:[#allocation43_spill] sm:$0xff]  ;;  %v26439_v0 = vpop.permute.xlu0 %3976  ;;  %v28340_v54 = vld [vmem:[#allocation46_spill] sm:$0xff] }
 0x3be   :  { %v7496_v45 = vsel %vm1965_vm7, %v7495_v6, %v28333_v21  ;;  %9151 = vrot.lane.b32.xlu0 %v9120_v4, %s21104_s10  ;;  %2602 = vst.msk [vmem:[#allocation2 + $0x2c] sm:$0x1] %vm2590_vm12, %v25951_v9  ;;  %v9449_v46 = vrot.slane %v9232_v17, %v21460_v43  ;;  %v19633_v47 = vadd.f32 %v25475_v15, %v25467_v50  ;;  %v20744_v50 = vld [vmem:[%s27942_s2 + $0x8e0] sm:$0xff]   ;;  %v28338_v33 = vunpack.c.l.b16 %v28337_v13  ;;  %v26491_v13 = vpop.f32.mrb[16].mxu1 }
 0x3bf   :  { %v7516_v16 = vpack.c.b16 %v7496_v45, %v7496_v45  ;;  %v11456_v9 = vrot.slane %v11449_v34, %v21460_v43  ;;  %v11552_v51 = vsel %vm1965_vm7, %v26322_v41, %v11551_v1  ;;  %v10056_v14 = vsel %vm1965_vm7, %v10055_v20, %v28335_v49  ;;  %3675 = vst.msk [vmem:[#allocation2 + $0x2c] sm:$0x1] %vm3663_vm15, %v26039_v63  ;;  %v20747_v41 = vld [vmem:[%s27942_s2 + $0x828] sm:$0xff]  }
 0x3c0   :  { %v4744_v15 = vrot.slane %v4737_v39, %v21460_v43  ;;  %v11568_v27 = vpack.c.b16 %v11552_v51, %v11552_v51  ;;  %v10076_v26 = vpack.c.b16 %v10056_v14, %v10056_v14  ;;  %4012 = vst.msk [vmem:[#allocation2 + $0x2c] sm:$0x1] %vm4000_vm0, %v26146_v2  ;;  %v13461_v6 = vadd.f32 %v19633_v47, %v26089_v23  ;;  %v28339_v21 = vld [vmem:[#allocation21_spill] sm:$0xff]  ;;  %v26453_v47 = vpop.f32.mrb[16].mxu0  ;;  %v26467_v14 = vpop.permute.xlu1 %6313 }
 0x3c1   :  { %v7681_v30 = vrot.slane %v7516_v16, %v21460_v43  ;;  %11487 = vrot.lane.b32.xlu1 %v11456_v9, %s21104_s10  ;;  %v19655_v4 = vadd.f32 %v28336_v57, %v25477_v5  ;;  %v1989_v19 = vrot.slane %v28338_v33, 7  ;;  %v6288_v2 = vrot.slane %v6281_v35, %v21460_v43  ;;  %19952 = vmatpush3.bf16.msra.mxu1 %v20741_v24  ;;  %v20750_v5 = vld [vmem:[%s27942_s2 + $0x870] sm:$0xff]   ;;  %v20748_v1 = vld [vmem:[%s27942_s2 + $0x8e8] sm:$0xff]  }
 0x3c2   :  { %3982 = vrot.lane.b32.xlu0 %v3951_v59, %s21105_s11  ;;  %4828 = vst.msk [vmem:[#allocation2 + $0x2d] sm:$0x1] %vm2253_vm11, %v4744_v15  ;;  %v9456_v18 = vrot.slane %v9449_v46, %v21460_v43  ;;  %v10241_v17 = vrot.slane %v10076_v26, %v21460_v43  ;;  %v20745_v59 = vld [vmem:[%s27942_s2 + $0x8a0] sm:$0xff]   ;;  %19933 = vmatprep.subr.bf16.mxu0 %v20746_v32  ;;  %v4553_v45 = vrot.slane %v28339_v21, 7  ;;  %v28341_v20 = vunpack.c.l.b16 %v28340_v54  ;;  %v20751_v32 = vld [vmem:[%s27942_s2 + $0x830] sm:$0xff]   ;;  %v26503_v21 = vpop.f32.mrb[17].mxu1 }
 0x3c3   :  { %v7688_v63 = vrot.slane %v7681_v30, %v21460_v43  ;;  %5164 = vst.msk [vmem:[#allocation2 + $0x2d] sm:$0x1] %vm2590_vm12, %v25968_v36  ;;  %v11785_v34 = vrot.slane %v11568_v27, %v21460_v43  ;;  %19953 = vmatprep.subr.bf16.mxu1 %v20744_v50  ;;  %v13501_v16 = vadd.f32 %v19655_v4, %v13461_v6  ;;  %v28342_v39 = vld [vmem:[#allocation45_spill] sm:$0xff]  ;;  %v28344_v30 = vld [vmem:[#allocation18_spill] sm:$0xff]  ;;  %v26469_v50 = vpop.f32.mrb[17].mxu0  ;;  %v28345_v27 = vld [vmem:[#allocation19_spill] sm:$0xff] }
 0x3c4   :  { %v1990_v35 = vsel %vm1965_vm7, %v1989_v19, %v28341_v20  ;;  %v28343_v46 = vunpack.c.l.b16 %v28342_v39  ;;  %v10248_v36 = vrot.slane %v10241_v17, %v21460_v43  ;;  %6012 = vst.msk [vmem:[#allocation2 + $0x2d] sm:$0x1] %vm3663_vm15, %v26052_v8  ;;  %19934 = vmatpush3.bf16.msra.mxu0 %v20747_v41  ;;  %v4554_v51 = vsel %vm1965_vm7, %v4553_v45, %v28344_v30  ;;  %v26465_v49 = vld.sshfl [vmem:[#allocation2 + $0x24] sm:$0x33 pattern:$0x75316420]  ;;  %v9482_v20 = vpop.permute.xlu0 %9481 }
 0x3c5   :  { %7772 = vst.msk [vmem:[#allocation2 + $0x2e] sm:$0x1] %vm2253_vm11, %v7688_v63  ;;  %v2009_v9 = vpack.c.b16 %v1990_v35, %v1990_v35  ;;  %6319 = vrot.lane.b32.xlu1 %v6288_v2, %s21105_s11  ;;  %vm17721_vm6 = vcmp.ge.f32.partialorder %v13501_v16, 0.0  ;;  %v20754_v8 = vld [vmem:[%s27942_s2 + $0x878] sm:$0xff]   ;;  %v4573_v15 = vpack.c.b16 %v4554_v51, %v4554_v51  ;;  %v28346_v26 = vunpack.c.l.b16 %v28345_v27  ;;  %v19766_v63 = vpop.f32.mrb[18].mxu0  ;;  %19954 = vmatpush3.bf16.msra.mxu1 %v20745_v59  ;;  %v28348_v17 = vld [vmem:[#allocation13_spill] sm:$0xff] }
 0x3c6   :  { %v7497_v24 = vrot.slane %v28343_v46, 7  ;;  %8108 = vst.msk [vmem:[#allocation2 + $0x2e] sm:$0x1] %vm2590_vm12, %v25993_v52  ;;  %9487 = vrot.lane.b32.xlu0 %v9456_v18, %s21105_s11  ;;  %v17737_v52 = vmul.f32 0.33, %v13501_v16  ;;  %19935 = vmatprep.subr.bf16.mxu0 %v20750_v5  ;;  %v28347_v57 = vld [vmem:[#allocation23_spill] sm:$0xff]  ;;  %v11792_v19 = vrot.slane %v11785_v34, %v21460_v43  ;;  %v15621_v46 = vcombine.high %v26465_v49, %v26465_v49 }
 0x3c7   :  { %9180 = vst.msk [vmem:[#allocation2 + $0x2e] sm:$0x1] %vm3663_vm15, %v26075_v7  ;;  %v20749_v7 = vld [vmem:[%s27942_s2 + $0x8a8] sm:$0xff]   ;;  %v10057_v4 = vrot.slane %v28347_v57, 7  ;;  %v19767_v33 = vpop.f32.mrb[19].mxu0  ;;  %19955 = vmatprep.subr.bf16.mxu1 %v20748_v1  ;;  %v4751_v18 = vrot.slane %v4573_v15, %v21460_v43  ;;  %v20755_v34 = vld [vmem:[%s27942_s2 + $0x838] sm:$0xff]  }
 0x3c8   :  { %6348 = vst.msk [vmem:[#allocation2 + $0x2d] sm:$0x1] %vm4000_vm0, %v26164_v25  ;;  %v7498_v41 = vsel %vm1965_vm7, %v7497_v24, %v28346_v26  ;;  %9516 = vst.msk [vmem:[#allocation2 + $0x2e] sm:$0x1] %vm4000_vm0, %v26201_v48  ;;  %v2187_v25 = vrot.slane %v2009_v9, %v21460_v43  ;;  %v17753_v2 = vsel %vm17721_vm6, %v13501_v16, %v17737_v52  ;;  %v20752_v48 = vld [vmem:[%s27942_s2 + $0x8f0] sm:$0xff]   ;;  %19936 = vmatpush3.bf16.msra.mxu0 %v20751_v32  ;;  %v28350_v1 = vld [vmem:[#allocation20_spill] sm:$0xff] }
 0x3c9   :  { %10332 = vst.msk [vmem:[#allocation2 + $0x2f] sm:$0x1] %vm2253_vm11, %v10248_v36  ;;  %v7517_v6 = vpack.c.b16 %v7498_v41, %v7498_v41  ;;  %v28349_v59 = vld [vmem:[#allocation26_spill] sm:$0xff]  ;;  %v17771_v45 = vpack.c.bf16 %v17753_v2, %v17753_v2  ;;  %v10058_v54 = vsel %vm1965_vm7, %v10057_v4, %v28350_v1  ;;  %v19788_v35 = vpop.f32.mrb[18].mxu1  ;;  %11823 = vrot.lane.b32.xlu1 %v11792_v19, %s21105_s11  ;;  %v20758_v39 = vld [vmem:[%s27942_s2 + $0x940] sm:$0xff]   ;;  %v28353_v27 = vld [vmem:[#allocation15_spill] sm:$0xff] }
 0x3ca   :  { %10668 = vst.msk [vmem:[#allocation2 + $0x2f] sm:$0x1] %vm2590_vm12, %v26007_v61  ;;  %v19677_v5 = vadd.f32 %v28349_v59, %v28348_v17  ;;  %v2194_v61 = vrot.slane %v2187_v25, %v21460_v43  ;;  %19937 = vmatprep.subr.bf16.mxu0 %v20754_v8  ;;  %v10077_v24 = vpack.c.b16 %v10058_v54, %v10058_v54  ;;  %v28351_v36 = vld [vmem:[#allocation25_spill] sm:$0xff]  ;;  %v19789_v30 = vpop.f32.mrb[19].mxu1  ;;  %v26531_v8 = vpop.permute.xlu1 %11817  ;;  %v20756_v41 = vld [vmem:[%s27942_s2 + $0x8f8] sm:$0xff]  }
 0x3cb   :  { %11516 = vst.msk [vmem:[#allocation2 + $0x2f] sm:$0x1] %vm3663_vm15, %v26106_v12  ;;  %v7695_v16 = vrot.slane %v7517_v6, %v21460_v43  ;;  %v4758_v12 = vrot.slane %v4751_v18, %v21460_v43  ;;  %v28352_v32 = vunpack.c.l.b16 %v28351_v36  ;;  %v17779_v51 = vrot.slane %v17771_v45, %v21460_v43  ;;  %19956 = vmatpush3.bf16.msra.mxu1 %v20749_v7  ;;  %v28354_v7 = vld [vmem:[#allocation12_spill] sm:$0xff]  ;;  %v28357_v33 = vld [vmem:[#allocation35_spill] sm:$0xff] }
 0x3cc   :  { %11852 = vst.msk [vmem:[#allocation2 + $0x2f] sm:$0x1] %vm4000_vm0, %v26217_v42  ;;  %v20753_v42 = vld [vmem:[%s27942_s2 + $0x8b0] sm:$0xff]   ;;  %v13762_v15 = vadd.f32 %v19677_v5, %v26089_v23  ;;  %v19699_v26 = vadd.f32 %v25697_v37, %v28353_v27  ;;  %19957 = vmatprep.subr.bf16.mxu1 %v20752_v48  ;;  %v10255_v63 = vrot.slane %v10077_v24, %v21460_v43  ;;  %v28355_v25 = vunpack.c.l.b16 %v28354_v7  ;;  %v28356_v57 = vld [vmem:[#allocation36_spill] sm:$0xff]  ;;  %v20763_v24 = vld [vmem:[%s27942_s2 + $0x908] sm:$0xff]  }
 0x3cd   :  { %v1991_v9 = vrot.slane %v28352_v32, 7  ;;  %2266 = vst.msk [vmem:[#allocation2 + $0x30] sm:$0x1] %vm2253_vm11, %v2194_v61  ;;  %v7702_v52 = vrot.slane %v7695_v16, %v21460_v43  ;;  %4829 = vst.msk [vmem:[#allocation2 + $0x31] sm:$0x1] %vm2253_vm11, %v4758_v12  ;;  %v4555_v4 = vrot.slane %v28356_v57, 7  ;;  %v28358_v37 = vunpack.c.l.b16 %v28357_v33  ;;  %19938 = vmatpush3.bf16.msra.mxu0 %v20755_v34 }
 0x3ce   :  { %2603 = vst.msk [vmem:[#allocation2 + $0x30] sm:$0x1] %vm2590_vm12, %v26239_v55  ;;  %5165 = vst.msk [vmem:[#allocation2 + $0x31] sm:$0x1] %vm2590_vm12, %v26258_v10  ;;  %v26553_v55 = vrot.slane %v26245_v56, %v21460_v43  ;;  %v20759_v2 = vld [vmem:[%s27942_s2 + $0x900] sm:$0xff]   ;;  %v17786_v48 = vrot.slane %v17779_v51, %v21460_v43  ;;  %v26562_v17 = vadd.f32 %v19699_v26, %v13762_v15  ;;  %19967 = vmatprep.subr.bf16.mxu0 %v20758_v39  ;;  %v20762_v10 = vld [vmem:[%s27942_s2 + $0x948] sm:$0xff]   ;;  %v5132_v32 = vpop.permute.xlu1 %5131 }
 0x3cf   :  { %v1992_v6 = vsel %vm1965_vm7, %v1991_v9, %v28355_v25  ;;  %v7499_v19 = vrot.slane %v28358_v37, 7  ;;  %7773 = vst.msk [vmem:[#allocation2 + $0x32] sm:$0x1] %vm2253_vm11, %v7702_v52  ;;  %v10262_v56 = vrot.slane %v10255_v63, %v21460_v43  ;;  %v28360_v5 = vld [vmem:[#allocation24_spill] sm:$0xff]  ;;  %19958 = vmatpush3.bf16.msra.mxu1 %v20753_v42  ;;  %v26584_v1 = vrot.slane %v15621_v46, %v21460_v43  ;;  %v28367_v63 = vld [vmem:[#allocation37_spill] sm:$0xff] }
 0x3d0   :  { %3676 = vst.msk [vmem:[#allocation2 + $0x30] sm:$0x1] %vm3663_vm15, %v26336_v40  ;;  %v2010_v18 = vpack.c.b16 %v1992_v6, %v1992_v6  ;;  %6013 = vst.msk [vmem:[#allocation2 + $0x31] sm:$0x1] %vm3663_vm15, %v26350_v31  ;;  %v28359_v40 = vld [vmem:[#allocation14_spill] sm:$0xff]  ;;  %v28361_v45 = vunpack.c.l.b16 %v28360_v5  ;;  %v20757_v16 = vld [vmem:[%s27942_s2 + $0x8b8] sm:$0xff]   ;;  %17787 = vrot.lane.b32.xlu0 %v17786_v48, %s21104_s10  ;;  %19959 = vmatprep.subr.bf16.mxu1 %v20756_v41 }
 0x3d1   :  { %8109 = vst.msk [vmem:[#allocation2 + $0x32] sm:$0x1] %vm2590_vm12, %v26288_v3  ;;  %v4556_v59 = vsel %vm1965_vm7, %v4555_v4, %v28359_v40  ;;  %v28362_v3 = vld [vmem:[#allocation27_spill] sm:$0xff]  ;;  %15566 = vmatmul.mubr.bf16.vlgmr.msra.gmra.mrb[32].mxu0 %v26553_v55  ;;  %v20760_v35 = vld [vmem:[%s27942_s2 + $0x9c0] sm:$0xff]   ;;  %v4557_v30 = vrot.slane %v25882_v38, 7  ;;  %v15637_v25 = vcombine.high %v26584_v1, %v26584_v1  ;;  %v20764_v6 = vld [vmem:[%s27942_s2 + $0x9c8] sm:$0xff]  }
 0x3d2   :  { %4013 = vst.msk [vmem:[#allocation2 + $0x30] sm:$0x1] %vm4000_vm0, %v26439_v0  ;;  %v7500_v61 = vsel %vm1965_vm7, %v7499_v19, %v28361_v45  ;;  %v10059_v34 = vrot.slane %v28362_v3, 7  ;;  %6349 = vst.msk [vmem:[#allocation2 + $0x31] sm:$0x1] %vm4000_vm0, %v26467_v14  ;;  %v2201_v31 = vrot.slane %v2010_v18, %v21460_v43  ;;  %v2569_v0 = vpop.permute.xlu0 %2568  ;;  %v4574_v54 = vpack.c.b16 %v4556_v59, %v4556_v59  ;;  %v28365_v42 = vld [vmem:[#allocation16_spill] sm:$0xff] }
 0x3d3   :  { %9181 = vst.msk [vmem:[#allocation2 + $0x32] sm:$0x1] %vm3663_vm15, %v26381_v22  ;;  %v7518_v12 = vpack.c.b16 %v7500_v61, %v7500_v61  ;;  %v28363_v22 = vld [vmem:[#allocation38_spill] sm:$0xff]  ;;  %v28364_v14 = vunpack.c.l.b16 %v25847_v60  ;;  %19968 = vmatpush3.bf16.msra.mxu0 %v20759_v2  ;;  %15866 = vmatprep.mubr.bf16.mxu0 %v26584_v1  ;;  %v15335_v60 = vcombine.high %v26553_v55, %v26553_v55  ;;  %v28366_v52 = vunpack.c.l.b16 %v28365_v42  ;;  %v20761_v38 = vld [vmem:[%s27942_s2 + $0x980] sm:$0xff]   ;;  %v10636_v2 = vpop.permute.xlu1 %10635  ;;  %v28370_v18 = vld [vmem:[#allocation47_spill] sm:$0xff] }
 0x3d4   :  { %10333 = vst.msk [vmem:[#allocation2 + $0x33] sm:$0x1] %vm2253_vm11, %v10262_v56  ;;  %v10060_v39 = vsel %vm1965_vm7, %v10059_v34, %v28363_v22  ;;  %v2208_v36 = vrot.slane %v2201_v31, %v21460_v43  ;;  %19969 = vmatprep.subr.bf16.mxu0 %v20762_v10  ;;  %19960 = vmatpush3.bf16.msra.mxu1 %v20757_v16  ;;  %v28368_v4 = vld [vmem:[#allocation29_spill] sm:$0xff]  ;;  %v20767_v19 = vld [vmem:[%s27942_s2 + $0x910] sm:$0xff]   ;;  %v10061_v56 = vrot.slane %v28370_v18, 7  ;;  %v20770_v40 = vld [vmem:[%s27942_s2 + $0x958] sm:$0xff]  }
 0x3d5   :  { %9517 = vst.msk [vmem:[#allocation2 + $0x32] sm:$0x1] %vm4000_vm0, %v9482_v20  ;;  %v1993_v46 = vrot.slane %v28364_v14, 7  ;;  %v4765_v20 = vrot.slane %v4574_v54, %v21460_v43  ;;  %v10078_v9 = vpack.c.b16 %v10060_v39, %v10060_v39  ;;  %v7709_v51 = vrot.slane %v7518_v12, %v21460_v43  ;;  %19989 = vmatprep.subr.bf16.mxu1 %v20760_v35  ;;  %v28371_v5 = vld [vmem:[#allocation40_spill] sm:$0xff]  ;;  %v20765_v34 = vld [vmem:[%s27942_s2 + $0x988] sm:$0xff]   ;;  %v20769_v42 = vld [vmem:[%s27942_s2 + $0x990] sm:$0xff]  }
 0x3d6   :  { %10669 = vst.msk [vmem:[#allocation2 + $0x33] sm:$0x1] %vm2590_vm12, %v26305_v28  ;;  %v20766_v28 = vld [vmem:[%s27942_s2 + $0x950] sm:$0xff]   ;;  %v8076_v26 = vpop.permute.xlu0 %8075  ;;  %v4558_v7 = vsel %vm1965_vm7, %v4557_v30, %v28367_v63  ;;  %v28369_v33 = vunpack.c.l.b16 %v28368_v4  ;;  %v19721_v10 = vadd.f32 %v26067_v11, %v26063_v58  ;;  %v28372_v45 = vunpack.c.l.b16 %v28371_v5  ;;  %v28374_v31 = vld [vmem:[#allocation28_spill] sm:$0xff] }
 0x3d7   :  { %11517 = vst.msk [vmem:[#allocation2 + $0x33] sm:$0x1] %vm3663_vm15, %v26401_v44  ;;  %v1994_v15 = vsel %vm1965_vm7, %v1993_v46, %v28366_v52  ;;  %v4772_v27 = vrot.slane %v4765_v20, %v21460_v43  ;;  %v10269_v44 = vrot.slane %v10078_v9, %v21460_v43  ;;  %v4575_v57 = vpack.c.b16 %v4558_v7, %v4558_v7  ;;  %v20771_v22 = vld [vmem:[%s27942_s2 + $0x918] sm:$0xff]   ;;  %v28376_v46 = vld [vmem:[#allocation42_spill] sm:$0xff]  ;;  %v20774_v9 = vld [vmem:[%s27942_s2 + $0x960] sm:$0xff]  }
 0x3d8   :  { %11853 = vst.msk [vmem:[#allocation2 + $0x33] sm:$0x1] %vm4000_vm0, %v26531_v8  ;;  %v2011_v41 = vpack.c.b16 %v1994_v15, %v1994_v15  ;;  %v7716_v8 = vrot.slane %v7709_v51, %v21460_v43  ;;  %v7501_v37 = vrot.slane %v28369_v33, 7  ;;  %19970 = vmatpush3.bf16.msra.mxu0 %v20763_v24  ;;  %15606 = vmatmul.mubr.bf16.vlgmr.msra.gmra.mrb[32].mxu1 %v15335_v60  ;;  %v28373_v58 = vunpack.c.l.b16 %v26139_v29  ;;  %v20768_v29 = vld [vmem:[%s27942_s2 + $0x9d0] sm:$0xff]   ;;  %v28379_v51 = vld [vmem:[#allocation17_spill] sm:$0xff] }
 0x3d9   :  { %2267 = vst.msk [vmem:[#allocation2 + $0x34] sm:$0x1] %vm2253_vm11, %v2208_v36  ;;  %4830 = vst.msk [vmem:[#allocation2 + $0x35] sm:$0x1] %vm2253_vm11, %v4772_v27  ;;  %v10276_v55 = vrot.slane %v10269_v44, %v21460_v43  ;;  %19971 = vmatprep.subr.bf16.mxu0 %v20766_v28  ;;  %v4779_v59 = vrot.slane %v4575_v57, %v21460_v43  ;;  %v19743_v3 = vadd.f32 %v26108_v53, %v26091_v62  ;;  %v28375_v62 = vld [vmem:[#allocation34_spill] sm:$0xff]  ;;  %v28378_v20 = vld [vmem:[#allocation39_spill] sm:$0xff] }
 0x3da   :  { %2604 = vst.msk [vmem:[#allocation2 + $0x34] sm:$0x1] %vm2590_vm12, %v2569_v0  ;;  %v2215_v48 = vrot.slane %v2011_v41, %v21460_v43  ;;  %5166 = vst.msk [vmem:[#allocation2 + $0x35] sm:$0x1] %vm2590_vm12, %v5132_v32  ;;  %v7502_v61 = vsel %vm1965_vm7, %v7501_v37, %v28372_v45  ;;  %v1995_v11 = vrot.slane %v28373_v58, 7  ;;  %19990 = vmatpush3.bf16.msra.mxu1 %v20761_v38  ;;  %15906 = vmatprep.mubr.bf16.mxu1 %v15637_v25  ;;  %v3642_v39 = vpop.permute.xlu0 %3641  ;;  %v28380_v38 = vld [vmem:[#allocation30_spill] sm:$0xff] }
 0x3db   :  { %7774 = vst.msk [vmem:[#allocation2 + $0x36] sm:$0x1] %vm2253_vm11, %v7716_v8  ;;  %10334 = vst.msk [vmem:[#allocation2 + $0x37] sm:$0x1] %vm2253_vm11, %v10276_v55  ;;  %v7519_v1 = vpack.c.b16 %v7502_v61, %v7502_v61  ;;  %v10062_v0 = vsel %vm1965_vm7, %v10061_v56, %v28374_v31  ;;  %v4559_v53 = vrot.slane %v28375_v62, 7  ;;  %19991 = vmatprep.subr.bf16.mxu1 %v20764_v6  ;;  %v28377_v24 = vunpack.c.l.b16 %v28376_v46  ;;  %v20772_v44 = vld [vmem:[%s27942_s2 + $0x9d8] sm:$0xff]  }
 0x3dc   :  { %8110 = vst.msk [vmem:[#allocation2 + $0x36] sm:$0x1] %vm2590_vm12, %v8076_v26  ;;  %v2222_v16 = vrot.slane %v2215_v48, %v21460_v43  ;;  %10670 = vst.msk [vmem:[#allocation2 + $0x37] sm:$0x1] %vm2590_vm12, %v10636_v2  ;;  %v4786_v54 = vrot.slane %v4779_v59, %v21460_v43  ;;  %v10079_v35 = vpack.c.b16 %v10062_v0, %v10062_v0  ;;  %19972 = vmatpush3.bf16.msra.mxu0 %v20767_v19  ;;  %v20775_v6 = vld [vmem:[%s27942_s2 + $0x920] sm:$0xff]   ;;  %v28384_v37 = vld [vmem:[#allocation31_spill] sm:$0xff]  ;;  %v5980_v2 = vpop.permute.xlu1 %5979 }
 0x3dd   :  { %v14063_v12 = vadd.f32 %v19721_v10, %v26089_v23  ;;  %v7723_v14 = vrot.slane %v7519_v1, %v21460_v43  ;;  %v1996_v36 = vsel %vm1965_vm7, %v1995_v11, %v28377_v24  ;;  %v4560_v32 = vsel %vm1965_vm7, %v4559_v53, %v28378_v20  ;;  %19973 = vmatprep.subr.bf16.mxu0 %v20770_v40  ;;  %v28382_v57 = vld [vmem:[#allocation32_spill] sm:$0xff]  ;;  %v20778_v55 = vld [vmem:[%s27942_s2 + $0x968] sm:$0xff]   ;;  %v20784_v24 = vld [vmem:[%s27942_s2 + $0x9f0] sm:$0xff]  }
 0x3de   :  { %2268 = vst.msk [vmem:[#allocation2 + $0x38] sm:$0x1] %vm2253_vm11, %v2222_v16  ;;  %4831 = vst.msk [vmem:[#allocation2 + $0x39] sm:$0x1] %vm2253_vm11, %v4786_v54  ;;  %v10283_v30 = vrot.slane %v10079_v35, %v21460_v43  ;;  %v2012_v28 = vpack.c.b16 %v1996_v36, %v1996_v36  ;;  %vm17720_vm8 = vcmp.ge.f32.partialorder %v28379_v51, 0.0  ;;  %19992 = vmatpush3.bf16.msra.mxu1 %v20765_v34  ;;  %v28381_v27 = vunpack.c.l.b16 %v28380_v38  ;;  %v20773_v40 = vld [vmem:[%s27942_s2 + $0x998] sm:$0xff]   ;;  %v9148_v1 = vpop.permute.xlu0 %9147 }
 0x3df   :  { %3677 = vst.msk [vmem:[#allocation2 + $0x34] sm:$0x1] %vm3663_vm15, %v3642_v39  ;;  %v14103_v60 = vadd.f32 %v19743_v3, %v14063_v12  ;;  %v7730_v52 = vrot.slane %v7723_v14, %v21460_v43  ;;  %v4576_v15 = vpack.c.b16 %v4560_v32, %v4560_v32  ;;  %19993 = vmatprep.subr.bf16.mxu1 %v20768_v29  ;;  %v17736_v25 = vmul.f32 0.33, %v28379_v51  ;;  %v28385_v45 = vld [vmem:[#allocation33_spill] sm:$0xff]  ;;  %v20783_v12 = vld [vmem:[%s27942_s2 + $0x930] sm:$0xff]  }
 0x3e0   :  { %v7503_v26 = vrot.slane %v28381_v27, 7  ;;  %v10290_v41 = vrot.slane %v10283_v30, %v21460_v43  ;;  %v2229_v7 = vrot.slane %v2012_v28, %v21460_v43  ;;  %19974 = vmatpush3.bf16.msra.mxu0 %v20771_v22  ;;  %v28383_v4 = vunpack.c.l.b16 %v28382_v57  ;;  %6014 = vst.msk [vmem:[#allocation2 + $0x35] sm:$0x1] %vm3663_vm15, %v5980_v2  ;;  %v20779_v34 = vld [vmem:[%s27942_s2 + $0x928] sm:$0xff]   ;;  %v20777_v62 = vld [vmem:[%s27942_s2 + $0x9a0] sm:$0xff]   ;;  %v11484_v22 = vpop.permute.xlu1 %11483  ;;  %v20786_v39 = vld [vmem:[%s27942_s2 + $0x978] sm:$0xff]  }
 0x3e1   :  { %vm17723_vm9 = vcmp.ge.f32.partialorder %v14103_v60, 0.0  ;;  %v17739_v63 = vmul.f32 0.33, %v14103_v60  ;;  %7775 = vst.msk [vmem:[#allocation2 + $0x3a] sm:$0x1] %vm2253_vm11, %v7730_v52  ;;  %v4793_v8 = vrot.slane %v4576_v15, %v21460_v43  ;;  %v10063_v19 = vrot.slane %v28384_v37, 7  ;;  %19975 = vmatprep.subr.bf16.mxu0 %v20774_v9 }
 0x3e2   :  { %v7504_v33 = vsel %vm1965_vm7, %v7503_v26, %v28383_v4  ;;  %10335 = vst.msk [vmem:[#allocation2 + $0x3b] sm:$0x1] %vm2253_vm11, %v10290_v41  ;;  %v2236_v18 = vrot.slane %v2229_v7, %v21460_v43  ;;  %v19765_v10 = vadd.f32 %v26469_v50, %v26453_v47  ;;  %19994 = vmatpush3.bf16.msra.mxu1 %v20769_v42  ;;  %v20776_v47 = vld [vmem:[%s27942_s2 + $0x9e0] sm:$0xff]   ;;  %v20780_v54 = vld [vmem:[%s27942_s2 + $0x9e8] sm:$0xff]   ;;  %v3979_v14 = vpop.permute.xlu0 %3978  ;;  %v20787_v20 = vld [vmem:[%s27942_s2 + $0x938] sm:$0xff]  }
 0x3e3   :  { %v17755_v48 = vsel %vm17723_vm9, %v14103_v60, %v17739_v63  ;;  %v7520_v56 = vpack.c.b16 %v7504_v33, %v7504_v33  ;;  %v4800_v5 = vrot.slane %v4793_v8, %v21460_v43  ;;  %v10064_v61 = vsel %vm1965_vm7, %v10063_v19, %v28385_v45  ;;  %19995 = vmatprep.subr.bf16.mxu1 %v20772_v44  ;;  %v20781_v46 = vld [vmem:[%s27942_s2 + $0x9a8] sm:$0xff]   ;;  %v20790_v9 = vld [vmem:[%s27942_s2 + $0xa40] sm:$0xff]   ;;  %v20785_v60 = vld [vmem:[%s27942_s2 + $0x9b0] sm:$0xff]  }
 0x3e4   :  { %v17794_v59 = vpack.c.bf16 %v17755_v48, %v17755_v48  ;;  %v19787_v3 = vadd.f32 %v26503_v21, %v26491_v13  ;;  %2269 = vst.msk [vmem:[#allocation2 + $0x3c] sm:$0x1] %vm2253_vm11, %v2236_v18  ;;  %v10080_v58 = vpack.c.b16 %v10064_v61, %v10064_v61  ;;  %v14364_v11 = vadd.f32 %v19765_v10, %v26089_v23  ;;  %v20782_v21 = vld [vmem:[%s27942_s2 + $0x970] sm:$0xff]   ;;  %v6316_v32 = vpop.permute.xlu1 %6315  ;;  %v20791_v42 = vld [vmem:[%s27942_s2 + $0xa00] sm:$0xff]   ;;  %v20794_v38 = vld [vmem:[%s27942_s2 + $0xa48] sm:$0xff]  }
 0x3e5   :  { %v7737_v50 = vrot.slane %v7520_v56, %v21460_v43  ;;  %19976 = vmatpush3.bf16.msra.mxu0 %v20775_v6  ;;  %4832 = vst.msk [vmem:[#allocation2 + $0x3d] sm:$0x1] %vm2253_vm11, %v4800_v5  ;;  %v17752_v13 = vsel %vm17720_vm8, %v28379_v51, %v17736_v25  ;;  %vm17769_vm7 = vcmask 516096   ;;  %v20788_v51 = vld [vmem:[%s27942_s2 + $0x9f8] sm:$0xff]   ;;  %v15628_v15 = vrot.slane %v26465_v49, %v21460_v43  ;;  %v20792_v49 = vld [vmem:[%s27942_s2 + $0xac0] sm:$0xff]   ;;  %v20795_v44 = vld [vmem:[%s27942_s2 + $0xa08] sm:$0xff]  }
 0x3e6   :  { %v17802_v16 = vrot.slane %v17794_v59, %v21460_v43  ;;  %19977 = vmatprep.subr.bf16.mxu0 %v20778_v55  ;;  %v10297_v31 = vrot.slane %v10080_v58, %v21460_v43  ;;  %v26751_v0 = vadd.f32 %v19787_v3, %v14364_v11  ;;  %19996 = vmatpush3.bf16.msra.mxu1 %v20773_v40  ;;  %v26780_v36 = vld.sshfl [vmem:[#allocation2 + $0x28] sm:$0x33 pattern:$0x75316420]  ;;  %v9484_v30 = vpop.permute.xlu0 %9483  ;;  %v20789_v27 = vld [vmem:[%s27942_s2 + $0x9b8] sm:$0xff]   ;;  %v20798_v41 = vld [vmem:[%s27942_s2 + $0xa50] sm:$0xff]  }
 0x3e7   :  { %v7744_v23 = vrot.slane %v7737_v50, %v21460_v43  ;;  %9182 = vst.msk [vmem:[#allocation2 + $0x36] sm:$0x1] %vm3663_vm15, %v9148_v1  ;;  %v17768_v29 = vpack.c.bf16 %v17752_v13, %v17752_v13  ;;  %19997 = vmatprep.subr.bf16.mxu1 %v20776_v47  ;;  %11518 = vst.msk [vmem:[#allocation2 + $0x37] sm:$0x1] %vm3663_vm15, %v11484_v22  ;;  %v15922_v28 = vcombine.high %v26780_v36, %v26780_v36  ;;  %v20793_v63 = vld [vmem:[%s27942_s2 + $0xa80] sm:$0xff]   ;;  %v20796_v6 = vld [vmem:[%s27942_s2 + $0xac8] sm:$0xff]  }
 0x3e8   :  { %v17809_v53 = vrot.slane %v17802_v16, %v21460_v43  ;;  %v10304_v35 = vrot.slane %v10297_v31, %v21460_v43  ;;  %4014 = vst.msk [vmem:[#allocation2 + $0x34] sm:$0x1] %vm4000_vm0, %v3979_v14  ;;  %6350 = vst.msk [vmem:[#allocation2 + $0x35] sm:$0x1] %vm4000_vm0, %v6316_v32  ;;  %v11820_v52 = vpop.permute.xlu1 %11819  ;;  %v15636_v25 = vcombine.high %v15628_v15, %v15628_v15  ;;  %v20799_v4 = vld [vmem:[%s27942_s2 + $0xa10] sm:$0xff]   ;;  %v20802_v19 = vld [vmem:[%s27942_s2 + $0xa58] sm:$0xff]  }
 0x3e9   :  { %7776 = vst.msk [vmem:[#allocation2 + $0x3e] sm:$0x1] %vm2253_vm11, %v7744_v23  ;;  %19978 = vmatpush3.bf16.msra.mxu0 %v20779_v34  ;;  %v15936_v26 = vrot.slane %v15922_v28, %v21460_v43  ;;  %v19807_v7 = vpop.f32.mrb[20].mxu0  ;;  %v20797_v2 = vld [vmem:[%s27942_s2 + $0xa88] sm:$0xff]   ;;  %v20800_v48 = vld [vmem:[%s27942_s2 + $0xad0] sm:$0xff]   ;;  %v20803_v18 = vld [vmem:[%s27942_s2 + $0xa18] sm:$0xff]  }
 0x3ea   :  { %17810 = vrot.lane.b32.xlu1 %v17809_v53, %s21104_s10  ;;  %17770 = vst.msk [vmem:[#allocation3] sm:$0x1] %vm17769_vm7, %v17768_v29  ;;  %19979 = vmatprep.subr.bf16.mxu0 %v20782_v21  ;;  %v19808_v8 = vpop.f32.mrb[21].mxu0  ;;  %v20806_v10 = vld [vmem:[%s27942_s2 + $0xa60] sm:$0xff]   ;;  %v20801_v40 = vld [vmem:[%s27942_s2 + $0xa90] sm:$0xff]   ;;  %v20804_v59 = vld [vmem:[%s27942_s2 + $0xad8] sm:$0xff]  }
 0x3eb   :  { %10336 = vst.msk [vmem:[#allocation2 + $0x3f] sm:$0x1] %vm2253_vm11, %v10304_v35  ;;  %19998 = vmatpush3.bf16.msra.mxu1 %v20777_v62  ;;  %v15938_v57 = vcombine.high %v15936_v26, %v15936_v26  ;;  %v26829_v33 = vadd.f32 %v19808_v8, %v19807_v7  ;;  %v19810_v37 = vpop.f32.mrb[22].mxu0  ;;  %v20807_v45 = vld [vmem:[%s27942_s2 + $0xa20] sm:$0xff]   ;;  %v20810_v3 = vld [vmem:[%s27942_s2 + $0xa68] sm:$0xff]   ;;  %v20805_v47 = vld [vmem:[%s27942_s2 + $0xa98] sm:$0xff]  }
 0x3ec   :  { %19999 = vmatprep.subr.bf16.mxu1 %v20780_v54  ;;  %9518 = vst.msk [vmem:[#allocation2 + $0x36] sm:$0x1] %vm4000_vm0, %v9484_v30  ;;  %11854 = vst.msk [vmem:[#allocation2 + $0x37] sm:$0x1] %vm4000_vm0, %v11820_v52  ;;  %v19811_v55 = vpop.f32.mrb[23].mxu0  ;;  %v20808_v50 = vld [vmem:[%s27942_s2 + $0xae0] sm:$0xff]  }
 0x3ed   :  { %19980 = vmatpush3.bf16.msra.mxu0 %v20783_v12  ;;  %v20811_v11 = vld [vmem:[%s27942_s2 + $0xa28] sm:$0xff]   ;;  %v20814_v34 = vld [vmem:[%s27942_s2 + $0xa70] sm:$0xff]   ;;  %v20809_v16 = vld [vmem:[%s27942_s2 + $0xaa0] sm:$0xff]   ;;  %v17738_v32 = vmul.f32 0.33, %v26562_v17  ;;  %vm17722_vm11 = vcmp.ge.f32.partialorder %v26562_v17, 0.0 }
 0x3ee   :  { %19981 = vmatprep.subr.bf16.mxu0 %v20786_v39  ;;  %v20812_v21 = vld [vmem:[%s27942_s2 + $0xae8] sm:$0xff]   ;;  %v20815_v1 = vld [vmem:[%s27942_s2 + $0xa30] sm:$0xff]   ;;  %v20818_v23 = vld [vmem:[%s27942_s2 + $0xa78] sm:$0xff]  }
 0x3ef   :  { %20000 = vmatpush3.bf16.msra.mxu1 %v20781_v46  ;;  %v20813_v31 = vld [vmem:[%s27942_s2 + $0xaa8] sm:$0xff]   ;;  %v20816_v62 = vld [vmem:[%s27942_s2 + $0xaf0] sm:$0xff]   ;;  %v20819_v54 = vld [vmem:[%s27942_s2 + $0xa38] sm:$0xff]  }
 0x3f0   :  { %20001 = vmatprep.subr.bf16.mxu1 %v20784_v24  ;;  %v26893_v53 = vld.sshfl [vmem:[#allocation2 + $0x2c] sm:$0x33 pattern:$0x75316420]  ;;  %v20822_v35 = vld [vmem:[%s27942_s2 + $0xb40] sm:$0xff]   ;;  %v20817_v12 = vld [vmem:[%s27942_s2 + $0xab0] sm:$0xff]   ;;  %v15929_v24 = vrot.slane %v26780_v36, %v21460_v43 }
 0x3f1   :  { %19982 = vmatpush3.bf16.msra.mxu0 %v20787_v20  ;;  %v16223_v22 = vcombine.high %v26893_v53, %v26893_v53  ;;  %v20820_v39 = vld [vmem:[%s27942_s2 + $0xaf8] sm:$0xff]   ;;  %v20823_v46 = vld [vmem:[%s27942_s2 + $0xb00] sm:$0xff]   ;;  %v20826_v20 = vld [vmem:[%s27942_s2 + $0xb48] sm:$0xff]  }
 0x3f2   :  { %20011 = vmatprep.subr.bf16.mxu0 %v20790_v9  ;;  %v20821_v9 = vld [vmem:[%s27942_s2 + $0xab8] sm:$0xff]   ;;  %v20824_v36 = vld [vmem:[%s27942_s2 + $0xbc0] sm:$0xff]   ;;  %v20829_v8 = vld [vmem:[%s27942_s2 + $0xb88] sm:$0xff]  }
 0x3f3   :  { %20002 = vmatpush3.bf16.msra.mxu1 %v20785_v60  ;;  %v16237_v30 = vrot.slane %v16223_v22, %v21460_v43  ;;  %v20825_v52 = vld [vmem:[%s27942_s2 + $0xb80] sm:$0xff]   ;;  %v20832_v37 = vld [vmem:[%s27942_s2 + $0xbd0] sm:$0xff]   ;;  %v20851_v22 = vld [vmem:[%s27942_s2 + $0xb38] sm:$0xff]  }
 0x3f4   :  { %20003 = vmatprep.subr.bf16.mxu1 %v20788_v51  ;;  %15867 = vmatmul.mubr.bf16.vlgmr.msra.gmra.mrb[36].mxu0 %v15628_v15  ;;  %v2571_v56 = vpop.permute.xlu0 %2570  ;;  %v20827_v51 = vld [vmem:[%s27942_s2 + $0xb08] sm:$0xff]   ;;  %v17754_v15 = vsel %vm17722_vm11, %v26562_v17, %v17738_v32  ;;  %v20834_v17 = vld [vmem:[%s27942_s2 + $0xb58] sm:$0xff]   ;;  %v26954_v7 = vld [vmem:[%s27946_s6] ss:$0 sm:$0xff] }
 0x3f5   :  { %20012 = vmatpush3.bf16.msra.mxu0 %v20791_v42  ;;  %16167 = vmatprep.mubr.bf16.mxu0 %v15936_v26  ;;  %2605 = vst.msk [vmem:[#allocation2 + $0x38] sm:$0x1] %vm2590_vm12, %v2571_v56  ;;  %v20830_v42 = vld [vmem:[%s27942_s2 + $0xb50] sm:$0xff]   ;;  %v20828_v26 = vld [vmem:[%s27942_s2 + $0xbc8] sm:$0xff]   ;;  %v20852_v32 = vld [vmem:[%s27942_s2 + $0xbf8] sm:$0xff]  }
 0x3f6   :  { %20013 = vmatprep.subr.bf16.mxu0 %v20794_v38  ;;  %v20833_v56 = vld [vmem:[%s27942_s2 + $0xb90] sm:$0xff]  }
 0x3f7   :  { %20004 = vmatpush3.bf16.msra.mxu1 %v20789_v27  ;;  %v5134_v5 = vpop.permute.xlu1 %5133  ;;  %v15937_v27 = vcombine.high %v15929_v24, %v15929_v24 }
 0x3f8   :  { %20033 = vmatprep.subr.bf16.mxu1 %v20792_v49  ;;  %5167 = vst.msk [vmem:[#allocation2 + $0x39] sm:$0x1] %vm2590_vm12, %v5134_v5  ;;  %v8078_v61 = vpop.permute.xlu0 %8077  ;;  %v17792_v49 = vpack.c.bf16 %v17754_v15, %v17754_v15  ;;  %v20839_v5 = vld [vmem:[%s27942_s2 + $0xb20] sm:$0xff]  }
 0x3f9   :  { %20014 = vmatpush3.bf16.msra.mxu0 %v20795_v44  ;;  %8111 = vst.msk [vmem:[#allocation2 + $0x3a] sm:$0x1] %vm2590_vm12, %v8078_v61  ;;  %v20857_v15 = vld [vmem:[%s27942_s2 + $0xc80] sm:$0xff]  }
 0x3fa   :  { %15907 = vmatmul.mubr.bf16.vlgmr.msra.gmra.mrb[36].mxu1 %v15636_v25  ;;  %20015 = vmatprep.subr.bf16.mxu0 %v20798_v41  ;;  %v16239_v41 = vcombine.high %v16237_v30, %v16237_v30  ;;  %v14665_v25 = vadd.f32 %v26954_v7, %v26829_v33  ;;  %17793 = vst.msk [vmem:[#allocation3 + $0x1] sm:$0x1] %vm17769_vm7, %v17792_v49  ;;  %v20835_v33 = vld [vmem:[%s27942_s2 + $0xb18] sm:$0xff]   ;;  %v20860_v49 = vld [vmem:[%s27942_s2 + $0xcc8] sm:$0xff]  }
 0x3fb   :  { %20034 = vmatpush3.bf16.msra.mxu1 %v20793_v63  ;;  %16207 = vmatprep.mubr.bf16.mxu1 %v15938_v57  ;;  %v10638_v58 = vpop.permute.xlu1 %10637  ;;  %v20831_v63 = vld [vmem:[%s27942_s2 + $0xb10] sm:$0xff]  }
 0x3fc   :  { %20035 = vmatprep.subr.bf16.mxu1 %v20796_v6  ;;  %10671 = vst.msk [vmem:[#allocation2 + $0x3b] sm:$0x1] %vm2590_vm12, %v10638_v58 }
 0x3fd   :  { %20016 = vmatpush3.bf16.msra.mxu0 %v20799_v4 }
 0x3fe   :  { %20017 = vmatprep.subr.bf16.mxu0 %v20802_v19 }
 0x3ff   :  { %20036 = vmatpush3.bf16.msra.mxu1 %v20797_v2  ;;  %v3644_v13 = vpop.permute.xlu0 %3643 }
 0x400   :  { %20037 = vmatprep.subr.bf16.mxu1 %v20800_v48  ;;  %3678 = vst.msk [vmem:[#allocation2 + $0x38] sm:$0x1] %vm3663_vm15, %v3644_v13  ;;  %v20838_v48 = vld [vmem:[%s27942_s2 + $0xb60] sm:$0xff]   ;;  %v20846_v13 = vld [vmem:[%s27942_s2 + $0xb70] sm:$0xff]  }
 0x401   :  { %20018 = vmatpush3.bf16.msra.mxu0 %v20803_v18 }
 0x402   :  { %20019 = vmatprep.subr.bf16.mxu0 %v20806_v10 }
 0x403   :  { %20038 = vmatpush3.bf16.msra.mxu1 %v20801_v40  ;;  %v20836_v40 = vld [vmem:[%s27942_s2 + $0xbd8] sm:$0xff]  }
 0x404   :  { %20039 = vmatprep.subr.bf16.mxu1 %v20804_v59  ;;  %v5982_v29 = vpop.permute.xlu1 %5981 }
 0x405   :  { %20020 = vmatpush3.bf16.msra.mxu0 %v20807_v45  ;;  %6015 = vst.msk [vmem:[#allocation2 + $0x39] sm:$0x1] %vm3663_vm15, %v5982_v29  ;;  %v20842_v45 = vld [vmem:[%s27942_s2 + $0xb68] sm:$0xff]   ;;  %v20850_v29 = vld [vmem:[%s27942_s2 + $0xb78] sm:$0xff]  }
 0x406   :  { %20021 = vmatprep.subr.bf16.mxu0 %v20810_v3  ;;  %v20837_v3 = vld [vmem:[%s27942_s2 + $0xb98] sm:$0xff]  }
 0x407   :  { %20040 = vmatpush3.bf16.msra.mxu1 %v20805_v47 }
 0x408   :  { %20041 = vmatprep.subr.bf16.mxu1 %v20808_v50 }
 0x409   :  { %20022 = vmatpush3.bf16.msra.mxu0 %v20811_v11  ;;  %v9150_v14 = vpop.permute.xlu0 %9149  ;;  %v20840_v11 = vld [vmem:[%s27942_s2 + $0xbe0] sm:$0xff]  }
 0x40a   :  { %20023 = vmatprep.subr.bf16.mxu0 %v20814_v34  ;;  %9183 = vst.msk [vmem:[#allocation2 + $0x3a] sm:$0x1] %vm3663_vm15, %v9150_v14  ;;  %v20843_v34 = vld [vmem:[%s27942_s2 + $0xb28] sm:$0xff]   ;;  %v20854_v14 = vld [vmem:[%s27942_s2 + $0xc40] sm:$0xff]  }
 0x40b   :  { %20042 = vmatpush3.bf16.msra.mxu1 %v20809_v16 }
 0x40c   :  { %20043 = vmatprep.subr.bf16.mxu1 %v20812_v21  ;;  %v11486_v60 = vpop.permute.xlu1 %11485  ;;  %v20841_v21 = vld [vmem:[%s27942_s2 + $0xba0] sm:$0xff]  }
 0x40d   :  { %20024 = vmatpush3.bf16.msra.mxu0 %v20815_v1  ;;  %11519 = vst.msk [vmem:[#allocation2 + $0x3b] sm:$0x1] %vm3663_vm15, %v11486_v60  ;;  %v3981_v28 = vpop.permute.xlu0 %3980  ;;  %v19829_v6 = vpop.f32.mrb[20].mxu1  ;;  %v20858_v60 = vld [vmem:[%s27942_s2 + $0xc48] sm:$0xff]  }
 0x40e   :  { %20025 = vmatprep.subr.bf16.mxu0 %v20818_v23  ;;  %4015 = vst.msk [vmem:[#allocation2 + $0x38] sm:$0x1] %vm4000_vm0, %v3981_v28  ;;  %v19830_v57 = vpop.f32.mrb[21].mxu1  ;;  %v20844_v23 = vld [vmem:[%s27942_s2 + $0xbe8] sm:$0xff]  }
 0x40f   :  { %20044 = vmatpush3.bf16.msra.mxu1 %v20813_v31  ;;  %v19831_v19 = vadd.f32 %v19830_v57, %v19829_v6  ;;  %v19832_v55 = vpop.f32.mrb[22].mxu1  ;;  %v20847_v31 = vld [vmem:[%s27942_s2 + $0xb30] sm:$0xff]   ;;  %v20867_v57 = vld [vmem:[%s27942_s2 + $0xc18] sm:$0xff]  }
 0x410   :  { %20045 = vmatprep.subr.bf16.mxu1 %v20816_v62  ;;  %v19833_v2 = vpop.f32.mrb[23].mxu1  ;;  %v20868_v55 = vld [vmem:[%s27942_s2 + $0xcd8] sm:$0xff]  }
 0x411   :  { %20026 = vmatpush3.bf16.msra.mxu0 %v20819_v54  ;;  %v6318_v38 = vpop.permute.xlu1 %6317  ;;  %v14705_v18 = vadd.f32 %v19831_v19, %v14665_v25  ;;  %v20845_v54 = vld [vmem:[%s27942_s2 + $0xba8] sm:$0xff]  }
 0x412   :  { %20055 = vmatprep.subr.bf16.mxu0 %v20822_v35  ;;  %6351 = vst.msk [vmem:[#allocation2 + $0x39] sm:$0x1] %vm4000_vm0, %v6318_v38  ;;  %v9486_v44 = vpop.permute.xlu0 %9485  ;;  %v20848_v35 = vld [vmem:[%s27942_s2 + $0xbf0] sm:$0xff]   ;;  %v20874_v2 = vld [vmem:[%s27942_s2 + $0xc68] sm:$0xff]  }
 0x413   :  { %20046 = vmatpush3.bf16.msra.mxu1 %v20817_v12  ;;  %9519 = vst.msk [vmem:[#allocation2 + $0x3a] sm:$0x1] %vm4000_vm0, %v9486_v44  ;;  %vm17725_vm10 = vcmp.ge.f32.partialorder %v14705_v18, 0.0  ;;  %v17741_v59 = vmul.f32 0.33, %v14705_v18 }
 0x414   :  { %20047 = vmatprep.subr.bf16.mxu1 %v20820_v39  ;;  %16168 = vmatmul.mubr.bf16.vlgmr.msra.gmra.mrb[40].mxu0 %v15929_v24  ;;  %v27021_v12 = vld.sshfl [vmem:[#allocation2 + $0x30] sm:$0x33 pattern:$0x75316420] }
 0x415   :  { %20056 = vmatpush3.bf16.msra.mxu0 %v20823_v46  ;;  %16468 = vmatprep.mubr.bf16.mxu0 %v16237_v30  ;;  %v11822_v4 = vpop.permute.xlu1 %11821  ;;  %v17757_v61 = vsel %vm17725_vm10, %v14705_v18, %v17741_v59  ;;  %v20849_v46 = vld [vmem:[%s27942_s2 + $0xbb0] sm:$0xff]   ;;  %v16524_v24 = vcombine.high %v27021_v12, %v27021_v12  ;;  %v16230_v30 = vrot.slane %v26893_v53, %v21460_v43  ;;  %v20859_v53 = vld [vmem:[%s27942_s2 + $0xc08] sm:$0xff]   ;;  %v20872_v18 = vld [vmem:[%s27942_s2 + $0xce0] sm:$0xff]  }
 0x416   :  { %20057 = vmatprep.subr.bf16.mxu0 %v20826_v20  ;;  %11855 = vst.msk [vmem:[#allocation2 + $0x3b] sm:$0x1] %vm4000_vm0, %v11822_v4  ;;  %v17816_v47 = vpack.c.bf16 %v17757_v61, %v17757_v61  ;;  %v20870_v4 = vld [vmem:[%s27942_s2 + $0xc60] sm:$0xff]   ;;  %v20882_v61 = vld [vmem:[%s27942_s2 + $0xc78] sm:$0xff]  }
 0x417   :  { %20048 = vmatpush3.bf16.msra.mxu1 %v20821_v9  ;;  %v20855_v9 = vld [vmem:[%s27942_s2 + $0xc00] sm:$0xff]   ;;  %v16538_v28 = vrot.slane %v16524_v24, %v21460_v43  ;;  %v16531_v24 = vrot.slane %v27021_v12, %v21460_v43 }
 0x418   :  { %20077 = vmatprep.subr.bf16.mxu1 %v20824_v36  ;;  %v17824_v16 = vrot.slane %v17816_v47, %v21460_v43  ;;  %v20853_v36 = vld [vmem:[%s27942_s2 + $0xbb8] sm:$0xff]   ;;  %v20873_v59 = vld [vmem:[%s27942_s2 + $0xca0] sm:$0xff]   ;;  %v20880_v47 = vld [vmem:[%s27942_s2 + $0xcf0] sm:$0xff]  }
 0x419   :  { %20058 = vmatpush3.bf16.msra.mxu0 %v20827_v51  ;;  %v2573_v10 = vpop.permute.xlu0 %2572  ;;  %v16540_v44 = vcombine.high %v16538_v28, %v16538_v28  ;;  %v20888_v12 = vld [vmem:[%s27942_s2 + $0xdc0] sm:$0xff]  }
 0x41a   :  { %16208 = vmatmul.mubr.bf16.vlgmr.msra.gmra.mrb[40].mxu1 %v15937_v27  ;;  %20059 = vmatprep.subr.bf16.mxu0 %v20830_v42  ;;  %2606 = vst.msk [vmem:[#allocation2 + $0x3c] sm:$0x1] %vm2590_vm12, %v2573_v10  ;;  %v17831_v1 = vrot.slane %v17824_v16, %v21460_v43  ;;  %v20856_v42 = vld [vmem:[%s27942_s2 + $0xcc0] sm:$0xff]  }
 0x41b   :  { %20078 = vmatpush3.bf16.msra.mxu1 %v20825_v52  ;;  %16508 = vmatprep.mubr.bf16.mxu1 %v16239_v41  ;;  %v20862_v52 = vld [vmem:[%s27942_s2 + $0xc50] sm:$0xff]   ;;  %v20886_v16 = vld [vmem:[%s27942_s2 + $0xd40] sm:$0xff]  }
 0x41c   :  { %20079 = vmatprep.subr.bf16.mxu1 %v20828_v26  ;;  %17832 = vrot.lane.b32.xlu0 %v17831_v1, %s21104_s10  ;;  %v16238_v26 = vcombine.high %v16230_v30, %v16230_v30  ;;  %v20863_v41 = vld [vmem:[%s27942_s2 + $0xc10] sm:$0xff]  }
 0x41d   :  { %20060 = vmatpush3.bf16.msra.mxu0 %v20831_v63  ;;  %v5136_v50 = vpop.permute.xlu1 %5135  ;;  %v8080_v58 = vpop.permute.xlu0 %8079  ;;  %v20866_v63 = vld [vmem:[%s27942_s2 + $0xc58] sm:$0xff]  }
 0x41e   :  { %20061 = vmatprep.subr.bf16.mxu0 %v20834_v17  ;;  %5168 = vst.msk [vmem:[#allocation2 + $0x3d] sm:$0x1] %vm2590_vm12, %v5136_v50  ;;  %8112 = vst.msk [vmem:[#allocation2 + $0x3e] sm:$0x1] %vm2590_vm12, %v8080_v58  ;;  %v20861_v17 = vld [vmem:[%s27942_s2 + $0xc88] sm:$0xff]  }
 0x41f   :  { %20080 = vmatpush3.bf16.msra.mxu1 %v20829_v8  ;;  %v20864_v8 = vld [vmem:[%s27942_s2 + $0xcd0] sm:$0xff]  }
 0x420   :  { %20081 = vmatprep.subr.bf16.mxu1 %v20832_v37  ;;  %v20865_v37 = vld [vmem:[%s27942_s2 + $0xc90] sm:$0xff]  }
 0x421   :  { %20062 = vmatpush3.bf16.msra.mxu0 %v20835_v33  ;;  %v20871_v33 = vld [vmem:[%s27942_s2 + $0xc20] sm:$0xff]   ;;  %v27133_v50 = vld.sshfl [vmem:[#allocation2 + $0x34] sm:$0x33 pattern:$0x75316420] }
 0x422   :  { %20063 = vmatprep.subr.bf16.mxu0 %v20838_v48  ;;  %v20869_v48 = vld [vmem:[%s27942_s2 + $0xc98] sm:$0xff]  }
 0x423   :  { %20082 = vmatpush3.bf16.msra.mxu1 %v20833_v56  ;;  %v20875_v56 = vld [vmem:[%s27942_s2 + $0xc28] sm:$0xff]  }
 0x424   :  { %20083 = vmatprep.subr.bf16.mxu1 %v20836_v40  ;;  %v10640_v62 = vpop.permute.xlu1 %10639  ;;  %v20878_v40 = vld [vmem:[%s27942_s2 + $0xc70] sm:$0xff]  }
 0x425   :  { %20064 = vmatpush3.bf16.msra.mxu0 %v20839_v5  ;;  %10672 = vst.msk [vmem:[#allocation2 + $0x3f] sm:$0x1] %vm2590_vm12, %v10640_v62  ;;  %vm17790_vm12 = vcmask 1040896   ;;  %v20876_v5 = vld [vmem:[%s27942_s2 + $0xce8] sm:$0xff]  }
 0x426   :  { %20065 = vmatprep.subr.bf16.mxu0 %v20842_v45  ;;  %v20879_v45 = vld [vmem:[%s27942_s2 + $0xc30] sm:$0xff]  }
 0x427   :  { %20084 = vmatpush3.bf16.msra.mxu1 %v20837_v3  ;;  %v20877_v3 = vld [vmem:[%s27942_s2 + $0xca8] sm:$0xff]  }
 0x428   :  { %20085 = vmatprep.subr.bf16.mxu1 %v20840_v11  ;;  %v20883_v11 = vld [vmem:[%s27942_s2 + $0xc38] sm:$0xff]  }
 0x429   :  { %20066 = vmatpush3.bf16.msra.mxu0 %v20843_v34  ;;  %v3646_v39 = vpop.permute.xlu0 %3645 }
 0x42a   :  { %20067 = vmatprep.subr.bf16.mxu0 %v20846_v13  ;;  %3679 = vst.msk [vmem:[#allocation2 + $0x3c] sm:$0x1] %vm3663_vm15, %v3646_v39 }
 0x42b   :  { %20086 = vmatpush3.bf16.msra.mxu1 %v20841_v21  ;;  %v5984_v20 = vpop.permute.xlu1 %5983 }
 0x42c   :  { %20087 = vmatprep.subr.bf16.mxu1 %v20844_v23  ;;  %6016 = vst.msk [vmem:[#allocation2 + $0x3d] sm:$0x1] %vm3663_vm15, %v5984_v20  ;;  %v20881_v23 = vld [vmem:[%s27942_s2 + $0xcb0] sm:$0xff]   ;;  %v20890_v20 = vld [vmem:[%s27942_s2 + $0xd48] sm:$0xff]  }
 0x42d   :  { %20068 = vmatpush3.bf16.msra.mxu0 %v20847_v31  ;;  %v16825_v31 = vcombine.high %v27133_v50, %v27133_v50 }
 0x42e   :  { %20069 = vmatprep.subr.bf16.mxu0 %v20850_v29 }
 0x42f   :  { %20088 = vmatpush3.bf16.msra.mxu1 %v20845_v54  ;;  %v20884_v54 = vld [vmem:[%s27942_s2 + $0xcf8] sm:$0xff]  }
 0x430   :  { %20089 = vmatprep.subr.bf16.mxu1 %v20848_v35  ;;  %v9152_v51 = vpop.permute.xlu0 %9151 }
 0x431   :  { %20070 = vmatpush3.bf16.msra.mxu0 %v20851_v22  ;;  %9184 = vst.msk [vmem:[#allocation2 + $0x3e] sm:$0x1] %vm3663_vm15, %v9152_v51  ;;  %v20889_v51 = vld [vmem:[%s27942_s2 + $0xd80] sm:$0xff]  }
 0x432   :  { %20099 = vmatprep.subr.bf16.mxu0 %v20854_v14  ;;  %v20887_v14 = vld [vmem:[%s27942_s2 + $0xd00] sm:$0xff]  }
 0x433   :  { %20090 = vmatpush3.bf16.msra.mxu1 %v20849_v46  ;;  %v11488_v38 = vpop.permute.xlu1 %11487 }
 0x434   :  { %20091 = vmatprep.subr.bf16.mxu1 %v20852_v32  ;;  %16469 = vmatmul.mubr.bf16.vlgmr.msra.gmra.mrb[44].mxu0 %v16230_v30  ;;  %v3983_v27 = vpop.permute.xlu0 %3982  ;;  %11520 = vst.msk [vmem:[#allocation2 + $0x3f] sm:$0x1] %vm3663_vm15, %v11488_v38  ;;  %v16839_v30 = vrot.slane %v16825_v31, %v21460_v43  ;;  %vm17724_vm15 = vcmp.ge.f32.partialorder %v26751_v0, 0.0  ;;  %v20895_v38 = vld [vmem:[%s27942_s2 + $0xd10] sm:$0xff]  }
 0x435   :  { %20100 = vmatpush3.bf16.msra.mxu0 %v20855_v9  ;;  %16769 = vmatprep.mubr.bf16.mxu0 %v16538_v28  ;;  %4016 = vst.msk [vmem:[#allocation2 + $0x3c] sm:$0x1] %vm4000_vm0, %v3983_v27  ;;  %v20885_v9 = vld [vmem:[%s27942_s2 + $0xcb8] sm:$0xff]   ;;  %v20894_v28 = vld [vmem:[%s27942_s2 + $0xd50] sm:$0xff]  }
 0x436   :  { %20101 = vmatprep.subr.bf16.mxu0 %v20858_v60  ;;  %v17740_v60 = vmul.f32 0.33, %v26751_v0 }
 0x437   :  { %20092 = vmatpush3.bf16.msra.mxu1 %v20853_v36  ;;  %v6320_v25 = vpop.permute.xlu1 %6319  ;;  %v20891_v36 = vld [vmem:[%s27942_s2 + $0xd08] sm:$0xff]  }
 0x438   :  { %20121 = vmatprep.subr.bf16.mxu1 %v20856_v42  ;;  %v9488_v6 = vpop.permute.xlu0 %9487  ;;  %6352 = vst.msk [vmem:[#allocation2 + $0x3d] sm:$0x1] %vm4000_vm0, %v6320_v25  ;;  %v16539_v42 = vcombine.high %v16531_v24, %v16531_v24  ;;  %v20900_v25 = vld [vmem:[%s27942_s2 + $0xdd8] sm:$0xff]  }
 0x439   :  { %20102 = vmatpush3.bf16.msra.mxu0 %v20859_v53  ;;  %9520 = vst.msk [vmem:[#allocation2 + $0x3e] sm:$0x1] %vm4000_vm0, %v9488_v6  ;;  %v20892_v53 = vld [vmem:[%s27942_s2 + $0xdc8] sm:$0xff]   ;;  %v20903_v6 = vld [vmem:[%s27942_s2 + $0xd20] sm:$0xff]  }
 0x43a   :  { %16509 = vmatmul.mubr.bf16.vlgmr.msra.gmra.mrb[44].mxu1 %v16238_v26  ;;  %20103 = vmatprep.subr.bf16.mxu0 %v20862_v52  ;;  %v17756_v52 = vsel %vm17724_vm15, %v26751_v0, %v17740_v60  ;;  %v20898_v26 = vld [vmem:[%s27942_s2 + $0xd58] sm:$0xff]   ;;  %v20939_v60 = vld [vmem:[%s27942_s2 + $0xe28] sm:$0xff]  }
 0x43b   :  { %20122 = vmatpush3.bf16.msra.mxu1 %v20857_v15  ;;  %16809 = vmatprep.mubr.bf16.mxu1 %v16540_v44  ;;  %v11824_v19 = vpop.permute.xlu1 %11823  ;;  %v16841_v15 = vcombine.high %v16839_v30, %v16839_v30  ;;  %v17814_v27 = vpack.c.bf16 %v17756_v52, %v17756_v52  ;;  %v20896_v44 = vld [vmem:[%s27942_s2 + $0xdd0] sm:$0xff]  }
 0x43c   :  { %20123 = vmatprep.subr.bf16.mxu1 %v20860_v49  ;;  %11856 = vst.msk [vmem:[#allocation2 + $0x3f] sm:$0x1] %vm4000_vm0, %v11824_v19  ;;  %v20893_v49 = vld [vmem:[%s27942_s2 + $0xd88] sm:$0xff]   ;;  %v20910_v19 = vld [vmem:[%s27942_s2 + $0xd70] sm:$0xff]  }
 0x43d   :  { %20104 = vmatpush3.bf16.msra.mxu0 %v20863_v41  ;;  %17815 = vst.msk [vmem:[#allocation3 + $0x2] sm:$0x1] %vm17769_vm7, %v17814_v27  ;;  %v20899_v41 = vld [vmem:[%s27942_s2 + $0xd18] sm:$0xff]  }
 0x43e   :  { %20105 = vmatprep.subr.bf16.mxu0 %v20866_v63  ;;  %v20902_v63 = vld [vmem:[%s27942_s2 + $0xd60] sm:$0xff]   ;;  %v20946_v27 = vld [vmem:[%s27942_s2 + $0xe78] sm:$0xff]  }
 0x43f   :  { %20124 = vmatpush3.bf16.msra.mxu1 %v20861_v17  ;;  %v20897_v17 = vld [vmem:[%s27942_s2 + $0xd90] sm:$0xff]  }
 0x440   :  { %20125 = vmatprep.subr.bf16.mxu1 %v20864_v8  ;;  %v20906_v8 = vld [vmem:[%s27942_s2 + $0xd68] sm:$0xff]  }
 0x441   :  { %20106 = vmatpush3.bf16.msra.mxu0 %v20867_v57  ;;  %v20901_v57 = vld [vmem:[%s27942_s2 + $0xd98] sm:$0xff]  }
 0x442   :  { %20107 = vmatprep.subr.bf16.mxu0 %v20870_v4  ;;  %v17788_v10 = vpop.permute.xlu0 %17787  ;;  %v19851_v58 = vpop.f32.mrb[24].mxu0  ;;  %v20904_v4 = vld [vmem:[%s27942_s2 + $0xde0] sm:$0xff]  }
 0x443   :  { %20126 = vmatpush3.bf16.msra.mxu1 %v20865_v37  ;;  %17791 = vst.msk [vmem:[#allocation3] sm:$0x1] %vm17790_vm12, %v17788_v10  ;;  %v19852_v34 = vpop.f32.mrb[25].mxu0  ;;  %v20907_v37 = vld [vmem:[%s27942_s2 + $0xd28] sm:$0xff]  }
 0x444   :  { %20127 = vmatprep.subr.bf16.mxu1 %v20868_v55  ;;  %v19853_v13 = vadd.f32 %v19852_v34, %v19851_v58  ;;  %v19854_v21 = vpop.f32.mrb[26].mxu0  ;;  %v19873_v1 = vpop.f32.mrb[24].mxu1  ;;  %v20905_v55 = vld [vmem:[%s27942_s2 + $0xda0] sm:$0xff]   ;;  %v20922_v58 = vld [vmem:[%s27942_s2 + $0xe48] sm:$0xff]  }
 0x445   :  { %20108 = vmatpush3.bf16.msra.mxu0 %v20871_v33  ;;  %v19855_v62 = vpop.f32.mrb[27].mxu0  ;;  %v19874_v29 = vpop.f32.mrb[25].mxu1  ;;  %v20908_v33 = vld [vmem:[%s27942_s2 + $0xde8] sm:$0xff]   ;;  %v20921_v21 = vld [vmem:[%s27942_s2 + $0xe80] sm:$0xff]  }
 0x446   :  { %20109 = vmatprep.subr.bf16.mxu0 %v20874_v2  ;;  %v14966_v35 = vadd.f32 %v26954_v7, %v19853_v13  ;;  %v19875_v22 = vadd.f32 %v19874_v29, %v19873_v1  ;;  %v19876_v39 = vpop.f32.mrb[26].mxu1  ;;  %v20911_v2 = vld [vmem:[%s27942_s2 + $0xd30] sm:$0xff]   ;;  %v27244_v10 = vld.sshfl [vmem:[#allocation2 + $0x38] sm:$0x33 pattern:$0x75316420] }
 0x447   :  { %20128 = vmatpush3.bf16.msra.mxu1 %v20869_v48  ;;  %v19877_v46 = vpop.f32.mrb[27].mxu1  ;;  %v20914_v48 = vld [vmem:[%s27942_s2 + $0xd78] sm:$0xff]   ;;  %v20926_v13 = vld [vmem:[%s27942_s2 + $0xe50] sm:$0xff]   ;;  %v20934_v39 = vld [vmem:[%s27942_s2 + $0xe60] sm:$0xff]  }
 0x448   :  { %20129 = vmatprep.subr.bf16.mxu1 %v20872_v18  ;;  %v27158_v32 = vadd.f32 %v19875_v22, %v14966_v35  ;;  %v20909_v18 = vld [vmem:[%s27942_s2 + $0xda8] sm:$0xff]   ;;  %v20927_v62 = vld [vmem:[%s27942_s2 + $0xe10] sm:$0xff]   ;;  %v20930_v29 = vld [vmem:[%s27942_s2 + $0xe58] sm:$0xff]  }
 0x449   :  { %20110 = vmatpush3.bf16.msra.mxu0 %v20875_v56  ;;  %v20912_v56 = vld [vmem:[%s27942_s2 + $0xdf0] sm:$0xff]   ;;  %v20931_v22 = vld [vmem:[%s27942_s2 + $0xe18] sm:$0xff]  }
 0x44a   :  { %20111 = vmatprep.subr.bf16.mxu0 %v20878_v40  ;;  %v20915_v40 = vld [vmem:[%s27942_s2 + $0xd38] sm:$0xff]   ;;  %v20928_v35 = vld [vmem:[%s27942_s2 + $0xed0] sm:$0xff]   ;;  %vm17726_vm13 = vcmp.ge.f32.partialorder %v27158_v32, 0.0 }
 0x44b   :  { %20130 = vmatpush3.bf16.msra.mxu1 %v20873_v59  ;;  %v20918_v59 = vld [vmem:[%s27942_s2 + $0xe40] sm:$0xff]   ;;  %v20932_v46 = vld [vmem:[%s27942_s2 + $0xed8] sm:$0xff]  }
 0x44c   :  { %20131 = vmatprep.subr.bf16.mxu1 %v20876_v5  ;;  %v20913_v5 = vld [vmem:[%s27942_s2 + $0xdb0] sm:$0xff]  }
 0x44d   :  { %20112 = vmatpush3.bf16.msra.mxu0 %v20879_v45  ;;  %v17126_v45 = vcombine.high %v27244_v10, %v27244_v10 }
 0x44e   :  { %20113 = vmatprep.subr.bf16.mxu0 %v20882_v61  ;;  %v20916_v61 = vld [vmem:[%s27942_s2 + $0xdf8] sm:$0xff]  }
 0x44f   :  { %20132 = vmatpush3.bf16.msra.mxu1 %v20877_v3  ;;  %v20919_v3 = vld [vmem:[%s27942_s2 + $0xe00] sm:$0xff]   ;;  %v17140_v34 = vrot.slane %v17126_v45, %v21460_v43 }
 0x450   :  { %20133 = vmatprep.subr.bf16.mxu1 %v20880_v47  ;;  %v16832_v47 = vrot.slane %v27133_v50, %v21460_v43  ;;  %v20923_v50 = vld [vmem:[%s27942_s2 + $0xe08] sm:$0xff]  }
 0x451   :  { %20114 = vmatpush3.bf16.msra.mxu0 %v20883_v11  ;;  %v20917_v11 = vld [vmem:[%s27942_s2 + $0xdb8] sm:$0xff]   ;;  %v17142_v31 = vcombine.high %v17140_v34, %v17140_v34 }
 0x452   :  { %20143 = vmatprep.subr.bf16.mxu0 %v20886_v16  ;;  %v20920_v16 = vld [vmem:[%s27942_s2 + $0xec0] sm:$0xff]   ;;  %v16840_v1 = vcombine.high %v16832_v47, %v16832_v47 }
 0x453   :  { %20134 = vmatpush3.bf16.msra.mxu1 %v20881_v23  ;;  %v20924_v23 = vld [vmem:[%s27942_s2 + $0xec8] sm:$0xff]  }
 0x454   :  { %20135 = vmatprep.subr.bf16.mxu1 %v20884_v54  ;;  %16770 = vmatmul.mubr.bf16.vlgmr.msra.gmra.mrb[48].mxu0 %v16531_v24  ;;  %v20925_v54 = vld [vmem:[%s27942_s2 + $0xe88] sm:$0xff]   ;;  %v20935_v24 = vld [vmem:[%s27942_s2 + $0xe20] sm:$0xff]  }
 0x455   :  { %20144 = vmatpush3.bf16.msra.mxu0 %v20887_v14  ;;  %17070 = vmatprep.mubr.bf16.mxu0 %v16839_v30  ;;  %v20929_v14 = vld [vmem:[%s27942_s2 + $0xe90] sm:$0xff]   ;;  %v20936_v30 = vld [vmem:[%s27942_s2 + $0xee0] sm:$0xff]  }
 0x456   :  { %20145 = vmatprep.subr.bf16.mxu0 %v20890_v20  ;;  %v20938_v20 = vld [vmem:[%s27942_s2 + $0xe68] sm:$0xff]  }
 0x457   :  { %20136 = vmatpush3.bf16.msra.mxu1 %v20885_v9  ;;  %v20933_v9 = vld [vmem:[%s27942_s2 + $0xe98] sm:$0xff]  }
 0x458   :  { %20165 = vmatprep.subr.bf16.mxu1 %v20888_v12  ;;  %v20942_v12 = vld [vmem:[%s27942_s2 + $0xe70] sm:$0xff]  }
 0x459   :  { %20146 = vmatpush3.bf16.msra.mxu0 %v20891_v36 }
 0x45a   :  { %16810 = vmatmul.mubr.bf16.vlgmr.msra.gmra.mrb[48].mxu1 %v16539_v42  ;;  %20147 = vmatprep.subr.bf16.mxu0 %v20894_v28  ;;  %v20937_v28 = vld [vmem:[%s27942_s2 + $0xea0] sm:$0xff]   ;;  %v20940_v42 = vld [vmem:[%s27942_s2 + $0xee8] sm:$0xff]  }
 0x45b   :  { %20166 = vmatpush3.bf16.msra.mxu1 %v20889_v51  ;;  %17110 = vmatprep.mubr.bf16.mxu1 %v16841_v15  ;;  %v20943_v15 = vld [vmem:[%s27942_s2 + $0xe30] sm:$0xff]  }
 0x45c   :  { %v17811_v0 = vpop.permute.xlu1 %17810  ;;  %20167 = vmatprep.subr.bf16.mxu1 %v20892_v53 }
 0x45d   :  { %17813 = vst.msk [vmem:[#allocation3 + $0x1] sm:$0x1] %vm17790_vm12, %v17811_v0  ;;  %20148 = vmatpush3.bf16.msra.mxu0 %v20895_v38 }
 0x45e   :  { %20149 = vmatprep.subr.bf16.mxu0 %v20898_v26  ;;  %v20941_v26 = vld [vmem:[%s27942_s2 + $0xea8] sm:$0xff]  }
 0x45f   :  { %20168 = vmatpush3.bf16.msra.mxu1 %v20893_v49 }
 0x460   :  { %20169 = vmatprep.subr.bf16.mxu1 %v20896_v44  ;;  %v20944_v44 = vld [vmem:[%s27942_s2 + $0xef0] sm:$0xff]  }
 0x461   :  { %20150 = vmatpush3.bf16.msra.mxu0 %v20899_v41  ;;  %v27348_v41 = vld.sshfl [vmem:[#allocation2 + $0x3c] sm:$0x33 pattern:$0x75316420] }
 0x462   :  { %20151 = vmatprep.subr.bf16.mxu0 %v20902_v63 }
 0x463   :  { %20170 = vmatpush3.bf16.msra.mxu1 %v20897_v17  ;;  %v20947_v17 = vld [vmem:[%s27942_s2 + $0xe38] sm:$0xff]  }
 0x464   :  { %20171 = vmatprep.subr.bf16.mxu1 %v20900_v25 }
 0x465   :  { %20152 = vmatpush3.bf16.msra.mxu0 %v20903_v6 }
 0x466   :  { %20153 = vmatprep.subr.bf16.mxu0 %v20906_v8  ;;  %v20950_v8 = vld [vmem:[%s27942_s2 + $0xf40] sm:$0xff]  }
 0x467   :  { %20172 = vmatpush3.bf16.msra.mxu1 %v20901_v57 }
 0x468   :  { %20173 = vmatprep.subr.bf16.mxu1 %v20904_v4  ;;  %v20945_v4 = vld [vmem:[%s27942_s2 + $0xeb0] sm:$0xff]  }
 0x469   :  { %20154 = vmatpush3.bf16.msra.mxu0 %v20907_v37  ;;  %v17427_v37 = vcombine.high %v27348_v41, %v27348_v41 }
 0x46a   :  { %20155 = vmatprep.subr.bf16.mxu0 %v20910_v19 }
 0x46b   :  { %20174 = vmatpush3.bf16.msra.mxu1 %v20905_v55  ;;  %v20948_v55 = vld [vmem:[%s27942_s2 + $0xef8] sm:$0xff]  }
 0x46c   :  { %20175 = vmatprep.subr.bf16.mxu1 %v20908_v33  ;;  %v20951_v33 = vld [vmem:[%s27942_s2 + $0xf00] sm:$0xff]  }
 0x46d   :  { %20156 = vmatpush3.bf16.msra.mxu0 %v20911_v2 }
 0x46e   :  { %20157 = vmatprep.subr.bf16.mxu0 %v20914_v48  ;;  %v17133_v48 = vrot.slane %v27244_v10, %v21460_v43  ;;  %v20952_v10 = vld [vmem:[%s27942_s2 + $0xfc0] sm:$0xff]  }
 0x46f   :  { %20176 = vmatpush3.bf16.msra.mxu1 %v20909_v18  ;;  %v20954_v18 = vld [vmem:[%s27942_s2 + $0xf48] sm:$0xff]  }
 0x470   :  { %20177 = vmatprep.subr.bf16.mxu1 %v20912_v56  ;;  %v20949_v56 = vld [vmem:[%s27942_s2 + $0xeb8] sm:$0xff]  }
 0x471   :  { %20158 = vmatpush3.bf16.msra.mxu0 %v20915_v40  ;;  %v17441_v40 = vrot.slane %v17427_v37, %v21460_v43 }
 0x472   :  { %20187 = vmatprep.subr.bf16.mxu0 %v20918_v59  ;;  %v17742_v59 = vmul.f32 0.33, %v27158_v32 }
 0x473   :  { %20178 = vmatpush3.bf16.msra.mxu1 %v20913_v5 }
 0x474   :  { %20179 = vmatprep.subr.bf16.mxu1 %v20916_v61  ;;  %17071 = vmatmul.mubr.bf16.vlgmr.msra.gmra.mrb[52].mxu0 %v16832_v47  ;;  %v20955_v61 = vld [vmem:[%s27942_s2 + $0xf08] sm:$0xff]  }
 0x475   :  { %20188 = vmatpush3.bf16.msra.mxu0 %v20919_v3  ;;  %17371 = vmatprep.mubr.bf16.mxu0 %v17140_v34  ;;  %v20958_v3 = vld [vmem:[%s27942_s2 + $0xf50] sm:$0xff]   ;;  %v20956_v34 = vld [vmem:[%s27942_s2 + $0xfc8] sm:$0xff]  }
 0x476   :  { %20189 = vmatprep.subr.bf16.mxu0 %v20922_v58  ;;  %v20953_v58 = vld [vmem:[%s27942_s2 + $0xf80] sm:$0xff]  }
 0x477   :  { %20180 = vmatpush3.bf16.msra.mxu1 %v20917_v11  ;;  %v17141_v11 = vcombine.high %v17133_v48, %v17133_v48 }
 0x478   :  { %20209 = vmatprep.subr.bf16.mxu1 %v20920_v16  ;;  %v17758_v16 = vsel %vm17726_vm13, %v27158_v32, %v17742_v59  ;;  %v20957_v32 = vld [vmem:[%s27942_s2 + $0xf88] sm:$0xff]  }
 0x479   :  { %20190 = vmatpush3.bf16.msra.mxu0 %v20923_v50  ;;  %v17443_v50 = vcombine.high %v17441_v40, %v17441_v40 }
 0x47a   :  { %17111 = vmatmul.mubr.bf16.vlgmr.msra.gmra.mrb[52].mxu1 %v16840_v1  ;;  %20191 = vmatprep.subr.bf16.mxu0 %v20926_v13  ;;  %v17836_v1 = vpack.c.bf16 %v17758_v16, %v17758_v16 }
 0x47b   :  { %20210 = vmatpush3.bf16.msra.mxu1 %v20921_v21  ;;  %17411 = vmatprep.mubr.bf16.mxu1 %v17142_v31  ;;  %v20959_v21 = vld [vmem:[%s27942_s2 + $0xf10] sm:$0xff]  }
 0x47c   :  { %20211 = vmatprep.subr.bf16.mxu1 %v20924_v23  ;;  %v20962_v23 = vld [vmem:[%s27942_s2 + $0xf58] sm:$0xff]   ;;  %17837 = vst.msk [vmem:[#allocation3 + $0x3] sm:$0x1] %vm17769_vm7, %v17836_v1 }
 0x47d   :  { %20192 = vmatpush3.bf16.msra.mxu0 %v20927_v62  ;;  %v20960_v62 = vld [vmem:[%s27942_s2 + $0xfd0] sm:$0xff]  }
 0x47e   :  { %20193 = vmatprep.subr.bf16.mxu0 %v20930_v29  ;;  %v20963_v29 = vld [vmem:[%s27942_s2 + $0xf18] sm:$0xff]  }
 0x47f   :  { %20212 = vmatpush3.bf16.msra.mxu1 %v20925_v54  ;;  %v19895_v36 = vpop.f32.mrb[28].mxu0  ;;  %v20966_v54 = vld [vmem:[%s27942_s2 + $0xf60] sm:$0xff]  }
 0x480   :  { %20213 = vmatprep.subr.bf16.mxu1 %v20928_v35  ;;  %v19896_v51 = vpop.f32.mrb[29].mxu0  ;;  %v20961_v35 = vld [vmem:[%s27942_s2 + $0xf90] sm:$0xff]  }
 0x481   :  { %20194 = vmatpush3.bf16.msra.mxu0 %v20931_v22  ;;  %v19897_v53 = vadd.f32 %v19896_v51, %v19895_v36  ;;  %v19898_v52 = vpop.f32.mrb[30].mxu0  ;;  %v20964_v22 = vld [vmem:[%s27942_s2 + $0xfd8] sm:$0xff]   ;;  %v20972_v36 = vld [vmem:[%s27942_s2 + $0xfe8] sm:$0xff]  }
 0x482   :  { %20195 = vmatprep.subr.bf16.mxu0 %v20934_v39  ;;  %v19899_v38 = vpop.f32.mrb[31].mxu0  ;;  %v19917_v0 = vpop.f32.mrb[28].mxu1  ;;  %v20967_v39 = vld [vmem:[%s27942_s2 + $0xf20] sm:$0xff]   ;;  %v20978_v52 = vld [vmem:[%s27942_s2 + $0xf78] sm:$0xff]  }
 0x483   :  { %20214 = vmatpush3.bf16.msra.mxu1 %v20929_v14  ;;  %v15267_v49 = vadd.f32 %v26954_v7, %v19897_v53  ;;  %v19918_v63 = vpop.f32.mrb[29].mxu1  ;;  %v20970_v14 = vld [vmem:[%s27942_s2 + $0xf68] sm:$0xff]   ;;  %v20976_v38 = vld [vmem:[%s27942_s2 + $0xff0] sm:$0xff]  }
 0x484   :  { %20215 = vmatprep.subr.bf16.mxu1 %v20932_v46  ;;  %v19919_v25 = vadd.f32 %v19918_v63, %v19917_v0  ;;  %v19920_v6 = vpop.f32.mrb[30].mxu1  ;;  %v20965_v46 = vld [vmem:[%s27942_s2 + $0xf98] sm:$0xff]  }
 0x485   :  { %20196 = vmatpush3.bf16.msra.mxu0 %v20935_v24  ;;  %v19921_v57 = vpop.f32.mrb[31].mxu1  ;;  %v20968_v24 = vld [vmem:[%s27942_s2 + $0xfe0] sm:$0xff]   ;;  %v20980_v6 = vld [vmem:[%s27942_s2 + $0xff8] sm:$0xff]  }
 0x486   :  { %20197 = vmatprep.subr.bf16.mxu0 %v20938_v20  ;;  %v15307_v19 = vadd.f32 %v19919_v25, %v15267_v49  ;;  %v20971_v20 = vld [vmem:[%s27942_s2 + $0xf28] sm:$0xff]   ;;  %v20979_v49 = vld [vmem:[%s27942_s2 + $0xf38] sm:$0xff]   ;;  %v17434_v57 = vrot.slane %v27348_v41, %v21460_v43 }
 0x487   :  { %20216 = vmatpush3.bf16.msra.mxu1 %v20933_v9  ;;  %v20974_v9 = vld [vmem:[%s27942_s2 + $0xf70] sm:$0xff]  }
 0x488   :  { %20217 = vmatprep.subr.bf16.mxu1 %v20936_v30  ;;  %vm17727_vm0 = vcmp.ge.f32.partialorder %v15307_v19, 0.0  ;;  %v17743_v2 = vmul.f32 0.33, %v15307_v19  ;;  %v17442_v37 = vcombine.high %v17434_v57, %v17434_v57 }
 0x489   :  { %20198 = vmatpush3.bf16.msra.mxu0 %v20939_v60  ;;  %v20969_v60 = vld [vmem:[%s27942_s2 + $0xfa0] sm:$0xff]  }
 0x48a   :  { %20199 = vmatprep.subr.bf16.mxu0 %v20942_v12  ;;  %v17759_v5 = vsel %vm17727_vm0, %v15307_v19, %v17743_v2 }
 0x48b   :  { %20218 = vmatpush3.bf16.msra.mxu1 %v20937_v28  ;;  %v17838_v45 = vpack.c.bf16 %v17759_v5, %v17759_v5 }
 0x48c   :  { %20219 = vmatprep.subr.bf16.mxu1 %v20940_v42  ;;  %v20975_v42 = vld [vmem:[%s27942_s2 + $0xf30] sm:$0xff]  }
 0x48d   :  { %20200 = vmatpush3.bf16.msra.mxu0 %v20943_v15  ;;  %v17846_v47 = vrot.slane %v17838_v45, %v21460_v43  ;;  %v20973_v15 = vld [vmem:[%s27942_s2 + $0xfa8] sm:$0xff]  }
 0x48e   :  { %20201 = vmatprep.subr.bf16.mxu0 %v20946_v27  ;;  %v17833_v31 = vpop.permute.xlu0 %17832 }
 0x48f   :  { %20220 = vmatpush3.bf16.msra.mxu1 %v20941_v26  ;;  %v17853_v13 = vrot.slane %v17846_v47, %v21460_v43  ;;  %17835 = vst.msk [vmem:[#allocation3 + $0x2] sm:$0x1] %vm17790_vm12, %v17833_v31 }
 0x490   :  { %20221 = vmatprep.subr.bf16.mxu1 %v20944_v44 }
 0x491   :  { %20202 = vmatpush3.bf16.msra.mxu0 %v20947_v17  ;;  %17854 = vrot.lane.b32.xlu1 %v17853_v13, %s21104_s10  ;;  %v20977_v17 = vld [vmem:[%s27942_s2 + $0xfb0] sm:$0xff]  }
 0x492   :  { %20231 = vmatprep.subr.bf16.mxu0 %v20950_v8 }
 0x493   :  { %20222 = vmatpush3.bf16.msra.mxu1 %v20945_v4  ;;  %v20981_v4 = vld [vmem:[%s27942_s2 + $0xfb8] sm:$0xff]  }
 0x494   :  { %20223 = vmatprep.subr.bf16.mxu1 %v20948_v55  ;;  %17372 = vmatmul.mubr.bf16.vlgmr.msra.gmra.mrb[56].mxu0 %v17133_v48 }
 0x495   :  { %20232 = vmatpush3.bf16.msra.mxu0 %v20951_v33  ;;  %17672 = vmatprep.mubr.bf16.mxu0 %v17441_v40 }
 0x496   :  { %20233 = vmatprep.subr.bf16.mxu0 %v20954_v18 }
 0x497   :  { %20224 = vmatpush3.bf16.msra.mxu1 %v20949_v56 }
 0x498   :  { %20253 = vmatprep.subr.bf16.mxu1 %v20952_v10 }
 0x499   :  { %20234 = vmatpush3.bf16.msra.mxu0 %v20955_v61 }
 0x49a   :  { %17412 = vmatmul.mubr.bf16.vlgmr.msra.gmra.mrb[56].mxu1 %v17141_v11  ;;  %20235 = vmatprep.subr.bf16.mxu0 %v20958_v3 }
 0x49b   :  { %20254 = vmatpush3.bf16.msra.mxu1 %v20953_v58  ;;  %17712 = vmatprep.mubr.bf16.mxu1 %v17443_v50 }
 0x49c   :  { %20255 = vmatprep.subr.bf16.mxu1 %v20956_v34 }
 0x49d   :  { %20236 = vmatpush3.bf16.msra.mxu0 %v20959_v21 }
 0x49e   :  { %20237 = vmatprep.subr.bf16.mxu0 %v20962_v23 }
 0x49f   :  { %20256 = vmatpush3.bf16.msra.mxu1 %v20957_v32 }
 0x4a0   :  { %20257 = vmatprep.subr.bf16.mxu1 %v20960_v62 }
 0x4a1   :  { %20238 = vmatpush3.bf16.msra.mxu0 %v20963_v29 }
 0x4a2   :  { %20239 = vmatprep.subr.bf16.mxu0 %v20966_v54 }
 0x4a3   :  { %20258 = vmatpush3.bf16.msra.mxu1 %v20961_v35 }
 0x4a4   :  { %20259 = vmatprep.subr.bf16.mxu1 %v20964_v22  ;;  %v19939_v30 = vpop.f32.mrb[32].mxu0 }
 0x4a5   :  { %20240 = vmatpush3.bf16.msra.mxu0 %v20967_v39  ;;  %v19940_v12 = vpop.f32.mrb[33].mxu0 }
 0x4a6   :  { %20241 = vmatprep.subr.bf16.mxu0 %v20970_v14  ;;  %v19941_v28 = vadd.f32 %v19940_v12, %v19939_v30  ;;  %v19942_v51 = vpop.f32.mrb[34].mxu0 }
 0x4a7   :  { %20260 = vmatpush3.bf16.msra.mxu1 %v20965_v46  ;;  %v19943_v53 = vpop.f32.mrb[35].mxu0 }
 0x4a8   :  { %20261 = vmatprep.subr.bf16.mxu1 %v20968_v24  ;;  %v15568_v27 = vadd.f32 %v26954_v7, %v19941_v28 }
 0x4a9   :  { %20242 = vmatpush3.bf16.msra.mxu0 %v20971_v20 }
 0x4aa   :  { %20243 = vmatprep.subr.bf16.mxu0 %v20974_v9 }
 0x4ab   :  { %20262 = vmatpush3.bf16.msra.mxu1 %v20969_v60  ;;  %v19961_v26 = vpop.f32.mrb[32].mxu1 }
 0x4ac   :  { %20263 = vmatprep.subr.bf16.mxu1 %v20972_v36  ;;  %v19962_v0 = vpop.f32.mrb[33].mxu1 }
 0x4ad   :  { %20244 = vmatpush3.bf16.msra.mxu0 %v20975_v42  ;;  %v19963_v44 = vadd.f32 %v19962_v0, %v19961_v26  ;;  %v19964_v63 = vpop.f32.mrb[34].mxu1 }
 0x4ae   :  { %20245 = vmatprep.subr.bf16.mxu0 %v20978_v52  ;;  %v19965_v25 = vpop.f32.mrb[35].mxu1 }
 0x4af   :  { %20264 = vmatpush3.bf16.msra.mxu1 %v20973_v15  ;;  %v15608_v8 = vadd.f32 %v19963_v44, %v15568_v27 }
 0x4b0   :  { %20265 = vmatprep.subr.bf16.mxu1 %v20976_v38 }
 0x4b1   :  { %20246 = vmatpush3.bf16.msra.mxu0 %v20979_v49  ;;  %v17744_v61 = vmul.f32 0.33, %v15608_v8  ;;  %vm17728_vm1 = vcmp.ge.f32.partialorder %v15608_v8, 0.0 }
 0x4b3   :  { %20266 = vmatpush3.bf16.msra.mxu1 %v20977_v17  ;;  %v17760_v11 = vsel %vm17728_vm1, %v15608_v8, %v17744_v61 }
 0x4b4   :  { %20267 = vmatprep.subr.bf16.mxu1 %v20980_v6  ;;  %17673 = vmatmul.mubr.bf16.vlgmr.msra.gmra.mrb[60].mxu0 %v17434_v57  ;;  %v17858_v34 = vpack.c.bf16 %v17760_v11, %v17760_v11  ;;  %v27489_v6 = vld [vmem:[%s27946_s6] ss:$0 sm:$0xff] }
 0x4b5   :  { %v20982_v11 = vld [vmem:[%s27943_s3 + $0x40] sm:$0xff]  }
 0x4b6   :  { %17859 = vst.msk [vmem:[#allocation3 + $0x4] sm:$0x1] %vm17769_vm7, %v17858_v34  ;;  %v20983_v34 = vld [vmem:[%s27943_s3] sm:$0xff]   ;;  %20275 = vmatprep.subr.bf16.mxu0 %v20982_v11  ;;  %v21010_v11 = vld [vmem:[%s27943_s3 + $0x78] sm:$0xff]  }
 0x4b7   :  { %20268 = vmatpush3.bf16.msra.mxu1 %v20981_v4  ;;  %20276 = vmatpush3.bf16.msra.mxu0 %v20983_v34 }
 0x4ba   :  { %17713 = vmatmul.mubr.bf16.vlgmr.msra.gmra.mrb[60].mxu1 %v17442_v37 }
 0x4c7   :  { %v19983_v19 = vpop.f32.mrb[36].mxu0 }
 0x4c8   :  { %v19984_v55 = vpop.f32.mrb[37].mxu0 }
 0x4c9   :  { %v19985_v33 = vadd.f32 %v19984_v55, %v19983_v19  ;;  %v19986_v2 = vpop.f32.mrb[38].mxu0 }
 0x4ca   :  { %v19987_v48 = vpop.f32.mrb[39].mxu0 }
 0x4cb   :  { %v15869_v18 = vadd.f32 %v26954_v7, %v19985_v33 }
 0x4cd   :  { %v20005_v56 = vpop.f32.mrb[36].mxu1 }
 0x4ce   :  { %v20006_v40 = vpop.f32.mrb[37].mxu1 }
 0x4cf   :  { %v20007_v41 = vadd.f32 %v20006_v40, %v20005_v56  ;;  %v20008_v59 = vpop.f32.mrb[38].mxu1 }
 0x4d0   :  { %v20009_v5 = vpop.f32.mrb[39].mxu1 }
 0x4d1   :  { %v15909_v10 = vadd.f32 %v20007_v41, %v15869_v18 }
 0x4d3   :  { %vm17729_vm14 = vcmp.ge.f32.partialorder %v15909_v10, 0.0  ;;  %v17745_v45 = vmul.f32 0.33, %v15909_v10 }
 0x4d5   :  { %v17761_v3 = vsel %vm17729_vm14, %v15909_v10, %v17745_v45 }
 0x4d6   :  { %v17860_v47 = vpack.c.bf16 %v17761_v3, %v17761_v3 }
 0x4d8   :  { %v17868_v58 = vrot.slane %v17860_v47, %v21460_v43 }
 0x4da   :  { %v17875_v16 = vrot.slane %v17868_v58, %v21460_v43 }
 0x4dc   :  { %17876 = vrot.lane.b32.xlu0 %v17875_v16, %s21104_s10  ;;  %v20984_v16 = vld [vmem:[%s27943_s3 + $0xc0] sm:$0xff]  }
 0x4dd   :  { %20297 = vmatprep.subr.bf16.mxu1 %v20984_v16 }
 0x4e7   :  { %v20027_v50 = vpop.f32.mrb[40].mxu0 }
 0x4e8   :  { %v20028_v13 = vpop.f32.mrb[41].mxu0 }
 0x4e9   :  { %v20029_v21 = vadd.f32 %v20028_v13, %v20027_v50  ;;  %v20030_v1 = vpop.f32.mrb[42].mxu0  ;;  %v20985_v13 = vld [vmem:[%s27943_s3 + $0x80] sm:$0xff]  }
 0x4ea   :  { %v20031_v23 = vpop.f32.mrb[43].mxu0  ;;  %20298 = vmatpush3.bf16.msra.mxu1 %v20985_v13  ;;  %v21011_v13 = vld [vmem:[%s27943_s3 + $0x38] sm:$0xff]  }
 0x4eb   :  { %v16170_v32 = vadd.f32 %v26954_v7, %v20029_v21  ;;  %v20986_v21 = vld [vmem:[%s27943_s3 + $0x48] sm:$0xff]  }
 0x4ec   :  { %v20988_v23 = vld [vmem:[%s27943_s3 + $0xc8] sm:$0xff]   ;;  %20277 = vmatprep.subr.bf16.mxu0 %v20986_v21  ;;  %v21012_v21 = vld [vmem:[%s27943_s3 + $0xf8] sm:$0xff]  }
 0x4ed   :  { %v20049_v31 = vpop.f32.mrb[40].mxu1  ;;  %20299 = vmatprep.subr.bf16.mxu1 %v20988_v23 }
 0x4ee   :  { %v20050_v62 = vpop.f32.mrb[41].mxu1 }
 0x4ef   :  { %v20051_v29 = vadd.f32 %v20050_v62, %v20049_v31  ;;  %v20052_v54 = vpop.f32.mrb[42].mxu1  ;;  %v20989_v31 = vld [vmem:[%s27943_s3 + $0x88] sm:$0xff]  }
 0x4f0   :  { %v20053_v35 = vpop.f32.mrb[43].mxu1  ;;  %v20992_v54 = vld [vmem:[%s27943_s3 + $0xd0] sm:$0xff]   ;;  %20300 = vmatpush3.bf16.msra.mxu1 %v20989_v31  ;;  %v21014_v31 = vld [vmem:[%s27943_s3 + $0x140] sm:$0xff]  }
 0x4f1   :  { %v16210_v22 = vadd.f32 %v20051_v29, %v16170_v32  ;;  %v20987_v32 = vld [vmem:[%s27943_s3 + $0x8] sm:$0xff]   ;;  %v20990_v29 = vld [vmem:[%s27943_s3 + $0x50] sm:$0xff]   ;;  %20301 = vmatprep.subr.bf16.mxu1 %v20992_v54 }
 0x4f2   :  { %20278 = vmatpush3.bf16.msra.mxu0 %v20987_v32  ;;  %v21013_v32 = vld [vmem:[%s27943_s3 + $0xb8] sm:$0xff]  }
 0x4f3   :  { %v17746_v46 = vmul.f32 0.33, %v16210_v22  ;;  %vm17730_vm2 = vcmp.ge.f32.partialorder %v16210_v22, 0.0  ;;  %20279 = vmatprep.subr.bf16.mxu0 %v20990_v29 }
 0x4f5   :  { %v17762_v12 = vsel %vm17730_vm2, %v16210_v22, %v17746_v46  ;;  %v20994_v46 = vld [vmem:[%s27943_s3 + $0x58] sm:$0xff]  }
 0x4f6   :  { %v17880_v51 = vpack.c.bf16 %v17762_v12, %v17762_v12  ;;  %v20998_v12 = vld [vmem:[%s27943_s3 + $0x60] sm:$0xff]  }
 0x4f8   :  { %17881 = vst.msk [vmem:[#allocation3 + $0x5] sm:$0x1] %vm17769_vm7, %v17880_v51 }
 0x503   :  { %v17855_v28 = vpop.permute.xlu1 %17854 }
 0x504   :  { %17857 = vst.msk [vmem:[#allocation3 + $0x3] sm:$0x1] %vm17790_vm12, %v17855_v28 }
 0x507   :  { %v20071_v39 = vpop.f32.mrb[44].mxu0 }
 0x508   :  { %v20072_v14 = vpop.f32.mrb[45].mxu0 }
 0x509   :  { %v20073_v24 = vadd.f32 %v20072_v14, %v20071_v39  ;;  %v20074_v20 = vpop.f32.mrb[46].mxu0  ;;  %v20991_v39 = vld [vmem:[%s27943_s3 + $0x10] sm:$0xff]  }
 0x50a   :  { %v20075_v9 = vpop.f32.mrb[47].mxu0  ;;  %v20993_v14 = vld [vmem:[%s27943_s3 + $0x90] sm:$0xff]   ;;  %20280 = vmatpush3.bf16.msra.mxu0 %v20991_v39 }
 0x50b   :  { %v16471_v30 = vadd.f32 %v26954_v7, %v20073_v24  ;;  %v20996_v24 = vld [vmem:[%s27943_s3 + $0xd8] sm:$0xff]   ;;  %20302 = vmatpush3.bf16.msra.mxu1 %v20993_v14  ;;  %20281 = vmatprep.subr.bf16.mxu0 %v20994_v46 }
 0x50c   :  { %20303 = vmatprep.subr.bf16.mxu1 %v20996_v24 }
 0x50d   :  { %v20093_v60 = vpop.f32.mrb[44].mxu1 }
 0x50e   :  { %v20094_v36 = vpop.f32.mrb[45].mxu1 }
 0x50f   :  { %v20095_v42 = vadd.f32 %v20094_v36, %v20093_v60  ;;  %v20096_v53 = vpop.f32.mrb[46].mxu1  ;;  %v20997_v60 = vld [vmem:[%s27943_s3 + $0x98] sm:$0xff]   ;;  %v20999_v36 = vld [vmem:[%s27943_s3 + $0x20] sm:$0xff]  }
 0x510   :  { %v20097_v52 = vpop.f32.mrb[47].mxu1  ;;  %20304 = vmatpush3.bf16.msra.mxu1 %v20997_v60 }
 0x511   :  { %v16511_v15 = vadd.f32 %v20095_v42, %v16471_v30  ;;  %v20995_v30 = vld [vmem:[%s27943_s3 + $0x18] sm:$0xff]  }
 0x512   :  { %20282 = vmatpush3.bf16.msra.mxu0 %v20995_v30 }
 0x513   :  { %vm17731_vm3 = vcmp.ge.f32.partialorder %v16511_v15, 0.0  ;;  %v17747_v38 = vmul.f32 0.33, %v16511_v15  ;;  %20283 = vmatprep.subr.bf16.mxu0 %v20998_v12 }
 0x515   :  { %v17763_v27 = vsel %vm17731_vm3, %v16511_v15, %v17747_v38 }
 0x516   :  { %v17882_v26 = vpack.c.bf16 %v17763_v27, %v17763_v27  ;;  %20284 = vmatpush3.bf16.msra.mxu0 %v20999_v36  ;;  %v21018_v36 = vld [vmem:[%s27943_s3 + $0x180] sm:$0xff]  }
 0x518   :  { %v17890_v49 = vrot.slane %v17882_v26, %v21460_v43 }
 0x51a   :  { %v17897_v7 = vrot.slane %v17890_v49, %v21460_v43 }
 0x51c   :  { %17898 = vrot.lane.b32.xlu1 %v17897_v7, %s21104_s10 }
 0x527   :  { %v20115_v0 = vpop.f32.mrb[48].mxu0 }
 0x528   :  { %v20116_v44 = vpop.f32.mrb[49].mxu0 }
 0x529   :  { %v20117_v63 = vadd.f32 %v20116_v44, %v20115_v0  ;;  %v20118_v17 = vpop.f32.mrb[50].mxu0 }
 0x52a   :  { %v20119_v25 = vpop.f32.mrb[51].mxu0 }
 0x52b   :  { %v16772_v8 = vadd.f32 %v27489_v6, %v20117_v63 }
 0x52d   :  { %v20137_v57 = vpop.f32.mrb[48].mxu1 }
 0x52e   :  { %v20138_v4 = vpop.f32.mrb[49].mxu1 }
 0x52f   :  { %v20139_v37 = vadd.f32 %v20138_v4, %v20137_v57  ;;  %v20140_v19 = vpop.f32.mrb[50].mxu1 }
 0x530   :  { %v20141_v55 = vpop.f32.mrb[51].mxu1 }
 0x531   :  { %v16812_v33 = vadd.f32 %v20139_v37, %v16772_v8 }
 0x533   :  { %vm17732_vm4 = vcmp.ge.f32.partialorder %v16812_v33, 0.0  ;;  %v17748_v2 = vmul.f32 0.33, %v16812_v33 }
 0x535   :  { %v17764_v48 = vsel %vm17732_vm4, %v16812_v33, %v17748_v2 }
 0x536   :  { %v17902_v18 = vpack.c.bf16 %v17764_v48, %v17764_v48 }
 0x538   :  { %17903 = vst.msk [vmem:[#allocation3 + $0x6] sm:$0x1] %vm17769_vm7, %v17902_v18 }
 0x547   :  { %v20159_v56 = vpop.f32.mrb[52].mxu0 }
 0x548   :  { %v20160_v40 = vpop.f32.mrb[53].mxu0 }
 0x549   :  { %v20161_v41 = vadd.f32 %v20160_v40, %v20159_v56  ;;  %v20162_v59 = vpop.f32.mrb[54].mxu0  ;;  %v21000_v56 = vld [vmem:[%s27943_s3 + $0xe0] sm:$0xff]  }
 0x54a   :  { %v20163_v5 = vpop.f32.mrb[55].mxu0  ;;  %v21001_v40 = vld [vmem:[%s27943_s3 + $0xa0] sm:$0xff]   ;;  %v21003_v59 = vld [vmem:[%s27943_s3 + $0x28] sm:$0xff]   ;;  %20305 = vmatprep.subr.bf16.mxu1 %v21000_v56  ;;  %v21042_v56 = vld [vmem:[%s27943_s3 + $0x1b0] sm:$0xff]  }
 0x54b   :  { %v17073_v10 = vadd.f32 %v27489_v6, %v20161_v41  ;;  %v21002_v41 = vld [vmem:[%s27943_s3 + $0x68] sm:$0xff]   ;;  %20306 = vmatpush3.bf16.msra.mxu1 %v21001_v40  ;;  %v21045_v40 = vld [vmem:[%s27943_s3 + $0x1f8] sm:$0xff]  }
 0x54c   :  { %v21004_v5 = vld [vmem:[%s27943_s3 + $0xe8] sm:$0xff]   ;;  %20285 = vmatprep.subr.bf16.mxu0 %v21002_v41  ;;  %v21044_v41 = vld [vmem:[%s27943_s3 + $0x138] sm:$0xff]  }
 0x54d   :  { %v20181_v45 = vpop.f32.mrb[52].mxu1  ;;  %20286 = vmatpush3.bf16.msra.mxu0 %v21003_v59  ;;  %20307 = vmatprep.subr.bf16.mxu1 %v21004_v5 }
 0x54e   :  { %v20182_v61 = vpop.f32.mrb[53].mxu1  ;;  %v17877_v3 = vpop.permute.xlu0 %17876 }
 0x54f   :  { %v20183_v47 = vadd.f32 %v20182_v61, %v20181_v45  ;;  %17879 = vst.msk [vmem:[#allocation3 + $0x4] sm:$0x1] %vm17790_vm12, %v17877_v3  ;;  %v20184_v58 = vpop.f32.mrb[54].mxu1  ;;  %v21006_v45 = vld [vmem:[%s27943_s3 + $0x70] sm:$0xff]   ;;  %v21005_v61 = vld [vmem:[%s27943_s3 + $0xa8] sm:$0xff]  }
 0x550   :  { %v20185_v50 = vpop.f32.mrb[55].mxu1  ;;  %v21007_v3 = vld [vmem:[%s27943_s3 + $0x30] sm:$0xff]   ;;  %20287 = vmatprep.subr.bf16.mxu0 %v21006_v45  ;;  %20308 = vmatpush3.bf16.msra.mxu1 %v21005_v61  ;;  %v18690_v45 = vld [vmem:[%s27944_s4 + $0x18] sm:$0xff]  ;;  %v18687_v61 = vld [vmem:[%s27944_s4] sm:$0xff] }
 0x551   :  { %v17113_v1 = vadd.f32 %v20183_v47, %v17073_v10  ;;  %v21008_v58 = vld [vmem:[%s27943_s3 + $0xf0] sm:$0xff]   ;;  %20288 = vmatpush3.bf16.msra.mxu0 %v21007_v3 }
 0x552   :  { %v21009_v50 = vld [vmem:[%s27943_s3 + $0xb0] sm:$0xff]   ;;  %20309 = vmatprep.subr.bf16.mxu1 %v21008_v58  ;;  %20289 = vmatprep.subr.bf16.mxu0 %v21010_v11  ;;  %v18694_v58 = vld [vmem:[%s27944_s4 + $0x38] sm:$0xff] }
 0x553   :  { %vm17733_vm5 = vcmp.ge.f32.partialorder %v17113_v1, 0.0  ;;  %v17749_v62 = vmul.f32 0.33, %v17113_v1 }
 0x554   :  { %20310 = vmatpush3.bf16.msra.mxu1 %v21009_v50  ;;  %v18693_v50 = vld [vmem:[%s27944_s4 + $0x30] sm:$0xff] }
 0x555   :  { %v17765_v35 = vsel %vm17733_vm5, %v17113_v1, %v17749_v62  ;;  %20290 = vmatpush3.bf16.msra.mxu0 %v21011_v13  ;;  %20311 = vmatprep.subr.bf16.mxu1 %v21012_v21  ;;  %v21017_v62 = vld [vmem:[%s27943_s3 + $0x1c0] sm:$0xff]   ;;  %v18696_v13 = vld [vmem:[%s27944_s4 + $0x48] sm:$0xff]  ;;  %v18698_v21 = vld [vmem:[%s27944_s4 + $0x58] sm:$0xff] }
 0x556   :  { %v17904_v22 = vpack.c.bf16 %v17765_v35, %v17765_v35  ;;  %20319 = vmatprep.subr.bf16.mxu0 %v21014_v31  ;;  %v18697_v31 = vld [vmem:[%s27944_s4 + $0x50] sm:$0xff] }
 0x558   :  { %v17912_v20 = vrot.slane %v17904_v22, %v21460_v43  ;;  %20312 = vmatpush3.bf16.msra.mxu1 %v21013_v32  ;;  %v18695_v32 = vld [vmem:[%s27944_s4 + $0x40] sm:$0xff] }
 0x559   :  { %20341 = vmatprep.subr.bf16.mxu1 %v21017_v62  ;;  %v18700_v62 = vld [vmem:[%s27944_s4 + $0x68] sm:$0xff] }
 0x55a   :  { %v17919_v9 = vrot.slane %v17912_v20, %v21460_v43 }
 0x55c   :  { %17920 = vrot.lane.b32.xlu0 %v17919_v9, %s21104_s10  ;;  %v21015_v9 = vld [vmem:[%s27943_s3 + $0x100] sm:$0xff]  }
 0x567   :  { %v20203_v28 = vpop.f32.mrb[56].mxu0 }
 0x568   :  { %v20204_v51 = vpop.f32.mrb[57].mxu0 }
 0x569   :  { %v20205_v42 = vadd.f32 %v20204_v51, %v20203_v28  ;;  %v20206_v53 = vpop.f32.mrb[58].mxu0  ;;  %v21019_v28 = vld [vmem:[%s27943_s3 + $0x148] sm:$0xff]  }
 0x56a   :  { %v20207_v52 = vpop.f32.mrb[59].mxu0 }
 0x56b   :  { %v17374_v15 = vadd.f32 %v27489_v6, %v20205_v42  ;;  %v21021_v42 = vld [vmem:[%s27943_s3 + $0x1c8] sm:$0xff]  }
 0x56c   :  { %v21020_v52 = vld [vmem:[%s27943_s3 + $0x108] sm:$0xff]  }
 0x56d   :  { %v20225_v38 = vpop.f32.mrb[56].mxu1 }
 0x56e   :  { %v20226_v27 = vpop.f32.mrb[57].mxu1 }
 0x56f   :  { %v20227_v26 = vadd.f32 %v20226_v27, %v20225_v38  ;;  %v20228_v49 = vpop.f32.mrb[58].mxu1  ;;  %v21022_v38 = vld [vmem:[%s27943_s3 + $0x188] sm:$0xff]   ;;  %v21025_v27 = vld [vmem:[%s27943_s3 + $0x1d0] sm:$0xff]  }
 0x570   :  { %v20229_v7 = vpop.f32.mrb[59].mxu1  ;;  %v21027_v49 = vld [vmem:[%s27943_s3 + $0x158] sm:$0xff]  }
 0x571   :  { %v17414_v0 = vadd.f32 %v20227_v26, %v17374_v15  ;;  %v21023_v15 = vld [vmem:[%s27943_s3 + $0x150] sm:$0xff]  }
 0x572   :  { %v21024_v26 = vld [vmem:[%s27943_s3 + $0x110] sm:$0xff]  }
 0x573   :  { %vm17734_vm6 = vcmp.ge.f32.partialorder %v17414_v0, 0.0  ;;  %v17750_v44 = vmul.f32 0.33, %v17414_v0  ;;  %v21026_v7 = vld [vmem:[%s27943_s3 + $0x190] sm:$0xff]  }
 0x575   :  { %v17766_v63 = vsel %vm17734_vm6, %v17414_v0, %v17750_v44  ;;  %v21029_v0 = vld [vmem:[%s27943_s3 + $0x1d8] sm:$0xff]  }
 0x576   :  { %v17924_v17 = vpack.c.bf16 %v17766_v63, %v17766_v63  ;;  %v21028_v44 = vld [vmem:[%s27943_s3 + $0x118] sm:$0xff]   ;;  %v21031_v63 = vld [vmem:[%s27943_s3 + $0x160] sm:$0xff]  }
 0x578   :  { %17925 = vst.msk [vmem:[#allocation3 + $0x7] sm:$0x1] %vm17769_vm7, %v17924_v17  ;;  %v21030_v17 = vld [vmem:[%s27943_s3 + $0x198] sm:$0xff]  }
 0x587   :  { %v20247_v25 = vpop.f32.mrb[60].mxu0 }
 0x588   :  { %v20248_v8 = vpop.f32.mrb[61].mxu0 }
 0x589   :  { %v20249_v57 = vadd.f32 %v20248_v8, %v20247_v25  ;;  %v20250_v4 = vpop.f32.mrb[62].mxu0  ;;  %v21033_v25 = vld [vmem:[%s27943_s3 + $0x1e0] sm:$0xff]  }
 0x58a   :  { %v20251_v37 = vpop.f32.mrb[63].mxu0  ;;  %v21032_v8 = vld [vmem:[%s27943_s3 + $0x120] sm:$0xff]  }
 0x58b   :  { %v17675_v19 = vadd.f32 %v27489_v6, %v20249_v57  ;;  %v21035_v57 = vld [vmem:[%s27943_s3 + $0x168] sm:$0xff]   ;;  %v21034_v4 = vld [vmem:[%s27943_s3 + $0x1a0] sm:$0xff]  }
 0x58c   :  { %v21037_v37 = vld [vmem:[%s27943_s3 + $0x1e8] sm:$0xff]  }
 0x58d   :  { %v20269_v55 = vpop.f32.mrb[60].mxu1 }
 0x58e   :  { %v17899_v33 = vpop.permute.xlu1 %17898  ;;  %v20270_v2 = vpop.f32.mrb[61].mxu1 }
 0x58f   :  { %17901 = vst.msk [vmem:[#allocation3 + $0x5] sm:$0x1] %vm17790_vm12, %v17899_v33  ;;  %v20271_v48 = vadd.f32 %v20270_v2, %v20269_v55  ;;  %v20272_v18 = vpop.f32.mrb[62].mxu1  ;;  %v21039_v55 = vld [vmem:[%s27943_s3 + $0x170] sm:$0xff]   ;;  %v21038_v33 = vld [vmem:[%s27943_s3 + $0x1a8] sm:$0xff]  }
 0x590   :  { %v20273_v6 = vpop.f32.mrb[63].mxu1  ;;  %v21041_v2 = vld [vmem:[%s27943_s3 + $0x1f0] sm:$0xff]   ;;  %v21043_v18 = vld [vmem:[%s27943_s3 + $0x178] sm:$0xff]  }
 0x591   :  { %v17715_v10 = vadd.f32 %v20271_v48, %v17675_v19  ;;  %v21036_v19 = vld [vmem:[%s27943_s3 + $0x128] sm:$0xff]   ;;  %v21040_v48 = vld [vmem:[%s27943_s3 + $0x130] sm:$0xff]   ;;  %v21046_v6 = vld [vmem:[%s27943_s3 + $0x1b8] sm:$0xff]  }
 0x593   :  { %vm17735_vm8 = vcmp.ge.f32.partialorder %v17715_v10, 0.0  ;;  %v17751_v47 = vmul.f32 0.33, %v17715_v10 }
 0x595   :  { %v17767_v34 = vsel %vm17735_vm8, %v17715_v10, %v17751_v47  ;;  %v18688_v10 = vld [vmem:[%s27944_s4 + $0x8] sm:$0xff] }
 0x596   :  { %v17926_v16 = vpack.c.bf16 %v17767_v34, %v17767_v34  ;;  %v20398_v3 = vpack.c.bf16 %v18690_v45, %v18688_v10  ;;  %v18692_v47 = vld [vmem:[%s27944_s4 + $0x28] sm:$0xff]  ;;  %v18812_v10 = vld [vmem:[%s27945_s5 + $0x20] sm:$0xff] }
 0x597   :  { %v20402_v34 = vpack.c.bf16 %v18694_v58, %v18692_v47  ;;  %v18813_v45 = vld [vmem:[%s27945_s5 + $0x28] sm:$0xff]  ;;  %v18814_v58 = vld [vmem:[%s27945_s5 + $0x30] sm:$0xff] }
 0x598   :  { %v17934_v1 = vrot.slane %v17926_v16, %v21460_v43  ;;  %v18691_v16 = vld [vmem:[%s27944_s4 + $0x20] sm:$0xff] }
 0x59a   :  { %v17941_v23 = vrot.slane %v17934_v1, %v21460_v43  ;;  %v20404_v1 = vpack.c.bf16 %v18693_v50, %v18691_v16  ;;  %v18833_v16 = vld [vmem:[%s27945_s5 + $0xc8] sm:$0xff] }
 0x59c   :  { %17942 = vrot.lane.b32.xlu1 %v17941_v23, %s21104_s10  ;;  %v20406_v23 = vpack.c.bf16 %v18698_v21, %v18696_v13  ;;  %v18816_v21 = vld [vmem:[%s27945_s5 + $0x40] sm:$0xff] }
 0x5ce   :  { %v17921_v29 = vpop.permute.xlu0 %17920 }
 0x5cf   :  { %17923 = vst.msk [vmem:[#allocation3 + $0x6] sm:$0x1] %vm17790_vm12, %v17921_v29  ;;  %v18702_v29 = vld [vmem:[%s27944_s4 + $0x78] sm:$0xff] }
 0x60e   :  { %v17943_v54 = vpop.permute.xlu1 %17942 }
 0x60f   :  { %17945 = vst.msk [vmem:[#allocation3 + $0x7] sm:$0x1] %vm17790_vm12, %v17943_v54  ;;  %v20408_v54 = vpack.c.bf16 %v18697_v31, %v18695_v32  ;;  %v18835_v32 = vld [vmem:[%s27945_s5 + $0xd8] sm:$0xff]  ;;  %vm18920_vm12 = vcmask 9216  }
 0x616   :  { %v17946_v35 = vld [vmem:[#allocation3] sm:$0xff] }
 0x617   :  { %v18090_v22 = vrot.slane %v17946_v35, %v21460_v43  ;;  %v18083_v39 = vcombine.high %v17946_v35, %v17946_v35  ;;  %v20410_v35 = vpack.c.bf16 %v18702_v29, %v18700_v62  ;;  %v18818_v29 = vld [vmem:[%s27945_s5 + $0x50] sm:$0xff] }
 0x619   :  { %v18098_v14 = vcombine.high %v18090_v22, %v18090_v22  ;;  %v27611_v46 = vrot.slane %v18083_v39, %v21460_v43  ;;  %v18106_v24 = vrot.slane %v18090_v22, %v21460_v43  ;;  %v18699_v22 = vld [vmem:[%s27944_s4 + $0x60] sm:$0xff]  ;;  %v18701_v39 = vld [vmem:[%s27944_s4 + $0x70] sm:$0xff] }
 0x61b   :  { %v18120_v20 = vrot.slane %v18098_v14, %v21460_v43  ;;  %v18099_v30 = vcombine.high %v27611_v46, %v27611_v46  ;;  %v18128_v51 = vcombine.high %v18106_v24, %v18106_v24  ;;  %v18113_v59 = vrot.slane %v27611_v46, %v21460_v43  ;;  %v18704_v14 = vld [vmem:[%s27944_s4 + $0x88] sm:$0xff]  ;;  %v18706_v46 = vld [vmem:[%s27944_s4 + $0x98] sm:$0xff] }
 0x61d   :  { %18556 = vmatprep.mubr.bf16.mxu0 %v18120_v20  ;;  %v18130_v60 = vcombine.high %v18120_v20, %v18120_v20  ;;  %v18127_v12 = vrot.slane %v18099_v30, %v21460_v43  ;;  %v18129_v5 = vcombine.high %v18113_v59, %v18113_v59  ;;  %v18689_v43 = vld [vmem:[%s27944_s4 + $0x10] sm:$0xff]  ;;  %v20414_v20 = vpack.c.bf16 %v18706_v46, %v18704_v14 }
 0x61e   :  { %18557 = vmatmul.mubr.bf16.vlgmr.msra.gmra.mrb[64].mxu0 %v18106_v24  ;;  %v20400_v11 = vpack.c.bf16 %v18689_v43, %v18687_v61  ;;  %v20412_v24 = vpack.c.bf16 %v18701_v39, %v18699_v22  ;;  %v18705_v30 = vld [vmem:[%s27944_s4 + $0x90] sm:$0xff]  ;;  %v20440_v43 = vpack.c.bf16 %v18813_v45, %v18812_v10  ;;  %v19504_v39 = vld [vmem:[%s27946_s6 + $0x1] ss:$0 sm:$0xff] }
 0x61f   :  { %20320 = vmatpush3.bf16.msra.mxu0 %v21015_v9  ;;  %18596 = vmatprep.mubr.bf16.mxu1 %v18130_v60  ;;  %v18131_v53 = vcombine.high %v18127_v12, %v18127_v12  ;;  %v18703_v9 = vld [vmem:[%s27944_s4 + $0x80] sm:$0xff]  ;;  %v18708_v60 = vld [vmem:[%s27944_s4 + $0xa8] sm:$0xff]  ;;  %v18830_v61 = vld [vmem:[%s27945_s5 + $0xb0] sm:$0xff] }
 0x620   :  { %18636 = vmatprep.mubr.bf16.mxu0 %v18127_v12  ;;  %18597 = vmatmul.mubr.bf16.vlgmr.msra.gmra.mrb[64].mxu1 %v18128_v51  ;;  %v18710_v12 = vld [vmem:[%s27944_s4 + $0xb8] sm:$0xff]  ;;  %v18707_v51 = vld [vmem:[%s27944_s4 + $0xa0] sm:$0xff] }
 0x621   :  { %20342 = vmatpush3.bf16.msra.mxu1 %v21018_v36  ;;  %20321 = vmatprep.subr.bf16.mxu0 %v21019_v28  ;;  %v20416_v36 = vpack.c.bf16 %v18705_v30, %v18703_v9  ;;  %v20418_v28 = vpack.c.bf16 %v18710_v12, %v18708_v60 }
 0x622   :  { %18676 = vmatprep.mubr.bf16.mxu1 %v18131_v53  ;;  %20343 = vmatprep.subr.bf16.mxu1 %v21021_v42  ;;  %v18709_v42 = vld [vmem:[%s27944_s4 + $0xb0] sm:$0xff] }
 0x623   :  { %20322 = vmatpush3.bf16.msra.mxu0 %v21020_v52  ;;  %v20420_v53 = vpack.c.bf16 %v18709_v42, %v18707_v51  ;;  %v18712_v52 = vld [vmem:[%s27944_s4 + $0xc8] sm:$0xff] }
 0x624   :  { %20323 = vmatprep.subr.bf16.mxu0 %v21023_v15  ;;  %v18714_v15 = vld [vmem:[%s27944_s4 + $0xd8] sm:$0xff] }
 0x625   :  { %20344 = vmatpush3.bf16.msra.mxu1 %v21022_v38  ;;  %v18711_v38 = vld [vmem:[%s27944_s4 + $0xc0] sm:$0xff] }
 0x626   :  { %20345 = vmatprep.subr.bf16.mxu1 %v21025_v27  ;;  %v20422_v27 = vpack.c.bf16 %v18714_v15, %v18712_v52 }
 0x627   :  { %20324 = vmatpush3.bf16.msra.mxu0 %v21024_v26  ;;  %v18713_v26 = vld [vmem:[%s27944_s4 + $0xd0] sm:$0xff] }
 0x628   :  { %20325 = vmatprep.subr.bf16.mxu0 %v21027_v49  ;;  %v18716_v49 = vld [vmem:[%s27944_s4 + $0xe8] sm:$0xff] }
 0x629   :  { %20346 = vmatpush3.bf16.msra.mxu1 %v21026_v7  ;;  %v18718_v7 = vld [vmem:[%s27944_s4 + $0xf8] sm:$0xff] }
 0x62a   :  { %20347 = vmatprep.subr.bf16.mxu1 %v21029_v0  ;;  %v21106_v0 = vmov 0.0  }
 0x62b   :  { %20326 = vmatpush3.bf16.msra.mxu0 %v21028_v44  ;;  %v20424_v44 = vpack.c.bf16 %v18713_v26, %v18711_v38 }
 0x62c   :  { %20327 = vmatprep.subr.bf16.mxu0 %v21031_v63  ;;  %v20426_v63 = vpack.c.bf16 %v18718_v7, %v18716_v49 }
 0x62d   :  { %20348 = vmatpush3.bf16.msra.mxu1 %v21030_v17  ;;  %v18715_v17 = vld [vmem:[%s27944_s4 + $0xe0] sm:$0xff] }
 0x62e   :  { %20349 = vmatprep.subr.bf16.mxu1 %v21033_v25  ;;  %v18717_v25 = vld [vmem:[%s27944_s4 + $0xf0] sm:$0xff] }
 0x62f   :  { %20328 = vmatpush3.bf16.msra.mxu0 %v21032_v8  ;;  %v18824_v8 = vld [vmem:[%s27945_s5 + $0x80] sm:$0xff] }
 0x630   :  { %20329 = vmatprep.subr.bf16.mxu0 %v21035_v57  ;;  %v18825_v57 = vld [vmem:[%s27945_s5 + $0x88] sm:$0xff] }
 0x631   :  { %20350 = vmatpush3.bf16.msra.mxu1 %v21034_v4  ;;  %v18808_v4 = vld [vmem:[%s27945_s5] sm:$0xff] }
 0x632   :  { %20351 = vmatprep.subr.bf16.mxu1 %v21037_v37  ;;  %v20428_v37 = vpack.c.bf16 %v18717_v25, %v18715_v17 }
 0x633   :  { %20330 = vmatpush3.bf16.msra.mxu0 %v21036_v19  ;;  %v20430_v19 = vpack.c.bf16 %v18825_v57, %v18824_v8  ;;  %v18836_v8 = vld [vmem:[%s27945_s5 + $0xe0] sm:$0xff]  ;;  %v18837_v57 = vld [vmem:[%s27945_s5 + $0xe8] sm:$0xff] }
 0x634   :  { %20331 = vmatprep.subr.bf16.mxu0 %v21039_v55  ;;  %v18809_v55 = vld [vmem:[%s27945_s5 + $0x8] sm:$0xff] }
 0x635   :  { %20352 = vmatpush3.bf16.msra.mxu1 %v21038_v33  ;;  %v18826_v33 = vld [vmem:[%s27945_s5 + $0x90] sm:$0xff] }
 0x636   :  { %20353 = vmatprep.subr.bf16.mxu1 %v21041_v2  ;;  %v18827_v2 = vld [vmem:[%s27945_s5 + $0x98] sm:$0xff] }
 0x637   :  { %20332 = vmatpush3.bf16.msra.mxu0 %v21040_v48  ;;  %v20432_v48 = vpack.c.bf16 %v18809_v55, %v18808_v4  ;;  %v20454_v4 = vpack.c.bf16 %v18837_v57, %v18836_v8  ;;  %v18838_v55 = vld [vmem:[%s27945_s5 + $0xf0] sm:$0xff] }
 0x638   :  { %20333 = vmatprep.subr.bf16.mxu0 %v21043_v18  ;;  %v20434_v18 = vpack.c.bf16 %v18827_v2, %v18826_v33  ;;  %v18839_v2 = vld [vmem:[%s27945_s5 + $0xf8] sm:$0xff] }
 0x639   :  { %20354 = vmatpush3.bf16.msra.mxu1 %v21042_v56  ;;  %v18810_v56 = vld [vmem:[%s27945_s5 + $0x10] sm:$0xff] }
 0x63a   :  { %20355 = vmatprep.subr.bf16.mxu1 %v21045_v40  ;;  %v18811_v40 = vld [vmem:[%s27945_s5 + $0x18] sm:$0xff] }
 0x63b   :  { %20334 = vmatpush3.bf16.msra.mxu0 %v21044_v41  ;;  %v18828_v41 = vld [vmem:[%s27945_s5 + $0xa0] sm:$0xff] }
 0x63c   :  { %20399 = vmatprep.subr.bf16.mxu0 %v20398_v3  ;;  %v18831_v3 = vld [vmem:[%s27945_s5 + $0xb8] sm:$0xff] }
 0x63d   :  { %20356 = vmatpush3.bf16.msra.mxu1 %v21046_v6  ;;  %v18829_v6 = vld [vmem:[%s27945_s5 + $0xa8] sm:$0xff]  ;;  %v20442_v47 = vpack.c.bf16 %v18831_v3, %v18830_v61 }
 0x63e   :  { %18637 = vmatmul.mubr.bf16.vlgmr.msra.gmra.mrb[68].mxu0 %v18113_v59  ;;  %20431 = vmatprep.subr.bf16.mxu1 %v20430_v19  ;;  %v20436_v59 = vpack.c.bf16 %v18811_v40, %v18810_v56  ;;  %v18821_v19 = vld [vmem:[%s27945_s5 + $0x68] sm:$0xff]  ;;  %v20458_v56 = vpack.c.bf16 %v18839_v2, %v18838_v55 }
 0x63f   :  { %20401 = vmatpush1.bf16.msra.mxu0 %v20400_v11  ;;  %18795 = vmatprep.mubr.f32.mxu0 %v21106_v0  ;;  %v18815_v11 = vld [vmem:[%s27945_s5 + $0x38] sm:$0xff] }
 0x640   :  { %18677 = vmatmul.mubr.bf16.vlgmr.msra.gmra.mrb[68].mxu1 %v18129_v5  ;;  %20403 = vmatprep.subr.bf16.mxu0 %v20402_v34  ;;  %v20438_v5 = vpack.c.bf16 %v18829_v6, %v18828_v41  ;;  %v18832_v34 = vld [vmem:[%s27945_s5 + $0xc0] sm:$0xff]  ;;  %v20444_v50 = vpack.c.bf16 %v18815_v11, %v18814_v58  ;;  %v28386_v6 = vld [vmem:[#allocation11_spill] sm:$0xff] }
 0x641   :  { %20433 = vmatpush3.bf16.msra.mxu1 %v20432_v48  ;;  %v20446_v13 = vpack.c.bf16 %v18833_v16, %v18832_v34  ;;  %v18822_v48 = vld [vmem:[%s27945_s5 + $0x70] sm:$0xff]  ;;  %v18719_v41 = vld [vmem:[%s27946_s6 + $0x2] sm:$0x3] }
 0x642   :  { %20435 = vmatprep.subr.bf16.mxu1 %v20434_v18  ;;  %v18823_v18 = vld [vmem:[%s27945_s5 + $0x78] sm:$0xff] }
 0x643   :  { %20405 = vmatpush1.bf16.msra.mxu0 %v20404_v1  ;;  %v18817_v1 = vld [vmem:[%s27945_s5 + $0x48] sm:$0xff]  ;;  %v20460_v40 = vpack.c.bf16 %v18823_v18, %v18822_v48 }
 0x644   :  { %20407 = vmatprep.subr.bf16.mxu0 %v20406_v23  ;;  %v18834_v23 = vld [vmem:[%s27945_s5 + $0xd0] sm:$0xff]  ;;  %v20448_v31 = vpack.c.bf16 %v18817_v1, %v18816_v21 }
 0x645   :  { %20437 = vmatpush3.bf16.msra.mxu1 %v20436_v59  ;;  %v20450_v62 = vpack.c.bf16 %v18835_v32, %v18834_v23  ;;  %v18724_v59 = vrot.slane %v18719_v41, %v28386_v6 }
 0x646   :  { %20439 = vmatprep.subr.bf16.mxu1 %v20438_v5  ;;  %v28387_v5 = vld [vmem:[#allocation10_spill] sm:$0xff] }
 0x647   :  { %20409 = vmatpush1.bf16.msra.mxu0 %v20408_v54  ;;  %v18819_v54 = vld [vmem:[%s27945_s5 + $0x58] sm:$0xff]  ;;  %v18728_v10 = vrot.slane %v18719_v41, %v28387_v5 }
 0x648   :  { %20411 = vmatprep.subr.bf16.mxu0 %v20410_v35  ;;  %v20452_v35 = vpack.c.bf16 %v18819_v54, %v18818_v29 }
 0x649   :  { %20441 = vmatpush3.bf16.msra.mxu1 %v20440_v43 }
 0x64a   :  { %20443 = vmatprep.subr.bf16.mxu1 %v20442_v47 }
 0x64b   :  { %20413 = vmatpush1.bf16.msra.mxu0 %v20412_v24 }
 0x64c   :  { %20415 = vmatprep.subr.bf16.mxu0 %v20414_v20 }
 0x64d   :  { %20445 = vmatpush3.bf16.msra.mxu1 %v20444_v50  ;;  %v19569_v50 = vld [vmem:[%s27946_s6 + $0x4] ss:$0 sm:$0xff]  ;;  %s21107_s6 = smov [#allocation6]  }
 0x64e   :  { %20447 = vmatprep.subr.bf16.mxu1 %v20446_v13  ;;  %s18963_s11 = sshll.u32 %s21107_s6, 4  ;;  %s18964_s11 = int_to_ptr.vmem [resolvable:$true] %s18963_s11 }
 0x64f   :  { %20417 = vmatpush1.bf16.msra.mxu0 %v20416_v36  ;;  %s21053_s17 = scalar_lea.vmem %s18964_s11, 64  ;;  %p21058_p1 = scmp.lt.s32.totalorder %s18964_s11, %s18964_s11 }
 0x650   :  { %20419 = vmatprep.subr.bf16.mxu0 %v20418_v28  ;;  %p21054_p0 = scmp.ne.s32.totalorder %s18964_s11, %s21053_s17  ;;  %p21059_p2 = scmp.lt.s32.totalorder %s21053_s17, %s21053_s17 }
 0x651   :  { %20449 = vmatpush3.bf16.msra.mxu1 %v20448_v31 }
 0x652   :  { %20451 = vmatprep.subr.bf16.mxu1 %v20450_v62  ;;  %p21060_p3 = por %p21059_p2, %p21058_p1 }
 0x653   :  { %20421 = vmatpush1.bf16.msra.mxu0 %v20420_v53 }
 0x654   :  { %20423 = vmatprep.subr.bf16.mxu0 %v20422_v27  ;;  %p21061_p4 = pnand %p21060_p3, %p21054_p0 }
 0x655   :  { %20453 = vmatpush3.bf16.msra.mxu1 %v20452_v35 }
 0x656   :  { %20455 = vmatprep.subr.bf16.mxu1 %v20454_v4 }
 0x657   :  { %20425 = vmatpush1.bf16.msra.mxu0 %v20424_v44 }
 0x658   :  { %20427 = vmatprep.subr.bf16.mxu0 %v20426_v63 }
 0x65b   :  { %20429 = vmatpush1.bf16.msra.mxu0 %v20428_v37  ;;  %v18820_v37 = vld [vmem:[%s27945_s5 + $0x60] sm:$0xff] }
 0x65c   :  { %v20456_v33 = vpack.c.bf16 %v18821_v19, %v18820_v37 }
 0x65e   :  { %20457 = vmatpush3.bf16.msra.mxu1 %v20456_v33 }
 0x65f   :  { %20459 = vmatprep.subr.bf16.mxu1 %v20458_v56 }
 0x662   :  { %20461 = vmatpush3.bf16.msra.mxu1 %v20460_v40 }
 0x6f1   :  { %v20291_v22 = vpop.f32.mrb[64].mxu0 }
 0x6f2   :  { %v20292_v14 = vpop.f32.mrb[65].mxu0 }
 0x6f3   :  { %v20293_v46 = vadd.f32 %v20292_v14, %v20291_v22  ;;  %v20294_v24 = vpop.f32.mrb[66].mxu0  ;;  %v20313_v20 = vpop.f32.mrb[64].mxu1 }
 0x6f4   :  { %v20295_v9 = vpop.f32.mrb[67].mxu0  ;;  %v20314_v30 = vpop.f32.mrb[65].mxu1 }
 0x6f5   :  { %v18559_v60 = vadd.f32 %v20293_v46, %v19504_v39  ;;  %v20315_v12 = vadd.f32 %v20314_v30, %v20313_v20  ;;  %v20316_v36 = vpop.f32.mrb[66].mxu1 }
 0x6f6   :  { %v20317_v28 = vpop.f32.mrb[67].mxu1 }
 0x6f7   :  { %v18599_v51 = vadd.f32 %v20315_v12, %v18559_v60 }
 0x711   :  { %v20335_v42 = vpop.f32.mrb[68].mxu0 }
 0x712   :  { %v20336_v53 = vpop.f32.mrb[69].mxu0 }
 0x713   :  { %v20337_v52 = vadd.f32 %v20336_v53, %v20335_v42  ;;  %v20338_v15 = vpop.f32.mrb[70].mxu0  ;;  %v20357_v38 = vpop.f32.mrb[68].mxu1 }
 0x714   :  { %v20339_v27 = vpop.f32.mrb[71].mxu0  ;;  %v20358_v26 = vpop.f32.mrb[69].mxu1 }
 0x715   :  { %v18639_v49 = vadd.f32 %v20337_v52, %v18599_v51  ;;  %v20359_v7 = vadd.f32 %v20358_v26, %v20357_v38  ;;  %v20360_v0 = vpop.f32.mrb[70].mxu1 }
 0x716   :  { %v20361_v44 = vpop.f32.mrb[71].mxu1 }
 0x717   :  { %v18679_v63 = vadd.f32 %v20359_v7, %v18639_v49 }
 0x719   :  { %v18685_v17 = vmul.f32 0.33, %v18679_v63  ;;  %vm18684_vm9 = vcmp.ge.f32.partialorder %v18679_v63, 0.0 }
 0x71b   :  { %v18686_v25 = vsel %vm18684_vm9, %v18679_v63, %v18685_v17 }
 0x71c   :  { %18796 = vmatmul.mubr.f32.vlgmr.msra.gmra.mrb[72].mxu0 %v18686_v25 }
 0x7ef   :  { %v18797_v45 = vpop.f32.mrb[72].mxu0 }
 0x7f0   :  { %v18798_v61 = vadd.f32 %v18797_v45, %v18724_v59  ;;  %v18799_v3 = vpop.f32.mrb[73].mxu0 }
 0x7f1   :  { %v18800_v43 = vadd.f32 %v18799_v3, %v18728_v10 }
 0x7f2   :  { %v18804_v47 = vmul.f32 0.33, %v18798_v61  ;;  %vm18802_vm7 = vcmp.ge.f32.partialorder %v18798_v61, 0.0 }
 0x7f3   :  { %v18805_v58 = vmul.f32 0.33, %v18800_v43  ;;  %vm18803_vm11 = vcmp.ge.f32.partialorder %v18800_v43, 0.0 }
 0x7f4   :  { %v18806_v34 = vsel %vm18802_vm7, %v18798_v61, %v18804_v47 }
 0x7f5   :  { %v18807_v11 = vsel %vm18803_vm11, %v18800_v43, %v18805_v58 }
 0x7f6   :  { %18911 = vmatprep.mubr.f32.mxu1 %v18807_v11  ;;  %v18937_v62 = vcombine.low %v18806_v34, %v18807_v11 }
 0x7f7   :  { %18912 = vmatmul.mubr.f32.vlgmr.msra.gmra.mrb[72].mxu1 %v18806_v34 }
 0x7f8   :  { %19570 = vst.sshfl [vmem:[#allocation6] sm:$0x33 pattern:$0x76325410] %v18937_v62 }
 0x8ca   :  { %v20395_v16 = vpop.f32.mrb[72].mxu1 }
 0x8cb   :  { %v20396_v13 = vpop.f32.mrb[73].mxu1 }
 0x8cc   :  { %v20397_v21 = vadd.f32 %v20396_v13, %v20395_v16 }
 0x8ce   :  { %v18914_v1 = vadd.f32 %v20397_v21, %v19569_v50 }
 0x8d0   :  { %v18918_v23 = vmul.f32 0.33, %v18914_v1  ;;  %vm18917_vm10 = vcmp.ge.f32.partialorder %v18914_v1, 0.0 }
 0x8d2   :  { %v18919_v32 = vsel %vm18917_vm10, %v18914_v1, %v18918_v23 }
 0x8d3   :  { %v18921_v31 = vsel %vm18920_vm12, %v18919_v32, -inf }
 0x8d4   :  { %18922 = vmax.xlane.f32.xlu0 %v18921_v31 }
 0x961   :  { %v18923_v29 = vpop.xlane.xlu0 %18922 }
 0x962   :  { %v18924_v54 = vsub.f32 %v18919_v32, %v18923_v29 }
 0x964   :  { %v18925_v35 = vmul.f32 1.442695, %v18924_v54 }
 0x966   :  { %21047 = vpow2.f32 %v18925_v35 }
 0x970   :  { %v21048_v22 = vpop.eup %21047 }
 0x971   :  { %v18927_v39 = vsel %vm18920_vm12, %v21048_v22, 0.0 }
 0x972   :  { %18928 = vadd.xlane.f32.xlu1 %v18927_v39 }
 0x973   :  { %21064 = shalt.err (!%p21061_p4)
}
 0x974   :  { %s21065_s19 = scalar_lea.hbm %s27948_s8, 64 }
 0x975   :  { %p21066_p5 = scmp.ne.s32.totalorder %s27948_s8, %s21065_s19  ;;  %p21069_p6 = scmp.lt.u32.totalorder %s21065_s19, %s27948_s8 }
 0x977   :  { %p21071_p7 = pnand %p21069_p6, %p21066_p5 }
 0x979   :  { %21074 = shalt.err (!%p21071_p7)
}
 0x97a   :  { %18966 = dma.vmem_to_hbm [thread:$0]  %s18964_s11, 64, %s27948_s8, [#allocation7]  }
 0x97b   :  { %s21108_s24 = smov [#allocation4]  }
 0x97c   :  { %s18953_s25 = sshll.u32 %s21108_s24, 4  ;;  %s18954_s25 = int_to_ptr.vmem [resolvable:$true] %s18953_s25 }
 0x97d   :  { %s21075_s26 = scalar_lea.vmem %s18954_s25, 32  ;;  %p21080_p9 = scmp.lt.s32.totalorder %s18954_s25, %s18954_s25 }
 0x97e   :  { %p21076_p8 = scmp.ne.s32.totalorder %s18954_s25, %s21075_s26  ;;  %p21081_p10 = scmp.lt.s32.totalorder %s21075_s26, %s21075_s26 }
 0x980   :  { %p21082_p11 = por %p21081_p10, %p21080_p9 }
 0x982   :  { %p21083_p12 = pnand %p21082_p11, %p21076_p8 }
 0x9ff   :  { %v18929_v14 = vpop.xlane.xlu1 %18928 }
 0xa00   :  { %21049 = vlog2.f32 %v18929_v14 }
 0xa0a   :  { %v21050_v46 = vpop.eup %21049 }
 0xa0b   :  { %v18931_v24 = vmul.f32 0.6931472, %v21050_v46 }
 0xa0d   :  { %v18932_v20 = vadd.f32 %v18931_v24, %v18923_v29 }
 0xa0f   :  { %v18933_v9 = vsub.f32 %v18919_v32, %v18932_v20 }
 0xa11   :  { %18934 = vst.msk [vmem:[#allocation4] sm:$0x3] %vm18920_vm12, %v18933_v9 }
 0xa12   :  { %21086 = shalt.err (!%p21083_p12)
}
 0xa13   :  { %s21087_s28 = scalar_lea.hbm %s27947_s7, 32 }
 0xa14   :  { %p21088_p13 = scmp.ne.s32.totalorder %s27947_s7, %s21087_s28  ;;  %p21091_p0 = scmp.lt.u32.totalorder %s21087_s28, %s27947_s7 }
 0xa16   :  { %p21093_p1 = pnand %p21091_p0, %p21088_p13 }
 0xa18   :  { %21096 = shalt.err (!%p21093_p1)
}
 0xa19   :  { %18956 = dma.vmem_to_hbm [thread:$0]  %s18954_s25, 32, %s27947_s7, [#allocation5]  }
 0xa1a   :  { %21097 = dma.done.wait [#allocation5], 32  }
 0xa1b   :  { %21098 = vsyncadd [#allocation5], 4294967264 }
 0xa1c   :  { %21099 = dma.done.wait [#allocation7], 64  }
 0xa1d   :  { %21100 = vsyncadd [#allocation7], 4294967232 }
 0xa1e   :  { %18973 = vsyncpa [#allocation5], 1 }
 0xa1f   :  { %18974 = vsyncpa [#allocation7], 1 }

</bundles_post_ra>
